<compile_context>
chip_gen: v7x
topology: tpu7x:2x2x1
jax: 0.10.0
libtpu: 0.0.40
codegen_flags: <defaults>
</compile_context>

<pallas_src>
import math
import functools

import jax
import jax.numpy as jnp
from jax.experimental import pallas as pl
from jax.experimental.pallas import tpu as pltpu

_NEG = -10000.0
_CLS_ID = 101   # bert-*-cased cls_token_id
_SEP_ID = 102   # bert-*-cased sep_token_id
_VMEM_LIMIT = 64 * 1024 * 1024   # raise v5e 16 MiB / v6e-v7x 32 MiB scoped default


# ----------------------------------------------------------------------------- #
# shared in-kernel helpers
# ----------------------------------------------------------------------------- #
def _bce_with_logits(x, z):
    # numerically stable F.binary_cross_entropy_with_logits(..., reduction='none')
    return jnp.maximum(x, 0.0) - x * z + jnp.log(1.0 + jnp.exp(-jnp.abs(x)))


def _log_sigmoid(x):
    return jnp.minimum(x, 0.0) - jnp.log(1.0 + jnp.exp(-jnp.abs(x)))


def _pick_h_chunk(H):
    """Largest 128-multiple chunk (<=512, prefer 256) dividing H; else whole H."""
    if H <= 256:
        return H
    for ck in (256, 512, 384, 128):
        if H % ck == 0:
            return ck
    return H


def _linear_logits(hid_ref, w_ref, b_ref, *, h_chunk):
    """Lane-dense QA head: logits[b, s] = sum_h hid[b, s, h] * w[h] + bias.

    hid_ref: (Bt, S, H) (bf16 or f32), w_ref: (1, H) f32 (VMEM), b_ref: (1,) f32 (SMEM).
    Chunked H contraction: multiply in the hid dtype, widen to f32 only at the
    accumulate, so no full-tile f32 temporary is materialized.
    Returns (Bt, S) f32 with S on the lane axis.
    """
    Bt, S, H = hid_ref.shape
    ck = h_chunk
    acc = jnp.zeros((Bt, S), jnp.float32)
    for c in range(H // ck):                               # static, short trip-count
        h = hid_ref[:, :, c * ck:(c + 1) * ck]             # (Bt, S, ck) native dtype
        w = w_ref[:, c * ck:(c + 1) * ck].reshape(1, 1, ck).astype(h.dtype)
        acc = acc + jnp.sum((h * w).astype(jnp.float32), axis=-1)
    return acc + b_ref[0]


def _round_up(x, m):
    return ((x + m - 1) // m) * m


def _pad_rows(x, rows, value=0):
    b = x.shape[0]
    if rows == b:
        return x
    pad = [(0, rows - b)] + [(0, 0)] * (x.ndim - 1)
    return jnp.pad(x, pad, constant_values=value)


def _hid_spec(Bt, S, H, dtype, n_steps):
    blk_bytes = Bt * S * H * jnp.dtype(dtype).itemsize
    if n_steps >= 4 and blk_bytes <= 8 * 1024 * 1024:
        # deeper pipelining on the dominant HBM stream when VMEM comfortably allows
        return pl.BlockSpec((Bt, S, H), lambda b: (b, 0, 0),
                            pipeline_mode=pl.Buffered(3))
    return pl.BlockSpec((Bt, S, H), lambda b: (b, 0, 0))


# ----------------------------------------------------------------------------- #
# Kernel 1: fused QA head + weighted BCE label loss (training branch)
#           each grid step emits its own partial [sum(loss*w), sum(w)] block
# ----------------------------------------------------------------------------- #
def _fused_label_loss_kernel(hid_ref, w_ref, b_ref, ids_ref, mask_ref,
                             start_ref, end_ref, part_ref,
                             *, cls_id, sep_id, label_smoothing, neg_ratio, h_chunk):
    x = _linear_logits(hid_ref, w_ref, b_ref, h_chunk=h_chunk)    # (Bt, S) f32
    Bt, S = x.shape

    ids = ids_ref[...]                                            # (Bt, S) int32
    mask = mask_ref[...].astype(jnp.float32)                      # (Bt, S) f32
    start = jnp.broadcast_to(start_ref[...], (Bt, S))             # (Bt, S) int32
    end = jnp.broadcast_to(end_ref[...], (Bt, S))                 # (Bt, S) int32

    ar = jax.lax.broadcasted_iota(jnp.int32, (Bt, S), 1)
    trg = ((start <= ar) & (ar <= end)).astype(jnp.float32)
    trg = jnp.where(ar == 0, 0.0, trg)                            # _trg_t[:, 0] = 0
    trg = jnp.where((ids == cls_id) | (ids == sep_id), 0.0, trg)
    trg = jnp.where(mask <= 0.0, 0.0, trg)

    pos_count = jnp.maximum(jnp.sum(trg, axis=-1, keepdims=True), 1.0)
    neg_count = jnp.maximum(
        jnp.sum(((trg == 0.0) & (mask > 0.0)).astype(jnp.float32),
                axis=-1, keepdims=True), 1.0)
    neg_dw = jnp.broadcast_to(neg_ratio * pos_count / neg_count, (Bt, S))

    v0 = _bce_with_logits(x, trg)
    if label_smoothing > 0.0:
        v1 = _bce_with_logits(x, 1.0 - trg)
        loss0 = v1 * label_smoothing + v0 * (1.0 - label_smoothing)
        loss0 = loss0 + ((1.0 - label_smoothing) * math.log(1.0 - label_smoothing)
                         + label_smoothing * math.log(label_smoothing))
    else:
        loss0 = v0

    weight0 = jnp.where(trg <= 0.0, neg_dw, jnp.ones_like(loss0)) * mask

    suml = jnp.sum(loss0 * weight0)
    sumw = jnp.sum(weight0)

    # lane-dense (1, 8, 128) partial block: [0,0,0]=sum(loss*w), [0,0,1]=sum(w)
    sub = jax.lax.broadcasted_iota(jnp.int32, (1, 8, 128), 1)
    lane = jax.lax.broadcasted_iota(jnp.int32, (1, 8, 128), 2)
    part_ref[...] = jnp.where((sub == 0) & (lane == 0), suml,
                              jnp.where((sub == 0) & (lane == 1), sumw, 0.0))


def qa_label_loss_fused(bert_hid, qa_w, qa_b, input_ids, attention_mask,
                        start_positions, end_positions,
                        *, label_smoothing=0.0, neg_ratio=5.0, block_b=8):
    B, S, H = bert_hid.shape
    assert block_b % 8 == 0
    Bp = _round_up(B, block_b)
    Bt = block_b
    nb = Bp // Bt

    if start_positions.ndim > 1:
        start_positions = start_positions.reshape(start_positions.shape[0])
    if end_positions.ndim > 1:
        end_positions = end_positions.reshape(end_positions.shape[0])

    # pad batch to a grid multiple; padded rows have attention_mask=0 -> zero weight
    bert_hid = _pad_rows(bert_hid, Bp)
    input_ids = _pad_rows(input_ids.astype(jnp.int32), Bp)
    attention_mask = _pad_rows(attention_mask, Bp)
    start_p = _pad_rows(start_positions.astype(jnp.int32), Bp).reshape(Bp, 1)
    end_p = _pad_rows(end_positions.astype(jnp.int32), Bp).reshape(Bp, 1)

    h_chunk = _pick_h_chunk(H)
    kernel = functools.partial(_fused_label_loss_kernel,
                               cls_id=_CLS_ID, sep_id=_SEP_ID,
                               label_smoothing=float(label_smoothing),
                               neg_ratio=float(neg_ratio),
                               h_chunk=h_chunk)

    hid_isz = jnp.dtype(bert_hid.dtype).itemsize
    cost = pl.CostEstimate(
        flops=int(2 * Bp * S * H + 32 * Bp * S),
        transcendentals=int(4 * Bp * S),
        bytes_accessed=int(Bp * S * H * hid_isz + Bp * S * 8 + nb * 8 * 128 * 4))

    partials = pl.pallas_call(
        kernel,
        out_shape=jax.ShapeDtypeStruct((nb, 8, 128), jnp.float32),
        grid=(nb,),
        in_specs=[
            _hid_spec(Bt, S, H, bert_hid.dtype, nb),                     # bert_hid
            pl.BlockSpec((1, H), lambda b: (0, 0)),                      # qa_w (lane-dense)
            pl.BlockSpec(memory_space=pltpu.MemorySpace.SMEM),           # qa_b (scalar path)
            pl.BlockSpec((Bt, S), lambda b: (b, 0)),                     # input_ids
            pl.BlockSpec((Bt, S), lambda b: (b, 0)),                     # attention_mask
            pl.BlockSpec((Bt, 1), lambda b: (b, 0)),                     # start_positions
            pl.BlockSpec((Bt, 1), lambda b: (b, 0)),                     # end_positions
        ],
        out_specs=pl.BlockSpec((1, 8, 128), lambda b: (b, 0, 0)),
        compiler_params=pltpu.CompilerParams(
            dimension_semantics=("parallel",),       # megacore-capable loss reduction
            vmem_limit_bytes=_VMEM_LIMIT),
        cost_estimate=cost,
    )(bert_hid, qa_w, qa_b, input_ids, attention_mask, start_p, end_p)

    # tiny final reduce in XLA (exactly sum(loss*w)/sum(w), like the torch reference)
    suml = jnp.sum(partials[..., 0])
    sumw = jnp.sum(partials[..., 1])
    return suml / sumw


# ----------------------------------------------------------------------------- #
# Kernel 2: fused QA head + start/end span logits (inference branch)
# ----------------------------------------------------------------------------- #
def _fused_label_infer_kernel(hid_ref, w_ref, b_ref, mask_ref,
                              start_out_ref, end_out_ref, *, pthr, h_chunk):
    logits = _linear_logits(hid_ref, w_ref, b_ref, h_chunk=h_chunk)   # (Bt, S) f32
    Bt, S = logits.shape

    mask = mask_ref[...].astype(jnp.float32)
    x = jnp.where(mask <= 0.0, _NEG, logits)                  # logits[mask<=0] = NEG

    t = jnp.where(x < pthr, _NEG, x)                          # t_logits[t < pthr] = NEG
    lp1 = _log_sigmoid(t)
    lp0 = _log_sigmoid(-t)
    null = jnp.broadcast_to(
        jnp.min(lp0 * mask, axis=-1, keepdims=True) * 2.0, (Bt, S))

    ar = jax.lax.broadcasted_iota(jnp.int32, (Bt, S), 1)
    # NOTE: lane rolls assume S is a multiple of 128 (or equals the full lane tile).
    lp0_prev = pltpu.roll(lp0, shift=1, axis=1)               # element i -> lp0[i-1]
    lp0_next = pltpu.roll(lp0, shift=S - 1, axis=1)           # element i -> lp0[i+1]

    # start_logits = cat([null, lp0[:, :-1] + lp1[:, 1:]])
    start_out_ref[...] = jnp.where(ar == 0, null, lp0_prev + lp1)
    # end_logits = cat([null, lp1[:, 1:-1] + lp0[:, 2:], NEG])
    end_out_ref[...] = jnp.where(ar == 0, null,
                                 jnp.where(ar == S - 1, _NEG, lp1 + lp0_next))


def qa_label_infer_fused(bert_hid, qa_w, qa_b, attention_mask,
                         *, pthr=0.0, block_b=8):
    B, S, H = bert_hid.shape
    assert block_b % 8 == 0
    Bp = _round_up(B, block_b)
    Bt = block_b
    nb = Bp // Bt

    bert_hid = _pad_rows(bert_hid, Bp)
    attention_mask = _pad_rows(attention_mask, Bp)

    h_chunk = _pick_h_chunk(H)
    kernel = functools.partial(_fused_label_infer_kernel, pthr=float(pthr),
                               h_chunk=h_chunk)

    hid_isz = jnp.dtype(bert_hid.dtype).itemsize
    cost = pl.CostEstimate(
        flops=int(2 * Bp * S * H + 16 * Bp * S),
        transcendentals=int(4 * Bp * S),
        bytes_accessed=int(Bp * S * H * hid_isz + Bp * S * 4 + 2 * Bp * S * 4))

    start_logits, end_logits = pl.pallas_call(
        kernel,
        out_shape=(jax.ShapeDtypeStruct((Bp, S), jnp.float32),
                   jax.ShapeDtypeStruct((Bp, S), jnp.float32)),
        grid=(nb,),
        in_specs=[
            _hid_spec(Bt, S, H, bert_hid.dtype, nb),                     # bert_hid
            pl.BlockSpec((1, H), lambda b: (0, 0)),                      # qa_w
            pl.BlockSpec(memory_space=pltpu.MemorySpace.SMEM),           # qa_b
            pl.BlockSpec((Bt, S), lambda b: (b, 0)),                     # attention_mask
        ],
        out_specs=(pl.BlockSpec((Bt, S), lambda b: (b, 0)),
                   pl.BlockSpec((Bt, S), lambda b: (b, 0))),
        compiler_params=pltpu.CompilerParams(
            dimension_semantics=("parallel",),
            vmem_limit_bytes=_VMEM_LIMIT),
        cost_estimate=cost,
    )(bert_hid, qa_w, qa_b, attention_mask)
    return start_logits[:B], end_logits[:B]


# ----------------------------------------------------------------------------- #
# QaModel forward (qa_head_type='label')
# ----------------------------------------------------------------------------- #
def qa_model_forward(params, bert_hid, input_ids, attention_mask,
                     start_positions=None, end_positions=None,
                     *, qa_label_ls=0.0, qa_label_negratio=5.0, qa_label_pthr=0.0,
                     block_b=8):
    # TODO(synk): the pretrained BERT encoder / tokenizer load is not translated;
    #             `bert_hid` stands in for `self.bert(...)[0]`.
    # TODO(synk): the data-dependent max_len truncation (dynamic shapes) is skipped.
    # TODO(synk): the non-default 'ptr' head (split + CrossEntropyLoss) and the
    #             host-side decode() post-processing are not implemented.
    input_ids = input_ids.astype(jnp.int32)

    if start_positions is not None and end_positions is not None:
        total_loss = qa_label_loss_fused(
            bert_hid, params["qa_w"], params["qa_b"],
            input_ids, attention_mask, start_positions, end_positions,
            label_smoothing=qa_label_ls, neg_ratio=qa_label_negratio,
            block_b=block_b)
        return (total_loss, None, None)
    else:
        start_logits, end_logits = qa_label_infer_fused(
            bert_hid, params["qa_w"], params["qa_b"], attention_mask,
            pthr=qa_label_pthr, block_b=block_b)
        return (start_logits, end_logits)


# ----------------------------------------------------------------------------- #
if __name__ == "__main__":
    # small demo shapes; B deliberately NOT a multiple of block_b to exercise padding
    B, S, H = 12, 128, 128

    key = jax.random.PRNGKey(0)
    k_hid, k_ids, k_w = jax.random.split(key, 3)

    # synthetic encoder output (stand-in for BERT hidden states), bf16 to halve HBM reads
    bert_hid = jax.random.normal(k_hid, (B, S, H), dtype=jnp.float32).astype(jnp.bfloat16)

    # synthetic token ids with CLS at position 0 and SEP at the last valid position
    input_ids = jax.random.randint(k_ids, (B, S), 1000, 2000).astype(jnp.int32)
    input_ids = input_ids.at[:, 0].set(_CLS_ID)

    valid_len = jnp.full((B,), S, jnp.int32).at[1].set(96).at[5].set(64)
    pos_iota = jax.lax.broadcasted_iota(jnp.int32, (B, S), 1)
    attention_mask = (pos_iota < valid_len[:, None]).astype(jnp.float32)
    input_ids = jnp.where(pos_iota == (valid_len[:, None] - 1), _SEP_ID, input_ids)

    start_positions = (jnp.arange(B, dtype=jnp.int32) % 7) + 3
    end_positions = start_positions + 4

    # deterministic QA head params: nn.Linear(H, 1)  (weight stored lane-dense (1, H))
    params = {
        "qa_w": (jax.random.normal(k_w, (1, H), dtype=jnp.float32) / math.sqrt(H)),
        "qa_b": jnp.zeros((1,), dtype=jnp.float32),
    }

    # training branch (returns total_loss)
    total_loss, _, _ = qa_model_forward(params, bert_hid, input_ids, attention_mask,
                                        start_positions, end_positions)
    # inference branch (returns start_logits, end_logits)
    start_logits, end_logits = qa_model_forward(params, bert_hid, input_ids,
                                                attention_mask)

    jax.block_until_ready((total_loss, start_logits, end_logits))
    print("KERNEL_OK")
</pallas_src>

<mosaic_0001>
module attributes {stable_mosaic.version = 11 : i64} {
  func.func @_fused_label_loss_kernel(%arg0: i32, %arg1: memref<8x128x128xbf16, #tpu.memory_space<vmem>>, %arg2: memref<1x128xf32, #tpu.memory_space<vmem>>, %arg3: memref<1xf32, #tpu.memory_space<smem>>, %arg4: memref<8x128xi32, #tpu.memory_space<vmem>>, %arg5: memref<8x128xf32, #tpu.memory_space<vmem>>, %arg6: memref<8x1xi32, #tpu.memory_space<vmem>>, %arg7: memref<8x1xi32, #tpu.memory_space<vmem>>, %arg8: memref<1x8x128xf32, #tpu.memory_space<vmem>>) attributes {dimension_semantics = [#tpu.dimension_semantics<parallel>], iteration_bounds = array<i64: 2>, scalar_prefetch = 0 : i64, scratch_operands = 0 : i64, tpu.core_type = #tpu.core_type<tc>, window_params = [{transform_indices = @transform_0, window_bounds = array<i64: 8, 128, 128>}, {pipeline_mode = #tpu.pipeline_mode<synchronous>, transform_indices = @transform_1, window_bounds = array<i64: 1, 128>}, {transform_indices = @transform_2, window_bounds = array<i64: 1>}, {transform_indices = @transform_3, window_bounds = array<i64: 8, 128>}, {transform_indices = @transform_4, window_bounds = array<i64: 8, 128>}, {transform_indices = @transform_5, window_bounds = array<i64: 8, 1>}, {transform_indices = @transform_6, window_bounds = array<i64: 8, 1>}, {transform_indices = @transform_7, window_bounds = array<i64: 1, 8, 128>}]} {
    %cst = arith.constant 0.000000e+00 : f32
    %0 = vector.broadcast %cst : f32 to vector<8x128xf32>
    %c0 = arith.constant 0 : index
    %c0_0 = arith.constant 0 : index
    %c0_1 = arith.constant 0 : index
    %1 = vector.load %arg1[%c0, %c0_0, %c0_1] : memref<8x128x128xbf16, #tpu.memory_space<vmem>>, vector<8x128x128xbf16>
    %c0_2 = arith.constant 0 : index
    %c0_3 = arith.constant 0 : index
    %2 = vector.load %arg2[%c0_2, %c0_3] : memref<1x128xf32, #tpu.memory_space<vmem>>, vector<1x128xf32>
    %3 = vector.shape_cast %2 : vector<1x128xf32> to vector<1x1x128xf32>
    %4 = arith.truncf %3 : vector<1x1x128xf32> to vector<1x1x128xbf16>
    %5 = vector.broadcast %4 : vector<1x1x128xbf16> to vector<8x128x128xbf16>
    %6 = arith.mulf %1, %5 : vector<8x128x128xbf16>
    %7 = arith.extf %6 : vector<8x128x128xbf16> to vector<8x128x128xf32>
    %cst_4 = arith.constant dense<0.000000e+00> : vector<8x128xf32>
    %8 = vector.multi_reduction <add>, %7, %cst_4 [2] : vector<8x128x128xf32> to vector<8x128xf32>
    %9 = arith.addf %0, %8 : vector<8x128xf32>
    %c0_5 = arith.constant 0 : index
    %10 = memref.load %arg3[%c0_5] : memref<1xf32, #tpu.memory_space<smem>>
    %11 = vector.broadcast %10 : f32 to vector<8x128xf32>
    %12 = arith.addf %9, %11 : vector<8x128xf32>
    %c0_6 = arith.constant 0 : index
    %c0_7 = arith.constant 0 : index
    %13 = vector.load %arg4[%c0_6, %c0_7] : memref<8x128xi32, #tpu.memory_space<vmem>>, vector<8x128xi32>
    %c0_8 = arith.constant 0 : index
    %c0_9 = arith.constant 0 : index
    %14 = vector.load %arg5[%c0_8, %c0_9] : memref<8x128xf32, #tpu.memory_space<vmem>>, vector<8x128xf32>
    %c0_10 = arith.constant 0 : index
    %c0_11 = arith.constant 0 : index
    %15 = vector.load %arg6[%c0_10, %c0_11] : memref<8x1xi32, #tpu.memory_space<vmem>>, vector<8x1xi32>
    %16 = vector.shape_cast %15 : vector<8x1xi32> to vector<8x1xi32>
    %17 = vector.broadcast %16 : vector<8x1xi32> to vector<8x128xi32>
    %c0_12 = arith.constant 0 : index
    %c0_13 = arith.constant 0 : index
    %18 = vector.load %arg7[%c0_12, %c0_13] : memref<8x1xi32, #tpu.memory_space<vmem>>, vector<8x1xi32>
    %19 = vector.shape_cast %18 : vector<8x1xi32> to vector<8x1xi32>
    %20 = vector.broadcast %19 : vector<8x1xi32> to vector<8x128xi32>
    %21 = tpu.iota {dimensions = array<i32: 1>} : vector<8x128xi32>
    %22 = arith.cmpi sle, %17, %21 : vector<8x128xi32>
    %23 = arith.cmpi sle, %21, %20 : vector<8x128xi32>
    %24 = arith.andi %22, %23 : vector<8x128xi1>
    %25 = arith.extui %24 : vector<8x128xi1> to vector<8x128xi32>
    %26 = arith.sitofp %25 : vector<8x128xi32> to vector<8x128xf32>
    %c0_i32 = arith.constant 0 : i32
    %27 = vector.broadcast %c0_i32 : i32 to vector<8x128xi32>
    %28 = arith.cmpi eq, %21, %27 : vector<8x128xi32>
    %cst_14 = arith.constant 0.000000e+00 : f32
    %29 = vector.broadcast %cst_14 : f32 to vector<8x128xf32>
    %30 = arith.select %28, %29, %26 : vector<8x128xi1>, vector<8x128xf32>
    %c101_i32 = arith.constant 101 : i32
    %31 = vector.broadcast %c101_i32 : i32 to vector<8x128xi32>
    %32 = arith.cmpi eq, %13, %31 : vector<8x128xi32>
    %c102_i32 = arith.constant 102 : i32
    %33 = vector.broadcast %c102_i32 : i32 to vector<8x128xi32>
    %34 = arith.cmpi eq, %13, %33 : vector<8x128xi32>
    %35 = arith.ori %32, %34 : vector<8x128xi1>
    %cst_15 = arith.constant 0.000000e+00 : f32
    %36 = vector.broadcast %cst_15 : f32 to vector<8x128xf32>
    %37 = arith.select %35, %36, %30 : vector<8x128xi1>, vector<8x128xf32>
    %cst_16 = arith.constant 0.000000e+00 : f32
    %38 = vector.broadcast %cst_16 : f32 to vector<8x128xf32>
    %39 = arith.cmpf ole, %14, %38 : vector<8x128xf32>
    %cst_17 = arith.constant 0.000000e+00 : f32
    %40 = vector.broadcast %cst_17 : f32 to vector<8x128xf32>
    %41 = arith.select %39, %40, %37 : vector<8x128xi1>, vector<8x128xf32>
    %cst_18 = arith.constant dense<0.000000e+00> : vector<8xf32>
    %42 = vector.multi_reduction <add>, %41, %cst_18 [1] : vector<8x128xf32> to vector<8xf32>
    %43 = vector.shape_cast %42 : vector<8xf32> to vector<8x1xf32>
    %cst_19 = arith.constant 1.000000e+00 : f32
    %44 = vector.broadcast %cst_19 : f32 to vector<8x1xf32>
    %45 = arith.maximumf %43, %44 : vector<8x1xf32>
    %cst_20 = arith.constant 0.000000e+00 : f32
    %46 = vector.broadcast %cst_20 : f32 to vector<8x128xf32>
    %47 = arith.cmpf oeq, %41, %46 : vector<8x128xf32>
    %cst_21 = arith.constant 0.000000e+00 : f32
    %48 = vector.broadcast %cst_21 : f32 to vector<8x128xf32>
    %49 = arith.cmpf ogt, %14, %48 : vector<8x128xf32>
    %50 = arith.andi %47, %49 : vector<8x128xi1>
    %51 = arith.extui %50 : vector<8x128xi1> to vector<8x128xi32>
    %52 = arith.sitofp %51 : vector<8x128xi32> to vector<8x128xf32>
    %cst_22 = arith.constant dense<0.000000e+00> : vector<8xf32>
    %53 = vector.multi_reduction <add>, %52, %cst_22 [1] : vector<8x128xf32> to vector<8xf32>
    %54 = vector.shape_cast %53 : vector<8xf32> to vector<8x1xf32>
    %cst_23 = arith.constant 1.000000e+00 : f32
    %55 = vector.broadcast %cst_23 : f32 to vector<8x1xf32>
    %56 = arith.maximumf %54, %55 : vector<8x1xf32>
    %cst_24 = arith.constant 5.000000e+00 : f32
    %57 = vector.broadcast %cst_24 : f32 to vector<8x1xf32>
    %58 = arith.mulf %57, %45 : vector<8x1xf32>
    %59 = arith.divf %58, %56 : vector<8x1xf32>
    %60 = vector.shape_cast %59 : vector<8x1xf32> to vector<8x1xf32>
    %61 = vector.broadcast %60 : vector<8x1xf32> to vector<8x128xf32>
    %cst_25 = arith.constant 0.000000e+00 : f32
    %62 = vector.broadcast %cst_25 : f32 to vector<8x128xf32>
    %63 = arith.maximumf %12, %62 : vector<8x128xf32>
    %64 = arith.mulf %12, %41 : vector<8x128xf32>
    %65 = arith.subf %63, %64 : vector<8x128xf32>
    %66 = math.absf %12 : vector<8x128xf32>
    %cst_26 = arith.constant 0.000000e+00 : f32
    %67 = vector.broadcast %cst_26 : f32 to vector<8x128xf32>
    %68 = arith.subf %67, %66 : vector<8x128xf32>
    %69 = math.exp %68 : vector<8x128xf32>
    %cst_27 = arith.constant 1.000000e+00 : f32
    %70 = vector.broadcast %cst_27 : f32 to vector<8x128xf32>
    %71 = arith.addf %70, %69 : vector<8x128xf32>
    %72 = math.log %71 : vector<8x128xf32>
    %73 = arith.addf %65, %72 : vector<8x128xf32>
    %cst_28 = arith.constant 0.000000e+00 : f32
    %74 = vector.broadcast %cst_28 : f32 to vector<8x128xf32>
    %75 = arith.cmpf ole, %41, %74 : vector<8x128xf32>
    %cst_29 = arith.constant 1.000000e+00 : f32
    %76 = vector.broadcast %cst_29 : f32 to vector<8x128xf32>
    %77 = arith.select %75, %61, %76 : vector<8x128xi1>, vector<8x128xf32>
    %78 = arith.mulf %77, %14 : vector<8x128xf32>
    %79 = arith.mulf %73, %78 : vector<8x128xf32>
    %80 = vector.shape_cast %79 : vector<8x128xf32> to vector<1x8x128xf32>
    %cst_30 = arith.constant dense<0.000000e+00> : vector<1xf32>
    %81 = vector.multi_reduction <add>, %80, %cst_30 [1, 2] : vector<1x8x128xf32> to vector<1xf32>
    %82 = vector.shape_cast %81 : vector<1xf32> to vector<1x1x1xf32>
    %83 = vector.extract %82[0, 0, 0] : f32 from vector<1x1x1xf32>
    %84 = vector.shape_cast %78 : vector<8x128xf32> to vector<1x8x128xf32>
    %cst_31 = arith.constant dense<0.000000e+00> : vector<1xf32>
    %85 = vector.multi_reduction <add>, %84, %cst_31 [1, 2] : vector<1x8x128xf32> to vector<1xf32>
    %86 = vector.shape_cast %85 : vector<1xf32> to vector<1x1x1xf32>
    %87 = vector.extract %86[0, 0, 0] : f32 from vector<1x1x1xf32>
    %88 = tpu.iota {dimensions = array<i32: 1>} : vector<1x8x128xi32>
    %89 = tpu.iota {dimensions = array<i32: 2>} : vector<1x8x128xi32>
    %c0_i32_32 = arith.constant 0 : i32
    %90 = vector.broadcast %c0_i32_32 : i32 to vector<1x8x128xi32>
    %91 = arith.cmpi eq, %88, %90 : vector<1x8x128xi32>
    %c0_i32_33 = arith.constant 0 : i32
    %92 = vector.broadcast %c0_i32_33 : i32 to vector<1x8x128xi32>
    %93 = arith.cmpi eq, %89, %92 : vector<1x8x128xi32>
    %94 = arith.andi %91, %93 : vector<1x8x128xi1>
    %c0_i32_34 = arith.constant 0 : i32
    %95 = vector.broadcast %c0_i32_34 : i32 to vector<1x8x128xi32>
    %96 = arith.cmpi eq, %88, %95 : vector<1x8x128xi32>
    %c1_i32 = arith.constant 1 : i32
    %97 = vector.broadcast %c1_i32 : i32 to vector<1x8x128xi32>
    %98 = arith.cmpi eq, %89, %97 : vector<1x8x128xi32>
    %99 = arith.andi %96, %98 : vector<1x8x128xi1>
    %cst_35 = arith.constant 0.000000e+00 : f32
    %100 = vector.broadcast %87 : f32 to vector<1x8x128xf32>
    %101 = vector.broadcast %cst_35 : f32 to vector<1x8x128xf32>
    %102 = arith.select %99, %100, %101 : vector<1x8x128xi1>, vector<1x8x128xf32>
    %103 = vector.broadcast %83 : f32 to vector<1x8x128xf32>
    %104 = arith.select %94, %103, %102 : vector<1x8x128xi1>, vector<1x8x128xf32>
    %c0_36 = arith.constant 0 : index
    %c0_37 = arith.constant 0 : index
    %c0_38 = arith.constant 0 : index
    %105 = vector.load %arg8[%c0_36, %c0_37, %c0_38] : memref<1x8x128xf32, #tpu.memory_space<vmem>>, vector<1x8x128xf32>
    tpu.vector_store %arg8[%c0_36, %c0_37, %c0_38], %104 {strides = array<i32>} : memref<1x8x128xf32, #tpu.memory_space<vmem>>, vector<1x8x128xf32>,
    return
  }
  func.func @transform_0(%arg0: i32) -> (i32, i32, i32) {
    %c0_i32 = arith.constant 0 : i32
    %c0_i32_0 = arith.constant 0 : i32
    %c0_i32_1 = arith.constant 0 : i32
    return %arg0, %c0_i32, %c0_i32_0 : i32, i32, i32
  }
  func.func @transform_1(%arg0: i32) -> (i32, i32) {
    %c0_i32 = arith.constant 0 : i32
    %c0_i32_0 = arith.constant 0 : i32
    %c0_i32_1 = arith.constant 0 : i32
    return %c0_i32, %c0_i32_0 : i32, i32
  }
  func.func @transform_2(%arg0: i32) -> i32 {
    %c0_i32 = arith.constant 0 : i32
    %c0_i32_0 = arith.constant 0 : i32
    return %c0_i32 : i32
  }
  func.func @transform_3(%arg0: i32) -> (i32, i32) {
    %c0_i32 = arith.constant 0 : i32
    %c0_i32_0 = arith.constant 0 : i32
    return %arg0, %c0_i32 : i32, i32
  }
  func.func @transform_4(%arg0: i32) -> (i32, i32) {
    %c0_i32 = arith.constant 0 : i32
    %c0_i32_0 = arith.constant 0 : i32
    return %arg0, %c0_i32 : i32, i32
  }
  func.func @transform_5(%arg0: i32) -> (i32, i32) {
    %c0_i32 = arith.constant 0 : i32
    %c0_i32_0 = arith.constant 0 : i32
    return %arg0, %c0_i32 : i32, i32
  }
  func.func @transform_6(%arg0: i32) -> (i32, i32) {
    %c0_i32 = arith.constant 0 : i32
    %c0_i32_0 = arith.constant 0 : i32
    return %arg0, %c0_i32 : i32, i32
  }
  func.func @transform_7(%arg0: i32) -> (i32, i32, i32) {
    %c0_i32 = arith.constant 0 : i32
    %c0_i32_0 = arith.constant 0 : i32
    %c0_i32_1 = arith.constant 0 : i32
    return %arg0, %c0_i32, %c0_i32_0 : i32, i32, i32
  }
}

</mosaic_0001>

<bundles_post_ra>
// kernel: tpu_custom_call.1
= control target key start
LH: loop header
LB: loop body
LE: loop exit
PB: predicated region body
PF: predicated region fallthrough
CT: control target
= control target key end

     0   :  { %s11010_s0 = inlined_call_operand.hbm [shape: bf16[16,128,128], index: 0, kind: input, shape index: {}]   ;;  %s11011_s1 = inlined_call_operand.hbm [shape: f32[1,128], index: 1, kind: input, shape index: {}]   ;;  %s11012_s2 = inlined_call_operand.<no memory space> [shape: f32[1], index: 2, kind: input, shape index: {}]   ;;  %s11013_s3 = inlined_call_operand.hbm [shape: s32[16,128], index: 3, kind: input, shape index: {}]   ;;  %s11014_s4 = inlined_call_operand.hbm [shape: f32[16,128], index: 4, kind: input, shape index: {}]   ;;  %s11015_s5 = inlined_call_operand.hbm [shape: s32[16,1], index: 5, kind: input, shape index: {}]   ;;  %s11016_s6 = inlined_call_operand.hbm [shape: s32[16,1], index: 6, kind: input, shape index: {}]   ;;  %s11017_s7 = inlined_call_operand.hbm [shape: f32[2,8,128], index: 7, kind: output, shape index: {}]  }
   0x1   :  { %11290 = sst [smem:[#allocation403_spill]] %s11010_s0 }
   0x2   :  { %12 = sst [smem:[#allocation2]] %s11012_s2 }
   0x3   :  { %13 = vsyncpa [#allocation4], 0 }
   0x4   :  { %15 = vsyncpa [#allocation4 + $0x1], 0 }
   0x5   :  { %16 = vsyncpa [#allocation7], 0 }
   0x6   :  { %17 = vsyncpa [#allocation5], 0 }
   0x7   :  { %19 = vsyncpa [#allocation5 + $0x1], 0  ;;  %s6602_s26 = smov 0   ;;  %s6604_s27 = smov 0  }
   0x8   :  { %s6606_s28 = smov 0   ;;  %s6608_s29 = smov 0  }
   0x9 LB: > { %s6623_s2 = sadd.s32 1, %s6546_s29   ;;  %s32_s30 = sadd.s32 1, %s6542_s28  ;;  %s6546_s29 = sphi %s6608_s29, %s12744_s29   ;;  %s6542_s28 = sphi %s6606_s28, %s12743_s28   ;;  %s6538_s27 = sphi %s6604_s27, %s12742_s27   ;;  %s6534_s26 = sphi %s6602_s26, %s12741_s26  }
   0xa   : > { %s29_s8 = ssub.s32 %s6546_s29, %s6623_s2  ;;  %p11018_p0 = scmp.ne.s32.totalorder %s6542_s28, %s6538_s27 }
   0xb   : > { %p30_p1 = scmp.eq.s32.totalorder %s29_s8, 0  ;;  %p40_p2 = scmp.eq.s32.totalorder %s6546_s29, 0 }
   0xc   : > { %p5738_p4 = scmp.lt.s32.totalorder %s6546_s29, 2  ;;  %s255_s10 = sand.u32 1, %s6546_s29  }
   0xd   : > { %s6634_s9 = scalar_select %p30_p1, %s6542_s28, %s32_s30  }
   0xe   : > { %p41_p5 = por %p40_p2, %p11018_p0  ;;  %s257_s11 = sand.u32 1, %s6542_s28  }
   0xf   : > { %s5664_s12 = sshll.u32 %s257_s11, 9  ;;  %s5692_s13 = sshll.u32 %s6546_s29, 13 }
  0x10   : > { %s11291_s0 = sld [smem:[#allocation403_spill]]  ;;  %s259_s17 = scalar_lea.vmem [#allocation3], %s5664_s12 }
  0x11   : > { %s267_s18 = sshll.u32 %s259_s17, 4  ;;  %p6649_p6 = pnand %p5738_p4, %p41_p5  ;;  %s6653_s18 = int_to_ptr.vmem [resolvable:$true] %s267_s18 }
  0x12   : > { %s6655_s20 = scalar_lea.sflag [#allocation4], %s255_s10 }
  0x13   : > { %s11292_s19 = scalar_select %p6649_p6, 1, 0 }
  0x14   : > { %p6661_p8 = pneg %p6649_p6 }
  0x16   : > { %s6647_s16 = scalar_lea.hbm %s11291_s0, %s5692_s13  ;;  %s6299_s25 = scalar_lea.hbm %s11291_s0, 16384 }
  0x17   : > { %s6294_s21 = scalar_lea.hbm %s6647_s16, 8192  ;;  %p6300_p11 = scmp.lt.u32.totalorder %s6647_s16, %s11291_s0 }
  0x18   : > { %p6295_p7 = scmp.ne.s32.totalorder %s6647_s16, %s6294_s21  ;;  %p6301_p12 = scmp.lt.u32.totalorder %s6299_s25, %s6294_s21 }
  0x19   : > { %p6303_p1 = scmp.lt.u32.totalorder %s6294_s21, %s6647_s16 }
  0x1a   : > { %p6297_p9 = pnand %p6661_p8, %p6295_p7  ;;  %p6302_p13 = por %p6301_p12, %p6300_p11 }
  0x1c   : > { %p6298_p10 = pneg %p6297_p9  ;;  %p6304_p2 = por %p6303_p1, %p6302_p13 }
  0x1e   : > { %p6305_p4 = pnand %p6304_p2, %p6298_p10 }
  0x20   : > { %6308 = shalt.err (!%p6305_p4)
}
  0x21   : > { %s6309_s10 = scalar_lea.vmem %s6653_s18, 8192  ;;  %s6548_s12 = smov [#allocation3]  }
  0x22   : > { %p6310_p5 = scmp.ne.s32.totalorder %s6653_s18, %s6309_s10  ;;  %s6314_s13 = sshll.u32 %s6548_s12, 4  ;;  %s6315_s13 = int_to_ptr.vmem [resolvable:$false] %s6314_s13 }
  0x23   : > { %s6316_s14 = scalar_lea.vmem %s6315_s13, 16384  ;;  %p6317_p3 = scmp.lt.s32.totalorder %s6653_s18, %s6315_s13 }
  0x24   : > { %p6312_p7 = pnand %p6310_p5, %p6661_p8  ;;  %p6318_p0 = scmp.lt.s32.totalorder %s6316_s14, %s6309_s10 }
  0x26   : > { %p6313_p9 = pneg %p6312_p7  ;;  %p6319_p11 = por %p6318_p0, %p6317_p3 }
  0x28   : > { %p6320_p12 = pnand %p6319_p11, %p6313_p9 }
  0x2a   : > { %6323 = shalt.err (!%p6320_p12)
}
  0x2b   : > { %s6549_s15 = smov 64   ;;  %s6550_s17 = smov 4  }
  0x2c   : > { %5720 = dma.hbm_to_vmem [thread:$0]  (!%p6649_p6), %s6647_s16, 8192, %s6653_s18, %s6655_s20, %s6549_s15, %s6549_s15, %s6550_s17  }
  0x2d   : > { %s6687_s21 = sshll.u32 %s257_s11, 3  ;;  %s6690_s23 = sshll.u32 %s6546_s29, 7 }
  0x2e   : > { %s6696_s30 = scalar_lea.hbm %s11013_s3, %s6690_s23  ;;  %s281_s8 = scalar_lea.vmem [#allocation8], %s6687_s21 }
  0x2f   : > { %s288_s10 = sshll.u32 %s281_s8, 4  ;;  %s6703_s18 = scalar_lea.hbm %s11014_s4, %s6690_s23  ;;  %s289_s10 = int_to_ptr.vmem [resolvable:$true] %s288_s10 }
  0x30   : > { %s6324_s12 = scalar_lea.hbm %s6696_s30, 128  ;;  %s6329_s15 = scalar_lea.hbm %s11013_s3, 256 }
  0x31   : > { %p6325_p0 = scmp.ne.s32.totalorder %s6696_s30, %s6324_s12  ;;  %p6330_p13 = scmp.lt.u32.totalorder %s6696_s30, %s11013_s3 }
  0x32   : > { %p6331_p1 = scmp.lt.u32.totalorder %s6329_s15, %s6324_s12  ;;  %p6333_p4 = scmp.lt.u32.totalorder %s6324_s12, %s6696_s30 }
  0x33   : > { %p6327_p3 = pnand %p6325_p0, %p6661_p8 }
  0x34   : > { %p6332_p2 = por %p6331_p1, %p6330_p13 }
  0x35   : > { %p6328_p10 = pneg %p6327_p3 }
  0x36   : > { %p6334_p5 = por %p6333_p4, %p6332_p2 }
  0x38   : > { %p6335_p7 = pnand %p6334_p5, %p6328_p10 }
  0x3a   : > { %6338 = shalt.err (!%p6335_p7)
}
  0x3b   : > { %s6339_s25 = scalar_lea.vmem %s289_s10, 128  ;;  %s6551_s8 = smov [#allocation8]  }
  0x3c   : > { %p6340_p9 = scmp.ne.s32.totalorder %s289_s10, %s6339_s25  ;;  %s6344_s16 = sshll.u32 %s6551_s8, 4  ;;  %s6345_s16 = int_to_ptr.vmem [resolvable:$false] %s6344_s16 }
  0x3d   : > { %s6346_s11 = scalar_lea.vmem %s6345_s16, 256  ;;  %p6347_p0 = scmp.lt.s32.totalorder %s289_s10, %s6345_s16 }
  0x3e   : > { %p6342_p11 = pnand %p6340_p9, %p6661_p8  ;;  %p6348_p3 = scmp.lt.s32.totalorder %s6346_s11, %s6339_s25 }
  0x40   : > { %p6343_p12 = pneg %p6342_p11  ;;  %p6349_p6 = por %p6348_p3, %p6347_p0 }
  0x42   : > { %p6350_p1 = pnand %p6349_p6, %p6343_p12 }
  0x44   : > { %6353 = shalt.err (!%p6350_p1)
}
  0x45   : > { %p11294_p13 = scmp.ne.s32.totalorder %s11292_s19, 0  ;;  %s299_s12 = scalar_lea.vmem [#allocation9], %s6687_s21 }
  0x46   : > { %s306_s13 = sshll.u32 %s299_s12, 4  ;;  %s6728_s17 = scalar_lea.hbm %s11015_s5, %s6690_s23  ;;  %s307_s13 = int_to_ptr.vmem [resolvable:$true] %s306_s13 }
  0x47   : > { %5723 = dma.hbm_to_vmem [thread:$0]  (!%p11294_p13), %s6696_s30, 128, %s289_s10, %s6655_s20  }
  0x48   : > { %s6354_s24 = scalar_lea.hbm %s6703_s18, 128  ;;  %s6359_s16 = scalar_lea.hbm %s11014_s4, 256 }
  0x49   : > { %p6355_p6 = scmp.ne.s32.totalorder %s6703_s18, %s6354_s24  ;;  %p6360_p4 = scmp.lt.u32.totalorder %s6703_s18, %s11014_s4 }
  0x4a   : > { %p6361_p5 = scmp.lt.u32.totalorder %s6359_s16, %s6354_s24  ;;  %p6363_p9 = scmp.lt.u32.totalorder %s6354_s24, %s6703_s18 }
  0x4b   : > { %p6357_p10 = pnand %p6355_p6, %p6661_p8 }
  0x4c   : > { %p6362_p7 = por %p6361_p5, %p6360_p4 }
  0x4d   : > { %p6358_p2 = pneg %p6357_p10 }
  0x4e   : > { %p6364_p11 = por %p6363_p9, %p6362_p7 }
  0x50   : > { %p6365_p12 = pnand %p6364_p11, %p6358_p2 }
  0x52   : > { %6368 = shalt.err (!%p6365_p12)
}
  0x53   : > { %s6369_s30 = scalar_lea.vmem %s307_s13, 128  ;;  %s6552_s10 = smov [#allocation9]  }
  0x54   : > { %p6370_p0 = scmp.ne.s32.totalorder %s307_s13, %s6369_s30  ;;  %s6374_s12 = sshll.u32 %s6552_s10, 4  ;;  %s6375_s12 = int_to_ptr.vmem [resolvable:$false] %s6374_s12 }
  0x55   : > { %s6376_s14 = scalar_lea.vmem %s6375_s12, 256  ;;  %p6377_p6 = scmp.lt.s32.totalorder %s307_s13, %s6375_s12 }
  0x56   : > { %p6372_p3 = pnand %p6370_p0, %p6661_p8  ;;  %p6378_p10 = scmp.lt.s32.totalorder %s6376_s14, %s6369_s30 }
  0x58   : > { %p6373_p1 = pneg %p6372_p3  ;;  %p6379_p13 = por %p6378_p10, %p6377_p6 }
  0x5a   : > { %p6380_p4 = pnand %p6379_p13, %p6373_p1 }
  0x5c   : > { %6383 = shalt.err (!%p6380_p4)
}
  0x5d   : > { %p11295_p5 = scmp.ne.s32.totalorder %s11292_s19, 0  ;;  %s317_s0 = scalar_lea.vmem [#allocation10], %s6687_s21 }
  0x5e   : > { %s324_s15 = sshll.u32 %s317_s0, 4  ;;  %s6384_s24 = scalar_lea.hbm %s6728_s17, 128  ;;  %s325_s15 = int_to_ptr.vmem [resolvable:$true] %s324_s15 }
  0x5f   : > { %5726 = dma.hbm_to_vmem [thread:$0]  (!%p11295_p5), %s6703_s18, 128, %s307_s13, %s6655_s20  }
  0x60   : > { %p6385_p2 = scmp.ne.s32.totalorder %s6728_s17, %s6384_s24  ;;  %s6389_s16 = scalar_lea.hbm %s11015_s5, 256 }
  0x61   : > { %p6390_p9 = scmp.lt.u32.totalorder %s6728_s17, %s11015_s5  ;;  %p6391_p11 = scmp.lt.u32.totalorder %s6389_s16, %s6384_s24 }
  0x62   : > { %p6387_p7 = pnand %p6385_p2, %p6661_p8  ;;  %p6393_p0 = scmp.lt.u32.totalorder %s6384_s24, %s6728_s17 }
  0x63   : > { %p6392_p12 = por %p6391_p11, %p6390_p9 }
  0x64   : > { %p6388_p13 = pneg %p6387_p7 }
  0x65   : > { %p6394_p3 = por %p6393_p0, %p6392_p12 }
  0x67   : > { %p6395_p1 = pnand %p6394_p3, %p6388_p13 }
  0x69   : > { %6398 = shalt.err (!%p6395_p1)
}
  0x6a   : > { %s6399_s18 = scalar_lea.vmem %s325_s15, 128  ;;  %s6553_s13 = smov [#allocation10]  }
  0x6b   : > { %p6400_p6 = scmp.ne.s32.totalorder %s325_s15, %s6399_s18  ;;  %s6404_s10 = sshll.u32 %s6553_s13, 4  ;;  %s6405_s10 = int_to_ptr.vmem [resolvable:$false] %s6404_s10 }
  0x6c   : > { %s6406_s12 = scalar_lea.vmem %s6405_s10, 256  ;;  %p6407_p2 = scmp.lt.s32.totalorder %s325_s15, %s6405_s10 }
  0x6d   : > { %p6402_p10 = pnand %p6400_p6, %p6661_p8  ;;  %p6408_p7 = scmp.lt.s32.totalorder %s6406_s12, %s6399_s18 }
  0x6f   : > { %p6403_p4 = pneg %p6402_p10  ;;  %p6409_p5 = por %p6408_p7, %p6407_p2 }
  0x71   : > { %p6410_p9 = pnand %p6409_p5, %p6403_p4 }
  0x73   : > { %6413 = shalt.err (!%p6410_p9)
}
  0x74   : > { %p11296_p11 = scmp.ne.s32.totalorder %s11292_s19, 0  ;;  %s6768_s14 = sadd.s32 4294967295, %s6546_s29  }
  0x75   : > { %s5660_s0 = sadd.s32 4294967294, %s6546_s29   ;;  %p45_p5 = scmp.ne.s32.totalorder %s6538_s27, %s6534_s26 }
  0x76   : > { %5729 = dma.hbm_to_vmem [thread:$0]  (!%p11296_p11), %s6728_s17, 128, %s325_s15, %s6655_s20  }
  0x77   : > { %p11022_p13 = scmp.eq.s32.totalorder %s6768_s14, 0  ;;  %p215_p12 = scmp.eq.s32.totalorder %s6768_s14, 1 }
  0x78   : > { %p221_p0 = scmp.eq.s32.totalorder %s5660_s0, 1  ;;  %p5661_p1 = scmp.ge.s32.totalorder %s6546_s29, 1 }
  0x79   : > { %p6777_p3 = por %p11022_p13, %p45_p5  ;;  %p11298_p6 = scmp.ne.s32.totalorder %s6542_s28, %s6538_s27 }
  0x7a   : > { %p6789_p4 = por %p221_p0, %p45_p5  ;;  %p228_p2 = scmp.lt.s32.totalorder %s6546_s29, 3 }
  0x7b   : > { %s11297_s24 = scalar_select %p6777_p3, 1, 0 }
  0x7c   : > { %p6785_p10 = por %p215_p12, %p11298_p6  ;;  %p6794_p7 = pnand %p5661_p1, %p228_p2 }
  0x7d   : > { %s11300_s15 = scalar_select %p6789_p4, 1, 0 }
  0x7e   : > { %s11299_s17 = scalar_select %p6785_p10, 1, 0 }
  0x7f   : > { %s11301_s25 = scalar_select %p6794_p7, 1, 0 }
  0x80   : > { %s6554_s8 = smov [#allocation6]   ;;  %s6802_s18 = scalar_lea.hbm %s11016_s6, %s6690_s23 }
  0x81   : > { %s241_s16 = sshll.u32 %s6554_s8, 4  ;;  %p5713_p9 = pneg %p6794_p7  ;;  %s6809_s16 = int_to_ptr.vmem [resolvable:$true] %s241_s16 }
  0x82   : > { %s335_s13 = scalar_lea.vmem [#allocation11], %s6687_s21  ;;  %s6414_s0 = scalar_lea.hbm %s6802_s18, 128 }
  0x83   : > { %s342_s10 = sshll.u32 %s335_s13, 4  ;;  %p6813_p5 = pnand %p5713_p9, %p11022_p13  ;;  %s6807_s10 = int_to_ptr.vmem [resolvable:$true] %s342_s10 }
  0x84   : > { %p6415_p12 = scmp.ne.s32.totalorder %s6802_s18, %s6414_s0  ;;  %s6419_s11 = scalar_lea.hbm %s11016_s6, 256 }
  0x85   : > { %s11302_s12 = scalar_select %p6813_p5, 1, 0 }
  0x86   : > { %p6417_p0 = pnand %p6415_p12, %p6661_p8  ;;  %p6420_p6 = scmp.lt.u32.totalorder %s6802_s18, %s11016_s6 }
  0x87   : > { %p6421_p2 = scmp.lt.u32.totalorder %s6419_s11, %s6414_s0  ;;  %p6423_p10 = scmp.lt.u32.totalorder %s6414_s0, %s6802_s18 }
  0x88   : > { %p6418_p1 = pneg %p6417_p0 }
  0x89   : > { %p6422_p4 = por %p6421_p2, %p6420_p6 }
  0x8b   : > { %p6424_p9 = por %p6423_p10, %p6422_p4 }
  0x8d   : > { %p6425_p13 = pnand %p6424_p9, %p6418_p1 }
  0x8f   : > { %6428 = shalt.err (!%p6425_p13)
}
  0x90   : > { %s6429_s13 = scalar_lea.vmem %s6807_s10, 128  ;;  %s6555_s23 = smov [#allocation11]  }
  0x91   : > { %p6430_p12 = scmp.ne.s32.totalorder %s6807_s10, %s6429_s13  ;;  %s6434_s8 = sshll.u32 %s6555_s23, 4  ;;  %s6435_s8 = int_to_ptr.vmem [resolvable:$false] %s6434_s8 }
  0x92   : > { %s6436_s21 = scalar_lea.vmem %s6435_s8, 256  ;;  %p6437_p7 = scmp.lt.s32.totalorder %s6807_s10, %s6435_s8 }
  0x93   : > { %p6432_p0 = pnand %p6430_p12, %p6661_p8  ;;  %p6438_p5 = scmp.lt.s32.totalorder %s6436_s21, %s6429_s13 }
  0x95   : > { %p6433_p3 = pneg %p6432_p0  ;;  %p6439_p6 = por %p6438_p5, %p6437_p7 }
  0x97   : > { %p6440_p2 = pnand %p6439_p6, %p6433_p3 }
  0x99   : > { %6443 = shalt.err (!%p6440_p2)
}
  0x9a   : > { %5732 = dma.hbm_to_vmem [thread:$0]  (!%p11296_p11), %s6802_s18, 128, %s6807_s10, %s6655_s20  }
  0x9b   : > { %s6444_s11 = scalar_lea.hbm %s11011_s1, 16  ;;  %p11303_p13 = scmp.ne.s32.totalorder %s11302_s12, 0 }
  0x9c   : > { %p6445_p8 = scmp.ne.s32.totalorder %s11011_s1, %s6444_s11  ;;  %p6451_p7 = scmp.lt.u32.totalorder %s6444_s11, %s11011_s1 }
  0x9d   : > { %p6446_p10 = pneg %p11303_p13 }
  0x9f   : > { %p6447_p4 = pnand %p6446_p10, %p6445_p8 }
  0xa1   : > { %p6448_p3 = pneg %p6447_p4 }
  0xa3   : > { %p6453_p5 = pnand %p6451_p7, %p6448_p3 }
  0xa5   : > { %6456 = shalt.err (!%p6453_p5)
}
  0xa6   : > { %s6457_s19 = scalar_lea.vmem %s6809_s16, 16  ;;  %s6464_s20 = scalar_lea.vmem %s6809_s16, 32 }
  0xa7   : > { %p6458_p11 = scmp.ne.s32.totalorder %s6809_s16, %s6457_s19  ;;  %p6465_p12 = scmp.lt.s32.totalorder %s6809_s16, %s6809_s16 }
  0xa8   : > { %p6466_p0 = scmp.lt.s32.totalorder %s6464_s20, %s6457_s19 }
  0xa9   : > { %p6460_p1 = pnand %p6458_p11, %p6446_p10 }
  0xaa   : > { %p6467_p6 = por %p6466_p0, %p6465_p12 }
  0xab   : > { %p6461_p9 = pneg %p6460_p1 }
  0xad   : > { %p6468_p2 = pnand %p6467_p6, %p6461_p9 }
  0xaf   : > { %6471 = shalt.err (!%p6468_p2)
}
  0xb0   : > { %5716 = dma.hbm_to_vmem [thread:$0]  (!%p11303_p13), %s11011_s1, 16, %s6809_s16, [#allocation7]  }
  0xb1   : > { %p11304_p8 = scmp.ne.s32.totalorder %s11301_s25, 0 }
  0xb3   : > { %351 = sbr.rel (%p11304_p8) target bundleno = 1789 (0x6fd), region = 48 }
  0xba   : > { %s353_s21 = sand.u32 1, %s6768_s14   ;;  %s6865_s0 = sand.u32 1, %s6538_s27  }
  0xbb   : > { %s5677_s22 = sshll.u32 %s6865_s0, 9  ;;  %s354_s11 = scalar_lea.sflag [#allocation4], %s353_s21 }
  0xbc   : > { %s6868_s30 = scalar_lea.vmem [#allocation3], %s5677_s22  ;;  %p11305_p10 = scmp.ne.s32.totalorder %s11297_s24, 0 }
  0xbe   : > { %6517 = dma.done.wait (%p11305_p10), %s354_s11, 8192  }
  0xbf   : > { %6519 = vsyncadd (%p11305_p10), %s354_s11, 4294959104  ;;  %p11306_p13 = scmp.eq.s32.totalorder %s6768_s14, 0 }
  0xc1   : > { %6521 = dma.done.wait (%p11306_p13), [#allocation7], 16   ;;  %p11307_p4 = pmov %p11306_p13 }
  0xc2   : > { %s6879_s25 = sshll.u32 %s6865_s0, 3 }
  0xc3   : > { %6523 = vsyncadd (%p11307_p4), [#allocation7], 4294967280  ;;  %s370_s16 = scalar_lea.vmem [#allocation8], %s6879_s25 }
  0xc4   : > { %6525 = dma.done.wait (%p11305_p10), %s354_s11, 512  }
  0xc5   : > { %6527 = vsyncadd (%p11305_p10), %s354_s11, 4294966784  ;;  %v11026_v0 = vlaneseq  ;;  %v577_v2 = vld [vmem:[#allocation6] sm:$0x1]  ;;  %v451_v8 = vld [vmem:[%s6868_s30 + $0x8] sm:$0xf]  ;;  %s397_s24 = scalar_lea.vmem [#allocation11], %s6879_s25 }
  0xc6   : > { %v578_v3 = vpack.c.bf16 %v577_v2, %v577_v2  ;;  %v449_v6 = vld [vmem:[%s6868_s30] sm:$0xf]  ;;  %v450_v9 = vld [vmem:[%s6868_s30 + $0x4] sm:$0xf]  ;;  %v452_v10 = vld [vmem:[%s6868_s30 + $0xc] sm:$0xf] }
  0xc7   : > { %v6887_v1 = vshrl.u32 %v11026_v0, 7  ;;  %v453_v16 = vld [vmem:[%s6868_s30 + $0x10] sm:$0xf]  ;;  %v454_v17 = vld [vmem:[%s6868_s30 + $0x14] sm:$0xf]  ;;  %s388_s12 = scalar_lea.vmem [#allocation10], %s6879_s25 }
  0xc8   : > { %v580_v5 = vpack.i.b16 %v578_v3, %v578_v3  ;;  %v455_v24 = vld [vmem:[%s6868_s30 + $0x18] sm:$0xf]  ;;  %v456_v25 = vld [vmem:[%s6868_s30 + $0x1c] sm:$0xf]  ;;  %v457_v30 = vld [vmem:[%s6868_s30 + $0x20] sm:$0xf] }
  0xc9   : > { %11308 = vst [vmem:[#allocation17_spill] sm:$0xff] %v6887_v1  ;;  %v6890_v4 = vsub.s32 0, %v6887_v1  ;;  %v458_v31 = vld [vmem:[%s6868_s30 + $0x24] sm:$0xf]  ;;  %v459_v36 = vld [vmem:[%s6868_s30 + $0x28] sm:$0xf] }
  0xca   : > { %v460_v37 = vld [vmem:[%s6868_s30 + $0x2c] sm:$0xf]  ;;  %v461_v42 = vld [vmem:[%s6868_s30 + $0x30] sm:$0xf]  ;;  %v462_v43 = vld [vmem:[%s6868_s30 + $0x34] sm:$0xf] }
  0xcb   : > { %v585_v7 = vrot.slane %v580_v5, %v6890_v4  ;;  %v463_v48 = vld [vmem:[%s6868_s30 + $0x38] sm:$0xf]  ;;  %v464_v49 = vld [vmem:[%s6868_s30 + $0x3c] sm:$0xf]  ;;  %v465_v54 = vld [vmem:[%s6868_s30 + $0x40] sm:$0xf] }
  0xcc   : > { %v466_v55 = vld [vmem:[%s6868_s30 + $0x44] sm:$0xf]  ;;  %v467_v60 = vld [vmem:[%s6868_s30 + $0x48] sm:$0xf]  ;;  %v468_v61 = vld [vmem:[%s6868_s30 + $0x4c] sm:$0xf] }
  0xcd   : > { %v6897_v11 = vcombine.low %v585_v7, %v585_v7  ;;  %v469_v5 = vld [vmem:[%s6868_s30 + $0x50] sm:$0xf]  ;;  %s379_s23 = scalar_lea.vmem [#allocation9], %s6879_s25  ;;  %s1230_s13 = sld [smem:[#allocation2]]  ;;  %vm4789_vm12 = vcmask 130112   ;;  %vm4796_vm13 = vcmask 195712  }
  0xce   : > { %vm4803_vm14 = vcmask 261312   ;;  %vm4810_vm15 = vcmask 326912   ;;  %s5688_s8 = sshll.u32 %s6768_s14, 7  ;;  %s447_s20 = scalar_lea.vmem [#allocation12], %s6879_s25 }
  0xcf   : > { %v590_v12 = vmul.bf16 %v6897_v11, %v449_v6  ;;  %v592_v13 = vmul.bf16 %v6897_v11, %v451_v8  ;;  %v591_v14 = vmul.bf16 %v6897_v11, %v450_v9  ;;  %v593_v15 = vmul.bf16 %v6897_v11, %v452_v10  ;;  %v470_v6 = vld [vmem:[%s6868_s30 + $0x54] sm:$0xf]  ;;  %s5500_s18 = sshll.u32 %s447_s20, 4  ;;  %s10966_s11 = scalar_lea.hbm %s11017_s7, %s5688_s8  ;;  %s10968_s18 = int_to_ptr.vmem [resolvable:$true] %s5500_s18 }
  0xd0   : > { %v594_v22 = vmul.bf16 %v6897_v11, %v453_v16  ;;  %v595_v23 = vmul.bf16 %v6897_v11, %v454_v17  ;;  %v596_v28 = vmul.bf16 %v6897_v11, %v455_v24  ;;  %v597_v29 = vmul.bf16 %v6897_v11, %v456_v25  ;;  %v475_v24 = vld [vmem:[%s6868_s30 + $0x68] sm:$0xf]  ;;  %v476_v25 = vld [vmem:[%s6868_s30 + $0x6c] sm:$0xf]  ;;  %s5487_s14 = scalar_lea.sflag [#allocation5], %s6865_s0  ;;  %p12738_p7 = scmp.ne.s32.totalorder %s11299_s17, 0 }
  0xd1   : > { %v718_v18 = vunpack.c.l.bf16 %v590_v12  ;;  %v720_v19 = vunpack.c.l.bf16 %v592_v13  ;;  %v719_v20 = vunpack.c.l.bf16 %v591_v14  ;;  %v721_v21 = vunpack.c.l.bf16 %v593_v15  ;;  %v471_v12 = vld [vmem:[%s6868_s30 + $0x58] sm:$0xf]  ;;  %v472_v13 = vld [vmem:[%s6868_s30 + $0x5c] sm:$0xf]  ;;  %s6558_s25 = smov [#allocation12]  }
  0xd2   : > { %v722_v26 = vunpack.c.l.bf16 %v594_v22  ;;  %v723_v27 = vunpack.c.l.bf16 %v595_v23  ;;  %v724_v32 = vunpack.c.l.bf16 %v596_v28  ;;  %v725_v33 = vunpack.c.l.bf16 %v597_v29 }
  0xd3   : > { %846 = vadd.xlane.f32.xlu0 %v718_v18  ;;  %850 = vadd.xlane.f32.xlu1 %v720_v19  ;;  %v598_v34 = vmul.bf16 %v6897_v11, %v457_v30  ;;  %v599_v35 = vmul.bf16 %v6897_v11, %v458_v31  ;;  %v600_v40 = vmul.bf16 %v6897_v11, %v459_v36  ;;  %v473_v18 = vld [vmem:[%s6868_s30 + $0x60] sm:$0xf]  ;;  %v474_v19 = vld [vmem:[%s6868_s30 + $0x64] sm:$0xf]  ;;  %v477_v30 = vld [vmem:[%s6868_s30 + $0x70] sm:$0xf] }
  0xd4   : > { %v601_v41 = vmul.bf16 %v6897_v11, %v460_v37  ;;  %v602_v46 = vmul.bf16 %v6897_v11, %v461_v42  ;;  %v603_v47 = vmul.bf16 %v6897_v11, %v462_v43  ;;  %v604_v52 = vmul.bf16 %v6897_v11, %v463_v48  ;;  %v478_v31 = vld [vmem:[%s6868_s30 + $0x74] sm:$0xf]  ;;  %v479_v36 = vld [vmem:[%s6868_s30 + $0x78] sm:$0xf]  ;;  %v480_v37 = vld [vmem:[%s6868_s30 + $0x7c] sm:$0xf] }
  0xd5   : > { %v726_v38 = vunpack.c.l.bf16 %v598_v34  ;;  %v727_v39 = vunpack.c.l.bf16 %v599_v35  ;;  %v728_v44 = vunpack.c.l.bf16 %v600_v40  ;;  %v605_v53 = vmul.bf16 %v6897_v11, %v464_v49  ;;  %v481_v42 = vld [vmem:[%s6868_s30 + $0x80] sm:$0xf]  ;;  %v482_v43 = vld [vmem:[%s6868_s30 + $0x84] sm:$0xf]  ;;  %v483_v48 = vld [vmem:[%s6868_s30 + $0x88] sm:$0xf] }
  0xd6   : > { %v729_v45 = vunpack.c.l.bf16 %v601_v41  ;;  %v730_v50 = vunpack.c.l.bf16 %v602_v46  ;;  %v731_v51 = vunpack.c.l.bf16 %v603_v47  ;;  %v732_v56 = vunpack.c.l.bf16 %v604_v52  ;;  %v484_v49 = vld [vmem:[%s6868_s30 + $0x8c] sm:$0xf] }
  0xd7   : > { %848 = vadd.xlane.f32.xlu0 %v719_v20  ;;  %852 = vadd.xlane.f32.xlu1 %v721_v21  ;;  %v733_v57 = vunpack.c.l.bf16 %v605_v53  ;;  %v606_v58 = vmul.bf16 %v6897_v11, %v465_v54  ;;  %v607_v59 = vmul.bf16 %v6897_v11, %v466_v55  ;;  %v608_v2 = vmul.bf16 %v6897_v11, %v467_v60  ;;  %v485_v54 = vld [vmem:[%s6868_s30 + $0x90] sm:$0xf]  ;;  %v486_v55 = vld [vmem:[%s6868_s30 + $0x94] sm:$0xf]  ;;  %v487_v60 = vld [vmem:[%s6868_s30 + $0x98] sm:$0xf] }
  0xd8   : > { %v609_v3 = vmul.bf16 %v6897_v11, %v468_v61  ;;  %v610_v9 = vmul.bf16 %v6897_v11, %v469_v5  ;;  %v611_v10 = vmul.bf16 %v6897_v11, %v470_v6  ;;  %v612_v16 = vmul.bf16 %v6897_v11, %v471_v12  ;;  %v488_v61 = vld [vmem:[%s6868_s30 + $0x9c] sm:$0xf]  ;;  %v489_v5 = vld [vmem:[%s6868_s30 + $0xa0] sm:$0xf]  ;;  %v490_v6 = vld [vmem:[%s6868_s30 + $0xa4] sm:$0xf] }
  0xd9   : > { %v734_v62 = vunpack.c.l.bf16 %v606_v58  ;;  %v735_v63 = vunpack.c.l.bf16 %v607_v59  ;;  %v736_v7 = vunpack.c.l.bf16 %v608_v2  ;;  %v613_v17 = vmul.bf16 %v6897_v11, %v472_v13  ;;  %v491_v12 = vld [vmem:[%s6868_s30 + $0xa8] sm:$0xf]  ;;  %v492_v13 = vld [vmem:[%s6868_s30 + $0xac] sm:$0xf] }
  0xda   : > { %v737_v8 = vunpack.c.l.bf16 %v609_v3  ;;  %v738_v14 = vunpack.c.l.bf16 %v610_v9  ;;  %v739_v15 = vunpack.c.l.bf16 %v611_v10  ;;  %v740_v20 = vunpack.c.l.bf16 %v612_v16 }
  0xdb   : > { %854 = vadd.xlane.f32.xlu0 %v722_v26  ;;  %856 = vadd.xlane.f32.xlu1 %v723_v27  ;;  %v741_v21 = vunpack.c.l.bf16 %v613_v17  ;;  %v614_v22 = vmul.bf16 %v6897_v11, %v473_v18  ;;  %v615_v23 = vmul.bf16 %v6897_v11, %v474_v19  ;;  %v616_v28 = vmul.bf16 %v6897_v11, %v475_v24  ;;  %v493_v18 = vld [vmem:[%s6868_s30 + $0xb0] sm:$0xf]  ;;  %v494_v19 = vld [vmem:[%s6868_s30 + $0xb4] sm:$0xf]  ;;  %v495_v24 = vld [vmem:[%s6868_s30 + $0xb8] sm:$0xf] }
  0xdc   : > { %v617_v29 = vmul.bf16 %v6897_v11, %v476_v25  ;;  %v618_v34 = vmul.bf16 %v6897_v11, %v477_v30  ;;  %v619_v35 = vmul.bf16 %v6897_v11, %v478_v31  ;;  %v620_v40 = vmul.bf16 %v6897_v11, %v479_v36  ;;  %v496_v25 = vld [vmem:[%s6868_s30 + $0xbc] sm:$0xf]  ;;  %v497_v30 = vld [vmem:[%s6868_s30 + $0xc0] sm:$0xf]  ;;  %v498_v31 = vld [vmem:[%s6868_s30 + $0xc4] sm:$0xf] }
  0xdd   : > { %v742_v26 = vunpack.c.l.bf16 %v614_v22  ;;  %v743_v27 = vunpack.c.l.bf16 %v615_v23  ;;  %v621_v41 = vmul.bf16 %v6897_v11, %v480_v37  ;;  %v622_v46 = vmul.bf16 %v6897_v11, %v481_v42  ;;  %v499_v36 = vld [vmem:[%s6868_s30 + $0xc8] sm:$0xf]  ;;  %v500_v37 = vld [vmem:[%s6868_s30 + $0xcc] sm:$0xf]  ;;  %v501_v42 = vld [vmem:[%s6868_s30 + $0xd0] sm:$0xf] }
  0xde   : > { %v623_v47 = vmul.bf16 %v6897_v11, %v482_v43  ;;  %v624_v52 = vmul.bf16 %v6897_v11, %v483_v48  ;;  %v625_v53 = vmul.bf16 %v6897_v11, %v484_v49  ;;  %v626_v58 = vmul.bf16 %v6897_v11, %v485_v54  ;;  %v502_v43 = vld [vmem:[%s6868_s30 + $0xd4] sm:$0xf]  ;;  %v503_v48 = vld [vmem:[%s6868_s30 + $0xd8] sm:$0xf]  ;;  %v504_v49 = vld [vmem:[%s6868_s30 + $0xdc] sm:$0xf] }
  0xdf   : > { %858 = vadd.xlane.f32.xlu0 %v724_v32  ;;  %860 = vadd.xlane.f32.xlu1 %v725_v33  ;;  %v744_v32 = vunpack.c.l.bf16 %v616_v28  ;;  %v745_v33 = vunpack.c.l.bf16 %v617_v29  ;;  %v627_v59 = vmul.bf16 %v6897_v11, %v486_v55  ;;  %v628_v2 = vmul.bf16 %v6897_v11, %v487_v60  ;;  %v505_v54 = vld [vmem:[%s6868_s30 + $0xe0] sm:$0xf]  ;;  %v506_v55 = vld [vmem:[%s6868_s30 + $0xe4] sm:$0xf]  ;;  %v507_v60 = vld [vmem:[%s6868_s30 + $0xe8] sm:$0xf] }
  0xe0   : > { %v629_v3 = vmul.bf16 %v6897_v11, %v488_v61  ;;  %v630_v9 = vmul.bf16 %v6897_v11, %v489_v5  ;;  %v631_v10 = vmul.bf16 %v6897_v11, %v490_v6  ;;  %v632_v16 = vmul.bf16 %v6897_v11, %v491_v12  ;;  %v508_v61 = vld [vmem:[%s6868_s30 + $0xec] sm:$0xf]  ;;  %v509_v5 = vld [vmem:[%s6868_s30 + $0xf0] sm:$0xf]  ;;  %v510_v6 = vld [vmem:[%s6868_s30 + $0xf4] sm:$0xf] }
  0xe1   : > { %v633_v17 = vmul.bf16 %v6897_v11, %v492_v13  ;;  %v634_v22 = vmul.bf16 %v6897_v11, %v493_v18  ;;  %v635_v23 = vmul.bf16 %v6897_v11, %v494_v19  ;;  %v636_v28 = vmul.bf16 %v6897_v11, %v495_v24  ;;  %v511_v12 = vld [vmem:[%s6868_s30 + $0xf8] sm:$0xf]  ;;  %v512_v13 = vld [vmem:[%s6868_s30 + $0xfc] sm:$0xf]  ;;  %v513_v18 = vld [vmem:[%s6868_s30 + $0x100] sm:$0xf] }
  0xe2   : > { %v637_v29 = vmul.bf16 %v6897_v11, %v496_v25  ;;  %v514_v19 = vld [vmem:[%s6868_s30 + $0x104] sm:$0xf]  ;;  %v515_v24 = vld [vmem:[%s6868_s30 + $0x108] sm:$0xf]  ;;  %v516_v25 = vld [vmem:[%s6868_s30 + $0x10c] sm:$0xf] }
  0xe3   : > { %862 = vadd.xlane.f32.xlu0 %v726_v38  ;;  %864 = vadd.xlane.f32.xlu1 %v727_v39  ;;  %v746_v38 = vunpack.c.l.bf16 %v618_v34  ;;  %v747_v39 = vunpack.c.l.bf16 %v619_v35  ;;  %v638_v34 = vmul.bf16 %v6897_v11, %v497_v30  ;;  %v639_v35 = vmul.bf16 %v6897_v11, %v498_v31  ;;  %v517_v30 = vld [vmem:[%s6868_s30 + $0x110] sm:$0xf]  ;;  %v518_v31 = vld [vmem:[%s6868_s30 + $0x114] sm:$0xf] }
  0xe7   : > { %866 = vadd.xlane.f32.xlu0 %v728_v44  ;;  %868 = vadd.xlane.f32.xlu1 %v729_v45  ;;  %v748_v44 = vunpack.c.l.bf16 %v620_v40  ;;  %v749_v45 = vunpack.c.l.bf16 %v621_v41  ;;  %v640_v40 = vmul.bf16 %v6897_v11, %v499_v36  ;;  %v641_v41 = vmul.bf16 %v6897_v11, %v500_v37  ;;  %v519_v36 = vld [vmem:[%s6868_s30 + $0x118] sm:$0xf]  ;;  %v520_v37 = vld [vmem:[%s6868_s30 + $0x11c] sm:$0xf] }
  0xeb   : > { %870 = vadd.xlane.f32.xlu0 %v730_v50  ;;  %872 = vadd.xlane.f32.xlu1 %v731_v51  ;;  %v750_v50 = vunpack.c.l.bf16 %v622_v46  ;;  %v751_v51 = vunpack.c.l.bf16 %v623_v47  ;;  %v642_v46 = vmul.bf16 %v6897_v11, %v501_v42  ;;  %v643_v47 = vmul.bf16 %v6897_v11, %v502_v43  ;;  %v521_v42 = vld [vmem:[%s6868_s30 + $0x120] sm:$0xf]  ;;  %v522_v43 = vld [vmem:[%s6868_s30 + $0x124] sm:$0xf] }
  0xef   : > { %874 = vadd.xlane.f32.xlu0 %v732_v56  ;;  %876 = vadd.xlane.f32.xlu1 %v733_v57  ;;  %v752_v56 = vunpack.c.l.bf16 %v624_v52  ;;  %v753_v57 = vunpack.c.l.bf16 %v625_v53  ;;  %v644_v52 = vmul.bf16 %v6897_v11, %v503_v48  ;;  %v645_v53 = vmul.bf16 %v6897_v11, %v504_v49  ;;  %v523_v48 = vld [vmem:[%s6868_s30 + $0x128] sm:$0xf]  ;;  %v524_v49 = vld [vmem:[%s6868_s30 + $0x12c] sm:$0xf] }
  0xf3   : > { %878 = vadd.xlane.f32.xlu0 %v734_v62  ;;  %880 = vadd.xlane.f32.xlu1 %v735_v63  ;;  %v754_v62 = vunpack.c.l.bf16 %v626_v58  ;;  %v755_v63 = vunpack.c.l.bf16 %v627_v59  ;;  %v646_v58 = vmul.bf16 %v6897_v11, %v505_v54  ;;  %v647_v59 = vmul.bf16 %v6897_v11, %v506_v55  ;;  %v525_v54 = vld [vmem:[%s6868_s30 + $0x130] sm:$0xf] }
  0xf7   : > { %882 = vadd.xlane.f32.xlu0 %v736_v7  ;;  %884 = vadd.xlane.f32.xlu1 %v737_v8  ;;  %v756_v7 = vunpack.c.l.bf16 %v628_v2  ;;  %v757_v8 = vunpack.c.l.bf16 %v629_v3  ;;  %v648_v2 = vmul.bf16 %v6897_v11, %v507_v60  ;;  %v649_v3 = vmul.bf16 %v6897_v11, %v508_v61 }
  0xfb   : > { %886 = vadd.xlane.f32.xlu0 %v738_v14  ;;  %888 = vadd.xlane.f32.xlu1 %v739_v15  ;;  %v758_v14 = vunpack.c.l.bf16 %v630_v9  ;;  %v759_v15 = vunpack.c.l.bf16 %v631_v10  ;;  %v650_v9 = vmul.bf16 %v6897_v11, %v509_v5  ;;  %v651_v10 = vmul.bf16 %v6897_v11, %v510_v6 }
  0xfc   : > { %v6556_v5 = vmov 0  }
  0xfd   : > { %5779 = vset.pattern.permute.xlu1 %v6556_v5  ;;  %5778 = vset.pattern.permute.xlu0 %v6556_v5  ;;  %v542_v5 = vld [vmem:[%s6868_s30 + $0x174] sm:$0xf] }
  0xff   : > { %890 = vadd.xlane.f32.xlu0 %v740_v20  ;;  %892 = vadd.xlane.f32.xlu1 %v741_v21  ;;  %v760_v20 = vunpack.c.l.bf16 %v632_v16  ;;  %v761_v21 = vunpack.c.l.bf16 %v633_v17  ;;  %v652_v16 = vmul.bf16 %v6897_v11, %v511_v12  ;;  %v653_v17 = vmul.bf16 %v6897_v11, %v512_v13  ;;  %v529_v13 = vld [vmem:[%s6868_s30 + $0x140] sm:$0xf] }
 0x103   : > { %894 = vadd.xlane.f32.xlu0 %v742_v26  ;;  %896 = vadd.xlane.f32.xlu1 %v743_v27  ;;  %v762_v26 = vunpack.c.l.bf16 %v634_v22  ;;  %v763_v27 = vunpack.c.l.bf16 %v635_v23  ;;  %v654_v22 = vmul.bf16 %v6897_v11, %v513_v18  ;;  %v655_v23 = vmul.bf16 %v6897_v11, %v514_v19 }
 0x107   : > { %898 = vadd.xlane.f32.xlu0 %v744_v32  ;;  %900 = vadd.xlane.f32.xlu1 %v745_v33  ;;  %v764_v32 = vunpack.c.l.bf16 %v636_v28  ;;  %v765_v33 = vunpack.c.l.bf16 %v637_v29  ;;  %v656_v28 = vmul.bf16 %v6897_v11, %v515_v24  ;;  %v657_v29 = vmul.bf16 %v6897_v11, %v516_v25 }
 0x10b   : > { %902 = vadd.xlane.f32.xlu0 %v746_v38  ;;  %904 = vadd.xlane.f32.xlu1 %v747_v39  ;;  %v766_v38 = vunpack.c.l.bf16 %v638_v34  ;;  %v767_v39 = vunpack.c.l.bf16 %v639_v35  ;;  %v658_v34 = vmul.bf16 %v6897_v11, %v517_v30  ;;  %v659_v35 = vmul.bf16 %v6897_v11, %v518_v31  ;;  %v534_v30 = vld [vmem:[%s6868_s30 + $0x154] sm:$0xf] }
 0x10f   : > { %906 = vadd.xlane.f32.xlu0 %v748_v44  ;;  %908 = vadd.xlane.f32.xlu1 %v749_v45  ;;  %v768_v44 = vunpack.c.l.bf16 %v640_v40  ;;  %v769_v45 = vunpack.c.l.bf16 %v641_v41  ;;  %v660_v40 = vmul.bf16 %v6897_v11, %v519_v36  ;;  %v661_v41 = vmul.bf16 %v6897_v11, %v520_v37  ;;  %v535_v37 = vld [vmem:[%s6868_s30 + $0x158] sm:$0xf] }
 0x113   : > { %910 = vadd.xlane.f32.xlu0 %v750_v50  ;;  %912 = vadd.xlane.f32.xlu1 %v751_v51  ;;  %v770_v50 = vunpack.c.l.bf16 %v642_v46  ;;  %v771_v51 = vunpack.c.l.bf16 %v643_v47  ;;  %v662_v46 = vmul.bf16 %v6897_v11, %v521_v42  ;;  %v663_v47 = vmul.bf16 %v6897_v11, %v522_v43 }
 0x117   : > { %914 = vadd.xlane.f32.xlu0 %v752_v56  ;;  %916 = vadd.xlane.f32.xlu1 %v753_v57  ;;  %v772_v56 = vunpack.c.l.bf16 %v644_v52  ;;  %v773_v57 = vunpack.c.l.bf16 %v645_v53  ;;  %v664_v52 = vmul.bf16 %v6897_v11, %v523_v48  ;;  %v665_v53 = vmul.bf16 %v6897_v11, %v524_v49 }
 0x119   : > { %v793_v60 = vunpack.c.l.bf16 %v665_v53  ;;  %v539_v53 = vld [vmem:[%s6868_s30 + $0x168] sm:$0xf] }
 0x11b   : > { %918 = vadd.xlane.f32.xlu0 %v754_v62  ;;  %920 = vadd.xlane.f32.xlu1 %v755_v63  ;;  %v774_v62 = vunpack.c.l.bf16 %v646_v58  ;;  %v775_v63 = vunpack.c.l.bf16 %v647_v59  ;;  %v666_v58 = vmul.bf16 %v6897_v11, %v525_v54  ;;  %v792_v59 = vunpack.c.l.bf16 %v664_v52  ;;  %v540_v54 = vld [vmem:[%s6868_s30 + $0x16c] sm:$0xf] }
 0x11d   : > { %v794_v6 = vunpack.c.l.bf16 %v666_v58 }
 0x11f   : > { %922 = vadd.xlane.f32.xlu0 %v756_v7  ;;  %924 = vadd.xlane.f32.xlu1 %v757_v8  ;;  %v776_v7 = vunpack.c.l.bf16 %v648_v2  ;;  %v777_v8 = vunpack.c.l.bf16 %v649_v3  ;;  %v527_v2 = vld [vmem:[%s6868_s30 + $0x138] sm:$0xf]  ;;  %v528_v3 = vld [vmem:[%s6868_s30 + $0x13c] sm:$0xf] }
 0x123   : > { %926 = vadd.xlane.f32.xlu0 %v758_v14  ;;  %928 = vadd.xlane.f32.xlu1 %v759_v15  ;;  %v778_v14 = vunpack.c.l.bf16 %v650_v9  ;;  %v779_v15 = vunpack.c.l.bf16 %v651_v10  ;;  %v669_v9 = vmul.bf16 %v6897_v11, %v528_v3  ;;  %v541_v3 = vld [vmem:[%s6868_s30 + $0x170] sm:$0xf] }
 0x127   : > { %930 = vadd.xlane.f32.xlu0 %v760_v20  ;;  %932 = vadd.xlane.f32.xlu1 %v761_v21  ;;  %v780_v20 = vunpack.c.l.bf16 %v652_v16  ;;  %v781_v21 = vunpack.c.l.bf16 %v653_v17  ;;  %v797_v16 = vunpack.c.l.bf16 %v669_v9  ;;  %v670_v17 = vmul.bf16 %v6897_v11, %v529_v13 }
 0x128   : > { %v683_v9 = vmul.bf16 %v6897_v11, %v542_v5 }
 0x12b   : > { %934 = vadd.xlane.f32.xlu0 %v762_v26  ;;  %936 = vadd.xlane.f32.xlu1 %v763_v27  ;;  %v782_v26 = vunpack.c.l.bf16 %v654_v22  ;;  %v783_v27 = vunpack.c.l.bf16 %v655_v23  ;;  %v532_v22 = vld [vmem:[%s6868_s30 + $0x14c] sm:$0xf]  ;;  %v798_v23 = vunpack.c.l.bf16 %v670_v17 }
 0x12f   : > { %938 = vadd.xlane.f32.xlu0 %v764_v32  ;;  %940 = vadd.xlane.f32.xlu1 %v765_v33  ;;  %v784_v32 = vunpack.c.l.bf16 %v656_v28  ;;  %v785_v33 = vunpack.c.l.bf16 %v657_v29  ;;  %v533_v29 = vld [vmem:[%s6868_s30 + $0x150] sm:$0xf] }
 0x133   : > { %942 = vadd.xlane.f32.xlu0 %v766_v38  ;;  %944 = vadd.xlane.f32.xlu1 %v767_v39  ;;  %v786_v38 = vunpack.c.l.bf16 %v658_v34  ;;  %v787_v39 = vunpack.c.l.bf16 %v659_v35  ;;  %v675_v34 = vmul.bf16 %v6897_v11, %v534_v30 }
 0x137   : > { %946 = vadd.xlane.f32.xlu0 %v768_v44  ;;  %948 = vadd.xlane.f32.xlu1 %v769_v45  ;;  %v788_v44 = vunpack.c.l.bf16 %v660_v40  ;;  %v789_v45 = vunpack.c.l.bf16 %v661_v41  ;;  %v803_v40 = vunpack.c.l.bf16 %v675_v34  ;;  %v676_v41 = vmul.bf16 %v6897_v11, %v535_v37  ;;  %v547_v37 = vld [vmem:[%s6868_s30 + $0x188] sm:$0xf] }
 0x13b   : > { %950 = vadd.xlane.f32.xlu0 %v770_v50  ;;  %952 = vadd.xlane.f32.xlu1 %v771_v51  ;;  %v790_v50 = vunpack.c.l.bf16 %v662_v46  ;;  %v791_v51 = vunpack.c.l.bf16 %v663_v47  ;;  %v538_v46 = vld [vmem:[%s6868_s30 + $0x164] sm:$0xf]  ;;  %v804_v47 = vunpack.c.l.bf16 %v676_v41  ;;  %v688_v41 = vmul.bf16 %v6897_v11, %v547_v37 }
 0x13f   : > { %954 = vadd.xlane.f32.xlu0 %v772_v56  ;;  %956 = vadd.xlane.f32.xlu1 %v773_v57  ;;  %v526_v57 = vld [vmem:[%s6868_s30 + $0x134] sm:$0xf] }
 0x140   : > { %v667_v61 = vmul.bf16 %v6897_v11, %v526_v57 }
 0x143   : > { %958 = vadd.xlane.f32.xlu0 %v774_v62  ;;  %960 = vadd.xlane.f32.xlu1 %v775_v63 }
 0x147   : > { %962 = vadd.xlane.f32.xlu0 %v776_v7  ;;  %964 = vadd.xlane.f32.xlu1 %v777_v8  ;;  %v795_v7 = vunpack.c.l.bf16 %v667_v61  ;;  %v668_v8 = vmul.bf16 %v6897_v11, %v527_v2 }
 0x14b   : > { %966 = vadd.xlane.f32.xlu0 %v778_v14  ;;  %968 = vadd.xlane.f32.xlu1 %v779_v15  ;;  %v530_v14 = vld [vmem:[%s6868_s30 + $0x144] sm:$0xf]  ;;  %v796_v15 = vunpack.c.l.bf16 %v668_v8  ;;  %v682_v8 = vmul.bf16 %v6897_v11, %v541_v3 }
 0x14c   : > { %v671_v18 = vmul.bf16 %v6897_v11, %v530_v14 }
 0x14d   : > { %v810_v17 = vunpack.c.l.bf16 %v682_v8 }
 0x14e   : > { %v799_v24 = vunpack.c.l.bf16 %v671_v18  ;;  %v811_v18 = vunpack.c.l.bf16 %v683_v9 }
 0x14f   : > { %970 = vadd.xlane.f32.xlu0 %v780_v20  ;;  %972 = vadd.xlane.f32.xlu1 %v781_v21  ;;  %v531_v21 = vld [vmem:[%s6868_s30 + $0x148] sm:$0xf] }
 0x150   : > { %v672_v25 = vmul.bf16 %v6897_v11, %v531_v21 }
 0x152   : > { %v800_v31 = vunpack.c.l.bf16 %v672_v25  ;;  %v545_v25 = vld [vmem:[%s6868_s30 + $0x180] sm:$0xf] }
 0x153   : > { %974 = vadd.xlane.f32.xlu0 %v782_v26  ;;  %976 = vadd.xlane.f32.xlu1 %v783_v27  ;;  %v673_v26 = vmul.bf16 %v6897_v11, %v532_v22 }
 0x157   : > { %978 = vadd.xlane.f32.xlu0 %v784_v32  ;;  %980 = vadd.xlane.f32.xlu1 %v785_v33  ;;  %v801_v32 = vunpack.c.l.bf16 %v673_v26  ;;  %v674_v33 = vmul.bf16 %v6897_v11, %v533_v29  ;;  %v546_v26 = vld [vmem:[%s6868_s30 + $0x184] sm:$0xf] }
 0x15b   : > { %982 = vadd.xlane.f32.xlu0 %v786_v38  ;;  %984 = vadd.xlane.f32.xlu1 %v787_v39  ;;  %v536_v38 = vld [vmem:[%s6868_s30 + $0x15c] sm:$0xf]  ;;  %v802_v39 = vunpack.c.l.bf16 %v674_v33 }
 0x15c   : > { %v677_v42 = vmul.bf16 %v6897_v11, %v536_v38  ;;  %v548_v38 = vld [vmem:[%s6868_s30 + $0x18c] sm:$0xf] }
 0x15e   : > { %v805_v48 = vunpack.c.l.bf16 %v677_v42  ;;  %v689_v42 = vmul.bf16 %v6897_v11, %v548_v38 }
 0x15f   : > { %986 = vadd.xlane.f32.xlu0 %v788_v44  ;;  %988 = vadd.xlane.f32.xlu1 %v789_v45  ;;  %v537_v45 = vld [vmem:[%s6868_s30 + $0x160] sm:$0xf] }
 0x160   : > { %v7048_v55 = vpop.xlane.xlu0 %846  ;;  %v7050_v56 = vpop.xlane.xlu1 %850  ;;  %v678_v49 = vmul.bf16 %v6897_v11, %v537_v45 }
 0x162   : > { %v806_v57 = vunpack.c.l.bf16 %v678_v49  ;;  %v816_v49 = vunpack.c.l.bf16 %v688_v41  ;;  %v557_v41 = vld [vmem:[%s6868_s30 + $0x1b0] sm:$0xf] }
 0x163   : > { %990 = vadd.xlane.f32.xlu0 %v790_v50  ;;  %992 = vadd.xlane.f32.xlu1 %v791_v51  ;;  %v679_v50 = vmul.bf16 %v6897_v11, %v538_v46 }
 0x164   : > { %v7055_v62 = vpop.xlane.xlu0 %848  ;;  %v7057_v63 = vpop.xlane.xlu1 %852 }
 0x165   : > { %v807_v58 = vunpack.c.l.bf16 %v679_v50  ;;  %v817_v50 = vunpack.c.l.bf16 %v689_v42  ;;  %v558_v42 = vld [vmem:[%s6868_s30 + $0x1b4] sm:$0xf] }
 0x167   : > { %994 = vadd.xlane.f32.xlu0 %v792_v59  ;;  %996 = vadd.xlane.f32.xlu1 %v793_v60  ;;  %v680_v59 = vmul.bf16 %v6897_v11, %v539_v53  ;;  %v681_v60 = vmul.bf16 %v6897_v11, %v540_v54 }
 0x168   : > { %v7063_v10 = vpop.xlane.xlu0 %854  ;;  %v7065_v12 = vpop.xlane.xlu1 %856 }
 0x16b   : > { %998 = vadd.xlane.f32.xlu0 %v794_v6  ;;  %1000 = vadd.xlane.f32.xlu1 %v795_v7  ;;  %v808_v6 = vunpack.c.l.bf16 %v680_v59  ;;  %v809_v7 = vunpack.c.l.bf16 %v681_v60  ;;  %v551_v59 = vld [vmem:[%s6868_s30 + $0x198] sm:$0xf]  ;;  %v552_v60 = vld [vmem:[%s6868_s30 + $0x19c] sm:$0xf] }
 0x16c   : > { %v7071_v19 = vpop.xlane.xlu0 %858  ;;  %v7073_v20 = vpop.xlane.xlu1 %860 }
 0x16f   : > { %1002 = vadd.xlane.f32.xlu0 %v796_v15  ;;  %1004 = vadd.xlane.f32.xlu1 %v797_v16  ;;  %v543_v15 = vld [vmem:[%s6868_s30 + $0x178] sm:$0xf]  ;;  %v544_v16 = vld [vmem:[%s6868_s30 + $0x17c] sm:$0xf] }
 0x170   : > { %v7079_v27 = vpop.xlane.xlu0 %862  ;;  %v7081_v28 = vpop.xlane.xlu1 %864  ;;  %v684_v21 = vmul.bf16 %v6897_v11, %v543_v15  ;;  %v685_v22 = vmul.bf16 %v6897_v11, %v544_v16  ;;  %v553_v15 = vld [vmem:[%s6868_s30 + $0x1a0] sm:$0xf]  ;;  %v554_v16 = vld [vmem:[%s6868_s30 + $0x1a4] sm:$0xf] }
 0x172   : > { %v812_v29 = vunpack.c.l.bf16 %v684_v21  ;;  %v813_v30 = vunpack.c.l.bf16 %v685_v22  ;;  %v694_v21 = vmul.bf16 %v6897_v11, %v553_v15  ;;  %v695_v22 = vmul.bf16 %v6897_v11, %v554_v16 }
 0x173   : > { %1006 = vadd.xlane.f32.xlu0 %v798_v23  ;;  %1008 = vadd.xlane.f32.xlu1 %v799_v24 }
 0x174   : > { %v7087_v35 = vpop.xlane.xlu0 %866  ;;  %v7089_v36 = vpop.xlane.xlu1 %868 }
 0x177   : > { %1010 = vadd.xlane.f32.xlu0 %v800_v31  ;;  %1012 = vadd.xlane.f32.xlu1 %v801_v32  ;;  %v686_v31 = vmul.bf16 %v6897_v11, %v545_v25  ;;  %v687_v32 = vmul.bf16 %v6897_v11, %v546_v26 }
 0x178   : > { %v7095_v43 = vpop.xlane.xlu0 %870  ;;  %v7097_v44 = vpop.xlane.xlu1 %872 }
 0x17b   : > { %1014 = vadd.xlane.f32.xlu0 %v802_v39  ;;  %1016 = vadd.xlane.f32.xlu1 %v803_v40  ;;  %v814_v39 = vunpack.c.l.bf16 %v686_v31  ;;  %v815_v40 = vunpack.c.l.bf16 %v687_v32  ;;  %v822_v31 = vunpack.c.l.bf16 %v694_v21  ;;  %v823_v32 = vunpack.c.l.bf16 %v695_v22 }
 0x17c   : > { %v7103_v51 = vpop.xlane.xlu0 %874  ;;  %v7105_v52 = vpop.xlane.xlu1 %876 }
 0x17f   : > { %1018 = vadd.xlane.f32.xlu0 %v804_v47  ;;  %1020 = vadd.xlane.f32.xlu1 %v805_v48  ;;  %v549_v47 = vld [vmem:[%s6868_s30 + $0x190] sm:$0xf]  ;;  %v550_v48 = vld [vmem:[%s6868_s30 + $0x194] sm:$0xf] }
 0x180   : > { %v7111_v61 = vpop.xlane.xlu0 %878  ;;  %v7113_v2 = vpop.xlane.xlu1 %880  ;;  %v690_v53 = vmul.bf16 %v6897_v11, %v549_v47  ;;  %v691_v54 = vmul.bf16 %v6897_v11, %v550_v48 }
 0x182   : > { %v818_v3 = vunpack.c.l.bf16 %v690_v53  ;;  %v819_v5 = vunpack.c.l.bf16 %v691_v54 }
 0x183   : > { %1022 = vadd.xlane.f32.xlu0 %v806_v57  ;;  %1024 = vadd.xlane.f32.xlu1 %v807_v58 }
 0x184   : > { %v7119_v13 = vpop.xlane.xlu0 %882  ;;  %v7121_v14 = vpop.xlane.xlu1 %884 }
 0x187   : > { %1026 = vadd.xlane.f32.xlu0 %v808_v6  ;;  %1028 = vadd.xlane.f32.xlu1 %v809_v7  ;;  %v692_v6 = vmul.bf16 %v6897_v11, %v551_v59  ;;  %v693_v7 = vmul.bf16 %v6897_v11, %v552_v60  ;;  %v559_v59 = vld [vmem:[%s6868_s30 + $0x1b8] sm:$0xf]  ;;  %v560_v60 = vld [vmem:[%s6868_s30 + $0x1bc] sm:$0xf] }
 0x188   : > { %v7127_v23 = vpop.xlane.xlu0 %886  ;;  %v7129_v24 = vpop.xlane.xlu1 %888 }
 0x18b   : > { %1030 = vadd.xlane.f32.xlu0 %v810_v17  ;;  %1032 = vadd.xlane.f32.xlu1 %v811_v18  ;;  %v820_v17 = vunpack.c.l.bf16 %v692_v6  ;;  %v821_v18 = vunpack.c.l.bf16 %v693_v7  ;;  %v700_v6 = vmul.bf16 %v6897_v11, %v559_v59  ;;  %v701_v7 = vmul.bf16 %v6897_v11, %v560_v60  ;;  %v565_v59 = vld [vmem:[%s6868_s30 + $0x1d0] sm:$0xf]  ;;  %v566_v60 = vld [vmem:[%s6868_s30 + $0x1d4] sm:$0xf] }
 0x18c   : > { %v7135_v33 = vpop.xlane.xlu0 %890  ;;  %v7137_v34 = vpop.xlane.xlu1 %892 }
 0x18d   : > { %v828_v21 = vunpack.c.l.bf16 %v700_v6  ;;  %v829_v22 = vunpack.c.l.bf16 %v701_v7  ;;  %v706_v6 = vmul.bf16 %v6897_v11, %v565_v59  ;;  %v707_v7 = vmul.bf16 %v6897_v11, %v566_v60 }
 0x18f   : > { %1034 = vadd.xlane.f32.xlu0 %v812_v29  ;;  %1036 = vadd.xlane.f32.xlu1 %v813_v30  ;;  %v555_v29 = vld [vmem:[%s6868_s30 + $0x1a8] sm:$0xf]  ;;  %v556_v30 = vld [vmem:[%s6868_s30 + $0x1ac] sm:$0xf] }
 0x190   : > { %v7143_v45 = vpop.xlane.xlu0 %894  ;;  %v7145_v46 = vpop.xlane.xlu1 %896  ;;  %v696_v37 = vmul.bf16 %v6897_v11, %v555_v29  ;;  %v697_v38 = vmul.bf16 %v6897_v11, %v556_v30 }
 0x192   : > { %v824_v47 = vunpack.c.l.bf16 %v696_v37  ;;  %v825_v48 = vunpack.c.l.bf16 %v697_v38  ;;  %v563_v37 = vld [vmem:[%s6868_s30 + $0x1c8] sm:$0xf]  ;;  %v564_v38 = vld [vmem:[%s6868_s30 + $0x1cc] sm:$0xf] }
 0x193   : > { %1038 = vadd.xlane.f32.xlu0 %v814_v39  ;;  %1040 = vadd.xlane.f32.xlu1 %v815_v40 }
 0x194   : > { %v7151_v57 = vpop.xlane.xlu0 %898  ;;  %v7153_v58 = vpop.xlane.xlu1 %900 }
 0x197   : > { %1042 = vadd.xlane.f32.xlu0 %v816_v49  ;;  %1044 = vadd.xlane.f32.xlu1 %v817_v50  ;;  %v698_v49 = vmul.bf16 %v6897_v11, %v557_v41  ;;  %v699_v50 = vmul.bf16 %v6897_v11, %v558_v42 }
 0x198   : > { %v7159_v8 = vpop.xlane.xlu0 %902  ;;  %v7161_v9 = vpop.xlane.xlu1 %904 }
 0x19b   : > { %1046 = vadd.xlane.f32.xlu0 %v818_v3  ;;  %1048 = vadd.xlane.f32.xlu1 %v819_v5  ;;  %v826_v3 = vunpack.c.l.bf16 %v698_v49  ;;  %v827_v5 = vunpack.c.l.bf16 %v699_v50 }
 0x19c   : > { %v7167_v25 = vpop.xlane.xlu0 %906  ;;  %v7169_v26 = vpop.xlane.xlu1 %908 }
 0x19f   : > { %1050 = vadd.xlane.f32.xlu0 %v820_v17  ;;  %1052 = vadd.xlane.f32.xlu1 %v821_v18  ;;  %v561_v17 = vld [vmem:[%s6868_s30 + $0x1c0] sm:$0xf]  ;;  %v562_v18 = vld [vmem:[%s6868_s30 + $0x1c4] sm:$0xf] }
 0x1a0   : > { %v7175_v39 = vpop.xlane.xlu0 %910  ;;  %v7177_v40 = vpop.xlane.xlu1 %912  ;;  %v702_v29 = vmul.bf16 %v6897_v11, %v561_v17  ;;  %v703_v30 = vmul.bf16 %v6897_v11, %v562_v18 }
 0x1a2   : > { %v830_v41 = vunpack.c.l.bf16 %v702_v29  ;;  %v831_v42 = vunpack.c.l.bf16 %v703_v30  ;;  %v834_v29 = vunpack.c.l.bf16 %v706_v6  ;;  %v835_v30 = vunpack.c.l.bf16 %v707_v7 }
 0x1a3   : > { %1054 = vadd.xlane.f32.xlu0 %v822_v31  ;;  %1056 = vadd.xlane.f32.xlu1 %v823_v32 }
 0x1a4   : > { %v7183_v53 = vpop.xlane.xlu0 %914  ;;  %v7185_v54 = vpop.xlane.xlu1 %916 }
 0x1a7   : > { %1058 = vadd.xlane.f32.xlu0 %v824_v47  ;;  %1060 = vadd.xlane.f32.xlu1 %v825_v48  ;;  %v704_v47 = vmul.bf16 %v6897_v11, %v563_v37  ;;  %v705_v48 = vmul.bf16 %v6897_v11, %v564_v38 }
 0x1a8   : > { %v7191_v15 = vpop.xlane.xlu0 %918  ;;  %v7193_v16 = vpop.xlane.xlu1 %920 }
 0x1ab   : > { %1062 = vadd.xlane.f32.xlu0 %v826_v3  ;;  %1064 = vadd.xlane.f32.xlu1 %v827_v5  ;;  %v832_v3 = vunpack.c.l.bf16 %v704_v47  ;;  %v833_v5 = vunpack.c.l.bf16 %v705_v48  ;;  %v569_v47 = vld [vmem:[%s6868_s30 + $0x1e0] sm:$0xf]  ;;  %v570_v48 = vld [vmem:[%s6868_s30 + $0x1e4] sm:$0xf] }
 0x1ac   : > { %v7199_v31 = vpop.xlane.xlu0 %922  ;;  %v7201_v32 = vpop.xlane.xlu1 %924 }
 0x1af   : > { %1066 = vadd.xlane.f32.xlu0 %v828_v21  ;;  %1068 = vadd.xlane.f32.xlu1 %v829_v22  ;;  %v567_v21 = vld [vmem:[%s6868_s30 + $0x1d8] sm:$0xf]  ;;  %v568_v22 = vld [vmem:[%s6868_s30 + $0x1dc] sm:$0xf] }
 0x1b0   : > { %v7207_v49 = vpop.xlane.xlu0 %926  ;;  %v7209_v50 = vpop.xlane.xlu1 %928  ;;  %v708_v37 = vmul.bf16 %v6897_v11, %v567_v21  ;;  %v709_v38 = vmul.bf16 %v6897_v11, %v568_v22  ;;  %v571_v21 = vld [vmem:[%s6868_s30 + $0x1e8] sm:$0xf]  ;;  %v572_v22 = vld [vmem:[%s6868_s30 + $0x1ec] sm:$0xf] }
 0x1b2   : > { %v836_v59 = vunpack.c.l.bf16 %v708_v37  ;;  %v837_v60 = vunpack.c.l.bf16 %v709_v38  ;;  %v713_v37 = vmul.bf16 %v6897_v11, %v572_v22  ;;  %v576_v22 = vld [vmem:[%s6868_s30 + $0x1fc] sm:$0xf] }
 0x1b3   : > { %1070 = vadd.xlane.f32.xlu0 %v830_v41  ;;  %1072 = vadd.xlane.f32.xlu1 %v831_v42 }
 0x1b4   : > { %v7215_v17 = vpop.xlane.xlu0 %930  ;;  %v7217_v18 = vpop.xlane.xlu1 %932 }
 0x1b5   : > { %11309 = vst [vmem:[#allocation18_spill] sm:$0xff] %v7217_v18 }
 0x1b7   : > { %1074 = vadd.xlane.f32.xlu0 %v832_v3  ;;  %1076 = vadd.xlane.f32.xlu1 %v833_v5  ;;  %v710_v3 = vmul.bf16 %v6897_v11, %v569_v47  ;;  %v711_v5 = vmul.bf16 %v6897_v11, %v570_v48  ;;  %v573_v48 = vld [vmem:[%s6868_s30 + $0x1f0] sm:$0xf] }
 0x1b8   : > { %v7223_v41 = vpop.xlane.xlu0 %934  ;;  %v7225_v42 = vpop.xlane.xlu1 %936 }
 0x1b9   : > { %11310 = vst [vmem:[#allocation19_spill] sm:$0xff] %v7223_v41  ;;  %11311 = vst [vmem:[#allocation20_spill] sm:$0xff] %v7225_v42  ;;  %v838_v0 = vunpack.c.l.bf16 %v710_v3  ;;  %v841_v42 = vunpack.c.l.bf16 %v713_v37 }
 0x1bb   : > { %1078 = vadd.xlane.f32.xlu0 %v834_v29  ;;  %1080 = vadd.xlane.f32.xlu1 %v835_v30  ;;  %v839_v29 = vunpack.c.l.bf16 %v711_v5  ;;  %v712_v30 = vmul.bf16 %v6897_v11, %v571_v21  ;;  %v575_v21 = vld [vmem:[%s6868_s30 + $0x1f8] sm:$0xf] }
 0x1bc   : > { %v7231_v6 = vpop.xlane.xlu0 %938  ;;  %v7233_v7 = vpop.xlane.xlu1 %940  ;;  %v716_v41 = vmul.bf16 %v6897_v11, %v575_v21  ;;  %v1366_v21 = vld [vmem:[%s397_s24] sm:$0xff] }
 0x1bd   : > { %11312 = vst [vmem:[#allocation21_spill] sm:$0xff] %v7231_v6  ;;  %11313 = vst [vmem:[#allocation22_spill] sm:$0xff] %v7233_v7  ;;  %v574_v6 = vld [vmem:[%s6868_s30 + $0x1f4] sm:$0xf]  ;;  %v840_v7 = vunpack.c.l.bf16 %v712_v30  ;;  %s6472_s30 = scalar_lea.vmem %s10968_s18, 128 }
 0x1be   : > { %p6473_p3 = scmp.ne.s32.totalorder %s10968_s18, %s6472_s30 }
 0x1bf   : > { %1082 = vadd.xlane.f32.xlu0 %v836_v59  ;;  %1084 = vadd.xlane.f32.xlu1 %v837_v60  ;;  %v714_v59 = vmul.bf16 %v6897_v11, %v573_v48  ;;  %v715_v60 = vmul.bf16 %v6897_v11, %v574_v6  ;;  %v844_v6 = vunpack.c.l.bf16 %v716_v41 }
 0x1c0   : > { %v7239_v38 = vpop.xlane.xlu0 %942  ;;  %v7241_v47 = vpop.xlane.xlu1 %944  ;;  %p6474_p5 = pnand %p6473_p3, %p12738_p7 }
 0x1c1   : > { %11314 = vst [vmem:[#allocation23_spill] sm:$0xff] %v7239_v38  ;;  %11315 = vst [vmem:[#allocation24_spill] sm:$0xff] %v7241_v47  ;;  %v842_v38 = vunpack.c.l.bf16 %v714_v59  ;;  %v843_v47 = vunpack.c.l.bf16 %v715_v60 }
 0x1c2   : > { %p6475_p11 = pneg %p6474_p5 }
 0x1c3   : > { %1086 = vadd.xlane.f32.xlu0 %v838_v0  ;;  %1088 = vadd.xlane.f32.xlu1 %v839_v29  ;;  %v717_v0 = vmul.bf16 %v6897_v11, %v576_v22 }
 0x1c4   : > { %v7247_v3 = vpop.xlane.xlu0 %946  ;;  %v7249_v5 = vpop.xlane.xlu1 %948 }
 0x1c5   : > { %11316 = vst [vmem:[#allocation25_spill] sm:$0xff] %v7247_v3  ;;  %11317 = vst [vmem:[#allocation26_spill] sm:$0xff] %v7249_v5  ;;  %v845_v37 = vunpack.c.l.bf16 %v717_v0 }
 0x1c7   : > { %1090 = vadd.xlane.f32.xlu0 %v840_v7  ;;  %1092 = vadd.xlane.f32.xlu1 %v841_v42 }
 0x1c8   : > { %v7255_v29 = vpop.xlane.xlu0 %950  ;;  %v7257_v30 = vpop.xlane.xlu1 %952 }
 0x1c9   : > { %11318 = vst [vmem:[#allocation27_spill] sm:$0xff] %v7255_v29  ;;  %11319 = vst [vmem:[#allocation28_spill] sm:$0xff] %v7257_v30 }
 0x1cb   : > { %1094 = vadd.xlane.f32.xlu0 %v842_v38  ;;  %1096 = vadd.xlane.f32.xlu1 %v843_v47 }
 0x1cc   : > { %v7259_v48 = vpop.xlane.xlu0 %954  ;;  %v7261_v5 = vpop.xlane.xlu1 %956 }
 0x1cd   : > { %11320 = vst [vmem:[#allocation29_spill] sm:$0xff] %v7259_v48  ;;  %11321 = vst [vmem:[#allocation30_spill] sm:$0xff] %v7261_v5 }
 0x1cf   : > { %1098 = vadd.xlane.f32.xlu0 %v844_v6  ;;  %1100 = vadd.xlane.f32.xlu1 %v845_v37  ;;  %v1362_v6 = vld [vmem:[%s388_s12] sm:$0xff] }
 0x1d0   : > { %v7263_v42 = vpop.xlane.xlu0 %958  ;;  %v7265_v7 = vpop.xlane.xlu1 %960 }
 0x1d1   : > { %11322 = vst [vmem:[#allocation31_spill] sm:$0xff] %v7263_v42  ;;  %11323 = vst [vmem:[#allocation32_spill] sm:$0xff] %v7265_v7 }
 0x1d4   : > { %v7267_v11 = vpop.xlane.xlu0 %962  ;;  %v7269_v59 = vpop.xlane.xlu1 %964 }
 0x1d5   : > { %11324 = vst [vmem:[#allocation33_spill] sm:$0xff] %v7267_v11  ;;  %11325 = vst [vmem:[#allocation34_spill] sm:$0xff] %v7269_v59 }
 0x1d8   : > { %v7271_v38 = vpop.xlane.xlu0 %966  ;;  %v7273_v47 = vpop.xlane.xlu1 %968 }
 0x1d9   : > { %11326 = vst [vmem:[#allocation35_spill] sm:$0xff] %v7271_v38  ;;  %11327 = vst [vmem:[#allocation36_spill] sm:$0xff] %v7273_v47 }
 0x1dc   : > { %v7275_v41 = vpop.xlane.xlu0 %970  ;;  %v7277_v60 = vpop.xlane.xlu1 %972 }
 0x1dd   : > { %11328 = vst [vmem:[#allocation37_spill] sm:$0xff] %v7275_v41  ;;  %11329 = vst [vmem:[#allocation38_spill] sm:$0xff] %v7277_v60 }
 0x1e0   : > { %v7280_v22 = vpop.xlane.xlu0 %974  ;;  %v7282_v0 = vpop.xlane.xlu1 %976  ;;  %1368 = vperm.xlu1 %5779, %v1366_v21  }
 0x1e1   : > { %11330 = vst [vmem:[#allocation39_spill] sm:$0xff] %v7280_v22  ;;  %11331 = vst [vmem:[#allocation40_spill] sm:$0xff] %v7282_v0 }
 0x1e4   : > { %v7285_v37 = vpop.xlane.xlu0 %978  ;;  %v7287_v59 = vpop.xlane.xlu1 %980 }
 0x1e5   : > { %11332 = vst [vmem:[#allocation41_spill] sm:$0xff] %v7285_v37  ;;  %11333 = vst [vmem:[#allocation42_spill] sm:$0xff] %v7287_v59  ;;  %1364 = vperm.xlu0 %5778, %v1362_v6  }
 0x1e8   : > { %v7289_v38 = vpop.xlane.xlu0 %982  ;;  %v7291_v47 = vpop.xlane.xlu1 %984 }
 0x1e9   : > { %11334 = vst [vmem:[#allocation43_spill] sm:$0xff] %v7289_v38  ;;  %11335 = vst [vmem:[#allocation44_spill] sm:$0xff] %v7291_v47 }
 0x1ec   : > { %v7293_v41 = vpop.xlane.xlu0 %986  ;;  %v7295_v60 = vpop.xlane.xlu1 %988 }
 0x1ed   : > { %11336 = vst [vmem:[#allocation45_spill] sm:$0xff] %v7293_v41  ;;  %11337 = vst [vmem:[#allocation46_spill] sm:$0xff] %v7295_v60 }
 0x1f0   : > { %v7297_v11 = vpop.xlane.xlu0 %990  ;;  %v7299_v22 = vpop.xlane.xlu1 %992 }
 0x1f1   : > { %11338 = vst [vmem:[#allocation47_spill] sm:$0xff] %v7297_v11  ;;  %11339 = vst [vmem:[#allocation48_spill] sm:$0xff] %v7299_v22 }
 0x1f4   : > { %v7301_v21 = vpop.xlane.xlu0 %994  ;;  %v7303_v0 = vpop.xlane.xlu1 %996 }
 0x1f5   : > { %11340 = vst [vmem:[#allocation49_spill] sm:$0xff] %v7301_v21  ;;  %11341 = vst [vmem:[#allocation50_spill] sm:$0xff] %v7303_v0 }
 0x1f8   : > { %v7305_v37 = vpop.xlane.xlu0 %998  ;;  %v7307_v59 = vpop.xlane.xlu1 %1000 }
 0x1f9   : > { %11342 = vst [vmem:[#allocation51_spill] sm:$0xff] %v7305_v37  ;;  %11343 = vst [vmem:[#allocation52_spill] sm:$0xff] %v7307_v59 }
 0x1fc   : > { %v7309_v6 = vpop.xlane.xlu0 %1002  ;;  %v7311_v38 = vpop.xlane.xlu1 %1004 }
 0x1fd   : > { %11344 = vst [vmem:[#allocation53_spill] sm:$0xff] %v7309_v6  ;;  %11345 = vst [vmem:[#allocation54_spill] sm:$0xff] %v7311_v38 }
 0x200   : > { %v7313_v47 = vpop.xlane.xlu0 %1006  ;;  %v7315_v41 = vpop.xlane.xlu1 %1008 }
 0x201   : > { %11346 = vst [vmem:[#allocation55_spill] sm:$0xff] %v7313_v47  ;;  %11347 = vst [vmem:[#allocation56_spill] sm:$0xff] %v7315_v41 }
 0x204   : > { %v7317_v60 = vpop.xlane.xlu0 %1010  ;;  %v7319_v11 = vpop.xlane.xlu1 %1012 }
 0x205   : > { %11348 = vst [vmem:[#allocation57_spill] sm:$0xff] %v7317_v60  ;;  %11349 = vst [vmem:[#allocation58_spill] sm:$0xff] %v7319_v11 }
 0x208   : > { %v7321_v22 = vpop.xlane.xlu0 %1014  ;;  %v7323_v21 = vpop.xlane.xlu1 %1016 }
 0x209   : > { %11350 = vst [vmem:[#allocation59_spill] sm:$0xff] %v7321_v22  ;;  %11351 = vst [vmem:[#allocation60_spill] sm:$0xff] %v7323_v21 }
 0x20c   : > { %v7325_v0 = vpop.xlane.xlu0 %1018  ;;  %v7327_v37 = vpop.xlane.xlu1 %1020 }
 0x20d   : > { %11352 = vst [vmem:[#allocation61_spill] sm:$0xff] %v7325_v0  ;;  %11353 = vst [vmem:[#allocation62_spill] sm:$0xff] %v7327_v37 }
 0x210   : > { %v7329_v59 = vpop.xlane.xlu0 %1022  ;;  %v7331_v6 = vpop.xlane.xlu1 %1024 }
 0x211   : > { %11354 = vst [vmem:[#allocation63_spill] sm:$0xff] %v7329_v59  ;;  %11355 = vst [vmem:[#allocation64_spill] sm:$0xff] %v7331_v6 }
 0x214   : > { %v7333_v38 = vpop.xlane.xlu0 %1026  ;;  %v7335_v47 = vpop.xlane.xlu1 %1028 }
 0x215   : > { %11356 = vst [vmem:[#allocation65_spill] sm:$0xff] %v7333_v38  ;;  %11357 = vst [vmem:[#allocation66_spill] sm:$0xff] %v7335_v47 }
 0x218   : > { %v7337_v41 = vpop.xlane.xlu0 %1030  ;;  %v7339_v60 = vpop.xlane.xlu1 %1032 }
 0x219   : > { %11358 = vst [vmem:[#allocation67_spill] sm:$0xff] %v7337_v41  ;;  %11359 = vst [vmem:[#allocation68_spill] sm:$0xff] %v7339_v60 }
 0x21c   : > { %v7341_v11 = vpop.xlane.xlu0 %1034  ;;  %v7343_v22 = vpop.xlane.xlu1 %1036 }
 0x21d   : > { %11360 = vst [vmem:[#allocation69_spill] sm:$0xff] %v7341_v11  ;;  %11361 = vst [vmem:[#allocation70_spill] sm:$0xff] %v7343_v22 }
 0x220   : > { %v7345_v21 = vpop.xlane.xlu0 %1038  ;;  %v7347_v0 = vpop.xlane.xlu1 %1040 }
 0x221   : > { %11362 = vst [vmem:[#allocation71_spill] sm:$0xff] %v7345_v21  ;;  %11363 = vst [vmem:[#allocation72_spill] sm:$0xff] %v7347_v0 }
 0x224   : > { %v7349_v37 = vpop.xlane.xlu0 %1042  ;;  %v7351_v59 = vpop.xlane.xlu1 %1044 }
 0x225   : > { %11364 = vst [vmem:[#allocation73_spill] sm:$0xff] %v7349_v37  ;;  %11365 = vst [vmem:[#allocation74_spill] sm:$0xff] %v7351_v59 }
 0x228   : > { %v7353_v6 = vpop.xlane.xlu0 %1046  ;;  %v7355_v38 = vpop.xlane.xlu1 %1048 }
 0x229   : > { %11366 = vst [vmem:[#allocation75_spill] sm:$0xff] %v7353_v6  ;;  %11367 = vst [vmem:[#allocation76_spill] sm:$0xff] %v7355_v38 }
 0x22c   : > { %v7357_v47 = vpop.xlane.xlu0 %1050  ;;  %v7359_v41 = vpop.xlane.xlu1 %1052 }
 0x22d   : > { %11368 = vst [vmem:[#allocation77_spill] sm:$0xff] %v7357_v47  ;;  %11369 = vst [vmem:[#allocation78_spill] sm:$0xff] %v7359_v41 }
 0x230   : > { %v7361_v60 = vpop.xlane.xlu0 %1054  ;;  %v7363_v11 = vpop.xlane.xlu1 %1056 }
 0x231   : > { %11370 = vst [vmem:[#allocation79_spill] sm:$0xff] %v7361_v60  ;;  %11371 = vst [vmem:[#allocation80_spill] sm:$0xff] %v7363_v11 }
 0x234   : > { %v7365_v22 = vpop.xlane.xlu0 %1058  ;;  %v7367_v21 = vpop.xlane.xlu1 %1060 }
 0x235   : > { %11372 = vst [vmem:[#allocation81_spill] sm:$0xff] %v7365_v22  ;;  %11373 = vst [vmem:[#allocation82_spill] sm:$0xff] %v7367_v21 }
 0x238   : > { %v7369_v0 = vpop.xlane.xlu0 %1062  ;;  %v7371_v37 = vpop.xlane.xlu1 %1064 }
 0x239   : > { %11374 = vst [vmem:[#allocation83_spill] sm:$0xff] %v7369_v0  ;;  %11375 = vst [vmem:[#allocation84_spill] sm:$0xff] %v7371_v37 }
 0x23c   : > { %v7373_v59 = vpop.xlane.xlu0 %1066  ;;  %v7375_v6 = vpop.xlane.xlu1 %1068 }
 0x23d   : > { %11376 = vst [vmem:[#allocation85_spill] sm:$0xff] %v7373_v59  ;;  %11377 = vst [vmem:[#allocation86_spill] sm:$0xff] %v7375_v6 }
 0x240   : > { %v7377_v38 = vpop.xlane.xlu0 %1070  ;;  %v7379_v41 = vpop.xlane.xlu1 %1072 }
 0x241   : > { %11378 = vst [vmem:[#allocation87_spill] sm:$0xff] %v7377_v38  ;;  %11379 = vst [vmem:[#allocation88_spill] sm:$0xff] %v7379_v41 }
 0x244   : > { %v7381_v60 = vpop.xlane.xlu0 %1074  ;;  %v7383_v11 = vpop.xlane.xlu1 %1076 }
 0x245   : > { %11380 = vst [vmem:[#allocation89_spill] sm:$0xff] %v7381_v60  ;;  %11381 = vst [vmem:[#allocation90_spill] sm:$0xff] %v7383_v11 }
 0x248   : > { %v7385_v22 = vpop.xlane.xlu0 %1078  ;;  %v7387_v21 = vpop.xlane.xlu1 %1080 }
 0x249   : > { %11382 = vst [vmem:[#allocation91_spill] sm:$0xff] %v7385_v22  ;;  %11383 = vst [vmem:[#allocation92_spill] sm:$0xff] %v7387_v21  ;;  %v11393_v21 = vlaneseq }
 0x24b   : > { %v7408_v47 = vand.u32 127, %v11393_v21  ;;  %v6557_v21 = vmov 0.0  }
 0x24c   : > { %v7389_v0 = vpop.xlane.xlu0 %1082  ;;  %v7391_v37 = vpop.xlane.xlu1 %1084 }
 0x24d   : > { %11384 = vst [vmem:[#allocation93_spill] sm:$0xff] %v7389_v0  ;;  %11385 = vst [vmem:[#allocation94_spill] sm:$0xff] %v7391_v37  ;;  %v1360_v0 = vld [vmem:[%s370_s16] sm:$0xff]  ;;  %vm11287_vm3 = vcmp.eq.s32.totalorder %v7408_v47, 0  ;;  %s6476_s16 = sshll.u32 %s6558_s25, 4  ;;  %s6477_s16 = int_to_ptr.vmem [resolvable:$false] %s6476_s16 }
 0x24e   : > { %11394 = vst [vmem:[#allocation102_spill] sm:$0xff] %v7408_v47  ;;  %vm1379_vm0 = vcmp.eq.s32.totalorder %v1360_v0, 101  ;;  %vm1380_vm1 = vcmp.eq.s32.totalorder %v1360_v0, 102  ;;  %s6478_s24 = scalar_lea.vmem %s6477_s16, 256  ;;  %p6479_p1 = scmp.lt.s32.totalorder %s10968_s18, %s6477_s16 }
 0x24f   : > { %vm1381_vm4 = vmor %vm1379_vm0, %vm1380_vm1  ;;  %vm4817_vm0 = vcmask 392512   ;;  %vm4824_vm1 = vcmask 458112   ;;  %p6480_p9 = scmp.lt.s32.totalorder %s6478_s24, %s6472_s30 }
 0x250   : > { %v7393_v59 = vpop.xlane.xlu0 %1086  ;;  %v7395_v6 = vpop.xlane.xlu1 %1088 }
 0x251   : > { %11386 = vst [vmem:[#allocation95_spill] sm:$0xff] %v7393_v59  ;;  %11387 = vst [vmem:[#allocation96_spill] sm:$0xff] %v7395_v6  ;;  %p6481_p12 = por %p6480_p9, %p6479_p1 }
 0x253   : > { %p6482_p0 = pnand %p6481_p12, %p6475_p11 }
 0x254   : > { %v7397_v38 = vpop.xlane.xlu0 %1090  ;;  %v7399_v41 = vpop.xlane.xlu1 %1092 }
 0x255   : > { %11388 = vst [vmem:[#allocation97_spill] sm:$0xff] %v7397_v38  ;;  %11389 = vst [vmem:[#allocation98_spill] sm:$0xff] %v7399_v41  ;;  %v7416_v41 = vld [vmem:[%s379_s23] sm:$0xff] }
 0x256   : > { %vm1383_vm7 = vcmp.le.f32.partialorder %v7416_v41, 0.0  ;;  %vm1389_vm8 = vcmp.gt.f32.partialorder %v7416_v41, 0.0 }
 0x258   : > { %v7401_v60 = vpop.xlane.xlu1 %1096  ;;  %v7403_v11 = vpop.xlane.xlu0 %1094 }
 0x259   : > { %11390 = vst [vmem:[#allocation99_spill] sm:$0xff] %v7401_v60  ;;  %11391 = vst [vmem:[#allocation100_spill] sm:$0xff] %v7403_v11 }
 0x25c   : > { %v7405_v22 = vpop.xlane.xlu1 %1100  ;;  %v7412_v37 = vpop.xlane.xlu0 %1098 }
 0x25d   : > { %11392 = vst [vmem:[#allocation101_spill] sm:$0xff] %v7405_v22  ;;  %11395 = vst [vmem:[#allocation103_spill] sm:$0xff] %v7412_v37 }
 0x260   : > { %v1369_v59 = vpop.permute.xlu1 %1368 }
 0x261   : > { %vm1373_vm2 = vcmp.le.s32.totalorder %v7408_v47, %v1369_v59 }
 0x264   : > { %v1365_v60 = vpop.permute.xlu0 %1364 }
 0x265   : > { %vm1372_vm5 = vcmp.le.s32.totalorder %v1365_v60, %v7408_v47 }
 0x266   : > { %vm1374_vm6 = vmand %vm1372_vm5, %vm1373_vm2  ;;  %vm4831_vm2 = vcmask 523712   ;;  %vm4845_vm5 = vcmask 654912  }
 0x267   : > { %v5685_v22 = vsel %vm1374_vm6, 1.0, %v6557_v21  ;;  %vm4852_vm6 = vcmask 720512  }
 0x268   : > { %v1378_v37 = vsel %vm11287_vm3, 0.0, %v5685_v22  ;;  %v11029_v22 = vsub.s32 1, %v6887_v1  ;;  %vm5442_vm3 = vcmask 1041409  }
 0x269   : > { %v1382_v0 = vsel %vm1381_vm4, 0.0, %v1378_v37  ;;  %vm4838_vm4 = vcmask 589312  }
 0x26a   : > { %v7423_v11 = vsel %vm1383_vm7, 0.0, %v1382_v0  ;;  %vm11288_vm7 = vcmask 786112  }
 0x26b   : > { %1385 = vadd.xlane.f32.xlu1 %v7423_v11  ;;  %vm1388_vm9 = vcmp.eq.f32.partialorder %v7423_v11, 0.0  ;;  %v1531_v60 = vrot.slane %v7423_v11, %v6890_v4  ;;  %v1598_v37 = vrot.slane %v7423_v11, %v11029_v22  ;;  %vm3472_vm11 = vcmp.le.f32.partialorder %v7423_v11, 0.0 }
 0x26c   : > { %vm1390_vm10 = vmand %vm1388_vm9, %vm1389_vm8  ;;  %vm11289_vm8 = vcmask 851712   ;;  %vm4873_vm9 = vcmask 917312  }
 0x26d   : > { %v5686_v59 = vsel %vm1390_vm10, 1.0, %v6557_v21  ;;  %v11028_v21 = vsub.s32 2, %v6887_v1  ;;  %vm4880_vm10 = vcmask 982912  }
 0x26e   : > { %1393 = vadd.xlane.f32.xlu0 %v5686_v59  ;;  %v11027_v59 = vsub.s32 3, %v6887_v1 }
 0x26f   : > { %v1665_v0 = vrot.slane %v7423_v11, %v11028_v21 }
 0x27c   : > { %1533 = vbcast.lane.b32.xlu1 %v1531_v60, 256 }
 0x280   : > { %1537 = vbcast.lane.b32.xlu1 %v1531_v60, 264 }
 0x284   : > { %1541 = vbcast.lane.b32.xlu1 %v1531_v60, 272  ;;  %1545 = vbcast.lane.b32.xlu0 %v1531_v60, 280 }
 0x288   : > { %1549 = vbcast.lane.b32.xlu1 %v1531_v60, 288  ;;  %1569 = vbcast.lane.b32.xlu0 %v1531_v60, 328 }
 0x28c   : > { %1553 = vbcast.lane.b32.xlu1 %v1531_v60, 296  ;;  %1577 = vbcast.lane.b32.xlu0 %v1531_v60, 344 }
 0x290   : > { %1557 = vbcast.lane.b32.xlu1 %v1531_v60, 304  ;;  %1585 = vbcast.lane.b32.xlu0 %v1531_v60, 360 }
 0x294   : > { %1561 = vbcast.lane.b32.xlu1 %v1531_v60, 312  ;;  %1593 = vbcast.lane.b32.xlu0 %v1531_v60, 376 }
 0x298   : > { %1565 = vbcast.lane.b32.xlu1 %v1531_v60, 320  ;;  %1604 = vbcast.lane.b32.xlu0 %v1598_v37, 264 }
 0x29c   : > { %1573 = vbcast.lane.b32.xlu1 %v1531_v60, 336  ;;  %1612 = vbcast.lane.b32.xlu0 %v1598_v37, 280 }
 0x2a0   : > { %1581 = vbcast.lane.b32.xlu1 %v1531_v60, 352  ;;  %1620 = vbcast.lane.b32.xlu0 %v1598_v37, 296 }
 0x2a4   : > { %1589 = vbcast.lane.b32.xlu1 %v1531_v60, 368  ;;  %1628 = vbcast.lane.b32.xlu0 %v1598_v37, 312  ;;  %v1732_v60 = vrot.slane %v7423_v11, %v11027_v59 }
 0x2a8   : > { %1600 = vbcast.lane.b32.xlu1 %v1598_v37, 256  ;;  %1636 = vbcast.lane.b32.xlu0 %v1598_v37, 328 }
 0x2ac   : > { %1608 = vbcast.lane.b32.xlu1 %v1598_v37, 272  ;;  %1644 = vbcast.lane.b32.xlu0 %v1598_v37, 344 }
 0x2b0   : > { %1616 = vbcast.lane.b32.xlu1 %v1598_v37, 288  ;;  %1652 = vbcast.lane.b32.xlu0 %v1598_v37, 360 }
 0x2b4   : > { %1624 = vbcast.lane.b32.xlu1 %v1598_v37, 304  ;;  %1660 = vbcast.lane.b32.xlu0 %v1598_v37, 376 }
 0x2b8   : > { %1632 = vbcast.lane.b32.xlu1 %v1598_v37, 320  ;;  %1671 = vbcast.lane.b32.xlu0 %v1665_v0, 264 }
 0x2bc   : > { %1640 = vbcast.lane.b32.xlu1 %v1598_v37, 336  ;;  %1679 = vbcast.lane.b32.xlu0 %v1665_v0, 280 }
 0x2c0   : > { %1648 = vbcast.lane.b32.xlu1 %v1598_v37, 352  ;;  %1687 = vbcast.lane.b32.xlu0 %v1665_v0, 296 }
 0x2c4   : > { %1656 = vbcast.lane.b32.xlu1 %v1598_v37, 368  ;;  %1695 = vbcast.lane.b32.xlu0 %v1665_v0, 312  ;;  %v11032_v37 = vsub.s32 4, %v6887_v1 }
 0x2c6   : > { %v1799_v59 = vrot.slane %v7423_v11, %v11032_v37 }
 0x2c8   : > { %1667 = vbcast.lane.b32.xlu1 %v1665_v0, 256  ;;  %1703 = vbcast.lane.b32.xlu0 %v1665_v0, 328 }
 0x2cc   : > { %1675 = vbcast.lane.b32.xlu1 %v1665_v0, 272  ;;  %1711 = vbcast.lane.b32.xlu0 %v1665_v0, 344 }
 0x2d0   : > { %1683 = vbcast.lane.b32.xlu1 %v1665_v0, 288  ;;  %1719 = vbcast.lane.b32.xlu0 %v1665_v0, 360 }
 0x2d4   : > { %1691 = vbcast.lane.b32.xlu1 %v1665_v0, 304  ;;  %1727 = vbcast.lane.b32.xlu0 %v1665_v0, 376 }
 0x2d8   : > { %1699 = vbcast.lane.b32.xlu1 %v1665_v0, 320  ;;  %1738 = vbcast.lane.b32.xlu0 %v1732_v60, 264 }
 0x2dc   : > { %1707 = vbcast.lane.b32.xlu1 %v1665_v0, 336  ;;  %1746 = vbcast.lane.b32.xlu0 %v1732_v60, 280 }
 0x2e0   : > { %1715 = vbcast.lane.b32.xlu1 %v1665_v0, 352  ;;  %1754 = vbcast.lane.b32.xlu0 %v1732_v60, 296 }
 0x2e4   : > { %1723 = vbcast.lane.b32.xlu1 %v1665_v0, 368  ;;  %1762 = vbcast.lane.b32.xlu0 %v1732_v60, 312 }
 0x2e8   : > { %1734 = vbcast.lane.b32.xlu1 %v1732_v60, 256  ;;  %1770 = vbcast.lane.b32.xlu0 %v1732_v60, 328 }
 0x2ec   : > { %1742 = vbcast.lane.b32.xlu1 %v1732_v60, 272  ;;  %1778 = vbcast.lane.b32.xlu0 %v1732_v60, 344 }
 0x2f0   : > { %1750 = vbcast.lane.b32.xlu1 %v1732_v60, 288  ;;  %1786 = vbcast.lane.b32.xlu0 %v1732_v60, 360 }
 0x2f4   : > { %1758 = vbcast.lane.b32.xlu1 %v1732_v60, 304  ;;  %1794 = vbcast.lane.b32.xlu0 %v1732_v60, 376 }
 0x2f8   : > { %v7446_v21 = vpop.xlane.xlu1 %1385  ;;  %1766 = vbcast.lane.b32.xlu1 %v1732_v60, 320  ;;  %1805 = vbcast.lane.b32.xlu0 %v1799_v59, 264 }
 0x2fb   : > { %v7450_v22 = vpop.xlane.xlu0 %1393 }
 0x2fc   : > { %1774 = vbcast.lane.b32.xlu1 %v1732_v60, 336  ;;  %v7448_v0 = vpop.permute.xlu1 %1533  ;;  %1813 = vbcast.lane.b32.xlu0 %v1799_v59, 280 }
 0x2fd   : > { %11396 = vst [vmem:[#allocation104_spill] sm:$0xff] %v7448_v0 }
 0x2ff   : > { %v7454_v38 = vpop.permute.xlu0 %1545 }
 0x300   : > { %1782 = vbcast.lane.b32.xlu1 %v1732_v60, 352  ;;  %v7452_v47 = vpop.permute.xlu1 %1537  ;;  %11398 = vst [vmem:[#allocation106_spill] sm:$0xff] %v7454_v38  ;;  %1821 = vbcast.lane.b32.xlu0 %v1799_v59, 296 }
 0x301   : > { %11397 = vst [vmem:[#allocation105_spill] sm:$0xff] %v7452_v47 }
 0x303   : > { %v7458_v37 = vpop.permute.xlu0 %1569 }
 0x304   : > { %1790 = vbcast.lane.b32.xlu1 %v1732_v60, 368  ;;  %v7456_v6 = vpop.permute.xlu1 %1541  ;;  %11400 = vst [vmem:[#allocation108_spill] sm:$0xff] %v7458_v37  ;;  %1829 = vbcast.lane.b32.xlu0 %v1799_v59, 312 }
 0x305   : > { %11399 = vst [vmem:[#allocation107_spill] sm:$0xff] %v7456_v6  ;;  %v11033_v6 = vsub.s32 5, %v6887_v1 }
 0x307   : > { %v7462_v42 = vpop.permute.xlu0 %1577 }
 0x308   : > { %1801 = vbcast.lane.b32.xlu1 %v1799_v59, 256  ;;  %v7460_v7 = vpop.permute.xlu1 %1549  ;;  %11402 = vst [vmem:[#allocation110_spill] sm:$0xff] %v7462_v42  ;;  %1837 = vbcast.lane.b32.xlu0 %v1799_v59, 328  ;;  %v1866_v42 = vrot.slane %v7423_v11, %v11033_v6 }
 0x309   : > { %11401 = vst [vmem:[#allocation109_spill] sm:$0xff] %v7460_v7 }
 0x30b   : > { %v7466_v5 = vpop.permute.xlu0 %1585 }
 0x30c   : > { %1809 = vbcast.lane.b32.xlu1 %v1799_v59, 272  ;;  %v7464_v0 = vpop.permute.xlu1 %1553  ;;  %11404 = vst [vmem:[#allocation112_spill] sm:$0xff] %v7466_v5  ;;  %1845 = vbcast.lane.b32.xlu0 %v1799_v59, 344 }
 0x30d   : > { %11403 = vst [vmem:[#allocation111_spill] sm:$0xff] %v7464_v0 }
 0x30f   : > { %v7470_v60 = vpop.permute.xlu0 %1593 }
 0x310   : > { %1817 = vbcast.lane.b32.xlu1 %v1799_v59, 288  ;;  %v7468_v38 = vpop.permute.xlu1 %1557  ;;  %11406 = vst [vmem:[#allocation114_spill] sm:$0xff] %v7470_v60  ;;  %1853 = vbcast.lane.b32.xlu0 %v1799_v59, 360 }
 0x311   : > { %11405 = vst [vmem:[#allocation113_spill] sm:$0xff] %v7468_v38 }
 0x313   : > { %v7475_v7 = vpop.permute.xlu0 %1604 }
 0x314   : > { %1825 = vbcast.lane.b32.xlu1 %v1799_v59, 304  ;;  %v7473_v37 = vpop.permute.xlu1 %1561  ;;  %11408 = vst [vmem:[#allocation116_spill] sm:$0xff] %v7475_v7  ;;  %1861 = vbcast.lane.b32.xlu0 %v1799_v59, 376 }
 0x315   : > { %11407 = vst [vmem:[#allocation115_spill] sm:$0xff] %v7473_v37 }
 0x317   : > { %v7482_v0 = vpop.permute.xlu0 %1612 }
 0x318   : > { %1833 = vbcast.lane.b32.xlu1 %v1799_v59, 320  ;;  %v7480_v5 = vpop.permute.xlu1 %1565  ;;  %11410 = vst [vmem:[#allocation118_spill] sm:$0xff] %v7482_v0  ;;  %1872 = vbcast.lane.b32.xlu0 %v1866_v42, 264 }
 0x319   : > { %11409 = vst [vmem:[#allocation117_spill] sm:$0xff] %v7480_v5 }
 0x31b   : > { %v7486_v38 = vpop.permute.xlu0 %1620 }
 0x31c   : > { %1841 = vbcast.lane.b32.xlu1 %v1799_v59, 336  ;;  %v7484_v60 = vpop.permute.xlu1 %1573  ;;  %11412 = vst [vmem:[#allocation120_spill] sm:$0xff] %v7486_v38  ;;  %1880 = vbcast.lane.b32.xlu0 %v1866_v42, 280 }
 0x31d   : > { %11411 = vst [vmem:[#allocation119_spill] sm:$0xff] %v7484_v60 }
 0x31f   : > { %v7490_v7 = vpop.permute.xlu0 %1628 }
 0x320   : > { %1849 = vbcast.lane.b32.xlu1 %v1799_v59, 352  ;;  %v7488_v37 = vpop.permute.xlu1 %1581  ;;  %11414 = vst [vmem:[#allocation122_spill] sm:$0xff] %v7490_v7  ;;  %1888 = vbcast.lane.b32.xlu0 %v1866_v42, 296 }
 0x321   : > { %11413 = vst [vmem:[#allocation121_spill] sm:$0xff] %v7488_v37 }
 0x323   : > { %v7494_v47 = vpop.permute.xlu0 %1636 }
 0x324   : > { %1857 = vbcast.lane.b32.xlu1 %v1799_v59, 368  ;;  %v7492_v6 = vpop.permute.xlu1 %1589  ;;  %11416 = vst [vmem:[#allocation124_spill] sm:$0xff] %v7494_v47  ;;  %1896 = vbcast.lane.b32.xlu0 %v1866_v42, 312  ;;  %v11034_v47 = vsub.s32 6, %v6887_v1 }
 0x325   : > { %11415 = vst [vmem:[#allocation123_spill] sm:$0xff] %v7492_v6 }
 0x327   : > { %v7498_v5 = vpop.permute.xlu0 %1644 }
 0x328   : > { %1868 = vbcast.lane.b32.xlu1 %v1866_v42, 256  ;;  %v7496_v0 = vpop.permute.xlu1 %1600  ;;  %11418 = vst [vmem:[#allocation126_spill] sm:$0xff] %v7498_v5  ;;  %1904 = vbcast.lane.b32.xlu0 %v1866_v42, 328  ;;  %v1933_v5 = vrot.slane %v7423_v11, %v11034_v47 }
 0x329   : > { %11417 = vst [vmem:[#allocation125_spill] sm:$0xff] %v7496_v0 }
 0x32b   : > { %v7502_v60 = vpop.permute.xlu0 %1652 }
 0x32c   : > { %1876 = vbcast.lane.b32.xlu1 %v1866_v42, 272  ;;  %v7500_v38 = vpop.permute.xlu1 %1608  ;;  %11420 = vst [vmem:[#allocation128_spill] sm:$0xff] %v7502_v60  ;;  %1912 = vbcast.lane.b32.xlu0 %v1866_v42, 344 }
 0x32d   : > { %11419 = vst [vmem:[#allocation127_spill] sm:$0xff] %v7500_v38 }
 0x32f   : > { %v7506_v59 = vpop.permute.xlu0 %1660 }
 0x330   : > { %1884 = vbcast.lane.b32.xlu1 %v1866_v42, 288  ;;  %v7504_v7 = vpop.permute.xlu1 %1616  ;;  %11422 = vst [vmem:[#allocation130_spill] sm:$0xff] %v7506_v59  ;;  %1920 = vbcast.lane.b32.xlu0 %v1866_v42, 360 }
 0x331   : > { %11421 = vst [vmem:[#allocation129_spill] sm:$0xff] %v7504_v7 }
 0x333   : > { %v7511_v0 = vpop.permute.xlu0 %1671 }
 0x334   : > { %1892 = vbcast.lane.b32.xlu1 %v1866_v42, 304  ;;  %v7509_v6 = vpop.permute.xlu1 %1624  ;;  %11424 = vst [vmem:[#allocation132_spill] sm:$0xff] %v7511_v0  ;;  %1928 = vbcast.lane.b32.xlu0 %v1866_v42, 376 }
 0x335   : > { %11423 = vst [vmem:[#allocation131_spill] sm:$0xff] %v7509_v6 }
 0x337   : > { %v7518_v38 = vpop.permute.xlu0 %1679 }
 0x338   : > { %1900 = vbcast.lane.b32.xlu1 %v1866_v42, 320  ;;  %v7516_v60 = vpop.permute.xlu1 %1632  ;;  %11426 = vst [vmem:[#allocation134_spill] sm:$0xff] %v7518_v38  ;;  %1939 = vbcast.lane.b32.xlu0 %v1933_v5, 264 }
 0x339   : > { %11425 = vst [vmem:[#allocation133_spill] sm:$0xff] %v7516_v60 }
 0x33b   : > { %v7522_v7 = vpop.permute.xlu0 %1687 }
 0x33c   : > { %1908 = vbcast.lane.b32.xlu1 %v1866_v42, 336  ;;  %v7520_v59 = vpop.permute.xlu1 %1640  ;;  %11428 = vst [vmem:[#allocation136_spill] sm:$0xff] %v7522_v7  ;;  %1947 = vbcast.lane.b32.xlu0 %v1933_v5, 280 }
 0x33d   : > { %11427 = vst [vmem:[#allocation135_spill] sm:$0xff] %v7520_v59 }
 0x33f   : > { %v7526_v0 = vpop.permute.xlu0 %1695 }
 0x340   : > { %1916 = vbcast.lane.b32.xlu1 %v1866_v42, 352  ;;  %v7524_v6 = vpop.permute.xlu1 %1648  ;;  %11430 = vst [vmem:[#allocation138_spill] sm:$0xff] %v7526_v0  ;;  %1955 = vbcast.lane.b32.xlu0 %v1933_v5, 296 }
 0x341   : > { %11429 = vst [vmem:[#allocation137_spill] sm:$0xff] %v7524_v6 }
 0x343   : > { %v7530_v37 = vpop.permute.xlu0 %1703 }
 0x344   : > { %1924 = vbcast.lane.b32.xlu1 %v1866_v42, 368  ;;  %v7528_v47 = vpop.permute.xlu1 %1656  ;;  %11432 = vst [vmem:[#allocation140_spill] sm:$0xff] %v7530_v37  ;;  %1963 = vbcast.lane.b32.xlu0 %v1933_v5, 312  ;;  %v11035_v37 = vsub.s32 7, %v6887_v1 }
 0x345   : > { %11431 = vst [vmem:[#allocation139_spill] sm:$0xff] %v7528_v47 }
 0x347   : > { %v7534_v60 = vpop.permute.xlu0 %1711 }
 0x348   : > { %1935 = vbcast.lane.b32.xlu1 %v1933_v5, 256  ;;  %v7532_v38 = vpop.permute.xlu1 %1667  ;;  %11434 = vst [vmem:[#allocation142_spill] sm:$0xff] %v7534_v60  ;;  %1971 = vbcast.lane.b32.xlu0 %v1933_v5, 328  ;;  %v2000_v60 = vrot.slane %v7423_v11, %v11035_v37 }
 0x349   : > { %11433 = vst [vmem:[#allocation141_spill] sm:$0xff] %v7532_v38 }
 0x34b   : > { %v7538_v59 = vpop.permute.xlu0 %1719 }
 0x34c   : > { %1943 = vbcast.lane.b32.xlu1 %v1933_v5, 272  ;;  %v7536_v7 = vpop.permute.xlu1 %1675  ;;  %11436 = vst [vmem:[#allocation144_spill] sm:$0xff] %v7538_v59  ;;  %1979 = vbcast.lane.b32.xlu0 %v1933_v5, 344 }
 0x34d   : > { %11435 = vst [vmem:[#allocation143_spill] sm:$0xff] %v7536_v7 }
 0x34f   : > { %v7542_v42 = vpop.permute.xlu0 %1727 }
 0x350   : > { %1951 = vbcast.lane.b32.xlu1 %v1933_v5, 288  ;;  %v7540_v0 = vpop.permute.xlu1 %1683  ;;  %11438 = vst [vmem:[#allocation146_spill] sm:$0xff] %v7542_v42  ;;  %1987 = vbcast.lane.b32.xlu0 %v1933_v5, 360  ;;  %v1395_v42 = vmax.f32 %v7450_v22, 1.0  ;;  %v1387_v22 = vmax.f32 %v7446_v21, 1.0 }
 0x351   : > { %11437 = vst [vmem:[#allocation145_spill] sm:$0xff] %v7540_v0 }
 0x352   : > { %5780 = vrcp.f32 %v1395_v42 }
 0x353   : > { %v7547_v38 = vpop.permute.xlu0 %1738 }
 0x354   : > { %1959 = vbcast.lane.b32.xlu1 %v1933_v5, 304  ;;  %v7545_v47 = vpop.permute.xlu1 %1691  ;;  %11440 = vst [vmem:[#allocation148_spill] sm:$0xff] %v7547_v38  ;;  %1995 = vbcast.lane.b32.xlu0 %v1933_v5, 376 }
 0x355   : > { %11439 = vst [vmem:[#allocation147_spill] sm:$0xff] %v7545_v47 }
 0x357   : > { %v7554_v7 = vpop.permute.xlu0 %1746 }
 0x358   : > { %1967 = vbcast.lane.b32.xlu1 %v1933_v5, 320  ;;  %v7552_v59 = vpop.permute.xlu1 %1699  ;;  %11442 = vst [vmem:[#allocation150_spill] sm:$0xff] %v7554_v7  ;;  %2006 = vbcast.lane.b32.xlu0 %v2000_v60, 264 }
 0x359   : > { %11441 = vst [vmem:[#allocation149_spill] sm:$0xff] %v7552_v59  ;;  %v1396_v59 = vmul.f32 5.0, %v1387_v22 }
 0x35b   : > { %v7559_v6 = vpop.permute.xlu0 %1754 }
 0x35c   : > { %1975 = vbcast.lane.b32.xlu1 %v1933_v5, 336  ;;  %v7557_v0 = vpop.permute.xlu1 %1707  ;;  %11444 = vst [vmem:[#allocation152_spill] sm:$0xff] %v7559_v6  ;;  %2014 = vbcast.lane.b32.xlu0 %v2000_v60, 280  ;;  %v5781_v42 = vpop.eup %5780 }
 0x35d   : > { %11443 = vst [vmem:[#allocation151_spill] sm:$0xff] %v7557_v0 }
 0x35f   : > { %v7563_v47 = vpop.permute.xlu0 %1762 }
 0x360   : > { %1983 = vbcast.lane.b32.xlu1 %v1933_v5, 352  ;;  %v7561_v38 = vpop.permute.xlu1 %1715  ;;  %11446 = vst [vmem:[#allocation154_spill] sm:$0xff] %v7563_v47  ;;  %2022 = vbcast.lane.b32.xlu0 %v2000_v60, 296  ;;  %v1398_v47 = vmul.f32 %v5781_v42, %v1396_v59 }
 0x361   : > { %11445 = vst [vmem:[#allocation153_spill] sm:$0xff] %v7561_v38 }
 0x362   : > { %v3473_v21 = vsel %vm3472_vm11, %v1398_v47, 1.0  ;;  %vm4887_vm11 = vcmask 1048512  }
 0x363   : > { %v7567_v7 = vpop.permute.xlu0 %1770 }
 0x364   : > { %1991 = vbcast.lane.b32.xlu1 %v1933_v5, 368  ;;  %v7565_v37 = vpop.permute.xlu1 %1723  ;;  %11448 = vst [vmem:[#allocation156_spill] sm:$0xff] %v7567_v7  ;;  %2030 = vbcast.lane.b32.xlu0 %v2000_v60, 312 }
 0x365   : > { %11447 = vst [vmem:[#allocation155_spill] sm:$0xff] %v7565_v37 }
 0x367   : > { %v7572_v6 = vpop.permute.xlu0 %1778 }
 0x368   : > { %2002 = vbcast.lane.b32.xlu1 %v2000_v60, 256  ;;  %v7570_v0 = vpop.permute.xlu1 %1734  ;;  %11450 = vst [vmem:[#allocation158_spill] sm:$0xff] %v7572_v6  ;;  %2038 = vbcast.lane.b32.xlu0 %v2000_v60, 328  ;;  %v7584_v6 = vmul.f32 %v3473_v21, %v7416_v41 }
 0x369   : > { %11449 = vst [vmem:[#allocation157_spill] sm:$0xff] %v7570_v0 }
 0x36a   : > { %11455 = vst [vmem:[#allocation163_spill] sm:$0xff] %v7584_v6  ;;  %v3479_v59 = vrot.slane %v7584_v6, %v6890_v4 }
 0x36b   : > { %v7576_v5 = vpop.permute.xlu0 %1786 }
 0x36c   : > { %2010 = vbcast.lane.b32.xlu1 %v2000_v60, 272  ;;  %v7574_v38 = vpop.permute.xlu1 %1742  ;;  %11452 = vst [vmem:[#allocation160_spill] sm:$0xff] %v7576_v5  ;;  %2046 = vbcast.lane.b32.xlu0 %v2000_v60, 344 }
 0x36d   : > { %11451 = vst [vmem:[#allocation159_spill] sm:$0xff] %v7574_v38 }
 0x36f   : > { %v7581_v37 = vpop.permute.xlu0 %1794 }
 0x370   : > { %2018 = vbcast.lane.b32.xlu1 %v2000_v60, 288  ;;  %v7579_v7 = vpop.permute.xlu1 %1750  ;;  %11454 = vst [vmem:[#allocation162_spill] sm:$0xff] %v7581_v37  ;;  %2054 = vbcast.lane.b32.xlu0 %v2000_v60, 360 }
 0x371   : > { %11453 = vst [vmem:[#allocation161_spill] sm:$0xff] %v7579_v7 }
 0x373   : > { %v7588_v38 = vpop.permute.xlu0 %1805 }
 0x374   : > { %2026 = vbcast.lane.b32.xlu1 %v2000_v60, 304  ;;  %v7586_v22 = vpop.permute.xlu1 %1758  ;;  %11457 = vst [vmem:[#allocation165_spill] sm:$0xff] %v7588_v38  ;;  %2062 = vbcast.lane.b32.xlu0 %v2000_v60, 376 }
 0x375   : > { %11456 = vst [vmem:[#allocation164_spill] sm:$0xff] %v7586_v22 }
 0x377   : > { %v7594_v42 = vpop.permute.xlu0 %1813 }
 0x378   : > { %2034 = vbcast.lane.b32.xlu1 %v2000_v60, 320  ;;  %v7592_v11 = vpop.permute.xlu1 %1766  ;;  %11459 = vst [vmem:[#allocation167_spill] sm:$0xff] %v7594_v42  ;;  %3485 = vbcast.lane.b32.xlu0 %v3479_v59, 264 }
 0x379   : > { %11458 = vst [vmem:[#allocation166_spill] sm:$0xff] %v7592_v11 }
 0x37b   : > { %v7598_v41 = vpop.permute.xlu0 %1821 }
 0x37c   : > { %2042 = vbcast.lane.b32.xlu1 %v2000_v60, 336  ;;  %v7596_v47 = vpop.permute.xlu1 %1774  ;;  %11461 = vst [vmem:[#allocation169_spill] sm:$0xff] %v7598_v41  ;;  %3493 = vbcast.lane.b32.xlu0 %v3479_v59, 280 }
 0x37d   : > { %11460 = vst [vmem:[#allocation168_spill] sm:$0xff] %v7596_v47 }
 0x37f   : > { %v7602_v38 = vpop.permute.xlu0 %1829 }
 0x380   : > { %2050 = vbcast.lane.b32.xlu1 %v2000_v60, 352  ;;  %v7600_v21 = vpop.permute.xlu1 %1782  ;;  %11463 = vst [vmem:[#allocation171_spill] sm:$0xff] %v7602_v38  ;;  %3501 = vbcast.lane.b32.xlu0 %v3479_v59, 296 }
 0x381   : > { %11462 = vst [vmem:[#allocation170_spill] sm:$0xff] %v7600_v21 }
 0x383   : > { %v7606_v37 = vpop.permute.xlu0 %1837 }
 0x384   : > { %2058 = vbcast.lane.b32.xlu1 %v2000_v60, 368  ;;  %v7604_v4 = vpop.permute.xlu1 %1790  ;;  %11465 = vst [vmem:[#allocation173_spill] sm:$0xff] %v7606_v37  ;;  %3509 = vbcast.lane.b32.xlu0 %v3479_v59, 312 }
 0x385   : > { %11464 = vst [vmem:[#allocation172_spill] sm:$0xff] %v7604_v4 }
 0x387   : > { %v7610_v11 = vpop.permute.xlu0 %1845 }
 0x388   : > { %v7608_v42 = vpop.permute.xlu1 %1801  ;;  %3481 = vbcast.lane.b32.xlu1 %v3479_v59, 256  ;;  %11467 = vst [vmem:[#allocation175_spill] sm:$0xff] %v7610_v11  ;;  %3517 = vbcast.lane.b32.xlu0 %v3479_v59, 328  ;;  %v11474_v11 = vsub.s32 1, %v6887_v1 }
 0x389   : > { %11466 = vst [vmem:[#allocation174_spill] sm:$0xff] %v7608_v42 }
 0x38b   : > { %v7614_v47 = vpop.permute.xlu0 %1853 }
 0x38c   : > { %v7612_v41 = vpop.permute.xlu1 %1809  ;;  %3489 = vbcast.lane.b32.xlu1 %v3479_v59, 272  ;;  %11469 = vst [vmem:[#allocation177_spill] sm:$0xff] %v7614_v47  ;;  %3525 = vbcast.lane.b32.xlu0 %v3479_v59, 344 }
 0x38d   : > { %11468 = vst [vmem:[#allocation176_spill] sm:$0xff] %v7612_v41  ;;  %v7627_v41 = vrot.slane %v7584_v6, %v11474_v11 }
 0x38f   : > { %v7618_v60 = vpop.permute.xlu0 %1861 }
 0x390   : > { %v7616_v38 = vpop.permute.xlu1 %1817  ;;  %3497 = vbcast.lane.b32.xlu1 %v3479_v59, 288  ;;  %11471 = vst [vmem:[#allocation179_spill] sm:$0xff] %v7618_v60  ;;  %3533 = vbcast.lane.b32.xlu0 %v3479_v59, 360 }
 0x391   : > { %11470 = vst [vmem:[#allocation178_spill] sm:$0xff] %v7616_v38 }
 0x393   : > { %v7622_v42 = vpop.permute.xlu0 %1872 }
 0x394   : > { %v7620_v37 = vpop.permute.xlu1 %1825  ;;  %3505 = vbcast.lane.b32.xlu1 %v3479_v59, 304  ;;  %11473 = vst [vmem:[#allocation181_spill] sm:$0xff] %v7622_v42  ;;  %3541 = vbcast.lane.b32.xlu0 %v3479_v59, 376 }
 0x395   : > { %11472 = vst [vmem:[#allocation180_spill] sm:$0xff] %v7620_v37 }
 0x397   : > { %v7631_v47 = vpop.permute.xlu0 %1880 }
 0x398   : > { %v7629_v4 = vpop.permute.xlu1 %1833  ;;  %3513 = vbcast.lane.b32.xlu1 %v3479_v59, 320  ;;  %11476 = vst [vmem:[#allocation183_spill] sm:$0xff] %v7631_v47  ;;  %3552 = vbcast.lane.b32.xlu0 %v7627_v41, 264 }
 0x399   : > { %11475 = vst [vmem:[#allocation182_spill] sm:$0xff] %v7629_v4  ;;  %v7644_v4 = vstv %s1230_s13 }
 0x39a   : > { %v7711_v30 = vadd.f32 %v7644_v4, %v7071_v19 }
 0x39b   : > { %v7636_v37 = vpop.permute.xlu0 %1888 }
 0x39c   : > { %v7634_v60 = vpop.permute.xlu1 %1841  ;;  %3521 = vbcast.lane.b32.xlu1 %v3479_v59, 336  ;;  %11478 = vst [vmem:[#allocation185_spill] sm:$0xff] %v7636_v37  ;;  %3560 = vbcast.lane.b32.xlu0 %v7627_v41, 280  ;;  %v7653_v37 = vadd.f32 %v7644_v4, %v7048_v55  ;;  %11498 = vst [vmem:[#allocation205_spill] sm:$0xff] %v7711_v30 }
 0x39d   : > { %11477 = vst [vmem:[#allocation184_spill] sm:$0xff] %v7634_v60 }
 0x39e   : > { %11483 = vst [vmem:[#allocation190_spill] sm:$0xff] %v7653_v37 }
 0x39f   : > { %v7641_v11 = vpop.permute.xlu0 %1896 }
 0x3a0   : > { %v7639_v42 = vpop.permute.xlu1 %1849  ;;  %3529 = vbcast.lane.b32.xlu1 %v3479_v59, 352  ;;  %11480 = vst [vmem:[#allocation187_spill] sm:$0xff] %v7641_v11  ;;  %3568 = vbcast.lane.b32.xlu0 %v7627_v41, 296 }
 0x3a1   : > { %11479 = vst [vmem:[#allocation186_spill] sm:$0xff] %v7639_v42  ;;  %v2448_v42 = vand.u32 2147483647, %v7653_v37  ;;  %v11640_v37 = vld [vmem:[#allocation34_spill] sm:$0xff] }
 0x3a3   : > { %v7648_v38 = vpop.permute.xlu0 %1904 }
 0x3a4   : > { %v7646_v47 = vpop.permute.xlu1 %1857  ;;  %3537 = vbcast.lane.b32.xlu1 %v3479_v59, 368  ;;  %11482 = vst [vmem:[#allocation189_spill] sm:$0xff] %v7648_v38  ;;  %3576 = vbcast.lane.b32.xlu0 %v7627_v41, 312  ;;  %v7664_v59 = vadd.f32 %v7644_v4, %v7055_v62 }
 0x3a5   : > { %11481 = vst [vmem:[#allocation188_spill] sm:$0xff] %v7646_v47  ;;  %v7668_v47 = vadd.f32 %v7644_v4, %v7057_v63  ;;  %v7684_v63 = vadd.f32 %v7644_v4, %v7065_v12 }
 0x3a6   : > { %11486 = vst [vmem:[#allocation193_spill] sm:$0xff] %v7664_v59  ;;  %v2449_v62 = vand.u32 2147483647, %v7664_v59 }
 0x3a7   : > { %v7658_v11 = vpop.permute.xlu0 %1912  ;;  %11487 = vst [vmem:[#allocation194_spill] sm:$0xff] %v7668_v47  ;;  %v2451_v21 = vand.u32 2147483647, %v7668_v47  ;;  %11491 = vst [vmem:[#allocation198_spill] sm:$0xff] %v7684_v63  ;;  %v2453_v12 = vand.u32 2147483647, %v7684_v63 }
 0x3a8   : > { %v7655_v60 = vpop.permute.xlu1 %1868  ;;  %3548 = vbcast.lane.b32.xlu1 %v7627_v41, 256  ;;  %11485 = vst [vmem:[#allocation192_spill] sm:$0xff] %v7658_v11  ;;  %3584 = vbcast.lane.b32.xlu0 %v7627_v41, 328  ;;  %v2576_v11 = vsub.f32 0.0, %v2448_v42  ;;  %v7693_v42 = vadd.f32 %v7644_v4, %v7063_v10  ;;  %v2577_v5 = vsub.f32 0.0, %v2449_v62  ;;  %v11678_v47 = vld [vmem:[#allocation44_spill] sm:$0xff] }
 0x3a9   : > { %11484 = vst [vmem:[#allocation191_spill] sm:$0xff] %v7655_v60  ;;  %v7678_v60 = vadd.f32 %v7644_v4, %v7050_v56  ;;  %v2579_v7 = vsub.f32 0.0, %v2451_v21  ;;  %v2581_v48 = vsub.f32 0.0, %v2453_v12  ;;  %v2454_v12 = vand.u32 2147483647, %v7711_v30 }
 0x3aa   : > { %11494 = vst [vmem:[#allocation201_spill] sm:$0xff] %v7693_v42  ;;  %v2704_v56 = vmul.f32 1.442695, %v2576_v11  ;;  %v2452_v10 = vand.u32 2147483647, %v7693_v42 }
 0x3ab   : > { %v7673_v38 = vpop.permute.xlu0 %1920  ;;  %11490 = vst [vmem:[#allocation197_spill] sm:$0xff] %v7678_v60  ;;  %v2450_v22 = vand.u32 2147483647, %v7678_v60  ;;  %v2706_v62 = vmul.f32 1.442695, %v2577_v5 }
 0x3ac   : > { %v7670_v55 = vpop.permute.xlu1 %1876  ;;  %3556 = vbcast.lane.b32.xlu1 %v7627_v41, 272  ;;  %11489 = vst [vmem:[#allocation196_spill] sm:$0xff] %v7673_v38  ;;  %3592 = vbcast.lane.b32.xlu0 %v7627_v41, 344  ;;  %5782 = vpow2.f32 %v2704_v56  ;;  %v2710_v21 = vmul.f32 1.442695, %v2579_v7  ;;  %v2580_v5 = vsub.f32 0.0, %v2452_v10  ;;  %v7726_v7 = vadd.f32 %v7644_v4, %v7079_v27 }
 0x3ad   : > { %11488 = vst [vmem:[#allocation195_spill] sm:$0xff] %v7670_v55  ;;  %v2578_v11 = vsub.f32 0.0, %v2450_v22  ;;  %5784 = vpow2.f32 %v2706_v62  ;;  %v7731_v22 = vadd.f32 %v7644_v4, %v7081_v28 }
 0x3ae   : > { %11502 = vst [vmem:[#allocation208_spill] sm:$0xff] %v7726_v7  ;;  %5786 = vpow2.f32 %v2710_v21  ;;  %v2712_v27 = vmul.f32 1.442695, %v2580_v5 }
 0x3af   : > { %v7689_v38 = vpop.permute.xlu0 %1928  ;;  %v2708_v19 = vmul.f32 1.442695, %v2578_v11  ;;  %11503 = vst [vmem:[#allocation209_spill] sm:$0xff] %v7731_v22  ;;  %v2457_v28 = vand.u32 2147483647, %v7731_v22  ;;  %v2582_v11 = vsub.f32 0.0, %v2454_v12 }
 0x3b0   : > { %v7686_v55 = vpop.permute.xlu1 %1884  ;;  %3564 = vbcast.lane.b32.xlu1 %v7627_v41, 288  ;;  %11493 = vst [vmem:[#allocation200_spill] sm:$0xff] %v7689_v38  ;;  %3600 = vbcast.lane.b32.xlu0 %v7627_v41, 360  ;;  %v11632_v22 = vld [vmem:[#allocation32_spill] sm:$0xff] }
 0x3b1   : > { %11492 = vst [vmem:[#allocation199_spill] sm:$0xff] %v7686_v55  ;;  %v7700_v55 = vadd.f32 %v7644_v4, %v7073_v20  ;;  %5788 = vpow2.f32 %v2708_v19  ;;  %v7753_v19 = vadd.f32 %v7644_v4, %v7097_v44  ;;  %v2716_v12 = vmul.f32 1.442695, %v2582_v11 }
 0x3b3   : > { %11495 = vst [vmem:[#allocation202_spill] sm:$0xff] %v7700_v55  ;;  %v7705_v38 = vpop.permute.xlu0 %1939  ;;  %v2455_v20 = vand.u32 2147483647, %v7700_v55  ;;  %11509 = vst [vmem:[#allocation215_spill] sm:$0xff] %v7753_v19 }
 0x3b4   : > { %v7702_v0 = vpop.permute.xlu1 %1892  ;;  %3572 = vbcast.lane.b32.xlu1 %v7627_v41, 304  ;;  %11497 = vst [vmem:[#allocation204_spill] sm:$0xff] %v7705_v38  ;;  %3608 = vbcast.lane.b32.xlu0 %v7627_v41, 376 }
 0x3b5   : > { %11496 = vst [vmem:[#allocation203_spill] sm:$0xff] %v7702_v0  ;;  %v11499_v0 = vsub.s32 2, %v6887_v1 }
 0x3b7   : > { %v7717_v29 = vrot.slane %v7584_v6, %v11499_v0  ;;  %v7722_v56 = vpop.permute.xlu0 %1947  ;;  %v2714_v0 = vmul.f32 1.442695, %v2581_v48  ;;  %v7744_v48 = vadd.f32 %v7644_v4, %v7089_v36  ;;  %v2585_v36 = vsub.f32 0.0, %v2457_v28 }
 0x3b8   : > { %v7719_v38 = vpop.permute.xlu1 %1900  ;;  %3580 = vbcast.lane.b32.xlu1 %v7627_v41, 320  ;;  %11501 = vst [vmem:[#allocation207_spill] sm:$0xff] %v7722_v56  ;;  %v2456_v56 = vand.u32 2147483647, %v7726_v7  ;;  %v7779_v28 = vadd.f32 %v7644_v4, %v7095_v43 }
 0x3b9   : > { %11500 = vst [vmem:[#allocation206_spill] sm:$0xff] %v7719_v38  ;;  %3619 = vbcast.lane.b32.xlu0 %v7717_v29, 264  ;;  %v2583_v38 = vsub.f32 0.0, %v2455_v20  ;;  %11506 = vst [vmem:[#allocation212_spill] sm:$0xff] %v7744_v48  ;;  %5790 = vpow2.f32 %v2714_v0  ;;  %v5783_v20 = vpop.eup %5782  ;;  %v2459_v0 = vand.u32 2147483647, %v7744_v48 }
 0x3ba   : > { %5792 = vpow2.f32 %v2712_v27  ;;  %v2960_v11 = vadd.f32 1.0, %v5783_v20  ;;  %v2722_v44 = vmul.f32 1.442695, %v2585_v36  ;;  %11514 = vst [vmem:[#allocation220_spill] sm:$0xff] %v7779_v28  ;;  %v7789_v36 = vadd.f32 %v7644_v4, %v7103_v51 }
 0x3bb   : > { %v7737_v10 = vpop.permute.xlu0 %1955  ;;  %v2718_v62 = vmul.f32 1.442695, %v2583_v38  ;;  %v7759_v38 = vadd.f32 %v7644_v4, %v7087_v35  ;;  %v2461_v35 = vand.u32 2147483647, %v7753_v19 }
 0x3bc   : > { %v7734_v3 = vpop.permute.xlu1 %1908  ;;  %3588 = vbcast.lane.b32.xlu1 %v7627_v41, 336  ;;  %11505 = vst [vmem:[#allocation211_spill] sm:$0xff] %v7737_v10  ;;  %11516 = vst [vmem:[#allocation222_spill] sm:$0xff] %v7789_v36 }
 0x3bd   : > { %11504 = vst [vmem:[#allocation210_spill] sm:$0xff] %v7734_v3  ;;  %3627 = vbcast.lane.b32.xlu0 %v7717_v29, 280  ;;  %v2584_v3 = vsub.f32 0.0, %v2456_v56  ;;  %5794 = vpow2.f32 %v2718_v62  ;;  %11510 = vst [vmem:[#allocation216_spill] sm:$0xff] %v7759_v38  ;;  %v5785_v56 = vpop.eup %5784  ;;  %v2589_v42 = vsub.f32 0.0, %v2461_v35 }
 0x3be   : > { %v5787_v62 = vpop.eup %5786  ;;  %5796 = vpow2.f32 %v2716_v12  ;;  %v2462_v35 = vand.u32 2147483647, %v7789_v36 }
 0x3bf   : > { %v7749_v5 = vpop.permute.xlu0 %1963  ;;  %v2720_v18 = vmul.f32 1.442695, %v2584_v3  ;;  %v2458_v3 = vand.u32 2147483647, %v7759_v38  ;;  %v2963_v20 = vadd.f32 1.0, %v5787_v62  ;;  %5798 = vlog2.f32 %v2960_v11 }
 0x3c0   : > { %v7746_v21 = vpop.permute.xlu1 %1916  ;;  %3596 = vbcast.lane.b32.xlu1 %v7627_v41, 352  ;;  %11508 = vst [vmem:[#allocation214_spill] sm:$0xff] %v7749_v5 }
 0x3c1   : > { %11507 = vst [vmem:[#allocation213_spill] sm:$0xff] %v7746_v21  ;;  %3635 = vbcast.lane.b32.xlu0 %v7717_v29, 296  ;;  %v7773_v21 = vadd.f32 %v7644_v4, %v7105_v52  ;;  %v2961_v52 = vadd.f32 1.0, %v5785_v56  ;;  %5800 = vpow2.f32 %v2720_v18  ;;  %v2460_v56 = vand.u32 2147483647, %v7779_v28 }
 0x3c2   : > { %5802 = vpow2.f32 %v2722_v44  ;;  %v2586_v62 = vsub.f32 0.0, %v2458_v3  ;;  %v7804_v18 = vadd.f32 %v7644_v4, %v7111_v61  ;;  %v2730_v3 = vmul.f32 1.442695, %v2589_v42 }
 0x3c3   : > { %v7768_v10 = vpop.permute.xlu0 %1971  ;;  %11513 = vst [vmem:[#allocation219_spill] sm:$0xff] %v7773_v21  ;;  %v2463_v27 = vand.u32 2147483647, %v7773_v21  ;;  %5804 = vlog2.f32 %v2961_v52  ;;  %v7821_v52 = vadd.f32 %v7644_v4, %v7119_v13 }
 0x3c4   : > { %v7762_v5 = vpop.permute.xlu1 %1924  ;;  %3604 = vbcast.lane.b32.xlu1 %v7627_v41, 368  ;;  %11512 = vst [vmem:[#allocation218_spill] sm:$0xff] %v7768_v10  ;;  %v5789_v41 = vpop.eup %5788  ;;  %11519 = vst [vmem:[#allocation225_spill] sm:$0xff] %v7804_v18  ;;  %5806 = vlog2.f32 %v2963_v20  ;;  %v2724_v20 = vmul.f32 1.442695, %v2586_v62 }
 0x3c5   : > { %11511 = vst [vmem:[#allocation217_spill] sm:$0xff] %v7762_v5  ;;  %3643 = vbcast.lane.b32.xlu0 %v7717_v29, 312  ;;  %v2587_v5 = vsub.f32 0.0, %v2459_v0  ;;  %v5791_v12 = vpop.eup %5790  ;;  %v2591_v60 = vsub.f32 0.0, %v2463_v27  ;;  %11523 = vst [vmem:[#allocation229_spill] sm:$0xff] %v7821_v52 }
 0x3c6   : > { %v2965_v43 = vadd.f32 1.0, %v5791_v12  ;;  %v2464_v12 = vand.u32 2147483647, %v7804_v18 }
 0x3c7   : > { %v7792_v0 = vpop.permute.xlu0 %1979  ;;  %v2726_v51 = vmul.f32 1.442695, %v2587_v5 }
 0x3c8   : > { %v7784_v10 = vpop.permute.xlu1 %1935  ;;  %3615 = vbcast.lane.b32.xlu1 %v7717_v29, 256  ;;  %11517 = vst [vmem:[#allocation223_spill] sm:$0xff] %v7792_v0  ;;  %v5793_v0 = vpop.eup %5792 }
 0x3c9   : > { %11515 = vst [vmem:[#allocation221_spill] sm:$0xff] %v7784_v10  ;;  %v7797_v10 = vadd.f32 %v7644_v4, %v7113_v2  ;;  %3651 = vbcast.lane.b32.xlu0 %v7717_v29, 328  ;;  %v2962_v2 = vadd.f32 1.0, %v5789_v41  ;;  %v5795_v30 = vpop.eup %5794  ;;  %5808 = vpow2.f32 %v2726_v51  ;;  %v2588_v41 = vsub.f32 0.0, %v2460_v56 }
 0x3ca   : > { %v2964_v5 = vadd.f32 1.0, %v5793_v0  ;;  %v2967_v56 = vadd.f32 1.0, %v5795_v30  ;;  %v7831_v13 = vpop.eup %5796  ;;  %v2734_v0 = vmul.f32 1.442695, %v2591_v60  ;;  %v2592_v30 = vsub.f32 0.0, %v2464_v12 }
 0x3cb   : > { %11518 = vst [vmem:[#allocation224_spill] sm:$0xff] %v7797_v10  ;;  %v7811_v44 = vpop.permute.xlu0 %1987  ;;  %v2465_v61 = vand.u32 2147483647, %v7797_v10  ;;  %5810 = vlog2.f32 %v2962_v2  ;;  %v5799_v42 = vpop.eup %5798  ;;  %v2466_v2 = vand.u32 2147483647, %v7821_v52  ;;  %v7853_v60 = vadd.f32 %v7644_v4, %v7129_v24 }
 0x3cc   : > { %v7806_v11 = vpop.permute.xlu1 %1943  ;;  %3623 = vbcast.lane.b32.xlu1 %v7717_v29, 272  ;;  %11521 = vst [vmem:[#allocation227_spill] sm:$0xff] %v7811_v44  ;;  %5812 = vlog2.f32 %v2965_v43  ;;  %v7837_v44 = vpop.eup %5800  ;;  %v7841_v43 = vadd.f32 %v7644_v4, %v7127_v23  ;;  %v7857_v28 = vmul.f32 0.6931472, %v5799_v42  ;;  %v7871_v42 = vadd.f32 %v7644_v4, %v7135_v33 }
 0x3cd   : > { %11520 = vst [vmem:[#allocation226_spill] sm:$0xff] %v7806_v11  ;;  %v7816_v11 = vadd.f32 %v7644_v4, %v7121_v14  ;;  %3659 = vbcast.lane.b32.xlu0 %v7717_v29, 344  ;;  %v2590_v14 = vsub.f32 0.0, %v2462_v35  ;;  %5814 = vpow2.f32 %v2730_v3  ;;  %v2593_v62 = vsub.f32 0.0, %v2465_v61  ;;  %v5803_v61 = vpop.eup %5802  ;;  %11529 = vst [vmem:[#allocation235_spill] sm:$0xff] %v7853_v60 }
 0x3ce   : > { %5816 = vlog2.f32 %v2964_v5  ;;  %11526 = vst [vmem:[#allocation232_spill] sm:$0xff] %v7841_v43  ;;  %11530 = vst [vmem:[#allocation236_spill] sm:$0xff] %v7857_v28  ;;  %v2736_v5 = vmul.f32 1.442695, %v2592_v30  ;;  %v2469_v24 = vand.u32 2147483647, %v7853_v60  ;;  %v7885_v33 = vadd.f32 %v7644_v4, %v7143_v45 }
 0x3cf   : > { %11522 = vst [vmem:[#allocation228_spill] sm:$0xff] %v7816_v11  ;;  %v7829_v51 = vpop.permute.xlu0 %1995  ;;  %v2467_v7 = vand.u32 2147483647, %v7816_v11  ;;  %5818 = vpow2.f32 %v2724_v20  ;;  %v5805_v20 = vpop.eup %5804  ;;  %v2738_v12 = vmul.f32 1.442695, %v2593_v62  ;;  %11533 = vst [vmem:[#allocation238_spill] sm:$0xff] %v7871_v42  ;;  %v7897_v45 = vadd.f32 %v7644_v4, %v7145_v46 }
 0x3d0   : > { %v7825_v27 = vpop.permute.xlu1 %1951  ;;  %3631 = vbcast.lane.b32.xlu1 %v7717_v29, 288  ;;  %11525 = vst [vmem:[#allocation231_spill] sm:$0xff] %v7829_v51  ;;  %5820 = vlog2.f32 %v2967_v56  ;;  %v2468_v56 = vand.u32 2147483647, %v7841_v43  ;;  %v7875_v30 = vmul.f32 0.6931472, %v5805_v20  ;;  %v7937_v10 = vadd.f32 %v7644_v4, %v7159_v8 }
 0x3d1   : > { %11524 = vst [vmem:[#allocation230_spill] sm:$0xff] %v7825_v27  ;;  %3667 = vbcast.lane.b32.xlu0 %v7717_v29, 360  ;;  %v2728_v27 = vmul.f32 1.442695, %v2588_v41  ;;  %v2732_v41 = vmul.f32 1.442695, %v2590_v14  ;;  %5822 = vpow2.f32 %v2734_v0 }
 0x3d2   : > { %v2595_v23 = vsub.f32 0.0, %v2467_v7  ;;  %v2594_v14 = vsub.f32 0.0, %v2466_v2  ;;  %v11531_v0 = vsub.s32 3, %v6887_v1  ;;  %11535 = vst [vmem:[#allocation240_spill] sm:$0xff] %v7875_v30  ;;  %v2969_v51 = vadd.f32 1.0, %v5803_v61  ;;  %11537 = vst [vmem:[#allocation242_spill] sm:$0xff] %v7885_v33 }
 0x3d3   : > { %v7849_v35 = vpop.permute.xlu0 %2006  ;;  %5824 = vpow2.f32 %v2728_v27  ;;  %11540 = vst [vmem:[#allocation245_spill] sm:$0xff] %v7897_v45  ;;  %v2472_v46 = vand.u32 2147483647, %v7885_v33  ;;  %v2473_v52 = vand.u32 2147483647, %v7897_v45  ;;  %11549 = vst [vmem:[#allocation254_spill] sm:$0xff] %v7937_v10 }
 0x3d4   : > { %v7844_v3 = vpop.permute.xlu1 %1959  ;;  %3639 = vbcast.lane.b32.xlu1 %v7717_v29, 304  ;;  %11528 = vst [vmem:[#allocation234_spill] sm:$0xff] %v7849_v35  ;;  %v7863_v7 = vrot.slane %v7584_v6, %v11531_v0  ;;  %5826 = vpow2.f32 %v2732_v41  ;;  %v2742_v0 = vmul.f32 1.442695, %v2595_v23  ;;  %v2740_v18 = vmul.f32 1.442695, %v2594_v14 }
 0x3d5   : > { %11527 = vst [vmem:[#allocation233_spill] sm:$0xff] %v7844_v3  ;;  %3675 = vbcast.lane.b32.xlu0 %v7717_v29, 376  ;;  %v5807_v3 = vpop.eup %5806  ;;  %5828 = vpow2.f32 %v2738_v12  ;;  %v2596_v23 = vsub.f32 0.0, %v2468_v56  ;;  %v2470_v14 = vand.u32 2147483647, %v7871_v42  ;;  %v2597_v56 = vsub.f32 0.0, %v2469_v24 }
 0x3d6   : > { %v5809_v27 = vpop.eup %5808  ;;  %5830 = vpow2.f32 %v2736_v5 }
 0x3d7   : > { %v7873_v2 = vpop.permute.xlu0 %2014  ;;  %v5811_v35 = vpop.eup %5810  ;;  %v2971_v36 = vadd.f32 1.0, %v5809_v27  ;;  %5832 = vlog2.f32 %v2969_v51  ;;  %v2598_v11 = vsub.f32 0.0, %v2470_v14  ;;  %v2600_v14 = vsub.f32 0.0, %v2472_v46 }
 0x3d8   : > { %v7866_v62 = vpop.permute.xlu1 %1967  ;;  %3647 = vbcast.lane.b32.xlu1 %v7717_v29, 320  ;;  %11534 = vst [vmem:[#allocation239_spill] sm:$0xff] %v7873_v2  ;;  %v5813_v41 = vpop.eup %5812  ;;  %v7901_v61 = vmul.f32 0.6931472, %v5811_v35  ;;  %5834 = vpow2.f32 %v2742_v0  ;;  %v2744_v35 = vmul.f32 1.442695, %v2596_v23  ;;  %v7914_v0 = vadd.f32 %v7644_v4, %v7151_v57 }
 0x3d9   : > { %11532 = vst [vmem:[#allocation237_spill] sm:$0xff] %v7866_v62  ;;  %v7880_v62 = vadd.f32 %v7644_v4, %v7137_v34  ;;  %3686 = vbcast.lane.b32.xlu0 %v7863_v7, 264  ;;  %v5815_v12 = vpop.eup %5814  ;;  %v7892_v34 = vmul.f32 0.6931472, %v5807_v3  ;;  %5836 = vpow2.f32 %v2740_v18  ;;  %v2746_v57 = vmul.f32 1.442695, %v2597_v56 }
 0x3da   : > { %v5817_v38 = vpop.eup %5816  ;;  %11542 = vst [vmem:[#allocation247_spill] sm:$0xff] %v7901_v61  ;;  %11544 = vst [vmem:[#allocation249_spill] sm:$0xff] %v7914_v0  ;;  %v2973_v27 = vadd.f32 1.0, %v5815_v12  ;;  %5838 = vlog2.f32 %v2971_v36  ;;  %v2474_v36 = vand.u32 2147483647, %v7914_v0  ;;  %v7944_v56 = vadd.f32 %v7644_v4, %v7161_v9 }
 0x3db   : > { %11536 = vst [vmem:[#allocation241_spill] sm:$0xff] %v7880_v62  ;;  %11539 = vst [vmem:[#allocation244_spill] sm:$0xff] %v7892_v34  ;;  %v7899_v20 = vpop.permute.xlu0 %2022  ;;  %v7903_v5 = vpop.eup %5818  ;;  %v2471_v3 = vand.u32 2147483647, %v7880_v62  ;;  %v7919_v60 = vmul.f32 0.6931472, %v5817_v38  ;;  %v7957_v9 = vadd.f32 %v7644_v4, %v7167_v25  ;;  %v8325_v34 = vadd.f32 %v7644_v4, %v11640_v37 }
 0x3dc   : > { %v7889_v2 = vpop.permute.xlu1 %1975  ;;  %3655 = vbcast.lane.b32.xlu1 %v7717_v29, 336  ;;  %11541 = vst [vmem:[#allocation246_spill] sm:$0xff] %v7899_v20  ;;  %v7910_v20 = vmul.f32 0.6931472, %v5813_v41  ;;  %v7926_v41 = vadd.f32 %v7644_v4, %v7153_v58  ;;  %11551 = vst [vmem:[#allocation256_spill] sm:$0xff] %v7944_v56  ;;  %5840 = vlog2.f32 %v2973_v27  ;;  %v2966_v46 = vadd.f32 1.0, %v7831_v13 }
 0x3dd   : > { %11538 = vst [vmem:[#allocation243_spill] sm:$0xff] %v7889_v2  ;;  %3694 = vbcast.lane.b32.xlu0 %v7863_v7, 280  ;;  %v5821_v2 = vpop.eup %5820  ;;  %11546 = vst [vmem:[#allocation251_spill] sm:$0xff] %v7919_v60  ;;  %v2599_v43 = vsub.f32 0.0, %v2471_v3  ;;  %5842 = vpow2.f32 %v2744_v35  ;;  %v2748_v8 = vmul.f32 1.442695, %v2598_v11 }
 0x3de   : > { %11543 = vst [vmem:[#allocation248_spill] sm:$0xff] %v7910_v20  ;;  %v5823_v51 = vpop.eup %5822  ;;  %11547 = vst [vmem:[#allocation252_spill] sm:$0xff] %v7926_v41  ;;  %v7939_v58 = vmul.f32 0.6931472, %v5821_v2  ;;  %v2601_v12 = vsub.f32 0.0, %v2473_v52  ;;  %5844 = vpow2.f32 %v2746_v57  ;;  %v11630_v20 = vld [vmem:[#allocation31_spill] sm:$0xff] }
 0x3df   : > { %v7921_v18 = vpop.eup %5824  ;;  %v7928_v23 = vpop.permute.xlu0 %2030  ;;  %v2975_v60 = vadd.f32 1.0, %v5823_v51  ;;  %v2475_v2 = vand.u32 2147483647, %v7926_v41  ;;  %v2750_v42 = vmul.f32 1.442695, %v2599_v43  ;;  %11554 = vst [vmem:[#allocation259_spill] sm:$0xff] %v7957_v9  ;;  %v7965_v43 = vadd.f32 %v7644_v4, %v7169_v26 }
 0x3e0   : > { %v7916_v24 = vpop.permute.xlu1 %1983  ;;  %3663 = vbcast.lane.b32.xlu1 %v7717_v29, 352  ;;  %11548 = vst [vmem:[#allocation253_spill] sm:$0xff] %v7928_v23  ;;  %v7933_v38 = vpop.eup %5826  ;;  %11550 = vst [vmem:[#allocation255_spill] sm:$0xff] %v7939_v58  ;;  %v2752_v27 = vmul.f32 1.442695, %v2600_v14  ;;  %v7978_v26 = vadd.f32 %v7644_v4, %v7175_v39 }
 0x3e1   : > { %11545 = vst [vmem:[#allocation250_spill] sm:$0xff] %v7916_v24  ;;  %3702 = vbcast.lane.b32.xlu0 %v7863_v7, 296  ;;  %v5829_v23 = vpop.eup %5828  ;;  %v2476_v11 = vand.u32 2147483647, %v7937_v10  ;;  %5846 = vlog2.f32 %v2975_v60  ;;  %11555 = vst [vmem:[#allocation260_spill] sm:$0xff] %v7965_v43  ;;  %v2974_v21 = vadd.f32 1.0, %v7933_v38 }
 0x3e2   : > { %v7953_v24 = vpop.eup %5830  ;;  %v2977_v52 = vadd.f32 1.0, %v5829_v23  ;;  %5848 = vlog2.f32 %v2966_v46  ;;  %v2754_v14 = vmul.f32 1.442695, %v2601_v12  ;;  %11558 = vst [vmem:[#allocation263_spill] sm:$0xff] %v7978_v26  ;;  %v7985_v12 = vadd.f32 %v7644_v4, %v7177_v40  ;;  %11641 = vst [vmem:[#allocation34_spill] sm:$0xff] %v8325_v34 }
 0x3e3   : > { %v7951_v51 = vpop.permute.xlu0 %2038  ;;  %v5833_v13 = vpop.eup %5832  ;;  %5850 = vpow2.f32 %v2748_v8  ;;  %v2604_v45 = vsub.f32 0.0, %v2476_v11  ;;  %v2479_v60 = vand.u32 2147483647, %v7965_v43  ;;  %v8008_v11 = vadd.f32 %v7644_v4, %v7185_v54 }
 0x3e4   : > { %v7946_v3 = vpop.permute.xlu1 %1991  ;;  %3671 = vbcast.lane.b32.xlu1 %v7717_v29, 368  ;;  %11553 = vst [vmem:[#allocation258_spill] sm:$0xff] %v7951_v51  ;;  %v5835_v35 = vpop.eup %5834  ;;  %v2477_v51 = vand.u32 2147483647, %v7944_v56  ;;  %v2603_v29 = vsub.f32 0.0, %v2475_v2  ;;  %5852 = vpow2.f32 %v2750_v42  ;;  %11560 = vst [vmem:[#allocation265_spill] sm:$0xff] %v7985_v12 }
 0x3e5   : > { %11552 = vst [vmem:[#allocation257_spill] sm:$0xff] %v7946_v3  ;;  %3710 = vbcast.lane.b32.xlu0 %v7863_v7, 312  ;;  %v2602_v3 = vsub.f32 0.0, %v2474_v36  ;;  %v7970_v57 = vpop.eup %5836  ;;  %v2478_v36 = vand.u32 2147483647, %v7957_v9  ;;  %5854 = vlog2.f32 %v2977_v52  ;;  %v2979_v8 = vadd.f32 1.0, %v5835_v35 }
 0x3e6   : > { %v5839_v46 = vpop.eup %5838  ;;  %5856 = vpow2.f32 %v2752_v27  ;;  %v2605_v2 = vsub.f32 0.0, %v2477_v51  ;;  %v2758_v39 = vmul.f32 1.442695, %v2603_v29  ;;  %v2480_v27 = vand.u32 2147483647, %v7978_v26  ;;  %11565 = vst [vmem:[#allocation270_spill] sm:$0xff] %v8008_v11 }
 0x3e7   : > { %v7973_v23 = vpop.permute.xlu0 %2046  ;;  %v2756_v42 = vmul.f32 1.442695, %v2602_v3  ;;  %5858 = vpow2.f32 %v2754_v14  ;;  %v5841_v40 = vpop.eup %5840  ;;  %v2606_v52 = vsub.f32 0.0, %v2478_v36  ;;  %v7998_v3 = vadd.f32 %v7644_v4, %v7183_v53 }
 0x3e8   : > { %v7967_v25 = vpop.permute.xlu1 %2002  ;;  %3682 = vbcast.lane.b32.xlu1 %v7863_v7, 256  ;;  %11557 = vst [vmem:[#allocation262_spill] sm:$0xff] %v7973_v23  ;;  %v8001_v51 = vmul.f32 0.6931472, %v5839_v46  ;;  %v8003_v35 = vpop.eup %5842  ;;  %v2760_v29 = vmul.f32 1.442695, %v2604_v45  ;;  %5860 = vlog2.f32 %v2979_v8  ;;  %v8023_v53 = vadd.f32 %v7644_v4, %v7191_v15 }
 0x3e9   : > { %11556 = vst [vmem:[#allocation261_spill] sm:$0xff] %v7967_v25  ;;  %3718 = vbcast.lane.b32.xlu0 %v7863_v7, 328  ;;  %v7981_v25 = vmul.f32 0.6931472, %v5833_v13  ;;  %11563 = vst [vmem:[#allocation268_spill] sm:$0xff] %v7998_v3  ;;  %v5845_v36 = vpop.eup %5844  ;;  %5862 = vpow2.f32 %v2756_v42  ;;  %v2968_v54 = vadd.f32 1.0, %v7837_v44  ;;  %v8031_v44 = vadd.f32 %v7644_v4, %v7193_v16 }
 0x3ea   : > { %11564 = vst [vmem:[#allocation269_spill] sm:$0xff] %v8001_v51  ;;  %v2481_v14 = vand.u32 2147483647, %v7985_v12  ;;  %v2762_v13 = vmul.f32 1.442695, %v2605_v2  ;;  %5864 = vpow2.f32 %v2758_v39  ;;  %v2608_v2 = vsub.f32 0.0, %v2480_v27 }
 0x3eb   : > { %11559 = vst [vmem:[#allocation264_spill] sm:$0xff] %v7981_v25  ;;  %v7993_v33 = vpop.permute.xlu0 %2054  ;;  %v5847_v46 = vpop.eup %5846  ;;  %v8017_v41 = vmul.f32 0.6931472, %v5841_v40  ;;  %v2764_v42 = vmul.f32 1.442695, %v2606_v52  ;;  %11569 = vst [vmem:[#allocation274_spill] sm:$0xff] %v8023_v53  ;;  %5866 = vpow2.f32 %v2760_v29 }
 0x3ec   : > { %v7988_v23 = vpop.permute.xlu1 %2010  ;;  %3690 = vbcast.lane.b32.xlu1 %v7863_v7, 272  ;;  %11562 = vst [vmem:[#allocation267_spill] sm:$0xff] %v7993_v33  ;;  %v2607_v33 = vsub.f32 0.0, %v2479_v60  ;;  %v5849_v8 = vpop.eup %5848  ;;  %v2482_v60 = vand.u32 2147483647, %v7998_v3  ;;  %v2609_v45 = vsub.f32 0.0, %v2481_v14  ;;  %5868 = vpow2.f32 %v2762_v13 }
 0x3ed   : > { %11561 = vst [vmem:[#allocation266_spill] sm:$0xff] %v7988_v23  ;;  %3726 = vbcast.lane.b32.xlu0 %v7863_v7, 344  ;;  %11568 = vst [vmem:[#allocation273_spill] sm:$0xff] %v8017_v41  ;;  %v8026_v39 = vpop.eup %5850  ;;  %v2483_v40 = vand.u32 2147483647, %v8008_v11  ;;  %5870 = vlog2.f32 %v2968_v54  ;;  %v2981_v16 = vadd.f32 1.0, %v5845_v36  ;;  %v8057_v36 = vadd.f32 %v7644_v4, %v7201_v32 }
 0x3ee   : > { %11570 = vst [vmem:[#allocation275_spill] sm:$0xff] %v8031_v44  ;;  %v5853_v52 = vpop.eup %5852  ;;  %v2766_v27 = vmul.f32 1.442695, %v2607_v33  ;;  %v8042_v14 = vmul.f32 0.6931472, %v5847_v46  ;;  %5872 = vpow2.f32 %v2764_v42  ;;  %v8053_v46 = vadd.f32 %v7644_v4, %v7199_v31  ;;  %v11598_v3 = vld [vmem:[#allocation22_spill] sm:$0xff] }
 0x3ef   : > { %v8015_v0 = vpop.permute.xlu0 %2062  ;;  %v8038_v10 = vpop.eup %5854  ;;  %v8044_v56 = vmul.f32 0.6931472, %v5849_v8  ;;  %v2768_v33 = vmul.f32 1.442695, %v2608_v2  ;;  %v2484_v15 = vand.u32 2147483647, %v8023_v53  ;;  %v8072_v31 = vadd.f32 %v7644_v4, %v7207_v49 }
 0x3f0   : > { %v8011_v23 = vpop.permute.xlu1 %2018  ;;  %3698 = vbcast.lane.b32.xlu1 %v7863_v7, 288  ;;  %11567 = vst [vmem:[#allocation272_spill] sm:$0xff] %v8015_v0  ;;  %11573 = vst [vmem:[#allocation278_spill] sm:$0xff] %v8042_v14  ;;  %v8046_v13 = vpop.eup %5856  ;;  %v2610_v0 = vsub.f32 0.0, %v2482_v60  ;;  %v2770_v9 = vmul.f32 1.442695, %v2609_v45  ;;  %5874 = vpow2.f32 %v2766_v27 }
 0x3f1   : > { %11566 = vst [vmem:[#allocation271_spill] sm:$0xff] %v8011_v23  ;;  %3734 = vbcast.lane.b32.xlu0 %v7863_v7, 360  ;;  %11574 = vst [vmem:[#allocation279_spill] sm:$0xff] %v8044_v56  ;;  %v2611_v43 = vsub.f32 0.0, %v2483_v40  ;;  %v2485_v62 = vand.u32 2147483647, %v8031_v44  ;;  %5876 = vlog2.f32 %v2981_v16 }
 0x3f2   : > { %11575 = vst [vmem:[#allocation280_spill] sm:$0xff] %v8053_v46  ;;  %11576 = vst [vmem:[#allocation281_spill] sm:$0xff] %v8057_v36  ;;  %v11577_v54 = vsub.s32 4, %v6887_v1  ;;  %v2970_v45 = vadd.f32 1.0, %v7903_v5  ;;  %v2983_v40 = vadd.f32 1.0, %v5853_v52  ;;  %5878 = vpow2.f32 %v2768_v33 }
 0x3f3   : > { %v8040_v29 = vpop.permute.xlu0 %3485  ;;  %11579 = vst [vmem:[#allocation283_spill] sm:$0xff] %v8072_v31  ;;  %v8081_v5 = vadd.f32 %v7644_v4, %v7209_v50  ;;  %5880 = vpow2.f32 %v2770_v9  ;;  %v2774_v49 = vmul.f32 1.442695, %v2611_v43  ;;  %v2613_v56 = vsub.f32 0.0, %v2485_v62  ;;  %v11584_v62 = vld [vmem:[#allocation18_spill] sm:$0xff] }
 0x3f4   : > { %v8035_v23 = vpop.permute.xlu1 %2026  ;;  %3706 = vbcast.lane.b32.xlu1 %v7863_v7, 304  ;;  %11572 = vst [vmem:[#allocation277_spill] sm:$0xff] %v8040_v29  ;;  %v8062_v8 = vrot.slane %v7584_v6, %v11577_v54  ;;  %v2772_v54 = vmul.f32 1.442695, %v2610_v0  ;;  %v2486_v32 = vand.u32 2147483647, %v8053_v46  ;;  %v8088_v52 = vadd.f32 %v7644_v4, %v7215_v17 }
 0x3f5   : > { %11571 = vst [vmem:[#allocation276_spill] sm:$0xff] %v8035_v23  ;;  %3742 = vbcast.lane.b32.xlu0 %v7863_v7, 376  ;;  %v5859_v23 = vpop.eup %5858  ;;  %11581 = vst [vmem:[#allocation285_spill] sm:$0xff] %v8081_v5  ;;  %v2487_v16 = vand.u32 2147483647, %v8057_v36  ;;  %5882 = vlog2.f32 %v2970_v45  ;;  %v2972_v50 = vadd.f32 1.0, %v7921_v18  ;;  %v8099_v43 = vadd.f32 %v7644_v4, %v11584_v62 }
 0x3f6   : > { %v8068_v2 = vpop.eup %5860  ;;  %11582 = vst [vmem:[#allocation286_spill] sm:$0xff] %v8088_v52  ;;  %v2488_v9 = vand.u32 2147483647, %v8072_v31  ;;  %5884 = vlog2.f32 %v2983_v40  ;;  %v2985_v17 = vadd.f32 1.0, %v5859_v23  ;;  %v2489_v45 = vand.u32 2147483647, %v8081_v5 }
 0x3f7   : > { %v8075_v60 = vpop.permute.xlu0 %3493  ;;  %v8077_v27 = vpop.eup %5862  ;;  %11585 = vst [vmem:[#allocation18_spill] sm:$0xff] %v8099_v43  ;;  %5886 = vpow2.f32 %v2772_v54  ;;  %v2778_v51 = vmul.f32 1.442695, %v2613_v56  ;;  %v2614_v62 = vsub.f32 0.0, %v2486_v32  ;;  %v2615_v23 = vsub.f32 0.0, %v2487_v16  ;;  %v11587_v54 = vld [vmem:[#allocation19_spill] sm:$0xff] }
 0x3f8   : > { %v8064_v42 = vpop.permute.xlu1 %2034  ;;  %3714 = vbcast.lane.b32.xlu1 %v7863_v7, 320  ;;  %11580 = vst [vmem:[#allocation284_spill] sm:$0xff] %v8075_v60  ;;  %v5865_v14 = vpop.eup %5864  ;;  %5888 = vpow2.f32 %v2774_v49  ;;  %v2490_v40 = vand.u32 2147483647, %v8088_v52  ;;  %v2616_v18 = vsub.f32 0.0, %v2488_v9  ;;  %v11590_v32 = vld [vmem:[#allocation20_spill] sm:$0xff] }
 0x3f9   : > { %11578 = vst [vmem:[#allocation282_spill] sm:$0xff] %v8064_v42  ;;  %v2612_v42 = vsub.f32 0.0, %v2484_v15  ;;  %3753 = vbcast.lane.b32.xlu0 %v8062_v8, 264  ;;  %v8094_v15 = vpop.eup %5866  ;;  %5890 = vlog2.f32 %v2972_v50  ;;  %v2491_v56 = vand.u32 2147483647, %v8099_v43  ;;  %v8124_v38 = vadd.f32 %v7644_v4, %v11590_v32 }
 0x3fa   : > { %v8103_v12 = vpop.eup %5868  ;;  %5892 = vlog2.f32 %v2985_v17  ;;  %v2987_v50 = vadd.f32 1.0, %v5865_v14  ;;  %v2780_v26 = vmul.f32 1.442695, %v2614_v62  ;;  %v2782_v17 = vmul.f32 1.442695, %v2615_v23 }
 0x3fb   : > { %v8101_v33 = vpop.permute.xlu0 %3501  ;;  %v8108_v41 = vpop.eup %5870  ;;  %11591 = vst [vmem:[#allocation20_spill] sm:$0xff] %v8124_v38  ;;  %v2784_v14 = vmul.f32 1.442695, %v2616_v18  ;;  %v2619_v62 = vsub.f32 0.0, %v2491_v56  ;;  %v2493_v32 = vand.u32 2147483647, %v8124_v38 }
 0x3fc   : > { %v8090_v0 = vpop.permute.xlu1 %2042  ;;  %3722 = vbcast.lane.b32.xlu1 %v7863_v7, 336  ;;  %11586 = vst [vmem:[#allocation288_spill] sm:$0xff] %v8101_v33  ;;  %v8111_v61 = vpop.eup %5872  ;;  %v2507_v37 = vand.u32 2147483647, %v8325_v34 }
 0x3fd   : > { %11583 = vst [vmem:[#allocation287_spill] sm:$0xff] %v8090_v0  ;;  %v2776_v0 = vmul.f32 1.442695, %v2612_v42  ;;  %3761 = vbcast.lane.b32.xlu0 %v8062_v8, 280  ;;  %v8116_v42 = vadd.f32 %v7644_v4, %v11587_v54  ;;  %v8128_v16 = vpop.eup %5874  ;;  %v2617_v54 = vsub.f32 0.0, %v2489_v45  ;;  %v11594_v45 = vld [vmem:[#allocation21_spill] sm:$0xff] }
 0x3fe   : > { %v5877_v9 = vpop.eup %5876  ;;  %v8141_v58 = vadd.f32 %v7644_v4, %v11594_v45  ;;  %v8155_v45 = vadd.f32 %v7644_v4, %v11598_v3  ;;  %v2621_v56 = vsub.f32 0.0, %v2493_v32  ;;  %v11606_v32 = vld [vmem:[#allocation24_spill] sm:$0xff] }
 0x3ff   : > { %11588 = vst [vmem:[#allocation19_spill] sm:$0xff] %v8116_v42  ;;  %v8126_v49 = vpop.permute.xlu0 %3509  ;;  %5894 = vpow2.f32 %v2776_v0  ;;  %v8136_v28 = vpop.eup %5878  ;;  %v2492_v0 = vand.u32 2147483647, %v8116_v42  ;;  %v8201_v36 = vmul.f32 0.6931472, %v5877_v9  ;;  %v2978_v9 = vadd.f32 1.0, %v7970_v57 }
 0x400   : > { %v8118_v25 = vpop.permute.xlu1 %2050  ;;  %3730 = vbcast.lane.b32.xlu1 %v7863_v7, 352  ;;  %11592 = vst [vmem:[#allocation290_spill] sm:$0xff] %v8126_v49  ;;  %5896 = vpow2.f32 %v2778_v51  ;;  %v2618_v49 = vsub.f32 0.0, %v2490_v40  ;;  %11595 = vst [vmem:[#allocation21_spill] sm:$0xff] %v8141_v58  ;;  %v8146_v51 = vpop.eup %5880  ;;  %v2786_v40 = vmul.f32 1.442695, %v2617_v54 }
 0x401   : > { %11589 = vst [vmem:[#allocation289_spill] sm:$0xff] %v8118_v25  ;;  %3769 = vbcast.lane.b32.xlu0 %v8062_v8, 296  ;;  %v8132_v25 = vmul.f32 0.6931472, %v8038_v10  ;;  %5898 = vlog2.f32 %v2974_v21  ;;  %v8151_v23 = vpop.eup %5882  ;;  %11599 = vst [vmem:[#allocation22_spill] sm:$0xff] %v8155_v45  ;;  %v2620_v11 = vsub.f32 0.0, %v2492_v0 }
 0x402   : > { %5900 = vlog2.f32 %v2987_v50  ;;  %v8161_v18 = vpop.eup %5884  ;;  %v2788_v3 = vmul.f32 1.442695, %v2618_v49  ;;  %v2495_v49 = vand.u32 2147483647, %v8155_v45  ;;  %11609 = vst [vmem:[#allocation299_spill] sm:$0xff] %v8201_v36  ;;  %v11615_v36 = vld [vmem:[#allocation27_spill] sm:$0xff] }
 0x403   : > { %11593 = vst [vmem:[#allocation291_spill] sm:$0xff] %v8132_v25  ;;  %v8149_v19 = vpop.permute.xlu0 %3517  ;;  %5902 = vpow2.f32 %v2780_v26  ;;  %v8166_v54 = vpop.eup %5886  ;;  %v2494_v25 = vand.u32 2147483647, %v8141_v58  ;;  %v2790_v26 = vmul.f32 1.442695, %v2619_v62  ;;  %v8192_v62 = vadd.f32 %v7644_v4, %v11606_v32  ;;  %v11649_v45 = vld [vmem:[#allocation36_spill] sm:$0xff] }
 0x404   : > { %v8143_v10 = vpop.permute.xlu1 %2058  ;;  %3738 = vbcast.lane.b32.xlu1 %v7863_v7, 368  ;;  %11597 = vst [vmem:[#allocation293_spill] sm:$0xff] %v8149_v19  ;;  %v8159_v7 = vmul.f32 0.6931472, %v8068_v2  ;;  %5904 = vpow2.f32 %v2782_v17  ;;  %v8172_v50 = vpop.eup %5888  ;;  %v11604_v17 = vld [vmem:[#allocation23_spill] sm:$0xff]  ;;  %v11610_v19 = vld [vmem:[#allocation25_spill] sm:$0xff] }
 0x405   : > { %11596 = vst [vmem:[#allocation292_spill] sm:$0xff] %v8143_v10  ;;  %3777 = vbcast.lane.b32.xlu0 %v8062_v8, 312  ;;  %v2976_v10 = vadd.f32 1.0, %v7953_v24  ;;  %5906 = vpow2.f32 %v2784_v14  ;;  %v8177_v24 = vmul.f32 0.6931472, %v8108_v41  ;;  %v8179_v21 = vpop.eup %5890  ;;  %v8184_v0 = vadd.f32 %v7644_v4, %v11604_v17  ;;  %11607 = vst [vmem:[#allocation24_spill] sm:$0xff] %v8192_v62 }
 0x406   : > { %11600 = vst [vmem:[#allocation294_spill] sm:$0xff] %v8159_v7  ;;  %5908 = vpow2.f32 %v2786_v40  ;;  %v8188_v14 = vpop.eup %5892  ;;  %v2989_v40 = vadd.f32 1.0, %v8103_v12  ;;  %v2792_v17 = vmul.f32 1.442695, %v2620_v11  ;;  %v2794_v32 = vmul.f32 1.442695, %v2621_v56 }
 0x407   : > { %v8174_v44 = vpop.permute.xlu0 %3525  ;;  %11603 = vst [vmem:[#allocation297_spill] sm:$0xff] %v8177_v24  ;;  %11605 = vst [vmem:[#allocation23_spill] sm:$0xff] %v8184_v0  ;;  %5910 = vlog2.f32 %v2976_v10  ;;  %v2622_v24 = vsub.f32 0.0, %v2494_v25  ;;  %v8207_v10 = vadd.f32 %v7644_v4, %v11610_v19  ;;  %v2623_v11 = vsub.f32 0.0, %v2495_v49 }
 0x408   : > { %3749 = vbcast.lane.b32.xlu1 %v8062_v8, 256  ;;  %v8170_v2 = vpop.permute.xlu1 %3481  ;;  %11602 = vst [vmem:[#allocation296_spill] sm:$0xff] %v8174_v44  ;;  %5912 = vpow2.f32 %v2788_v3  ;;  %v2496_v25 = vand.u32 2147483647, %v8184_v0  ;;  %v11613_v3 = vld [vmem:[#allocation26_spill] sm:$0xff]  ;;  %v2991_v12 = vadd.f32 1.0, %v8128_v16 }
 0x409   : > { %11601 = vst [vmem:[#allocation295_spill] sm:$0xff] %v8170_v2  ;;  %3785 = vbcast.lane.b32.xlu0 %v8062_v8, 328  ;;  %v8196_v7 = vpop.eup %5894  ;;  %5914 = vpow2.f32 %v2790_v26  ;;  %11611 = vst [vmem:[#allocation25_spill] sm:$0xff] %v8207_v10  ;;  %v8215_v46 = vadd.f32 %v7644_v4, %v11613_v3  ;;  %v2497_v19 = vand.u32 2147483647, %v8192_v62  ;;  %v8228_v3 = vadd.f32 %v7644_v4, %v11615_v36  ;;  %v11622_v2 = vld [vmem:[#allocation29_spill] sm:$0xff] }
 0x40a   : > { %v8203_v44 = vpop.eup %5896  ;;  %5916 = vlog2.f32 %v2989_v40  ;;  %v2796_v5 = vmul.f32 1.442695, %v2622_v24  ;;  %v2498_v16 = vand.u32 2147483647, %v8207_v10  ;;  %v11619_v40 = vld [vmem:[#allocation28_spill] sm:$0xff]  ;;  %v2980_v24 = vadd.f32 1.0, %v8003_v35 }
 0x40b   : > { %v8210_v41 = vpop.permute.xlu0 %3533  ;;  %11614 = vst [vmem:[#allocation26_spill] sm:$0xff] %v8215_v46  ;;  %v8219_v56 = vpop.eup %5898  ;;  %5918 = vpow2.f32 %v2792_v17  ;;  %11616 = vst [vmem:[#allocation27_spill] sm:$0xff] %v8228_v3  ;;  %v8241_v17 = vadd.f32 %v7644_v4, %v11619_v40  ;;  %v2798_v31 = vmul.f32 1.442695, %v2623_v11  ;;  %v8254_v40 = vadd.f32 %v7644_v4, %v11622_v2  ;;  %v11626_v35 = vld [vmem:[#allocation30_spill] sm:$0xff] }
 0x40c   : > { %3757 = vbcast.lane.b32.xlu1 %v8062_v8, 272  ;;  %v8199_v53 = vpop.permute.xlu1 %3489  ;;  %11612 = vst [vmem:[#allocation300_spill] sm:$0xff] %v8210_v41  ;;  %v8224_v49 = vpop.eup %5900  ;;  %v8234_v41 = vmul.f32 0.6931472, %v8151_v23  ;;  %5920 = vpow2.f32 %v2794_v32  ;;  %v2499_v23 = vand.u32 2147483647, %v8215_v46  ;;  %v8272_v48 = vadd.f32 %v7644_v4, %v11626_v35 }
 0x40d   : > { %11608 = vst [vmem:[#allocation298_spill] sm:$0xff] %v8199_v53  ;;  %3793 = vbcast.lane.b32.xlu0 %v8062_v8, 344  ;;  %v8236_v53 = vpop.eup %5902  ;;  %11620 = vst [vmem:[#allocation28_spill] sm:$0xff] %v8241_v17  ;;  %5922 = vlog2.f32 %v2978_v9  ;;  %v2500_v11 = vand.u32 2147483647, %v8228_v3  ;;  %v2626_v2 = vsub.f32 0.0, %v2498_v16 }
 0x40e   : > { %11618 = vst [vmem:[#allocation302_spill] sm:$0xff] %v8234_v41  ;;  %v8246_v26 = vpop.eup %5904  ;;  %v2625_v41 = vsub.f32 0.0, %v2497_v19  ;;  %11623 = vst [vmem:[#allocation29_spill] sm:$0xff] %v8254_v40  ;;  %5924 = vlog2.f32 %v2991_v12  ;;  %v8265_v19 = vmul.f32 0.6931472, %v8161_v18  ;;  %v2627_v33 = vsub.f32 0.0, %v2499_v23 }
 0x40f   : > { %v8244_v36 = vpop.permute.xlu0 %3541  ;;  %v8250_v32 = vpop.eup %5906  ;;  %5926 = vpow2.f32 %v2796_v5  ;;  %v2501_v12 = vand.u32 2147483647, %v8241_v17  ;;  %11627 = vst [vmem:[#allocation30_spill] sm:$0xff] %v8272_v48  ;;  %v8281_v18 = vmul.f32 0.6931472, %v8179_v21  ;;  %v2982_v23 = vadd.f32 1.0, %v8026_v39 }
 0x410   : > { %3765 = vbcast.lane.b32.xlu1 %v8062_v8, 288  ;;  %v8231_v57 = vpop.permute.xlu1 %3497  ;;  %11621 = vst [vmem:[#allocation303_spill] sm:$0xff] %v8244_v36  ;;  %v8257_v43 = vpop.eup %5908  ;;  %11625 = vst [vmem:[#allocation305_spill] sm:$0xff] %v8265_v19  ;;  %5928 = vpow2.f32 %v2798_v31  ;;  %v2802_v19 = vmul.f32 1.442695, %v2625_v41  ;;  %v8292_v31 = vadd.f32 %v7644_v4, %v11632_v22  ;;  %v11657_v62 = vld [vmem:[#allocation38_spill] sm:$0xff] }
 0x411   : > { %11617 = vst [vmem:[#allocation301_spill] sm:$0xff] %v8231_v57  ;;  %v2624_v57 = vsub.f32 0.0, %v2496_v25  ;;  %3801 = vbcast.lane.b32.xlu0 %v8062_v8, 360  ;;  %v8267_v36 = vpop.eup %5910  ;;  %v2993_v25 = vadd.f32 1.0, %v8146_v51  ;;  %11629 = vst [vmem:[#allocation307_spill] sm:$0xff] %v8281_v18  ;;  %5930 = vlog2.f32 %v2980_v24  ;;  %v2628_v51 = vsub.f32 0.0, %v2500_v11 }
 0x412   : > { %v8277_v52 = vpop.eup %5912  ;;  %v2502_v35 = vand.u32 2147483647, %v8254_v40  ;;  %11633 = vst [vmem:[#allocation32_spill] sm:$0xff] %v8292_v31  ;;  %v2629_v24 = vsub.f32 0.0, %v2501_v12  ;;  %v2503_v11 = vand.u32 2147483647, %v8272_v48 }
 0x413   : > { %v8274_v5 = vpop.permute.xlu0 %3552  ;;  %v8283_v16 = vpop.eup %5914  ;;  %5932 = vlog2.f32 %v2993_v25  ;;  %v11729_v48 = vld [vmem:[#allocation58_spill] sm:$0xff] }
 0x414   : > { %3773 = vbcast.lane.b32.xlu1 %v8062_v8, 304  ;;  %v8262_v9 = vpop.permute.xlu1 %3505  ;;  %11628 = vst [vmem:[#allocation306_spill] sm:$0xff] %v8274_v5  ;;  %v8288_v5 = vadd.f32 %v7644_v4, %v11630_v20  ;;  %v8303_v18 = vpop.eup %5916  ;;  %v2804_v20 = vmul.f32 1.442695, %v2626_v2  ;;  %v2630_v2 = vsub.f32 0.0, %v2502_v35 }
 0x415   : > { %11624 = vst [vmem:[#allocation304_spill] sm:$0xff] %v8262_v9  ;;  %v2800_v9 = vmul.f32 1.442695, %v2624_v57  ;;  %3809 = vbcast.lane.b32.xlu0 %v8062_v8, 376  ;;  %v11634_v57 = vsub.s32 5, %v6887_v1  ;;  %v8308_v22 = vpop.eup %5918 }
 0x416   : > { %11631 = vst [vmem:[#allocation31_spill] sm:$0xff] %v8288_v5  ;;  %11637 = vst [vmem:[#allocation310_spill] sm:$0xff] %v8308_v22  ;;  %v8313_v39 = vpop.eup %5920  ;;  %v2504_v12 = vand.u32 2147483647, %v8288_v5  ;;  %v2810_v35 = vmul.f32 1.442695, %v2629_v24 }
 0x417   : > { %v8297_v21 = vrot.slane %v7584_v6, %v11634_v57  ;;  %v8306_v60 = vpop.permute.xlu0 %3560  ;;  %5934 = vpow2.f32 %v2800_v9  ;;  %v2806_v57 = vmul.f32 1.442695, %v2627_v33  ;;  %v8320_v25 = vpop.eup %5922  ;;  %v2808_v9 = vmul.f32 1.442695, %v2628_v51  ;;  %v11690_v22 = vld [vmem:[#allocation48_spill] sm:$0xff] }
 0x418   : > { %3781 = vbcast.lane.b32.xlu1 %v8062_v8, 320  ;;  %v8300_v41 = vpop.permute.xlu1 %3513  ;;  %11636 = vst [vmem:[#allocation309_spill] sm:$0xff] %v8306_v60  ;;  %5936 = vpow2.f32 %v2802_v19  ;;  %v2505_v33 = vand.u32 2147483647, %v8292_v31  ;;  %v8330_v19 = vpop.eup %5924  ;;  %v8335_v51 = vmul.f32 0.6931472, %v8188_v14 }
 0x419   : > { %11635 = vst [vmem:[#allocation308_spill] sm:$0xff] %v8300_v41  ;;  %3820 = vbcast.lane.b32.xlu0 %v8297_v21, 264  ;;  %v11638_v41 = vld [vmem:[#allocation33_spill] sm:$0xff]  ;;  %5938 = vlog2.f32 %v2982_v23  ;;  %v8337_v55 = vpop.eup %5926  ;;  %v2995_v23 = vadd.f32 1.0, %v8172_v50  ;;  %v2632_v24 = vsub.f32 0.0, %v2504_v12  ;;  %v11737_v31 = vld [vmem:[#allocation60_spill] sm:$0xff] }
 0x41a   : > { %v8318_v60 = vadd.f32 %v7644_v4, %v11638_v41  ;;  %5940 = vpow2.f32 %v2804_v20  ;;  %v2631_v41 = vsub.f32 0.0, %v2503_v11  ;;  %11644 = vst [vmem:[#allocation313_spill] sm:$0xff] %v8335_v51  ;;  %11645 = vst [vmem:[#allocation314_spill] sm:$0xff] %v8337_v55  ;;  %v2812_v20 = vmul.f32 1.442695, %v2630_v2  ;;  %v8350_v51 = vpop.eup %5928  ;;  %v11686_v55 = vld [vmem:[#allocation47_spill] sm:$0xff] }
 0x41b   : > { %v8332_v38 = vpop.permute.xlu0 %3568  ;;  %5942 = vpow2.f32 %v2806_v57  ;;  %v2633_v57 = vsub.f32 0.0, %v2505_v33  ;;  %v8360_v2 = vpop.eup %5930  ;;  %v8588_v17 = vmul.f32 0.6931472, %v8320_v25 }
 0x41c   : > { %11639 = vst [vmem:[#allocation33_spill] sm:$0xff] %v8318_v60  ;;  %3789 = vbcast.lane.b32.xlu1 %v8062_v8, 336  ;;  %v8328_v42 = vpop.permute.xlu1 %3521  ;;  %11643 = vst [vmem:[#allocation312_spill] sm:$0xff] %v8332_v38  ;;  %v2506_v11 = vand.u32 2147483647, %v8318_v60  ;;  %v11647_v38 = vld [vmem:[#allocation35_spill] sm:$0xff]  ;;  %5944 = vpow2.f32 %v2808_v9 }
 0x41d   : > { %11642 = vst [vmem:[#allocation311_spill] sm:$0xff] %v8328_v42  ;;  %3828 = vbcast.lane.b32.xlu0 %v8297_v21, 280  ;;  %v8342_v42 = vmul.f32 0.6931472, %v8219_v56  ;;  %v8348_v14 = vadd.f32 %v7644_v4, %v11647_v38  ;;  %v8355_v56 = vadd.f32 %v7644_v4, %v11649_v45  ;;  %5946 = vpow2.f32 %v2810_v35  ;;  %v11652_v38 = vld [vmem:[#allocation37_spill] sm:$0xff]  ;;  %v8375_v35 = vpop.eup %5932  ;;  %v11752_v60 = vld [vmem:[#allocation64_spill] sm:$0xff] }
 0x41e   : > { %v2814_v12 = vmul.f32 1.442695, %v2631_v41  ;;  %v8372_v45 = vmul.f32 0.6931472, %v8224_v49  ;;  %5948 = vlog2.f32 %v2995_v23  ;;  %v2816_v41 = vmul.f32 1.442695, %v2632_v24 }
 0x41f   : > { %11646 = vst [vmem:[#allocation315_spill] sm:$0xff] %v8342_v42  ;;  %11648 = vst [vmem:[#allocation35_spill] sm:$0xff] %v8348_v14  ;;  %v8364_v42 = vadd.f32 %v7644_v4, %v11652_v38  ;;  %v8367_v33 = vpop.permute.xlu0 %3576  ;;  %5950 = vpow2.f32 %v2812_v20  ;;  %v2634_v38 = vsub.f32 0.0, %v2506_v11  ;;  %v2508_v30 = vand.u32 2147483647, %v8348_v14  ;;  %v11759_v14 = vld [vmem:[#allocation66_spill] sm:$0xff] }
 0x420   : > { %11650 = vst [vmem:[#allocation36_spill] sm:$0xff] %v8355_v56  ;;  %3797 = vbcast.lane.b32.xlu1 %v8062_v8, 352  ;;  %v8358_v50 = vpop.permute.xlu1 %3529  ;;  %11654 = vst [vmem:[#allocation317_spill] sm:$0xff] %v8367_v33  ;;  %v2818_v58 = vmul.f32 1.442695, %v2633_v57  ;;  %v2635_v33 = vsub.f32 0.0, %v2507_v37  ;;  %v8383_v49 = vadd.f32 %v7644_v4, %v11657_v62  ;;  %5952 = vpow2.f32 %v2814_v12 }
 0x421   : > { %11651 = vst [vmem:[#allocation316_spill] sm:$0xff] %v8358_v50  ;;  %11653 = vst [vmem:[#allocation37_spill] sm:$0xff] %v8364_v42  ;;  %3836 = vbcast.lane.b32.xlu0 %v8297_v21, 296  ;;  %v2984_v50 = vadd.f32 1.0, %v8046_v13  ;;  %v8378_v9 = vpop.eup %5934  ;;  %v2509_v29 = vand.u32 2147483647, %v8355_v56 }
 0x422   : > { %11655 = vst [vmem:[#allocation318_spill] sm:$0xff] %v8372_v45  ;;  %11656 = vst [vmem:[#allocation319_spill] sm:$0xff] %v8378_v9  ;;  %v8388_v23 = vpop.eup %5936  ;;  %v2510_v20 = vand.u32 2147483647, %v8364_v42  ;;  %v2997_v37 = vadd.f32 1.0, %v8203_v44  ;;  %v2986_v12 = vadd.f32 1.0, %v8077_v27 }
 0x423   : > { %11658 = vst [vmem:[#allocation38_spill] sm:$0xff] %v8383_v49  ;;  %v8392_v11 = vpop.permute.xlu0 %3584  ;;  %v8395_v57 = vpop.eup %5938  ;;  %5954 = vlog2.f32 %v2984_v50  ;;  %v2820_v24 = vmul.f32 1.442695, %v2634_v38  ;;  %v2636_v0 = vsub.f32 0.0, %v2508_v30  ;;  %v2822_v62 = vmul.f32 1.442695, %v2635_v33 }
 0x424   : > { %3805 = vbcast.lane.b32.xlu1 %v8062_v8, 368  ;;  %v8386_v13 = vpop.permute.xlu1 %3537  ;;  %11660 = vst [vmem:[#allocation321_spill] sm:$0xff] %v8392_v11  ;;  %v8400_v8 = vmul.f32 0.6931472, %v8267_v36  ;;  %v8403_v45 = vpop.eup %5940  ;;  %5956 = vpow2.f32 %v2816_v41  ;;  %v11663_v11 = vld [vmem:[#allocation39_spill] sm:$0xff]  ;;  %v2637_v46 = vsub.f32 0.0, %v2509_v29 }
 0x425   : > { %11659 = vst [vmem:[#allocation320_spill] sm:$0xff] %v8386_v13  ;;  %3844 = vbcast.lane.b32.xlu0 %v8297_v21, 312  ;;  %11662 = vst [vmem:[#allocation323_spill] sm:$0xff] %v8403_v45  ;;  %v8407_v44 = vadd.f32 %v7644_v4, %v11663_v11  ;;  %v8409_v13 = vpop.eup %5942  ;;  %5958 = vpow2.f32 %v2818_v58  ;;  %v2511_v36 = vand.u32 2147483647, %v8383_v49  ;;  %v2638_v27 = vsub.f32 0.0, %v2510_v20 }
 0x426   : > { %11661 = vst [vmem:[#allocation322_spill] sm:$0xff] %v8400_v8  ;;  %v11666_v8 = vld [vmem:[#allocation40_spill] sm:$0xff]  ;;  %5960 = vlog2.f32 %v2997_v37  ;;  %v2999_v38 = vadd.f32 1.0, %v8246_v26  ;;  %v8422_v11 = vpop.eup %5944  ;;  %v11670_v58 = vld [vmem:[#allocation41_spill] sm:$0xff]  ;;  %v11672_v33 = vld [vmem:[#allocation42_spill] sm:$0xff]  ;;  %v2988_v20 = vadd.f32 1.0, %v8094_v15 }
 0x427   : > { %11664 = vst [vmem:[#allocation39_spill] sm:$0xff] %v8407_v44  ;;  %v8417_v41 = vadd.f32 %v7644_v4, %v11666_v8  ;;  %v8419_v30 = vpop.permute.xlu0 %3592  ;;  %11669 = vst [vmem:[#allocation326_spill] sm:$0xff] %v8422_v11  ;;  %v8426_v29 = vadd.f32 %v7644_v4, %v11670_v58  ;;  %v8430_v45 = vadd.f32 %v7644_v4, %v11672_v33  ;;  %5962 = vlog2.f32 %v2986_v12  ;;  %v8434_v8 = vpop.eup %5946 }
 0x428   : > { %3816 = vbcast.lane.b32.xlu1 %v8297_v21, 256  ;;  %v8413_v50 = vpop.permute.xlu1 %3548  ;;  %11668 = vst [vmem:[#allocation325_spill] sm:$0xff] %v8419_v30  ;;  %5964 = vpow2.f32 %v2820_v24  ;;  %v2824_v37 = vmul.f32 1.442695, %v2636_v0  ;;  %v2512_v26 = vand.u32 2147483647, %v8407_v44  ;;  %v8441_v58 = vpop.eup %5948 }
 0x429   : > { %11665 = vst [vmem:[#allocation324_spill] sm:$0xff] %v8413_v50  ;;  %11667 = vst [vmem:[#allocation40_spill] sm:$0xff] %v8417_v41  ;;  %3852 = vbcast.lane.b32.xlu0 %v8297_v21, 328  ;;  %v11674_v30 = vld [vmem:[#allocation43_spill] sm:$0xff]  ;;  %5966 = vpow2.f32 %v2822_v62  ;;  %v2826_v33 = vmul.f32 1.442695, %v2637_v46  ;;  %v8447_v63 = vpop.eup %5950 }
 0x42a   : > { %11671 = vst [vmem:[#allocation41_spill] sm:$0xff] %v8426_v29  ;;  %11673 = vst [vmem:[#allocation42_spill] sm:$0xff] %v8430_v45  ;;  %v8439_v50 = vadd.f32 %v7644_v4, %v11674_v30  ;;  %v2639_v11 = vsub.f32 0.0, %v2511_v36  ;;  %v3001_v15 = vadd.f32 1.0, %v8257_v43  ;;  %v2828_v0 = vmul.f32 1.442695, %v2638_v27  ;;  %v8463_v43 = vpop.eup %5952 }
 0x42b   : > { %11677 = vst [vmem:[#allocation328_spill] sm:$0xff] %v8447_v63  ;;  %v2513_v24 = vand.u32 2147483647, %v8417_v41  ;;  %v8452_v30 = vadd.f32 %v7644_v4, %v11678_v47  ;;  %v8454_v9 = vpop.permute.xlu0 %3600  ;;  %5968 = vlog2.f32 %v2999_v38  ;;  %v2514_v46 = vand.u32 2147483647, %v8426_v29  ;;  %v11681_v36 = vld [vmem:[#allocation45_spill] sm:$0xff] }
 0x42c   : > { %11675 = vst [vmem:[#allocation43_spill] sm:$0xff] %v8439_v50  ;;  %3824 = vbcast.lane.b32.xlu1 %v8297_v21, 272  ;;  %v8444_v12 = vpop.permute.xlu1 %3556  ;;  %11680 = vst [vmem:[#allocation329_spill] sm:$0xff] %v8454_v9  ;;  %v2515_v62 = vand.u32 2147483647, %v8430_v45  ;;  %5970 = vlog2.f32 %v2988_v20  ;;  %v2640_v27 = vsub.f32 0.0, %v2512_v26  ;;  %v8485_v29 = vadd.f32 %v7644_v4, %v11690_v22 }
 0x42d   : > { %11676 = vst [vmem:[#allocation327_spill] sm:$0xff] %v8444_v12  ;;  %11679 = vst [vmem:[#allocation44_spill] sm:$0xff] %v8452_v30  ;;  %v8460_v12 = vadd.f32 %v7644_v4, %v11681_v36  ;;  %3860 = vbcast.lane.b32.xlu0 %v8297_v21, 344  ;;  %5972 = vpow2.f32 %v2824_v37  ;;  %v2516_v47 = vand.u32 2147483647, %v8439_v50  ;;  %v11684_v63 = vld [vmem:[#allocation46_spill] sm:$0xff]  ;;  %v8470_v9 = vpop.eup %5954  ;;  %v8474_v36 = vadd.f32 %v7644_v4, %v11686_v55 }
 0x42e   : > { %11683 = vst [vmem:[#allocation330_spill] sm:$0xff] %v8463_v43  ;;  %v8468_v38 = vadd.f32 %v7644_v4, %v11684_v63  ;;  %5974 = vpow2.f32 %v2826_v33  ;;  %v2830_v59 = vmul.f32 1.442695, %v2639_v11  ;;  %v2990_v37 = vadd.f32 1.0, %v8111_v61  ;;  %v8480_v26 = vpop.eup %5956  ;;  %11691 = vst [vmem:[#allocation48_spill] sm:$0xff] %v8485_v29  ;;  %v11695_v22 = vld [vmem:[#allocation49_spill] sm:$0xff] }
 0x42f   : > { %11682 = vst [vmem:[#allocation45_spill] sm:$0xff] %v8460_v12  ;;  %11687 = vst [vmem:[#allocation47_spill] sm:$0xff] %v8474_v36  ;;  %v2641_v50 = vsub.f32 0.0, %v2513_v24  ;;  %v2517_v63 = vand.u32 2147483647, %v8452_v30  ;;  %v8487_v11 = vpop.permute.xlu0 %3608  ;;  %5976 = vlog2.f32 %v3001_v15  ;;  %v8489_v55 = vpop.eup %5958  ;;  %v2642_v33 = vsub.f32 0.0, %v2514_v46 }
 0x430   : > { %11685 = vst [vmem:[#allocation46_spill] sm:$0xff] %v8468_v38  ;;  %3832 = vbcast.lane.b32.xlu1 %v8297_v21, 288  ;;  %v8477_v20 = vpop.permute.xlu1 %3564  ;;  %11689 = vst [vmem:[#allocation332_spill] sm:$0xff] %v8480_v26  ;;  %5978 = vpow2.f32 %v2828_v0  ;;  %v2643_v43 = vsub.f32 0.0, %v2515_v62  ;;  %v8493_v61 = vpop.eup %5960  ;;  %v2832_v24 = vmul.f32 1.442695, %v2640_v27  ;;  %v8498_v45 = vadd.f32 %v7644_v4, %v11695_v22 }
 0x431   : > { %11688 = vst [vmem:[#allocation331_spill] sm:$0xff] %v8477_v20  ;;  %11692 = vst [vmem:[#allocation333_spill] sm:$0xff] %v8487_v11  ;;  %v2518_v20 = vand.u32 2147483647, %v8460_v12  ;;  %3868 = vbcast.lane.b32.xlu0 %v8297_v21, 360  ;;  %v2644_v26 = vsub.f32 0.0, %v2516_v47  ;;  %v8500_v15 = vpop.eup %5962  ;;  %5980 = vpow2.f32 %v2830_v59 }
 0x432   : > { %11693 = vst [vmem:[#allocation334_spill] sm:$0xff] %v8489_v55  ;;  %11694 = vst [vmem:[#allocation335_spill] sm:$0xff] %v8493_v61  ;;  %v2519_v30 = vand.u32 2147483647, %v8468_v38  ;;  %v2520_v0 = vand.u32 2147483647, %v8474_v36  ;;  %v8511_v47 = vpop.eup %5964  ;;  %5982 = vlog2.f32 %v2990_v37 }
 0x433   : > { %11696 = vst [vmem:[#allocation49_spill] sm:$0xff] %v8498_v45  ;;  %11697 = vst [vmem:[#allocation336_spill] sm:$0xff] %v8500_v15  ;;  %v11698_v46 = vld [vmem:[#allocation50_spill] sm:$0xff]  ;;  %v2834_v61 = vmul.f32 1.442695, %v2641_v50  ;;  %v2645_v22 = vsub.f32 0.0, %v2517_v63  ;;  %v8514_v15 = vpop.permute.xlu0 %3619  ;;  %v8516_v59 = vpop.eup %5966  ;;  %5984 = vpow2.f32 %v2832_v24 }
 0x434   : > { %v8505_v62 = vadd.f32 %v7644_v4, %v11698_v46  ;;  %3840 = vbcast.lane.b32.xlu1 %v8297_v21, 304  ;;  %v8509_v27 = vpop.permute.xlu1 %3572  ;;  %11701 = vst [vmem:[#allocation338_spill] sm:$0xff] %v8511_v47  ;;  %v2521_v12 = vand.u32 2147483647, %v8485_v29  ;;  %11702 = vst [vmem:[#allocation339_spill] sm:$0xff] %v8514_v15  ;;  %v2646_v55 = vsub.f32 0.0, %v2518_v20 }
 0x435   : > { %11700 = vst [vmem:[#allocation337_spill] sm:$0xff] %v8509_v27  ;;  %11703 = vst [vmem:[#allocation340_spill] sm:$0xff] %v8516_v59  ;;  %v2836_v36 = vmul.f32 1.442695, %v2642_v33  ;;  %v2838_v46 = vmul.f32 1.442695, %v2643_v43  ;;  %v8523_v10 = vpop.eup %5968  ;;  %5986 = vpow2.f32 %v2834_v61 }
 0x436   : > { %11699 = vst [vmem:[#allocation50_spill] sm:$0xff] %v8505_v62  ;;  %v11704_v38 = vld [vmem:[#allocation51_spill] sm:$0xff]  ;;  %3876 = vbcast.lane.b32.xlu0 %v8297_v21, 376  ;;  %11706 = vst [vmem:[#allocation341_spill] sm:$0xff] %v8523_v10  ;;  %v2840_v50 = vmul.f32 1.442695, %v2644_v26  ;;  %v8526_v15 = vpop.eup %5970 }
 0x437   : > { %v8520_v11 = vadd.f32 %v7644_v4, %v11704_v38  ;;  %v2647_v63 = vsub.f32 0.0, %v2519_v30  ;;  %v2522_v27 = vand.u32 2147483647, %v8498_v45  ;;  %11707 = vst [vmem:[#allocation342_spill] sm:$0xff] %v8526_v15  ;;  %v2648_v37 = vsub.f32 0.0, %v2520_v0  ;;  %v11708_v43 = vld [vmem:[#allocation52_spill] sm:$0xff]  ;;  %v8541_v30 = vpop.eup %5972  ;;  %v8546_v10 = vpop.permute.xlu0 %3627 }
 0x438   : > { %v2523_v33 = vand.u32 2147483647, %v8505_v62  ;;  %v8531_v20 = vadd.f32 %v7644_v4, %v11708_v43  ;;  %v11710_v38 = vsub.s32 6, %v6887_v1  ;;  %3848 = vbcast.lane.b32.xlu1 %v8297_v21, 320  ;;  %v8539_v26 = vpop.permute.xlu1 %3580  ;;  %11712 = vst [vmem:[#allocation344_spill] sm:$0xff] %v8541_v30  ;;  %v2649_v0 = vsub.f32 0.0, %v2521_v12  ;;  %v8548_v43 = vpop.eup %5974 }
 0x439   : > { %11705 = vst [vmem:[#allocation51_spill] sm:$0xff] %v8520_v11  ;;  %11711 = vst [vmem:[#allocation343_spill] sm:$0xff] %v8539_v26  ;;  %v2842_v24 = vmul.f32 1.442695, %v2645_v22  ;;  %v8544_v15 = vmul.f32 0.6931472, %v8303_v18  ;;  %5988 = vpow2.f32 %v2836_v36  ;;  %v8556_v61 = vpop.eup %5976 }
 0x43a   : > { %11709 = vst [vmem:[#allocation52_spill] sm:$0xff] %v8531_v20  ;;  %v8536_v47 = vrot.slane %v7584_v6, %v11710_v38  ;;  %11714 = vst [vmem:[#allocation346_spill] sm:$0xff] %v8546_v10  ;;  %v2844_v45 = vmul.f32 1.442695, %v2646_v55  ;;  %v2524_v38 = vand.u32 2147483647, %v8520_v11  ;;  %5990 = vpow2.f32 %v2838_v46  ;;  %v8562_v26 = vpop.eup %5978 }
 0x43b   : > { %11713 = vst [vmem:[#allocation345_spill] sm:$0xff] %v8544_v15  ;;  %v11715_v62 = vld [vmem:[#allocation53_spill] sm:$0xff]  ;;  %v2846_v12 = vmul.f32 1.442695, %v2647_v63  ;;  %v2650_v18 = vsub.f32 0.0, %v2522_v27  ;;  %v11717_v22 = vld [vmem:[#allocation54_spill] sm:$0xff]  ;;  %5992 = vpow2.f32 %v2840_v50  ;;  %v8570_v63 = vpop.permute.xlu0 %3635 }
 0x43c   : > { %v8553_v59 = vadd.f32 %v7644_v4, %v11715_v62  ;;  %3887 = vbcast.lane.b32.xlu0 %v8536_v47, 264  ;;  %v8560_v10 = vadd.f32 %v7644_v4, %v11717_v22  ;;  %11719 = vst [vmem:[#allocation347_spill] sm:$0xff] %v8562_v26  ;;  %v2848_v36 = vmul.f32 1.442695, %v2648_v37  ;;  %v2651_v55 = vsub.f32 0.0, %v2523_v33  ;;  %3856 = vbcast.lane.b32.xlu1 %v8297_v21, 336  ;;  %v8566_v62 = vpop.permute.xlu1 %3588  ;;  %v8572_v22 = vpop.eup %5980 }
 0x43d   : > { %v2525_v15 = vand.u32 2147483647, %v8531_v20  ;;  %11720 = vst [vmem:[#allocation348_spill] sm:$0xff] %v8566_v62  ;;  %5994 = vpow2.f32 %v2842_v24  ;;  %v2850_v30 = vmul.f32 1.442695, %v2649_v0  ;;  %11721 = vst [vmem:[#allocation349_spill] sm:$0xff] %v8570_v63  ;;  %v8580_v24 = vpop.eup %5982 }
 0x43e   : > { %11716 = vst [vmem:[#allocation53_spill] sm:$0xff] %v8553_v59  ;;  %11718 = vst [vmem:[#allocation54_spill] sm:$0xff] %v8560_v10  ;;  %5996 = vpow2.f32 %v2844_v45  ;;  %v2652_v50 = vsub.f32 0.0, %v2524_v38  ;;  %v2526_v37 = vand.u32 2147483647, %v8553_v59  ;;  %v11722_v33 = vld [vmem:[#allocation55_spill] sm:$0xff]  ;;  %v8593_v63 = vpop.eup %5984 }
 0x43f   : > { %v8577_v26 = vadd.f32 %v7644_v4, %v11722_v33  ;;  %5998 = vpow2.f32 %v2846_v12  ;;  %v2852_v0 = vmul.f32 1.442695, %v2650_v18  ;;  %v2527_v27 = vand.u32 2147483647, %v8560_v10  ;;  %v11723_v46 = vld [vmem:[#allocation56_spill] sm:$0xff]  ;;  %v11727_v62 = vld [vmem:[#allocation57_spill] sm:$0xff] }
 0x440   : > { %3895 = vbcast.lane.b32.xlu0 %v8536_v47, 280  ;;  %v8585_v3 = vadd.f32 %v7644_v4, %v11723_v46  ;;  %6000 = vpow2.f32 %v2848_v36  ;;  %v2854_v45 = vmul.f32 1.442695, %v2651_v55  ;;  %v2653_v38 = vsub.f32 0.0, %v2525_v15  ;;  %3864 = vbcast.lane.b32.xlu1 %v8297_v21, 352  ;;  %v8591_v33 = vpop.permute.xlu1 %3596  ;;  %11725 = vst [vmem:[#allocation56_spill] sm:$0xff] %v8593_v63  ;;  %v8599_v46 = vpop.permute.xlu0 %3643 }
 0x441   : > { %11724 = vst [vmem:[#allocation55_spill] sm:$0xff] %v8591_v33  ;;  %6002 = vpow2.f32 %v2850_v30  ;;  %v8597_v18 = vmul.f32 0.6931472, %v8330_v19  ;;  %11726 = vst [vmem:[#allocation350_spill] sm:$0xff] %v8599_v46  ;;  %v3003_v36 = vadd.f32 1.0, %v8283_v16  ;;  %v2654_v55 = vsub.f32 0.0, %v2526_v37  ;;  %v8608_v30 = vpop.eup %5986 }
 0x442   : > { %v2856_v15 = vmul.f32 1.442695, %v2652_v50  ;;  %v2528_v25 = vand.u32 2147483647, %v8577_v26  ;;  %v8605_v59 = vadd.f32 %v7644_v4, %v11727_v62  ;;  %6004 = vpow2.f32 %v2852_v0  ;;  %v11733_v0 = vld [vmem:[#allocation59_spill] sm:$0xff] }
 0x443   : > { %v2655_v12 = vsub.f32 0.0, %v2527_v27  ;;  %v2529_v19 = vand.u32 2147483647, %v8585_v3  ;;  %v8613_v46 = vadd.f32 %v7644_v4, %v11729_v48  ;;  %v8615_v16 = vpop.eup %5988  ;;  %6006 = vpow2.f32 %v2854_v45 }
 0x444   : > { %11728 = vst [vmem:[#allocation57_spill] sm:$0xff] %v8605_v59  ;;  %3903 = vbcast.lane.b32.xlu0 %v8536_v47, 296  ;;  %11731 = vst [vmem:[#allocation351_spill] sm:$0xff] %v8615_v16  ;;  %v2858_v50 = vmul.f32 1.442695, %v2653_v38  ;;  %3872 = vbcast.lane.b32.xlu1 %v8297_v21, 368  ;;  %v8622_v33 = vpop.permute.xlu1 %3604  ;;  %v8624_v27 = vpop.eup %5990  ;;  %v8628_v63 = vadd.f32 %v7644_v4, %v11733_v0  ;;  %6008 = vlog2.f32 %v3003_v36 }
 0x445   : > { %11730 = vst [vmem:[#allocation58_spill] sm:$0xff] %v8613_v46  ;;  %v8619_v62 = vmul.f32 0.6931472, %v8360_v2  ;;  %11732 = vst [vmem:[#allocation352_spill] sm:$0xff] %v8622_v33  ;;  %v8631_v16 = vpop.permute.xlu0 %3651  ;;  %v2992_v45 = vadd.f32 1.0, %v8136_v28  ;;  %v8634_v38 = vpop.eup %5992  ;;  %6010 = vpow2.f32 %v2856_v15  ;;  %v2656_v21 = vsub.f32 0.0, %v2528_v25 }
 0x446   : > { %11734 = vst [vmem:[#allocation59_spill] sm:$0xff] %v8628_v63  ;;  %11735 = vst [vmem:[#allocation353_spill] sm:$0xff] %v8631_v16  ;;  %v2860_v2 = vmul.f32 1.442695, %v2654_v55  ;;  %v2530_v37 = vand.u32 2147483647, %v8605_v59  ;;  %v8643_v36 = vadd.f32 %v7644_v4, %v11737_v31  ;;  %6012 = vpow2.f32 %v2858_v50 }
 0x447   : > { %11736 = vst [vmem:[#allocation354_spill] sm:$0xff] %v8634_v38  ;;  %v8638_v40 = vpop.eup %5994  ;;  %v2862_v0 = vmul.f32 1.442695, %v2655_v12  ;;  %v2657_v33 = vsub.f32 0.0, %v2529_v19  ;;  %v2531_v48 = vand.u32 2147483647, %v8613_v46  ;;  %6014 = vlog2.f32 %v2992_v45 }
 0x448   : > { %3911 = vbcast.lane.b32.xlu0 %v8536_v47, 312  ;;  %11738 = vst [vmem:[#allocation60_spill] sm:$0xff] %v8643_v36  ;;  %v8645_v28 = vpop.eup %5996  ;;  %v8649_v55 = vmul.f32 0.6931472, %v8375_v35  ;;  %3883 = vbcast.lane.b32.xlu1 %v8536_v47, 256  ;;  %v8652_v25 = vpop.permute.xlu1 %3615  ;;  %v3005_v12 = vadd.f32 1.0, %v8313_v39  ;;  %6016 = vpow2.f32 %v2860_v2 }
 0x449   : > { %11739 = vst [vmem:[#allocation355_spill] sm:$0xff] %v8645_v28  ;;  %11740 = vst [vmem:[#allocation356_spill] sm:$0xff] %v8652_v25  ;;  %v8655_v19 = vpop.eup %5998  ;;  %v2532_v16 = vand.u32 2147483647, %v8628_v63  ;;  %v11741_v31 = vld [vmem:[#allocation61_spill] sm:$0xff]  ;;  %v8662_v50 = vpop.permute.xlu0 %3659  ;;  %v2994_v35 = vadd.f32 1.0, %v8166_v54  ;;  %6018 = vpow2.f32 %v2862_v0 }
 0x44a   : > { %v8660_v38 = vadd.f32 %v7644_v4, %v11741_v31  ;;  %11743 = vst [vmem:[#allocation357_spill] sm:$0xff] %v8662_v50  ;;  %v8665_v15 = vpop.eup %6000  ;;  %v2864_v5 = vmul.f32 1.442695, %v2656_v21  ;;  %v2658_v28 = vsub.f32 0.0, %v2530_v37  ;;  %v11745_v25 = vld [vmem:[#allocation62_spill] sm:$0xff]  ;;  %v2659_v59 = vsub.f32 0.0, %v2531_v48 }
 0x44b   : > { %11744 = vst [vmem:[#allocation358_spill] sm:$0xff] %v8665_v15  ;;  %v8669_v39 = vadd.f32 %v7644_v4, %v11745_v25  ;;  %v8672_v63 = vpop.eup %6002  ;;  %v2866_v31 = vmul.f32 1.442695, %v2657_v33  ;;  %v2533_v45 = vand.u32 2147483647, %v8643_v36  ;;  %6020 = vlog2.f32 %v3005_v12  ;;  %v11749_v33 = vld [vmem:[#allocation63_spill] sm:$0xff] }
 0x44c   : > { %11742 = vst [vmem:[#allocation61_spill] sm:$0xff] %v8660_v38  ;;  %3919 = vbcast.lane.b32.xlu0 %v8536_v47, 328  ;;  %3891 = vbcast.lane.b32.xlu1 %v8536_v47, 272  ;;  %v8678_v37 = vpop.permute.xlu1 %3623  ;;  %v3007_v2 = vadd.f32 1.0, %v8350_v51  ;;  %v8681_v21 = vpop.eup %6004  ;;  %v2660_v25 = vsub.f32 0.0, %v2532_v16  ;;  %v8686_v48 = vadd.f32 %v7644_v4, %v11749_v33  ;;  %6022 = vlog2.f32 %v2994_v35  ;;  %v12231_v46 = vld [vmem:[#allocation153_spill] sm:$0xff] }
 0x44d   : > { %11746 = vst [vmem:[#allocation62_spill] sm:$0xff] %v8669_v39  ;;  %11747 = vst [vmem:[#allocation359_spill] sm:$0xff] %v8678_v37  ;;  %v2534_v0 = vand.u32 2147483647, %v8660_v38  ;;  %v8688_v50 = vpop.permute.xlu0 %3667  ;;  %v8690_v15 = vpop.eup %6006  ;;  %6024 = vpow2.f32 %v2864_v5  ;;  %v2868_v12 = vmul.f32 1.442695, %v2658_v28  ;;  %v8695_v51 = vadd.f32 %v7644_v4, %v11752_v60 }
 0x44e   : > { %11748 = vst [vmem:[#allocation360_spill] sm:$0xff] %v8681_v21  ;;  %11750 = vst [vmem:[#allocation63_spill] sm:$0xff] %v8686_v48  ;;  %v2535_v54 = vand.u32 2147483647, %v8669_v39  ;;  %v8698_v16 = vpop.eup %6008  ;;  %6026 = vpow2.f32 %v2866_v31  ;;  %v2870_v33 = vmul.f32 1.442695, %v2659_v59 }
 0x44f   : > { %11751 = vst [vmem:[#allocation361_spill] sm:$0xff] %v8688_v50  ;;  %11753 = vst [vmem:[#allocation64_spill] sm:$0xff] %v8695_v51  ;;  %v2661_v34 = vsub.f32 0.0, %v2533_v45  ;;  %v8701_v21 = vmul.f32 0.6931472, %v8395_v57  ;;  %v8703_v35 = vpop.eup %6010  ;;  %6028 = vlog2.f32 %v3007_v2  ;;  %v2996_v60 = vadd.f32 1.0, %v8196_v7 }
 0x450   : > { %3927 = vbcast.lane.b32.xlu0 %v8536_v47, 344  ;;  %11754 = vst [vmem:[#allocation362_spill] sm:$0xff] %v8703_v35  ;;  %3899 = vbcast.lane.b32.xlu1 %v8536_v47, 288  ;;  %v8709_v50 = vpop.permute.xlu1 %3631  ;;  %v2872_v37 = vmul.f32 1.442695, %v2660_v25  ;;  %v2662_v31 = vsub.f32 0.0, %v2534_v0  ;;  %v8718_v5 = vpop.eup %6012  ;;  %6030 = vpow2.f32 %v2868_v12  ;;  %v8723_v7 = vadd.f32 %v7644_v4, %v11759_v14 }
 0x451   : > { %11755 = vst [vmem:[#allocation363_spill] sm:$0xff] %v8709_v50  ;;  %v2536_v59 = vand.u32 2147483647, %v8686_v48  ;;  %v11756_v45 = vld [vmem:[#allocation65_spill] sm:$0xff]  ;;  %v8716_v35 = vpop.permute.xlu0 %3675  ;;  %v2663_v2 = vsub.f32 0.0, %v2535_v54  ;;  %v8726_v25 = vpop.eup %6014  ;;  %6032 = vpow2.f32 %v2870_v33  ;;  %v3009_v14 = vadd.f32 1.0, %v8388_v23 }
 0x452   : > { %v8714_v57 = vadd.f32 %v7644_v4, %v11756_v45  ;;  %11758 = vst [vmem:[#allocation364_spill] sm:$0xff] %v8716_v35  ;;  %v2537_v28 = vand.u32 2147483647, %v8695_v51  ;;  %11760 = vst [vmem:[#allocation66_spill] sm:$0xff] %v8723_v7  ;;  %v2874_v0 = vmul.f32 1.442695, %v2661_v34  ;;  %v8732_v35 = vpop.eup %6016  ;;  %6034 = vlog2.f32 %v2996_v60 }
 0x453   : > { %v8730_v56 = vmul.f32 0.6931472, %v8441_v58  ;;  %11761 = vst [vmem:[#allocation365_spill] sm:$0xff] %v8732_v35  ;;  %v8736_v12 = vmul.f32 0.6931472, %v8470_v9  ;;  %v8742_v34 = vpop.eup %6018  ;;  %6036 = vpow2.f32 %v2872_v37  ;;  %v2664_v58 = vsub.f32 0.0, %v2536_v59 }
 0x454   : > { %11757 = vst [vmem:[#allocation65_spill] sm:$0xff] %v8714_v57  ;;  %3935 = vbcast.lane.b32.xlu0 %v8536_v47, 360  ;;  %3907 = vbcast.lane.b32.xlu1 %v8536_v47, 304  ;;  %v8740_v50 = vpop.permute.xlu1 %3639  ;;  %11763 = vst [vmem:[#allocation367_spill] sm:$0xff] %v8742_v34  ;;  %v2876_v33 = vmul.f32 1.442695, %v2662_v31  ;;  %6038 = vpow2.f32 %v2874_v0 }
 0x455   : > { %11762 = vst [vmem:[#allocation366_spill] sm:$0xff] %v8740_v50  ;;  %v2538_v45 = vand.u32 2147483647, %v8714_v57  ;;  %v8745_v49 = vpop.permute.xlu0 %3686  ;;  %v8747_v54 = vpop.eup %6020  ;;  %v2878_v9 = vmul.f32 1.442695, %v2663_v2  ;;  %v2665_v42 = vsub.f32 0.0, %v2537_v28  ;;  %6040 = vlog2.f32 %v3009_v14 }
 0x456   : > { %11764 = vst [vmem:[#allocation368_spill] sm:$0xff] %v8745_v49  ;;  %v2539_v60 = vand.u32 2147483647, %v8723_v7  ;;  %v11765_v23 = vld [vmem:[#allocation67_spill] sm:$0xff]  ;;  %v8755_v50 = vpop.eup %6022  ;;  %v11768_v37 = vld [vmem:[#allocation68_spill] sm:$0xff]  ;;  %v2998_v2 = vadd.f32 1.0, %v8236_v53  ;;  %6042 = vpow2.f32 %v2876_v33 }
 0x457   : > { %v8752_v35 = vadd.f32 %v7644_v4, %v11765_v23  ;;  %11767 = vst [vmem:[#allocation369_spill] sm:$0xff] %v8755_v50  ;;  %v8759_v31 = vadd.f32 %v7644_v4, %v11768_v37  ;;  %v8763_v28 = vpop.eup %6024  ;;  %v11771_v49 = vld [vmem:[#allocation69_spill] sm:$0xff]  ;;  %v11773_v23 = vsub.s32 7, %v6887_v1  ;;  %v3011_v0 = vadd.f32 1.0, %v8409_v13  ;;  %v11780_v33 = vld [vmem:[#allocation71_spill] sm:$0xff]  ;;  %v11926_v34 = vld [vmem:[#allocation236_spill] sm:$0xff] }
 0x458   : > { %3943 = vbcast.lane.b32.xlu0 %v8536_v47, 376  ;;  %11770 = vst [vmem:[#allocation370_spill] sm:$0xff] %v8763_v28  ;;  %v8767_v57 = vadd.f32 %v7644_v4, %v11771_v49  ;;  %3915 = vbcast.lane.b32.xlu1 %v8536_v47, 320  ;;  %v8776_v37 = vpop.permute.xlu1 %3647  ;;  %v8778_v59 = vpop.eup %6026  ;;  %v2880_v53 = vmul.f32 1.442695, %v2664_v58  ;;  %v2666_v41 = vsub.f32 0.0, %v2538_v45  ;;  %6044 = vpow2.f32 %v2878_v9 }
 0x459   : > { %11766 = vst [vmem:[#allocation67_spill] sm:$0xff] %v8752_v35  ;;  %11769 = vst [vmem:[#allocation68_spill] sm:$0xff] %v8759_v31  ;;  %v8772_v7 = vrot.slane %v7584_v6, %v11773_v23  ;;  %v11776_v28 = vld [vmem:[#allocation70_spill] sm:$0xff]  ;;  %v8784_v1 = vpop.permute.xlu0 %3694  ;;  %v8786_v23 = vpop.eup %6028  ;;  %v2882_v14 = vmul.f32 1.442695, %v2665_v42  ;;  %v2667_v13 = vsub.f32 0.0, %v2539_v60  ;;  %v8793_v45 = vadd.f32 %v7644_v4, %v11780_v33 }
 0x45a   : > { %11772 = vst [vmem:[#allocation69_spill] sm:$0xff] %v8767_v57  ;;  %11774 = vst [vmem:[#allocation371_spill] sm:$0xff] %v8776_v37  ;;  %v8782_v49 = vadd.f32 %v7644_v4, %v11776_v28  ;;  %v2540_v6 = vand.u32 2147483647, %v8752_v35  ;;  %v2541_v37 = vand.u32 2147483647, %v8759_v31  ;;  %6046 = vlog2.f32 %v2998_v2  ;;  %v8796_v28 = vpop.eup %6030 }
 0x45b   : > { %11775 = vst [vmem:[#allocation372_spill] sm:$0xff] %v8778_v59  ;;  %11778 = vst [vmem:[#allocation373_spill] sm:$0xff] %v8784_v1  ;;  %v3000_v58 = vadd.f32 1.0, %v8250_v32  ;;  %v2542_v1 = vand.u32 2147483647, %v8767_v57  ;;  %v11783_v9 = vld [vmem:[#allocation72_spill] sm:$0xff]  ;;  %6048 = vlog2.f32 %v3011_v0  ;;  %v8807_v33 = vpop.eup %6032 }
 0x45c   : > { %11777 = vst [vmem:[#allocation70_spill] sm:$0xff] %v8782_v49  ;;  %11779 = vst [vmem:[#allocation374_spill] sm:$0xff] %v8786_v23  ;;  %3954 = vbcast.lane.b32.xlu0 %v8772_v7, 264  ;;  %v8801_v42 = vadd.f32 %v7644_v4, %v11783_v9  ;;  %v3013_v60 = vadd.f32 1.0, %v8434_v8  ;;  %3923 = vbcast.lane.b32.xlu1 %v8536_v47, 336  ;;  %v8805_v35 = vpop.permute.xlu1 %3655  ;;  %6050 = vpow2.f32 %v2880_v53  ;;  %v8813_v31 = vpop.eup %6034  ;;  %v2668_v9 = vsub.f32 0.0, %v2540_v6 }
 0x45d   : > { %11781 = vst [vmem:[#allocation71_spill] sm:$0xff] %v8793_v45  ;;  %11782 = vst [vmem:[#allocation375_spill] sm:$0xff] %v8796_v28  ;;  %v2884_v2 = vmul.f32 1.442695, %v2666_v41  ;;  %v2543_v32 = vand.u32 2147483647, %v8782_v49  ;;  %v8811_v57 = vpop.permute.xlu0 %3702  ;;  %6052 = vpow2.f32 %v2882_v14 }
 0x45e   : > { %11784 = vst [vmem:[#allocation72_spill] sm:$0xff] %v8801_v42  ;;  %11785 = vst [vmem:[#allocation376_spill] sm:$0xff] %v8805_v35  ;;  %v2886_v0 = vmul.f32 1.442695, %v2667_v13  ;;  %v11789_v8 = vld [vmem:[#allocation73_spill] sm:$0xff]  ;;  %v8820_v35 = vpop.eup %6036  ;;  %v2669_v41 = vsub.f32 0.0, %v2541_v37  ;;  %6054 = vlog2.f32 %v3000_v58 }
 0x45f   : > { %11786 = vst [vmem:[#allocation377_spill] sm:$0xff] %v8807_v33  ;;  %11787 = vst [vmem:[#allocation378_spill] sm:$0xff] %v8811_v57  ;;  %v8817_v59 = vadd.f32 %v7644_v4, %v11789_v8  ;;  %v2544_v53 = vand.u32 2147483647, %v8793_v45  ;;  %v11792_v49 = vld [vmem:[#allocation74_spill] sm:$0xff]  ;;  %v2670_v44 = vsub.f32 0.0, %v2542_v1  ;;  %6056 = vlog2.f32 %v3013_v60  ;;  %v8832_v8 = vpop.eup %6038 }
 0x460   : > { %11788 = vst [vmem:[#allocation379_spill] sm:$0xff] %v8813_v31  ;;  %3962 = vbcast.lane.b32.xlu0 %v8772_v7, 280  ;;  %11791 = vst [vmem:[#allocation380_spill] sm:$0xff] %v8820_v35  ;;  %v8825_v28 = vadd.f32 %v7644_v4, %v11792_v49  ;;  %v2545_v14 = vand.u32 2147483647, %v8801_v42  ;;  %v3002_v6 = vadd.f32 1.0, %v8277_v52  ;;  %v8830_v13 = vpop.permute.xlu1 %3663  ;;  %6058 = vpow2.f32 %v2884_v2  ;;  %v8838_v1 = vpop.eup %6040 }
 0x461   : > { %11790 = vst [vmem:[#allocation73_spill] sm:$0xff] %v8817_v59  ;;  %3931 = vbcast.lane.b32.xlu1 %v8536_v47, 352  ;;  %11794 = vst [vmem:[#allocation381_spill] sm:$0xff] %v8830_v13  ;;  %v2671_v37 = vsub.f32 0.0, %v2543_v32  ;;  %v11797_v45 = vld [vmem:[#allocation330_spill] sm:$0xff]  ;;  %v8836_v33 = vpop.permute.xlu0 %3710  ;;  %6060 = vpow2.f32 %v2886_v0  ;;  %v11800_v60 = vld [vmem:[#allocation75_spill] sm:$0xff]  ;;  %v8846_v2 = vpop.eup %6042 }
 0x462   : > { %11793 = vst [vmem:[#allocation74_spill] sm:$0xff] %v8825_v28  ;;  %11795 = vst [vmem:[#allocation382_spill] sm:$0xff] %v8832_v8  ;;  %v3015_v49 = vadd.f32 1.0, %v11797_v45  ;;  %v2888_v58 = vmul.f32 1.442695, %v2668_v9  ;;  %v8843_v42 = vadd.f32 %v7644_v4, %v11800_v60  ;;  %v2672_v57 = vsub.f32 0.0, %v2544_v53  ;;  %v8853_v0 = vpop.eup %6044 }
 0x463   : > { %11798 = vst [vmem:[#allocation330_spill] sm:$0xff] %v8836_v33  ;;  %11799 = vst [vmem:[#allocation383_spill] sm:$0xff] %v8838_v1  ;;  %v2546_v52 = vand.u32 2147483647, %v8817_v59  ;;  %v2890_v32 = vmul.f32 1.442695, %v2669_v41  ;;  %6062 = vlog2.f32 %v3002_v6 }
 0x464   : > { %11801 = vst [vmem:[#allocation75_spill] sm:$0xff] %v8843_v42  ;;  %3970 = vbcast.lane.b32.xlu0 %v8772_v7, 296  ;;  %11802 = vst [vmem:[#allocation384_spill] sm:$0xff] %v8846_v2  ;;  %v2547_v45 = vand.u32 2147483647, %v8825_v28  ;;  %v11803_v35 = vld [vmem:[#allocation76_spill] sm:$0xff]  ;;  %v8857_v60 = vpop.permute.xlu1 %3671  ;;  %v8859_v2 = vpop.eup %6046  ;;  %6064 = vlog2.f32 %v3015_v49 }
 0x465   : > { %v8851_v33 = vadd.f32 %v7644_v4, %v11803_v35  ;;  %11805 = vst [vmem:[#allocation385_spill] sm:$0xff] %v8853_v0  ;;  %v2892_v9 = vmul.f32 1.442695, %v2670_v44  ;;  %v2673_v13 = vsub.f32 0.0, %v2545_v14  ;;  %3939 = vbcast.lane.b32.xlu1 %v8536_v47, 368  ;;  %11807 = vst [vmem:[#allocation386_spill] sm:$0xff] %v8857_v60  ;;  %v8863_v35 = vpop.permute.xlu0 %3718  ;;  %v8865_v0 = vpop.eup %6048  ;;  %6066 = vpow2.f32 %v2888_v58 }
 0x466   : > { %11808 = vst [vmem:[#allocation387_spill] sm:$0xff] %v8859_v2  ;;  %v2894_v41 = vmul.f32 1.442695, %v2671_v37  ;;  %11811 = vst [vmem:[#allocation388_spill] sm:$0xff] %v8863_v35  ;;  %v2674_v44 = vsub.f32 0.0, %v2546_v52  ;;  %v11813_v6 = vld [vmem:[#allocation310_spill] sm:$0xff]  ;;  %v8870_v8 = vpop.eup %6050  ;;  %6068 = vpow2.f32 %v2890_v32 }
 0x467   : > { %11804 = vst [vmem:[#allocation76_spill] sm:$0xff] %v8851_v33  ;;  %11812 = vst [vmem:[#allocation389_spill] sm:$0xff] %v8865_v0  ;;  %v2548_v14 = vand.u32 2147483647, %v8843_v42  ;;  %v3004_v47 = vadd.f32 1.0, %v11813_v6  ;;  %v2675_v28 = vsub.f32 0.0, %v2547_v45  ;;  %v8873_v49 = vpop.eup %6052  ;;  %6070 = vpow2.f32 %v2892_v9 }
 0x468   : > { %3978 = vbcast.lane.b32.xlu0 %v8772_v7, 312  ;;  %11814 = vst [vmem:[#allocation310_spill] sm:$0xff] %v8870_v8  ;;  %v2896_v37 = vmul.f32 1.442695, %v2672_v57  ;;  %v2549_v31 = vand.u32 2147483647, %v8851_v33  ;;  %v8881_v6 = vpop.permute.xlu1 %3682  ;;  %v8883_v59 = vpop.eup %6054  ;;  %6072 = vpow2.f32 %v2894_v41 }
 0x469   : > { %11815 = vst [vmem:[#allocation390_spill] sm:$0xff] %v8873_v49  ;;  %v2898_v1 = vmul.f32 1.442695, %v2673_v13  ;;  %v11816_v53 = vld [vmem:[#allocation77_spill] sm:$0xff]  ;;  %3950 = vbcast.lane.b32.xlu1 %v8772_v7, 256  ;;  %11818 = vst [vmem:[#allocation391_spill] sm:$0xff] %v8881_v6  ;;  %v8891_v35 = vpop.permute.xlu0 %3726  ;;  %6074 = vlog2.f32 %v3004_v47 }
 0x46a   : > { %v8877_v58 = vadd.f32 %v7644_v4, %v11816_v53  ;;  %11819 = vst [vmem:[#allocation392_spill] sm:$0xff] %v8883_v59  ;;  %v11820_v57 = vld [vmem:[#allocation78_spill] sm:$0xff]  ;;  %v8893_v53 = vpop.eup %6056  ;;  %v2900_v52 = vmul.f32 1.442695, %v2674_v44  ;;  %v2676_v29 = vsub.f32 0.0, %v2548_v14  ;;  %6076 = vpow2.f32 %v2896_v37  ;;  %v12181_v38 = vld [vmem:[#allocation147_spill] sm:$0xff] }
 0x46b   : > { %v8887_v32 = vadd.f32 %v7644_v4, %v11820_v57  ;;  %v11823_v13 = vld [vmem:[#allocation334_spill] sm:$0xff]  ;;  %11825 = vst [vmem:[#allocation393_spill] sm:$0xff] %v8893_v53  ;;  %v8897_v41 = vpop.eup %6058  ;;  %v2902_v57 = vmul.f32 1.442695, %v2675_v28  ;;  %v2677_v6 = vsub.f32 0.0, %v2549_v31  ;;  %6078 = vpow2.f32 %v2898_v1  ;;  %v11834_v31 = vld [vmem:[#allocation80_spill] sm:$0xff] }
 0x46c   : > { %11817 = vst [vmem:[#allocation77_spill] sm:$0xff] %v8877_v58  ;;  %v3017_v8 = vadd.f32 1.0, %v11823_v13  ;;  %11824 = vst [vmem:[#allocation334_spill] sm:$0xff] %v8891_v35  ;;  %3986 = vbcast.lane.b32.xlu0 %v8772_v7, 328  ;;  %v8900_v45 = vpop.eup %6060  ;;  %v2550_v13 = vand.u32 2147483647, %v8877_v58  ;;  %v8909_v42 = vpop.permute.xlu1 %3690  ;;  %v8914_v37 = vadd.f32 %v7644_v4, %v11834_v31 }
 0x46d   : > { %11821 = vst [vmem:[#allocation78_spill] sm:$0xff] %v8887_v32  ;;  %11827 = vst [vmem:[#allocation394_spill] sm:$0xff] %v8897_v41  ;;  %v11830_v35 = vld [vmem:[#allocation79_spill] sm:$0xff]  ;;  %v11832_v14 = vld [vmem:[#allocation314_spill] sm:$0xff]  ;;  %3958 = vbcast.lane.b32.xlu1 %v8772_v7, 272  ;;  %v8917_v49 = vpop.permute.xlu0 %3734  ;;  %v8919_v60 = vpop.eup %6062 }
 0x46e   : > { %11829 = vst [vmem:[#allocation395_spill] sm:$0xff] %v8900_v45  ;;  %v8905_v44 = vadd.f32 %v7644_v4, %v11830_v35  ;;  %v3006_v47 = vadd.f32 1.0, %v11832_v14  ;;  %11833 = vst [vmem:[#allocation314_spill] sm:$0xff] %v8909_v42  ;;  %v2551_v28 = vand.u32 2147483647, %v8887_v32  ;;  %6080 = vlog2.f32 %v3017_v8  ;;  %v11836_v1 = vld [vmem:[#allocation340_spill] sm:$0xff]  ;;  %v8927_v32 = vpop.eup %6064 }
 0x46f   : > { %11835 = vst [vmem:[#allocation80_spill] sm:$0xff] %v8914_v37  ;;  %v3019_v9 = vadd.f32 1.0, %v11836_v1  ;;  %11837 = vst [vmem:[#allocation340_spill] sm:$0xff] %v8917_v49  ;;  %6082 = vpow2.f32 %v2900_v52  ;;  %v2904_v35 = vmul.f32 1.442695, %v2676_v29  ;;  %v11839_v14 = vld [vmem:[#allocation193_spill] sm:$0xff]  ;;  %v8934_v52 = vpop.eup %6066 }
 0x470   : > { %11831 = vst [vmem:[#allocation79_spill] sm:$0xff] %v8905_v44  ;;  %11838 = vst [vmem:[#allocation396_spill] sm:$0xff] %v8919_v60  ;;  %v11840_v41 = vld [vmem:[#allocation105_spill] sm:$0xff]  ;;  %v11841_v45 = vld [vmem:[#allocation335_spill] sm:$0xff]  ;;  %3994 = vbcast.lane.b32.xlu0 %v8772_v7, 344  ;;  %6084 = vpow2.f32 %v2902_v57  ;;  %v2678_v29 = vsub.f32 0.0, %v2550_v13  ;;  %v8942_v57 = vpop.permute.xlu1 %3698 }
 0x471   : > { %v2193_v58 = vmul.f32 %v11840_v41, %v11839_v14  ;;  %v8924_v42 = vmul.f32 0.6931472, %v11841_v45  ;;  %11842 = vst [vmem:[#allocation193_spill] sm:$0xff] %v8927_v32  ;;  %v2906_v8 = vmul.f32 1.442695, %v2677_v6  ;;  %v11843_v31 = vld [vmem:[#allocation81_spill] sm:$0xff]  ;;  %6086 = vlog2.f32 %v3006_v47  ;;  %v8944_v6 = vpop.eup %6068  ;;  %v8948_v13 = vpop.permute.xlu0 %3742 }
 0x472   : > { %v8931_v1 = vadd.f32 %v7644_v4, %v11843_v31  ;;  %v11845_v49 = vld [vmem:[#allocation319_spill] sm:$0xff]  ;;  %11846 = vst [vmem:[#allocation335_spill] sm:$0xff] %v8934_v52  ;;  %v2552_v41 = vand.u32 2147483647, %v8905_v44  ;;  %v11847_v33 = vld [vmem:[#allocation82_spill] sm:$0xff]  ;;  %3966 = vbcast.lane.b32.xlu1 %v8772_v7, 288  ;;  %6088 = vlog2.f32 %v3019_v9  ;;  %v8950_v52 = vpop.eup %6070 }
 0x473   : > { %v3008_v53 = vadd.f32 1.0, %v11845_v49  ;;  %v8939_v45 = vadd.f32 %v7644_v4, %v11847_v33  ;;  %11849 = vst [vmem:[#allocation319_spill] sm:$0xff] %v8942_v57  ;;  %11850 = vst [vmem:[#allocation82_spill] sm:$0xff] %v8944_v6  ;;  %v2679_v31 = vsub.f32 0.0, %v2551_v28  ;;  %v2553_v32 = vand.u32 2147483647, %v8914_v37  ;;  %v8961_v9 = vpop.eup %6072 }
 0x474   : > { %11844 = vst [vmem:[#allocation105_spill] sm:$0xff] %v8931_v1  ;;  %v3021_v49 = vadd.f32 1.0, %v8548_v43  ;;  %11851 = vst [vmem:[#allocation397_spill] sm:$0xff] %v8948_v13  ;;  %6090 = vpow2.f32 %v2904_v35  ;;  %v11853_v33 = vld [vmem:[#allocation83_spill] sm:$0xff]  ;;  %v11855_v44 = vld [vmem:[#allocation194_spill] sm:$0xff]  ;;  %v11857_v6 = vmax.f32 %v11839_v14, 0.0  ;;  %v8969_v37 = vpop.eup %6074 }
 0x475   : > { %11848 = vst [vmem:[#allocation81_spill] sm:$0xff] %v8939_v45  ;;  %11852 = vst [vmem:[#allocation398_spill] sm:$0xff] %v8950_v52  ;;  %v8954_v47 = vadd.f32 %v7644_v4, %v11853_v33  ;;  %v11856_v60 = vld [vmem:[#allocation106_spill] sm:$0xff]  ;;  %4002 = vbcast.lane.b32.xlu0 %v8772_v7, 360  ;;  %6092 = vpow2.f32 %v2906_v8  ;;  %v2554_v43 = vand.u32 2147483647, %v8931_v1  ;;  %v8975_v8 = vpop.eup %6076  ;;  %v8978_v59 = vpop.permute.xlu0 %3753 }
 0x476   : > { %v2195_v57 = vmul.f32 %v11856_v60, %v11855_v44  ;;  %v2321_v28 = vsub.f32 %v11857_v6, %v2193_v58  ;;  %11858 = vst [vmem:[#allocation194_spill] sm:$0xff] %v8961_v9  ;;  %v11859_v13 = vld [vmem:[#allocation84_spill] sm:$0xff]  ;;  %v2908_v0 = vmul.f32 1.442695, %v2678_v29  ;;  %v2680_v60 = vsub.f32 0.0, %v2552_v41  ;;  %3974 = vbcast.lane.b32.xlu1 %v8772_v7, 304  ;;  %v8973_v58 = vpop.permute.xlu1 %3706  ;;  %v8980_v33 = vpop.eup %6078 }
 0x477   : > { %11854 = vst [vmem:[#allocation83_spill] sm:$0xff] %v8954_v47  ;;  %v8966_v35 = vadd.f32 %v7644_v4, %v11859_v13  ;;  %11862 = vst [vmem:[#allocation84_spill] sm:$0xff] %v8969_v37  ;;  %v2555_v14 = vand.u32 2147483647, %v8939_v45  ;;  %6094 = vlog2.f32 %v3008_v53  ;;  %v2910_v6 = vmul.f32 1.442695, %v2679_v31 }
 0x478   : > { %11863 = vst [vmem:[#allocation399_spill] sm:$0xff] %v8973_v58  ;;  %11864 = vst [vmem:[#allocation400_spill] sm:$0xff] %v8975_v8  ;;  %v2681_v9 = vsub.f32 0.0, %v2553_v32  ;;  %6096 = vlog2.f32 %v3021_v49  ;;  %v2556_v29 = vand.u32 2147483647, %v8954_v47  ;;  %v11868_v41 = vmax.f32 %v11855_v44, 0.0  ;;  %v8989_v32 = vpop.eup %6080 }
 0x479   : > { %11860 = vst [vmem:[#allocation106_spill] sm:$0xff] %v8966_v35  ;;  %11866 = vst [vmem:[#allocation401_spill] sm:$0xff] %v8978_v59  ;;  %v11869_v52 = vld [vmem:[#allocation198_spill] sm:$0xff]  ;;  %v11870_v45 = vld [vmem:[#allocation111_spill] sm:$0xff]  ;;  %4010 = vbcast.lane.b32.xlu0 %v8772_v7, 376  ;;  %v2682_v31 = vsub.f32 0.0, %v2554_v43  ;;  %v8997_v44 = vpop.eup %6082  ;;  %6098 = vpow2.f32 %v2908_v0  ;;  %v9012_v0 = vpop.permute.xlu0 %3761 }
 0x47a   : > { %11867 = vst [vmem:[#allocation402_spill] sm:$0xff] %v8980_v33  ;;  %v2323_v53 = vsub.f32 %v11868_v41, %v2195_v57  ;;  %v2197_v37 = vmul.f32 %v11870_v45, %v11869_v52  ;;  %v11871_v58 = vld [vmem:[#allocation240_spill] sm:$0xff]  ;;  %11872 = vst [vmem:[#allocation198_spill] sm:$0xff] %v8989_v32  ;;  %v2557_v49 = vand.u32 2147483647, %v8966_v35  ;;  %v11873_v13 = vld [vmem:[#allocation85_spill] sm:$0xff]  ;;  %v9003_v43 = vpop.eup %6084  ;;  %6100 = vpow2.f32 %v2910_v6 }
 0x47b   : > { %v3345_v2 = vadd.f32 %v11871_v58, %v2321_v28  ;;  %v8994_v1 = vadd.f32 %v7644_v4, %v11873_v13  ;;  %v11875_v8 = vld [vmem:[#allocation323_spill] sm:$0xff]  ;;  %11876 = vst [vmem:[#allocation240_spill] sm:$0xff] %v8997_v44  ;;  %v2912_v57 = vmul.f32 1.442695, %v2680_v60  ;;  %v2683_v45 = vsub.f32 0.0, %v2555_v14  ;;  %v11877_v41 = vld [vmem:[#allocation277_spill] sm:$0xff]  ;;  %v9001_v58 = vpop.permute.xlu1 %3714  ;;  %v9014_v60 = vpop.eup %6086 }
 0x47c   : > { %v3010_v59 = vadd.f32 1.0, %v11875_v8  ;;  %3982 = vbcast.lane.b32.xlu1 %v8772_v7, 320  ;;  %11878 = vst [vmem:[#allocation85_spill] sm:$0xff] %v9001_v58  ;;  %11879 = vst [vmem:[#allocation323_spill] sm:$0xff] %v9003_v43  ;;  %v2914_v33 = vmul.f32 1.442695, %v2681_v9  ;;  %v9021_v32 = vpop.eup %6088 }
 0x47d   : > { %11874 = vst [vmem:[#allocation111_spill] sm:$0xff] %v8994_v1  ;;  %v4141_v28 = vmul.f32 %v11877_v41, %v3345_v2  ;;  %v11880_v47 = vld [vmem:[#allocation86_spill] sm:$0xff]  ;;  %v11882_v8 = vld [vmem:[#allocation336_spill] sm:$0xff]  ;;  %v2684_v2 = vsub.f32 0.0, %v2556_v29  ;;  %v11885_v14 = vmax.f32 %v11869_v52, 0.0  ;;  %v11887_v58 = vld [vmem:[#allocation115_spill] sm:$0xff] }
 0x47e   : > { %v9007_v13 = vadd.f32 %v7644_v4, %v11880_v47  ;;  %v9010_v35 = vmul.f32 0.6931472, %v11882_v8  ;;  %11883 = vst [vmem:[#allocation86_spill] sm:$0xff] %v9012_v0  ;;  %11884 = vst [vmem:[#allocation336_spill] sm:$0xff] %v9014_v60  ;;  %v11886_v44 = vld [vmem:[#allocation202_spill] sm:$0xff]  ;;  %v11888_v6 = vld [vmem:[#allocation244_spill] sm:$0xff]  ;;  %6102 = vlog2.f32 %v3010_v59  ;;  %v9024_v0 = vpop.eup %6090 }
 0x47f   : > { %v2325_v41 = vsub.f32 %v11885_v14, %v2197_v37  ;;  %v2199_v43 = vmul.f32 %v11887_v58, %v11886_v44  ;;  %v3347_v9 = vadd.f32 %v11888_v6, %v2323_v53  ;;  %4400 = vperm.xlu0 %5778, %v4141_v28   ;;  %11889 = vst [vmem:[#allocation202_spill] sm:$0xff] %v9021_v32  ;;  %v2916_v47 = vmul.f32 1.442695, %v2682_v31  ;;  %v11891_v60 = vld [vmem:[#allocation190_spill] sm:$0xff]  ;;  %v11892_v52 = vld [vmem:[#allocation104_spill] sm:$0xff]  ;;  %v9030_v53 = vpop.permute.xlu1 %3722  ;;  %v9032_v28 = vpop.eup %6092  ;;  %v12186_v51 = vld [vmem:[#allocation379_spill] sm:$0xff] }
 0x480   : > { %11881 = vst [vmem:[#allocation277_spill] sm:$0xff] %v9007_v13  ;;  %v2685_v23 = vsub.f32 0.0, %v2557_v49  ;;  %v2558_v8 = vand.u32 2147483647, %v8994_v1  ;;  %11890 = vst [vmem:[#allocation115_spill] sm:$0xff] %v9024_v0  ;;  %6104 = vpow2.f32 %v2912_v57  ;;  %v2192_v37 = vmul.f32 %v11892_v52, %v11891_v60  ;;  %v11893_v14 = vld [vmem:[#allocation284_spill] sm:$0xff] }
 0x481   : > { %v2918_v29 = vmul.f32 1.442695, %v2683_v45  ;;  %v4143_v50 = vmul.f32 %v11893_v14, %v3347_v9  ;;  %3990 = vbcast.lane.b32.xlu1 %v8772_v7, 336  ;;  %11894 = vst [vmem:[#allocation244_spill] sm:$0xff] %v9030_v53  ;;  %11895 = vst [vmem:[#allocation190_spill] sm:$0xff] %v9032_v28  ;;  %6106 = vpow2.f32 %v2914_v33  ;;  %v11896_v49 = vld [vmem:[#allocation341_spill] sm:$0xff]  ;;  %v9039_v45 = vpop.permute.xlu0 %3769  ;;  %v9041_v58 = vpop.eup %6094 }
 0x482   : > { %v2559_v31 = vand.u32 2147483647, %v9007_v13  ;;  %v9036_v59 = vmul.f32 0.6931472, %v11896_v49  ;;  %v3023_v57 = vadd.f32 1.0, %v8572_v22  ;;  %11897 = vst [vmem:[#allocation104_spill] sm:$0xff] %v9039_v45  ;;  %v9048_v1 = vpop.eup %6096  ;;  %6108 = vpow2.f32 %v2916_v47 }
 0x483   : > { %11898 = vst [vmem:[#allocation284_spill] sm:$0xff] %v9041_v58  ;;  %v2920_v6 = vmul.f32 1.442695, %v2684_v2  ;;  %v11899_v9 = vld [vmem:[#allocation209_spill] sm:$0xff]  ;;  %v11900_v52 = vld [vmem:[#allocation108_spill] sm:$0xff]  ;;  %v11901_v0 = vmax.f32 %v11886_v44, 0.0  ;;  %4406 = vperm.xlu0 %5778, %v4143_v50   ;;  %6110 = vpow2.f32 %v2918_v29  ;;  %v9060_v50 = vpop.permute.xlu1 %3730 }
 0x484   : > { %v2201_v14 = vmul.f32 %v11900_v52, %v11899_v9  ;;  %v11902_v28 = vld [vmem:[#allocation248_spill] sm:$0xff]  ;;  %11903 = vst [vmem:[#allocation341_spill] sm:$0xff] %v9048_v1  ;;  %v2922_v49 = vmul.f32 1.442695, %v2685_v23  ;;  %v2686_v13 = vsub.f32 0.0, %v2558_v8  ;;  %v11904_v22 = vld [vmem:[#allocation87_spill] sm:$0xff]  ;;  %6112 = vlog2.f32 %v3023_v57 }
 0x485   : > { %v2327_v53 = vsub.f32 %v11901_v0, %v2199_v43  ;;  %v3349_v33 = vadd.f32 %v11902_v28, %v2325_v41  ;;  %v9052_v45 = vadd.f32 %v7644_v4, %v11904_v22  ;;  %v11906_v2 = vmax.f32 %v11891_v60, 0.0  ;;  %v11907_v52 = vld [vmem:[#allocation197_spill] sm:$0xff]  ;;  %v11908_v58 = vld [vmem:[#allocation107_spill] sm:$0xff]  ;;  %v11909_v43 = vld [vmem:[#allocation288_spill] sm:$0xff]  ;;  %3998 = vbcast.lane.b32.xlu1 %v8772_v7, 352  ;;  %11910 = vst [vmem:[#allocation108_spill] sm:$0xff] %v9060_v50  ;;  %v9067_v28 = vpop.permute.xlu0 %3777  ;;  %v9069_v60 = vpop.eup %6098 }
 0x486   : > { %v2194_v44 = vmul.f32 %v11908_v58, %v11907_v52  ;;  %v2687_v41 = vsub.f32 0.0, %v2559_v31  ;;  %v11911_v23 = vld [vmem:[#allocation88_spill] sm:$0xff]  ;;  %v11913_v8 = vld [vmem:[#allocation326_spill] sm:$0xff]  ;;  %11914 = vst [vmem:[#allocation87_spill] sm:$0xff] %v9067_v28  ;;  %11915 = vst [vmem:[#allocation197_spill] sm:$0xff] %v9069_v60  ;;  %6114 = vpow2.f32 %v2920_v6  ;;  %v9076_v50 = vpop.eup %6100  ;;  %v11922_v6 = vmax.f32 %v11907_v52, 0.0 }
 0x487   : > { %11905 = vst [vmem:[#allocation209_spill] sm:$0xff] %v9052_v45  ;;  %v2320_v32 = vsub.f32 %v11906_v2, %v2192_v37  ;;  %v4145_v0 = vmul.f32 %v11909_v43, %v3349_v33  ;;  %v9064_v47 = vadd.f32 %v7644_v4, %v11911_v23  ;;  %v3012_v29 = vadd.f32 1.0, %v11913_v8  ;;  %v11917_v33 = vld [vmem:[#allocation212_spill] sm:$0xff]  ;;  %v11918_v22 = vld [vmem:[#allocation110_spill] sm:$0xff]  ;;  %v11919_v43 = vld [vmem:[#allocation255_spill] sm:$0xff] }
 0x488   : > { %v11916_v37 = vmax.f32 %v11899_v9, 0.0  ;;  %v2203_v2 = vmul.f32 %v11918_v22, %v11917_v33  ;;  %v3351_v31 = vadd.f32 %v11919_v43, %v2327_v53  ;;  %11920 = vst [vmem:[#allocation107_spill] sm:$0xff] %v9076_v50  ;;  %6116 = vpow2.f32 %v2922_v49  ;;  %v11921_v8 = vld [vmem:[#allocation342_spill] sm:$0xff]  ;;  %v11923_v9 = vld [vmem:[#allocation201_spill] sm:$0xff] }
 0x489   : > { %11912 = vst [vmem:[#allocation248_spill] sm:$0xff] %v9064_v47  ;;  %4412 = vperm.xlu0 %5778, %v4145_v0   ;;  %v2924_v57 = vmul.f32 1.442695, %v2686_v13  ;;  %v2560_v23 = vand.u32 2147483647, %v9052_v45  ;;  %v2322_v60 = vsub.f32 %v11922_v6, %v2194_v44  ;;  %v11925_v1 = vld [vmem:[#allocation290_spill] sm:$0xff]  ;;  %v3344_v53 = vadd.f32 %v11926_v34, %v2320_v32  ;;  %v9089_v0 = vpop.permute.xlu1 %3738  ;;  %v9091_v13 = vpop.eup %6102 }
 0x48a   : > { %v2329_v58 = vsub.f32 %v11916_v37, %v2201_v14  ;;  %v9080_v28 = vmul.f32 0.6931472, %v11921_v8  ;;  %v11924_v14 = vld [vmem:[#allocation109_spill] sm:$0xff]  ;;  %v4147_v22 = vmul.f32 %v11925_v1, %v3351_v31  ;;  %4006 = vbcast.lane.b32.xlu1 %v8772_v7, 368  ;;  %11927 = vst [vmem:[#allocation288_spill] sm:$0xff] %v9089_v0  ;;  %11928 = vst [vmem:[#allocation88_spill] sm:$0xff] %v9091_v13  ;;  %6118 = vlog2.f32 %v3012_v29  ;;  %v9098_v44 = vpop.permute.xlu0 %3785  ;;  %v9100_v6 = vpop.eup %6104 }
 0x48b   : > { %v2196_v37 = vmul.f32 %v11924_v14, %v11923_v9  ;;  %v2926_v49 = vmul.f32 1.442695, %v2687_v41  ;;  %v2561_v43 = vand.u32 2147483647, %v9064_v47  ;;  %v11929_v8 = vld [vmem:[#allocation89_spill] sm:$0xff]  ;;  %11931 = vst [vmem:[#allocation212_spill] sm:$0xff] %v9098_v44  ;;  %v9108_v45 = vpop.eup %6106  ;;  %6120 = vpow2.f32 %v2924_v57 }
 0x48c   : > { %v9096_v52 = vadd.f32 %v7644_v4, %v11929_v8  ;;  %11932 = vst [vmem:[#allocation110_spill] sm:$0xff] %v9100_v6  ;;  %v11933_v34 = vmax.f32 %v11917_v33, 0.0  ;;  %v11934_v7 = vld [vmem:[#allocation215_spill] sm:$0xff]  ;;  %v11935_v32 = vld [vmem:[#allocation112_spill] sm:$0xff]  ;;  %11938 = vst [vmem:[#allocation255_spill] sm:$0xff] %v9108_v45  ;;  %v2688_v8 = vsub.f32 0.0, %v2560_v23 }
 0x48d   : > { %v2205_v31 = vmul.f32 %v11935_v32, %v11934_v7  ;;  %v11936_v14 = vld [vmem:[#allocation264_spill] sm:$0xff]  ;;  %v11937_v41 = vld [vmem:[#allocation295_spill] sm:$0xff]  ;;  %4418 = vperm.xlu0 %5778, %v4147_v22   ;;  %v3025_v29 = vadd.f32 1.0, %v8608_v30  ;;  %v11940_v6 = vmax.f32 %v11923_v9, 0.0  ;;  %v11943_v32 = vld [vmem:[#allocation293_spill] sm:$0xff]  ;;  %v9118_v22 = vpop.permute.xlu1 %3749  ;;  %6122 = vpow2.f32 %v2926_v49 }
 0x48e   : > { %11930 = vst [vmem:[#allocation326_spill] sm:$0xff] %v9096_v52  ;;  %v2331_v1 = vsub.f32 %v11933_v34, %v2203_v2  ;;  %v3353_v0 = vadd.f32 %v11936_v14, %v2329_v58  ;;  %v4140_v50 = vmul.f32 %v11937_v41, %v3344_v53  ;;  %v11939_v44 = vld [vmem:[#allocation328_spill] sm:$0xff]  ;;  %v11941_v2 = vld [vmem:[#allocation205_spill] sm:$0xff]  ;;  %v11944_v58 = vld [vmem:[#allocation247_spill] sm:$0xff]  ;;  %v9120_v53 = vpop.eup %6108  ;;  %v2689_v57 = vsub.f32 0.0, %v2561_v43 }
 0x48f   : > { %v3014_v47 = vadd.f32 1.0, %v11939_v44  ;;  %v2324_v33 = vsub.f32 %v11940_v6, %v2196_v37  ;;  %v11942_v34 = vld [vmem:[#allocation113_spill] sm:$0xff]  ;;  %v3346_v14 = vadd.f32 %v11944_v58, %v2322_v60  ;;  %11945 = vst [vmem:[#allocation342_spill] sm:$0xff] %v9118_v22  ;;  %11946 = vst [vmem:[#allocation201_spill] sm:$0xff] %v9120_v53  ;;  %v2562_v30 = vand.u32 2147483647, %v9096_v52  ;;  %v9127_v37 = vpop.permute.xlu0 %3793  ;;  %v9129_v44 = vpop.eup %6110 }
 0x490   : > { %v2198_v13 = vmul.f32 %v11942_v34, %v11941_v2  ;;  %v4149_v48 = vmul.f32 %v11943_v32, %v3353_v0  ;;  %4397 = vperm.xlu1 %5779, %v4140_v50   ;;  %v11947_v23 = vld [vmem:[#allocation90_spill] sm:$0xff]  ;;  %11948 = vst [vmem:[#allocation109_spill] sm:$0xff] %v9127_v37  ;;  %11949 = vst [vmem:[#allocation290_spill] sm:$0xff] %v9129_v44  ;;  %v11950_v0 = vmax.f32 %v11934_v7, 0.0  ;;  %v11951_v50 = vld [vmem:[#allocation219_spill] sm:$0xff]  ;;  %v9137_v58 = vpop.eup %6112  ;;  %6124 = vlog2.f32 %v3025_v29 }
 0x491   : > { %v9125_v9 = vadd.f32 %v7644_v4, %v11947_v23  ;;  %v11952_v6 = vld [vmem:[#allocation114_spill] sm:$0xff]  ;;  %v11953_v34 = vld [vmem:[#allocation269_spill] sm:$0xff]  ;;  %v2928_v53 = vmul.f32 1.442695, %v2688_v8  ;;  %v9141_v22 = vpop.eup %6114  ;;  %v11956_v7 = vmax.f32 %v11941_v2, 0.0  ;;  %v2690_v37 = vsub.f32 0.0, %v2562_v30 }
 0x492   : > { %v2333_v60 = vsub.f32 %v11950_v0, %v2205_v31  ;;  %v2207_v41 = vmul.f32 %v11952_v6, %v11951_v50  ;;  %v3355_v32 = vadd.f32 %v11953_v34, %v2331_v1  ;;  %v11954_v49 = vld [vmem:[#allocation298_spill] sm:$0xff]  ;;  %4424 = vperm.xlu0 %5778, %v4149_v48   ;;  %11955 = vst [vmem:[#allocation236_spill] sm:$0xff] %v9141_v22  ;;  %v11957_v0 = vld [vmem:[#allocation208_spill] sm:$0xff]  ;;  %v11958_v6 = vld [vmem:[#allocation117_spill] sm:$0xff]  ;;  %v9151_v8 = vpop.eup %6116  ;;  %v2930_v23 = vmul.f32 1.442695, %v2689_v57 }
 0x493   : > { %v4142_v43 = vmul.f32 %v11954_v49, %v3346_v14  ;;  %v2326_v31 = vsub.f32 %v11956_v7, %v2198_v13  ;;  %v2200_v44 = vmul.f32 %v11958_v6, %v11957_v0  ;;  %v11959_v1 = vld [vmem:[#allocation296_spill] sm:$0xff]  ;;  %v11960_v14 = vld [vmem:[#allocation251_spill] sm:$0xff]  ;;  %v9149_v49 = vpop.permute.xlu1 %3757  ;;  %11962 = vst [vmem:[#allocation215_spill] sm:$0xff] %v9151_v8  ;;  %v2563_v29 = vand.u32 2147483647, %v9125_v9  ;;  %v9154_v20 = vpop.permute.xlu0 %3801  ;;  %v12009_v52 = vld [vmem:[#allocation302_spill] sm:$0xff] }
 0x494   : > { %v4151_v34 = vmul.f32 %v11959_v1, %v3355_v32  ;;  %v3348_v48 = vadd.f32 %v11960_v14, %v2324_v33  ;;  %11961 = vst [vmem:[#allocation89_spill] sm:$0xff] %v9149_v49  ;;  %6126 = vlog2.f32 %v3014_v47  ;;  %11963 = vst [vmem:[#allocation112_spill] sm:$0xff] %v9154_v20  ;;  %v11964_v13 = vmax.f32 %v11951_v50, 0.0  ;;  %v11965_v7 = vld [vmem:[#allocation224_spill] sm:$0xff]  ;;  %v11967_v1 = vld [vmem:[#allocation273_spill] sm:$0xff]  ;;  %v9162_v22 = vpop.eup %6118 }
 0x495   : > { %4403 = vperm.xlu1 %5779, %v4142_v43   ;;  %v11966_v6 = vld [vmem:[#allocation116_spill] sm:$0xff]  ;;  %v3357_v33 = vadd.f32 %v11967_v1, %v2333_v60  ;;  %v11968_v43 = vld [vmem:[#allocation301_spill] sm:$0xff]  ;;  %6128 = vpow2.f32 %v2928_v53  ;;  %v11969_v57 = vld [vmem:[#allocation91_spill] sm:$0xff]  ;;  %v3027_v50 = vadd.f32 1.0, %v8624_v27  ;;  %v2691_v49 = vsub.f32 0.0, %v2563_v29 }
 0x496   : > { %v2335_v2 = vsub.f32 %v11964_v13, %v2207_v41  ;;  %v2209_v32 = vmul.f32 %v11966_v6, %v11965_v7  ;;  %v4144_v14 = vmul.f32 %v11968_v43, %v3348_v48  ;;  %4430 = vperm.xlu0 %5778, %v4151_v34   ;;  %v9166_v30 = vadd.f32 %v7644_v4, %v11969_v57  ;;  %v11971_v47 = vld [vmem:[#allocation92_spill] sm:$0xff]  ;;  %v11975_v6 = vld [vmem:[#allocation119_spill] sm:$0xff]  ;;  %v9181_v57 = vpop.eup %6120  ;;  %v12199_v39 = vld [vmem:[#allocation149_spill] sm:$0xff] }
 0x497   : > { %v9170_v20 = vadd.f32 %v7644_v4, %v11971_v47  ;;  %v11973_v41 = vmax.f32 %v11957_v0, 0.0  ;;  %v11974_v60 = vld [vmem:[#allocation216_spill] sm:$0xff]  ;;  %v11977_v43 = vld [vmem:[#allocation279_spill] sm:$0xff]  ;;  %v9179_v11 = vpop.permute.xlu1 %3765  ;;  %11979 = vst [vmem:[#allocation205_spill] sm:$0xff] %v9181_v57  ;;  %6130 = vpow2.f32 %v2930_v23  ;;  %v2932_v47 = vmul.f32 1.442695, %v2690_v37  ;;  %v9184_v45 = vpop.permute.xlu0 %3809 }
 0x498   : > { %11970 = vst [vmem:[#allocation264_spill] sm:$0xff] %v9166_v30  ;;  %v2202_v48 = vmul.f32 %v11975_v6, %v11974_v60  ;;  %v11976_v34 = vld [vmem:[#allocation300_spill] sm:$0xff]  ;;  %v3350_v53 = vadd.f32 %v11977_v43, %v2326_v31  ;;  %11978 = vst [vmem:[#allocation328_spill] sm:$0xff] %v9179_v11  ;;  %v11984_v6 = vld [vmem:[#allocation118_spill] sm:$0xff]  ;;  %v9192_v11 = vpop.eup %6122  ;;  %v2564_v37 = vand.u32 2147483647, %v9166_v30  ;;  %6132 = vlog2.f32 %v3027_v50 }
 0x499   : > { %11972 = vst [vmem:[#allocation295_spill] sm:$0xff] %v9170_v20  ;;  %v2328_v13 = vsub.f32 %v11973_v41, %v2200_v44  ;;  %v4153_v1 = vmul.f32 %v11976_v34, %v3357_v33  ;;  %4409 = vperm.xlu1 %5779, %v4144_v14   ;;  %v11980_v8 = vld [vmem:[#allocation332_spill] sm:$0xff]  ;;  %11981 = vst [vmem:[#allocation113_spill] sm:$0xff] %v9184_v45  ;;  %v11982_v44 = vmax.f32 %v11965_v7, 0.0  ;;  %v11985_v34 = vld [vmem:[#allocation278_spill] sm:$0xff]  ;;  %v11990_v7 = vmax.f32 %v11974_v60, 0.0 }
 0x49a   : > { %v3016_v27 = vadd.f32 1.0, %v11980_v8  ;;  %v11983_v41 = vld [vmem:[#allocation228_spill] sm:$0xff]  ;;  %v3359_v31 = vadd.f32 %v11985_v34, %v2335_v2  ;;  %11987 = vst [vmem:[#allocation293_spill] sm:$0xff] %v9192_v11  ;;  %v2565_v23 = vand.u32 2147483647, %v9170_v20  ;;  %v11988_v8 = vld [vmem:[#allocation93_spill] sm:$0xff]  ;;  %v9208_v57 = vpop.eup %6124 }
 0x49b   : > { %v2337_v0 = vsub.f32 %v11982_v44, %v2209_v32  ;;  %v2211_v33 = vmul.f32 %v11984_v6, %v11983_v41  ;;  %v11986_v14 = vld [vmem:[#allocation304_spill] sm:$0xff]  ;;  %4436 = vperm.xlu0 %5778, %v4153_v1   ;;  %v9198_v29 = vadd.f32 %v7644_v4, %v11988_v8  ;;  %v2330_v32 = vsub.f32 %v11990_v7, %v2202_v48  ;;  %v11992_v6 = vld [vmem:[#allocation121_spill] sm:$0xff]  ;;  %v11993_v34 = vld [vmem:[#allocation303_spill] sm:$0xff]  ;;  %v9206_v45 = vpop.permute.xlu1 %3773  ;;  %v9215_v60 = vpop.permute.xlu0 %3820 }
 0x49c   : > { %v4146_v43 = vmul.f32 %v11986_v14, %v3350_v53  ;;  %v11991_v44 = vld [vmem:[#allocation220_spill] sm:$0xff]  ;;  %v4155_v53 = vmul.f32 %v11993_v34, %v3359_v31  ;;  %v11994_v1 = vld [vmem:[#allocation297_spill] sm:$0xff]  ;;  %11995 = vst [vmem:[#allocation90_spill] sm:$0xff] %v9206_v45  ;;  %11996 = vst [vmem:[#allocation219_spill] sm:$0xff] %v9208_v57  ;;  %v2934_v11 = vmul.f32 1.442695, %v2691_v49  ;;  %6134 = vlog2.f32 %v3016_v27 }
 0x49d   : > { %11989 = vst [vmem:[#allocation247_spill] sm:$0xff] %v9198_v29  ;;  %v2204_v2 = vmul.f32 %v11992_v6, %v11991_v44  ;;  %v3352_v14 = vadd.f32 %v11994_v1, %v2328_v13  ;;  %v11997_v30 = vld [vmem:[#allocation94_spill] sm:$0xff]  ;;  %v3029_v50 = vadd.f32 1.0, %v8638_v40  ;;  %11999 = vst [vmem:[#allocation269_spill] sm:$0xff] %v9215_v60  ;;  %v12000_v48 = vmax.f32 %v11983_v41, 0.0  ;;  %v12001_v7 = vld [vmem:[#allocation235_spill] sm:$0xff] }
 0x49e   : > { %4415 = vperm.xlu1 %5779, %v4146_v43   ;;  %v9212_v8 = vadd.f32 %v7644_v4, %v11997_v30  ;;  %v12002_v13 = vld [vmem:[#allocation120_spill] sm:$0xff]  ;;  %v12003_v6 = vld [vmem:[#allocation291_spill] sm:$0xff]  ;;  %v9223_v49 = vpop.eup %6126  ;;  %6136 = vpow2.f32 %v2932_v47  ;;  %v2692_v30 = vsub.f32 0.0, %v2564_v37  ;;  %v2693_v27 = vsub.f32 0.0, %v2565_v23  ;;  %v12006_v41 = vld [vmem:[#allocation222_spill] sm:$0xff] }
 0x49f   : > { %v2339_v31 = vsub.f32 %v12000_v48, %v2211_v33  ;;  %v2213_v43 = vmul.f32 %v12002_v13, %v12001_v7  ;;  %v3361_v34 = vadd.f32 %v12003_v6, %v2337_v0  ;;  %v12004_v1 = vld [vmem:[#allocation308_spill] sm:$0xff]  ;;  %4442 = vperm.xlu0 %5778, %v4155_v53   ;;  %v2566_v40 = vand.u32 2147483647, %v9198_v29  ;;  %v12007_v33 = vld [vmem:[#allocation123_spill] sm:$0xff]  ;;  %v12008_v57 = vld [vmem:[#allocation306_spill] sm:$0xff]  ;;  %v9234_v53 = vpop.eup %6128 }
 0x4a0   : > { %11998 = vst [vmem:[#allocation114_spill] sm:$0xff] %v9212_v8  ;;  %v4148_v45 = vmul.f32 %v12004_v1, %v3352_v14  ;;  %v12005_v60 = vmax.f32 %v11991_v44, 0.0  ;;  %v2206_v48 = vmul.f32 %v12007_v33, %v12006_v41  ;;  %v3354_v0 = vadd.f32 %v12009_v52, %v2330_v32  ;;  %v9232_v14 = vpop.permute.xlu1 %3781  ;;  %12011 = vst [vmem:[#allocation208_spill] sm:$0xff] %v9234_v53  ;;  %v12012_v37 = vld [vmem:[#allocation95_spill] sm:$0xff]  ;;  %v12014_v44 = vld [vmem:[#allocation338_spill] sm:$0xff] }
 0x4a1   : > { %v4157_v13 = vmul.f32 %v12008_v57, %v3361_v34  ;;  %12010 = vst [vmem:[#allocation298_spill] sm:$0xff] %v9232_v14  ;;  %6138 = vpow2.f32 %v2934_v11  ;;  %v2567_v47 = vand.u32 2147483647, %v9212_v8  ;;  %v9239_v23 = vadd.f32 %v7644_v4, %v12012_v37  ;;  %v12017_v52 = vld [vmem:[#allocation241_spill] sm:$0xff]  ;;  %v12019_v34 = vld [vmem:[#allocation294_spill] sm:$0xff]  ;;  %v12020_v33 = vld [vmem:[#allocation311_spill] sm:$0xff]  ;;  %v9250_v53 = vpop.eup %6130 }
 0x4a2   : > { %v2332_v20 = vsub.f32 %v12005_v60, %v2204_v2  ;;  %4421 = vperm.xlu1 %5779, %v4148_v45   ;;  %v3018_v2 = vadd.f32 1.0, %v12014_v44  ;;  %v9242_v60 = vpop.permute.xlu0 %3828  ;;  %v12016_v57 = vmax.f32 %v12001_v7, 0.0  ;;  %v12018_v45 = vld [vmem:[#allocation122_spill] sm:$0xff]  ;;  %v3363_v1 = vadd.f32 %v12019_v34, %v2339_v31  ;;  %12021 = vst [vmem:[#allocation251_spill] sm:$0xff] %v9250_v53  ;;  %v12022_v29 = vld [vmem:[#allocation96_spill] sm:$0xff]  ;;  %v12027_v8 = vld [vmem:[#allocation309_spill] sm:$0xff] }
 0x4a3   : > { %12013 = vst [vmem:[#allocation117_spill] sm:$0xff] %v9239_v23  ;;  %12015 = vst [vmem:[#allocation296_spill] sm:$0xff] %v9242_v60  ;;  %v2215_v32 = vmul.f32 %v12018_v45, %v12017_v52  ;;  %v4150_v11 = vmul.f32 %v12020_v33, %v3354_v0  ;;  %4448 = vperm.xlu0 %5778, %v4157_v13   ;;  %v2936_v14 = vmul.f32 1.442695, %v2692_v30  ;;  %v2694_v37 = vsub.f32 0.0, %v2566_v40  ;;  %v12026_v60 = vld [vmem:[#allocation125_spill] sm:$0xff]  ;;  %v9264_v30 = vpop.eup %6132 }
 0x4a4   : > { %v2341_v6 = vsub.f32 %v12016_v57, %v2213_v43  ;;  %v9254_v44 = vadd.f32 %v7644_v4, %v12022_v29  ;;  %6140 = vlog2.f32 %v3029_v50  ;;  %v12024_v7 = vmax.f32 %v12006_v41, 0.0  ;;  %v12025_v57 = vld [vmem:[#allocation225_spill] sm:$0xff]  ;;  %v12028_v34 = vld [vmem:[#allocation307_spill] sm:$0xff]  ;;  %v9262_v13 = vpop.permute.xlu1 %3789  ;;  %12030 = vst [vmem:[#allocation273_spill] sm:$0xff] %v9264_v30 }
 0x4a5   : > { %v2208_v45 = vmul.f32 %v12026_v60, %v12025_v57  ;;  %v4159_v31 = vmul.f32 %v12027_v8, %v3363_v1  ;;  %v3356_v0 = vadd.f32 %v12028_v34, %v2332_v20  ;;  %12029 = vst [vmem:[#allocation116_spill] sm:$0xff] %v9262_v13  ;;  %v2938_v40 = vmul.f32 1.442695, %v2693_v27  ;;  %v12033_v60 = vld [vmem:[#allocation245_spill] sm:$0xff]  ;;  %v12035_v1 = vld [vmem:[#allocation299_spill] sm:$0xff] }
 0x4a6   : > { %12023 = vst [vmem:[#allocation224_spill] sm:$0xff] %v9254_v44  ;;  %v2334_v43 = vsub.f32 %v12024_v7, %v2206_v48  ;;  %4427 = vperm.xlu1 %5779, %v4150_v11   ;;  %v2695_v33 = vsub.f32 0.0, %v2567_v47  ;;  %v2568_v29 = vand.u32 2147483647, %v9239_v23  ;;  %6142 = vlog2.f32 %v3018_v2  ;;  %v9267_v50 = vpop.permute.xlu0 %3836  ;;  %v12034_v7 = vld [vmem:[#allocation124_spill] sm:$0xff]  ;;  %v9275_v13 = vpop.eup %6134  ;;  %v12037_v2 = vld [vmem:[#allocation97_spill] sm:$0xff] }
 0x4a7   : > { %12031 = vst [vmem:[#allocation301_spill] sm:$0xff] %v9267_v50  ;;  %v12032_v41 = vmax.f32 %v12017_v52, 0.0  ;;  %v2217_v8 = vmul.f32 %v12034_v7, %v12033_v60  ;;  %v3365_v20 = vadd.f32 %v12035_v1, %v2341_v6  ;;  %v12036_v11 = vld [vmem:[#allocation316_spill] sm:$0xff]  ;;  %4454 = vperm.xlu0 %5778, %v4159_v31   ;;  %6144 = vpow2.f32 %v2936_v14  ;;  %v12041_v7 = vld [vmem:[#allocation127_spill] sm:$0xff] }
 0x4a8   : > { %v4152_v34 = vmul.f32 %v12036_v11, %v3356_v0  ;;  %v2940_v27 = vmul.f32 1.442695, %v2694_v37  ;;  %v2569_v47 = vand.u32 2147483647, %v9254_v44  ;;  %v9280_v50 = vadd.f32 %v7644_v4, %v12037_v2  ;;  %v12042_v6 = vld [vmem:[#allocation312_spill] sm:$0xff]  ;;  %v12043_v0 = vld [vmem:[#allocation315_spill] sm:$0xff]  ;;  %v9288_v11 = vpop.permute.xlu1 %3797  ;;  %v9290_v14 = vpop.eup %6136 }
 0x4a9   : > { %v2343_v48 = vsub.f32 %v12032_v41, %v2215_v32  ;;  %v12039_v52 = vmax.f32 %v12025_v57, 0.0  ;;  %v12040_v41 = vld [vmem:[#allocation229_spill] sm:$0xff]  ;;  %v4161_v1 = vmul.f32 %v12042_v6, %v3365_v20  ;;  %v3358_v31 = vadd.f32 %v12043_v0, %v2334_v43  ;;  %12044 = vst [vmem:[#allocation92_spill] sm:$0xff] %v9288_v11  ;;  %12045 = vst [vmem:[#allocation216_spill] sm:$0xff] %v9290_v14  ;;  %v12046_v2 = vld [vmem:[#allocation98_spill] sm:$0xff] }
 0x4aa   : > { %12038 = vst [vmem:[#allocation91_spill] sm:$0xff] %v9280_v50  ;;  %v2210_v53 = vmul.f32 %v12041_v7, %v12040_v41  ;;  %4433 = vperm.xlu1 %5779, %v4152_v34   ;;  %6146 = vpow2.f32 %v2938_v40  ;;  %v2942_v37 = vmul.f32 1.442695, %v2695_v33  ;;  %v2696_v23 = vsub.f32 0.0, %v2568_v29  ;;  %v9296_v57 = vpop.permute.xlu0 %3844  ;;  %v12050_v20 = vld [vmem:[#allocation252_spill] sm:$0xff]  ;;  %v12051_v7 = vld [vmem:[#allocation126_spill] sm:$0xff] }
 0x4ab   : > { %v2336_v32 = vsub.f32 %v12039_v52, %v2208_v45  ;;  %v9294_v44 = vadd.f32 %v7644_v4, %v12046_v2  ;;  %12048 = vst [vmem:[#allocation300_spill] sm:$0xff] %v9296_v57  ;;  %v12049_v45 = vmax.f32 %v12033_v60, 0.0  ;;  %v2219_v43 = vmul.f32 %v12051_v7, %v12050_v20  ;;  %v12052_v34 = vld [vmem:[#allocation305_spill] sm:$0xff]  ;;  %v12053_v0 = vld [vmem:[#allocation320_spill] sm:$0xff]  ;;  %4460 = vperm.xlu0 %5778, %v4161_v1   ;;  %v9304_v40 = vpop.eup %6138 }
 0x4ac   : > { %v3367_v6 = vadd.f32 %v12052_v34, %v2343_v48  ;;  %v4154_v11 = vmul.f32 %v12053_v0, %v3358_v31  ;;  %12054 = vst [vmem:[#allocation279_spill] sm:$0xff] %v9304_v40  ;;  %6148 = vpow2.f32 %v2940_v27  ;;  %v2697_v33 = vsub.f32 0.0, %v2569_v47  ;;  %v12058_v7 = vld [vmem:[#allocation317_spill] sm:$0xff]  ;;  %v12059_v48 = vld [vmem:[#allocation322_spill] sm:$0xff]  ;;  %v9314_v1 = vpop.permute.xlu1 %3805  ;;  %v12064_v0 = vld [vmem:[#allocation128_spill] sm:$0xff] }
 0x4ad   : > { %12047 = vst [vmem:[#allocation119_spill] sm:$0xff] %v9294_v44  ;;  %v2345_v52 = vsub.f32 %v12049_v45, %v2217_v8  ;;  %v2570_v29 = vand.u32 2147483647, %v9280_v50  ;;  %v3031_v2 = vadd.f32 1.0, %v8655_v19  ;;  %v12055_v57 = vmax.f32 %v12040_v41, 0.0  ;;  %v12056_v8 = vld [vmem:[#allocation232_spill] sm:$0xff] }
 0x4ae   : > { %v12057_v45 = vld [vmem:[#allocation129_spill] sm:$0xff]  ;;  %v4163_v30 = vmul.f32 %v12058_v7, %v3367_v6  ;;  %v3360_v34 = vadd.f32 %v12059_v48, %v2336_v32  ;;  %4439 = vperm.xlu1 %5779, %v4154_v11   ;;  %12060 = vst [vmem:[#allocation332_spill] sm:$0xff] %v9314_v1  ;;  %v9316_v31 = vpop.eup %6140  ;;  %6150 = vpow2.f32 %v2942_v37  ;;  %v2944_v27 = vmul.f32 1.442695, %v2696_v23  ;;  %v12063_v6 = vld [vmem:[#allocation256_spill] sm:$0xff] }
 0x4af   : > { %v2338_v60 = vsub.f32 %v12055_v57, %v2210_v53  ;;  %v2212_v14 = vmul.f32 %v12057_v45, %v12056_v8  ;;  %v2571_v47 = vand.u32 2147483647, %v9294_v44  ;;  %v9320_v19 = vmul.f32 0.6931472, %v8556_v61  ;;  %v9322_v53 = vpop.permute.xlu0 %3852  ;;  %v12065_v11 = vld [vmem:[#allocation313_spill] sm:$0xff]  ;;  %v12066_v7 = vld [vmem:[#allocation324_spill] sm:$0xff] }
 0x4b0   : > { %12061 = vst [vmem:[#allocation228_spill] sm:$0xff] %v9322_v53  ;;  %v12062_v41 = vmax.f32 %v12050_v20, 0.0  ;;  %v2221_v32 = vmul.f32 %v12064_v0, %v12063_v6  ;;  %v3369_v45 = vadd.f32 %v12065_v11, %v2345_v52  ;;  %v4156_v48 = vmul.f32 %v12066_v7, %v3360_v34  ;;  %4466 = vperm.xlu0 %5778, %v4163_v30   ;;  %v9330_v37 = vpop.eup %6142  ;;  %v12067_v40 = vld [vmem:[#allocation100_spill] sm:$0xff]  ;;  %v12070_v53 = vld [vmem:[#allocation131_spill] sm:$0xff]  ;;  %v12071_v50 = vld [vmem:[#allocation321_spill] sm:$0xff]  ;;  %v9342_v30 = vpop.permute.xlu1 %3816 }
 0x4b1   : > { %v2946_v23 = vmul.f32 1.442695, %v2697_v33  ;;  %v2698_v1 = vsub.f32 0.0, %v2570_v29  ;;  %v9334_v61 = vadd.f32 %v7644_v4, %v12067_v40  ;;  %6152 = vlog2.f32 %v3031_v2  ;;  %12072 = vst [vmem:[#allocation118_spill] sm:$0xff] %v9342_v30  ;;  %v9344_v33 = vpop.eup %6144  ;;  %v12074_v40 = vld [vmem:[#allocation99_spill] sm:$0xff]  ;;  %v12081_v7 = vld [vmem:[#allocation318_spill] sm:$0xff] }
 0x4b2   : > { %v2347_v57 = vsub.f32 %v12062_v41, %v2219_v43  ;;  %v12068_v20 = vmax.f32 %v12056_v8, 0.0  ;;  %v12069_v41 = vld [vmem:[#allocation238_spill] sm:$0xff]  ;;  %v4165_v52 = vmul.f32 %v12071_v50, %v3369_v45  ;;  %v3362_v34 = vadd.f32 %v8588_v17, %v2338_v60  ;;  %4445 = vperm.xlu1 %5779, %v4156_v48   ;;  %12073 = vst [vmem:[#allocation278_spill] sm:$0xff] %v9344_v33  ;;  %v12076_v8 = vld [vmem:[#allocation344_spill] sm:$0xff]  ;;  %v12086_v30 = vld [vmem:[#allocation325_spill] sm:$0xff] }
 0x4b3   : > { %v2214_v0 = vmul.f32 %v12070_v53, %v12069_v41  ;;  %6154 = vpow2.f32 %v2944_v27  ;;  %v2699_v29 = vsub.f32 0.0, %v2571_v47  ;;  %v9348_v2 = vadd.f32 %v7644_v4, %v12074_v40  ;;  %v9351_v11 = vpop.permute.xlu0 %3860  ;;  %v12079_v45 = vld [vmem:[#allocation260_spill] sm:$0xff]  ;;  %v12080_v17 = vld [vmem:[#allocation130_spill] sm:$0xff] }
 0x4b4   : > { %v2340_v43 = vsub.f32 %v12068_v20, %v2212_v14  ;;  %v3020_v14 = vadd.f32 1.0, %v12076_v8  ;;  %12077 = vst [vmem:[#allocation93_spill] sm:$0xff] %v9351_v11  ;;  %v12078_v53 = vmax.f32 %v12063_v6, 0.0  ;;  %v2223_v60 = vmul.f32 %v12080_v17, %v12079_v45  ;;  %v12082_v20 = vld [vmem:[#allocation327_spill] sm:$0xff]  ;;  %4472 = vperm.xlu0 %5778, %v4165_v52   ;;  %v9359_v27 = vpop.eup %6146  ;;  %v12085_v11 = vld [vmem:[#allocation133_spill] sm:$0xff]  ;;  %v9371_v52 = vpop.permute.xlu1 %3824 }
 0x4b5   : > { %12075 = vst [vmem:[#allocation304_spill] sm:$0xff] %v9348_v2  ;;  %v3371_v48 = vadd.f32 %v12081_v7, %v2347_v57  ;;  %v4158_v33 = vmul.f32 %v12082_v20, %v3362_v34  ;;  %6156 = vpow2.f32 %v2946_v23  ;;  %v2948_v47 = vmul.f32 1.442695, %v2698_v1  ;;  %12087 = vst [vmem:[#allocation220_spill] sm:$0xff] %v9371_v52  ;;  %v12091_v20 = vld [vmem:[#allocation265_spill] sm:$0xff]  ;;  %v12096_v52 = vld [vmem:[#allocation103_spill] sm:$0xff] }
 0x4b6   : > { %v2349_v50 = vsub.f32 %v12078_v53, %v2221_v32  ;;  %v2572_v40 = vand.u32 2147483647, %v9334_v61  ;;  %v9363_v8 = vmul.f32 0.6931472, %v8580_v24  ;;  %v12083_v6 = vmax.f32 %v12069_v41, 0.0  ;;  %v12084_v53 = vld [vmem:[#allocation242_spill] sm:$0xff]  ;;  %v9373_v23 = vpop.eup %6148 }
 0x4b7   : > { %v2216_v17 = vmul.f32 %v12085_v11, %v12084_v53  ;;  %v4167_v57 = vmul.f32 %v12086_v30, %v3371_v48  ;;  %v3364_v34 = vadd.f32 %v8619_v62, %v2340_v43  ;;  %4451 = vperm.xlu1 %5779, %v4158_v33   ;;  %12088 = vst [vmem:[#allocation121_spill] sm:$0xff] %v9373_v23  ;;  %v2950_v1 = vmul.f32 1.442695, %v2699_v29  ;;  %v9377_v41 = vpop.permute.xlu0 %3868  ;;  %v12092_v30 = vld [vmem:[#allocation132_spill] sm:$0xff]  ;;  %v12093_v62 = vld [vmem:[#allocation345_spill] sm:$0xff]  ;;  %v12094_v33 = vld [vmem:[#allocation331_spill] sm:$0xff] }
 0x4b8   : > { %v2342_v32 = vsub.f32 %v12083_v6, %v2214_v0  ;;  %v2573_v7 = vand.u32 2147483647, %v9348_v2  ;;  %6158 = vlog2.f32 %v3020_v14  ;;  %12089 = vst [vmem:[#allocation303_spill] sm:$0xff] %v9377_v41  ;;  %v12090_v0 = vmax.f32 %v12079_v45, 0.0  ;;  %v9385_v23 = vpop.eup %6150  ;;  %v12483_v2 = vld [vmem:[#allocation221_spill] sm:$0xff] }
 0x4b9   : > { %v2225_v48 = vmul.f32 %v12092_v30, %v12091_v20  ;;  %v3373_v43 = vadd.f32 %v12093_v62, %v2349_v50  ;;  %v4160_v6 = vmul.f32 %v12094_v33, %v3364_v34  ;;  %4478 = vperm.xlu0 %5778, %v4167_v57   ;;  %12095 = vst [vmem:[#allocation297_spill] sm:$0xff] %v9385_v23  ;;  %6160 = vpow2.f32 %v2948_v47  ;;  %v12100_v30 = vld [vmem:[#allocation135_spill] sm:$0xff]  ;;  %v12101_v50 = vld [vmem:[#allocation329_spill] sm:$0xff]  ;;  %v9398_v34 = vpop.permute.xlu1 %3832 }
 0x4ba   : > { %v2351_v11 = vsub.f32 %v12090_v0, %v2223_v60  ;;  %v2700_v29 = vsub.f32 0.0, %v2572_v40  ;;  %v9389_v14 = vadd.f32 %v7644_v4, %v12096_v52  ;;  %v3033_v24 = vadd.f32 1.0, %v8672_v63  ;;  %v12099_v0 = vld [vmem:[#allocation249_spill] sm:$0xff]  ;;  %12102 = vst [vmem:[#allocation235_spill] sm:$0xff] %v9398_v34 }
 0x4bb   : > { %v12098_v45 = vmax.f32 %v12084_v53, 0.0  ;;  %v2218_v41 = vmul.f32 %v12100_v30, %v12099_v0  ;;  %v4169_v62 = vmul.f32 %v12101_v50, %v3373_v43  ;;  %v3366_v57 = vadd.f32 %v8701_v21, %v2342_v32  ;;  %4457 = vperm.xlu1 %5779, %v4160_v6   ;;  %v9400_v47 = vpop.eup %6152  ;;  %v12103_v52 = vld [vmem:[#allocation101_spill] sm:$0xff]  ;;  %v12105_v53 = vld [vmem:[#allocation347_spill] sm:$0xff]  ;;  %v9407_v33 = vpop.permute.xlu0 %3876  ;;  %v12108_v30 = vld [vmem:[#allocation270_spill] sm:$0xff] }
 0x4bc   : > { %12097 = vst [vmem:[#allocation94_spill] sm:$0xff] %v9389_v14  ;;  %6162 = vpow2.f32 %v2950_v1  ;;  %v2701_v40 = vsub.f32 0.0, %v2573_v7  ;;  %v9404_v63 = vadd.f32 %v7644_v4, %v12103_v52  ;;  %12106 = vst [vmem:[#allocation291_spill] sm:$0xff] %v9407_v33  ;;  %v12109_v21 = vld [vmem:[#allocation134_spill] sm:$0xff]  ;;  %v3375_v6 = vadd.f32 %v8597_v18, %v2351_v11  ;;  %v12110_v50 = vld [vmem:[#allocation337_spill] sm:$0xff] }
 0x4bd   : > { %v2344_v60 = vsub.f32 %v12098_v45, %v2216_v17  ;;  %v3022_v17 = vadd.f32 1.0, %v12105_v53  ;;  %v12107_v45 = vmax.f32 %v12091_v20, 0.0  ;;  %v2227_v32 = vmul.f32 %v12109_v21, %v12108_v30  ;;  %4484 = vperm.xlu0 %5778, %v4169_v62   ;;  %v9415_v1 = vpop.eup %6154  ;;  %v12116_v21 = vld [vmem:[#allocation333_spill] sm:$0xff]  ;;  %v9425_v11 = vpop.permute.xlu1 %3840 }
 0x4be   : > { %12104 = vst [vmem:[#allocation120_spill] sm:$0xff] %v9404_v63  ;;  %v4162_v10 = vmul.f32 %v12110_v50, %v3366_v57  ;;  %12111 = vst [vmem:[#allocation308_spill] sm:$0xff] %v9415_v1  ;;  %v2952_v7 = vmul.f32 1.442695, %v2700_v29  ;;  %v2574_v4 = vand.u32 2147483647, %v9389_v14  ;;  %6164 = vlog2.f32 %v3033_v24 }
 0x4bf   : > { %v2353_v43 = vsub.f32 %v12107_v45, %v2225_v48  ;;  %v12113_v33 = vmax.f32 %v12099_v0, 0.0  ;;  %v12114_v48 = vld [vmem:[#allocation254_spill] sm:$0xff]  ;;  %v12115_v45 = vld [vmem:[#allocation137_spill] sm:$0xff]  ;;  %v4171_v23 = vmul.f32 %v12116_v21, %v3375_v6  ;;  %v3368_v18 = vadd.f32 %v8736_v12, %v2344_v60  ;;  %12117 = vst [vmem:[#allocation222_spill] sm:$0xff] %v9425_v11  ;;  %v9427_v62 = vpop.eup %6156  ;;  %v9431_v0 = vpop.permute.xlu0 %3887  ;;  %v12120_v50 = vld [vmem:[#allocation275_spill] sm:$0xff] }
 0x4c0   : > { %v2220_v34 = vmul.f32 %v12115_v45, %v12114_v48  ;;  %4463 = vperm.xlu1 %5779, %v4162_v10   ;;  %v2954_v29 = vmul.f32 1.442695, %v2701_v40  ;;  %v2575_v57 = vand.u32 2147483647, %v9404_v63  ;;  %6166 = vlog2.f32 %v3022_v17  ;;  %12118 = vst [vmem:[#allocation123_spill] sm:$0xff] %v9431_v0  ;;  %v12121_v6 = vld [vmem:[#allocation136_spill] sm:$0xff] }
 0x4c1   : > { %v2346_v20 = vsub.f32 %v12113_v33, %v2218_v41  ;;  %v12119_v41 = vmax.f32 %v12108_v30, 0.0  ;;  %v2229_v45 = vmul.f32 %v12121_v6, %v12120_v50  ;;  %v3377_v10 = vadd.f32 %v8649_v55, %v2353_v43  ;;  %v12122_v12 = vld [vmem:[#allocation343_spill] sm:$0xff]  ;;  %4490 = vperm.xlu0 %5778, %v4171_v23   ;;  %v9449_v23 = vpop.permute.xlu1 %3848  ;;  %v12232_v1 = vld [vmem:[#allocation364_spill] sm:$0xff] }
 0x4c2   : > { %v4164_v60 = vmul.f32 %v12122_v12, %v3368_v18  ;;  %v9439_v21 = vpop.eup %6158  ;;  %6168 = vpow2.f32 %v2952_v7  ;;  %v2702_v40 = vsub.f32 0.0, %v2574_v4  ;;  %v3035_v17 = vadd.f32 1.0, %v8690_v15  ;;  %v12126_v6 = vld [vmem:[#allocation339_spill] sm:$0xff]  ;;  %12127 = vst [vmem:[#allocation306_spill] sm:$0xff] %v9449_v23  ;;  %v12129_v15 = vld [vmem:[#allocation56_spill] sm:$0xff]  ;;  %v12132_v12 = vld [vmem:[#allocation281_spill] sm:$0xff] }
 0x4c3   : > { %v2355_v33 = vsub.f32 %v12119_v41, %v2227_v32  ;;  %v12123_v24 = vmax.f32 %v12114_v48, 0.0  ;;  %v12124_v32 = vld [vmem:[#allocation259_spill] sm:$0xff]  ;;  %v4173_v52 = vmul.f32 %v12126_v6, %v3377_v10  ;;  %v3370_v55 = vadd.f32 %v9010_v35, %v2346_v20  ;;  %v9451_v43 = vpop.eup %6160  ;;  %v9455_v48 = vpop.permute.xlu0 %3895  ;;  %v12133_v10 = vld [vmem:[#allocation138_spill] sm:$0xff]  ;;  %v12134_v20 = vld [vmem:[#allocation348_spill] sm:$0xff] }
 0x4c4   : > { %v12125_v41 = vld [vmem:[#allocation139_spill] sm:$0xff]  ;;  %4469 = vperm.xlu1 %5779, %v4164_v60   ;;  %12128 = vst [vmem:[#allocation302_spill] sm:$0xff] %v9451_v43  ;;  %6170 = vpow2.f32 %v2954_v29  ;;  %v2703_v7 = vsub.f32 0.0, %v2575_v57  ;;  %v3024_v18 = vadd.f32 1.0, %v12129_v15  ;;  %12130 = vst [vmem:[#allocation95_spill] sm:$0xff] %v9455_v48  ;;  %v12136_v4 = vld [vmem:[#allocation57_spill] sm:$0xff] }
 0x4c5   : > { %v2348_v30 = vsub.f32 %v12123_v24, %v2220_v34  ;;  %v2222_v11 = vmul.f32 %v12125_v41, %v12124_v32  ;;  %v12131_v34 = vmax.f32 %v12120_v50, 0.0  ;;  %v2231_v41 = vmul.f32 %v12133_v10, %v12132_v12  ;;  %4496 = vperm.xlu0 %5778, %v4173_v52   ;;  %v12140_v10 = vld [vmem:[#allocation346_spill] sm:$0xff]  ;;  %v9473_v52 = vpop.permute.xlu1 %3856  ;;  %v12150_v57 = vld [vmem:[#allocation143_spill] sm:$0xff]  ;;  %v12151_v15 = vld [vmem:[#allocation349_spill] sm:$0xff] }
 0x4c6   : > { %v3379_v35 = vadd.f32 %v8730_v56, %v2355_v33  ;;  %v4166_v60 = vmul.f32 %v12134_v20, %v3370_v55  ;;  %v9463_v6 = vpop.eup %6162  ;;  %v2956_v29 = vmul.f32 1.442695, %v2702_v40  ;;  %6172 = vlog2.f32 %v3035_v17  ;;  %12141 = vst [vmem:[#allocation241_spill] sm:$0xff] %v9473_v52  ;;  %v12200_v55 = vld [vmem:[#allocation357_spill] sm:$0xff] }
 0x4c7   : > { %v2357_v24 = vsub.f32 %v12131_v34, %v2229_v45  ;;  %12135 = vst [vmem:[#allocation338_spill] sm:$0xff] %v9463_v6  ;;  %v12137_v53 = vmax.f32 %v12124_v32, 0.0  ;;  %v12138_v45 = vld [vmem:[#allocation263_spill] sm:$0xff]  ;;  %v12139_v34 = vld [vmem:[#allocation141_spill] sm:$0xff]  ;;  %v3372_v56 = vadd.f32 %v9080_v28, %v2348_v30  ;;  %v2958_v40 = vmul.f32 1.442695, %v2703_v7 }
 0x4c8   : > { %v2224_v23 = vmul.f32 %v12139_v34, %v12138_v45  ;;  %v4175_v48 = vmul.f32 %v12140_v10, %v3379_v35  ;;  %4475 = vperm.xlu1 %5779, %v4166_v60   ;;  %v9475_v33 = vpop.eup %6164  ;;  %v9479_v17 = vmul.f32 0.6931472, %v8698_v16  ;;  %6174 = vlog2.f32 %v3024_v18  ;;  %v12145_v35 = vld [vmem:[#allocation285_spill] sm:$0xff]  ;;  %v12146_v34 = vld [vmem:[#allocation140_spill] sm:$0xff]  ;;  %v12147_v60 = vld [vmem:[#allocation55_spill] sm:$0xff] }
 0x4c9   : > { %v2350_v50 = vsub.f32 %v12137_v53, %v2222_v11  ;;  %v9481_v53 = vpop.permute.xlu0 %3903  ;;  %v12144_v11 = vmax.f32 %v12132_v12, 0.0  ;;  %v2233_v28 = vmul.f32 %v12146_v34, %v12145_v35  ;;  %v3381_v30 = vadd.f32 %v8924_v42, %v2357_v24  ;;  %v12169_v16 = vld [vmem:[#allocation374_spill] sm:$0xff] }
 0x4ca   : > { %12143 = vst [vmem:[#allocation122_spill] sm:$0xff] %v9481_v53  ;;  %v4168_v10 = vmul.f32 %v12147_v60, %v3372_v56  ;;  %4502 = vperm.xlu0 %5778, %v4175_v48   ;;  %v9489_v7 = vpop.eup %6166  ;;  %6176 = vpow2.f32 %v2956_v29  ;;  %v3037_v20 = vadd.f32 1.0, %v8718_v5  ;;  %v12148_v12 = vmax.f32 %v12138_v45, 0.0  ;;  %v9500_v48 = vpop.permute.xlu1 %3864  ;;  %v12154_v45 = vld [vmem:[#allocation351_spill] sm:$0xff]  ;;  %v12182_v53 = vld [vmem:[#allocation353_spill] sm:$0xff] }
 0x4cb   : > { %v2359_v32 = vsub.f32 %v12144_v11, %v2231_v41  ;;  %v12149_v11 = vld [vmem:[#allocation268_spill] sm:$0xff]  ;;  %v4177_v42 = vmul.f32 %v12151_v15, %v3381_v30  ;;  %v3374_v24 = vadd.f32 %v9363_v8, %v2350_v50  ;;  %12152 = vst [vmem:[#allocation294_spill] sm:$0xff] %v9500_v48  ;;  %6178 = vpow2.f32 %v2958_v40  ;;  %v12157_v30 = vld [vmem:[#allocation18_spill] sm:$0xff]  ;;  %v12165_v48 = vld [vmem:[#allocation145_spill] sm:$0xff] }
 0x4cc   : > { %v2352_v41 = vsub.f32 %v12148_v12, %v2224_v23  ;;  %v2226_v34 = vmul.f32 %v12150_v57, %v12149_v11  ;;  %4481 = vperm.xlu1 %5779, %v4168_v10   ;;  %v9502_v29 = vpop.eup %6168  ;;  %v3153_v56 = vmul.f32 0.6931472, %v8726_v25  ;;  %v9506_v5 = vmul.f32 0.6931472, %v8747_v54  ;;  %v12158_v8 = vld [vmem:[#allocation142_spill] sm:$0xff]  ;;  %v12159_v12 = vld [vmem:[#allocation352_spill] sm:$0xff] }
 0x4cd   : > { %12153 = vst [vmem:[#allocation311_spill] sm:$0xff] %v9502_v29  ;;  %v3026_v23 = vadd.f32 1.0, %v12154_v45  ;;  %v9509_v60 = vpop.permute.xlu0 %3911  ;;  %v12156_v57 = vmax.f32 %v12145_v35, 0.0  ;;  %v2235_v50 = vmul.f32 %v12158_v8, %v12157_v30  ;;  %v3383_v10 = vadd.f32 %v9036_v59, %v2359_v32  ;;  %v12162_v45 = vld [vmem:[#allocation367_spill] sm:$0xff]  ;;  %v12216_v29 = vld [vmem:[#allocation361_spill] sm:$0xff] }
 0x4ce   : > { %12155 = vst [vmem:[#allocation96_spill] sm:$0xff] %v9509_v60  ;;  %v4170_v18 = vmul.f32 %v12159_v12, %v3374_v24  ;;  %4508 = vperm.xlu0 %5778, %v4177_v42   ;;  %v9517_v40 = vpop.eup %6170  ;;  %6180 = vlog2.f32 %v3037_v20  ;;  %v3039_v52 = vadd.f32 1.0, %v12162_v45  ;;  %v12163_v35 = vmax.f32 %v12149_v11, 0.0  ;;  %v12166_v60 = vld [vmem:[#allocation350_spill] sm:$0xff]  ;;  %v9527_v42 = vpop.permute.xlu1 %3872  ;;  %v12168_v12 = vld [vmem:[#allocation369_spill] sm:$0xff] }
 0x4cf   : > { %v2361_v15 = vsub.f32 %v12156_v57, %v2233_v28  ;;  %12160 = vst [vmem:[#allocation225_spill] sm:$0xff] %v9517_v40  ;;  %v12164_v57 = vld [vmem:[#allocation274_spill] sm:$0xff]  ;;  %v4179_v59 = vmul.f32 %v12166_v60, %v3383_v10  ;;  %v3376_v32 = vadd.f32 %v3153_v56, %v2352_v41  ;;  %12167 = vst [vmem:[#allocation125_spill] sm:$0xff] %v9527_v42  ;;  %v3157_v25 = vmul.f32 0.6931472, %v12168_v12  ;;  %v12173_v60 = vld [vmem:[#allocation20_spill] sm:$0xff] }
 0x4d0   : > { %v2354_v28 = vsub.f32 %v12163_v35, %v2226_v34  ;;  %v2228_v8 = vmul.f32 %v12165_v48, %v12164_v57  ;;  %4487 = vperm.xlu1 %5779, %v4170_v18   ;;  %v9529_v24 = vpop.eup %6172  ;;  %v9533_v20 = vmul.f32 0.6931472, %v12169_v16  ;;  %6182 = vlog2.f32 %v3026_v23  ;;  %v12170_v45 = vld [vmem:[#allocation354_spill] sm:$0xff]  ;;  %v12174_v41 = vld [vmem:[#allocation144_spill] sm:$0xff] }
 0x4d1   : > { %v3028_v11 = vadd.f32 1.0, %v12170_v45  ;;  %v9536_v34 = vpop.permute.xlu0 %3919  ;;  %v12172_v48 = vmax.f32 %v12157_v30, 0.0  ;;  %v2237_v18 = vmul.f32 %v12174_v41, %v12173_v60  ;;  %v3385_v56 = vadd.f32 %v9320_v19, %v2361_v15  ;;  %v12175_v10 = vld [vmem:[#allocation356_spill] sm:$0xff] }
 0x4d2   : > { %12171 = vst [vmem:[#allocation309_spill] sm:$0xff] %v9536_v34  ;;  %v4172_v42 = vmul.f32 %v12175_v10, %v3376_v32  ;;  %4514 = vperm.xlu0 %5778, %v4179_v59   ;;  %v9544_v12 = vpop.eup %6174  ;;  %6184 = vlog2.f32 %v3039_v52  ;;  %v12178_v45 = vld [vmem:[#allocation372_spill] sm:$0xff]  ;;  %v12179_v30 = vmax.f32 %v12164_v57, 0.0  ;;  %v3378_v15 = vadd.f32 %v3157_v25, %v2354_v28  ;;  %v9554_v59 = vpop.permute.xlu1 %3883 }
 0x4d3   : > { %v2363_v35 = vsub.f32 %v12172_v48, %v2235_v50  ;;  %v3041_v34 = vadd.f32 1.0, %v12178_v45  ;;  %v12180_v48 = vld [vmem:[#allocation280_spill] sm:$0xff]  ;;  %v4181_v19 = vmul.f32 %v12182_v53, %v3385_v56  ;;  %12183 = vst [vmem:[#allocation307_spill] sm:$0xff] %v9554_v59  ;;  %v3161_v52 = vmul.f32 0.6931472, %v12186_v51  ;;  %v12187_v45 = vld [vmem:[#allocation355_spill] sm:$0xff] }
 0x4d4   : > { %v2356_v50 = vsub.f32 %v12179_v30, %v2228_v8  ;;  %v2230_v41 = vmul.f32 %v12181_v38, %v12180_v48  ;;  %4493 = vperm.xlu1 %5779, %v4172_v42   ;;  %v9556_v32 = vpop.eup %6176  ;;  %6186 = vlog2.f32 %v3028_v11  ;;  %v3030_v23 = vadd.f32 1.0, %v12187_v45  ;;  %v12190_v30 = vld [vmem:[#allocation22_spill] sm:$0xff]  ;;  %v12192_v42 = vld [vmem:[#allocation359_spill] sm:$0xff]  ;;  %v12196_v45 = vld [vmem:[#allocation377_spill] sm:$0xff] }
 0x4d5   : > { %12184 = vst [vmem:[#allocation245_spill] sm:$0xff] %v9556_v32  ;;  %v9561_v57 = vpop.permute.xlu0 %3927  ;;  %v12189_v8 = vmax.f32 %v12173_v60, 0.0  ;;  %v12191_v53 = vld [vmem:[#allocation146_spill] sm:$0xff]  ;;  %v3387_v28 = vadd.f32 %v9479_v17, %v2363_v35  ;;  %v4174_v56 = vmul.f32 %v12192_v42, %v3378_v15  ;;  %v9569_v16 = vpop.eup %6178  ;;  %v12195_v11 = vld [vmem:[#allocation383_spill] sm:$0xff]  ;;  %6188 = vlog2.f32 %v3041_v34  ;;  %v12210_v51 = vld [vmem:[#allocation72_spill] sm:$0xff] }
 0x4d6   : > { %12188 = vst [vmem:[#allocation124_spill] sm:$0xff] %v9561_v57  ;;  %v2239_v25 = vmul.f32 %v12191_v53, %v12190_v30  ;;  %4520 = vperm.xlu0 %5778, %v4181_v19   ;;  %12193 = vst [vmem:[#allocation299_spill] sm:$0xff] %v9569_v16  ;;  %v3187_v10 = vmul.f32 0.6931472, %v12195_v11  ;;  %v3043_v57 = vadd.f32 1.0, %v12196_v45  ;;  %v12197_v60 = vmax.f32 %v12180_v48, 0.0  ;;  %v9579_v19 = vpop.permute.xlu1 %3891 }
 0x4d7   : > { %v2365_v38 = vsub.f32 %v12189_v8, %v2237_v18  ;;  %v12198_v8 = vld [vmem:[#allocation283_spill] sm:$0xff]  ;;  %v4183_v17 = vmul.f32 %v12200_v55, %v3387_v28  ;;  %v3380_v35 = vadd.f32 %v3161_v52, %v2356_v50  ;;  %12201 = vst [vmem:[#allocation316_spill] sm:$0xff] %v9579_v19  ;;  %6190 = vlog2.f32 %v3030_v23  ;;  %v12204_v45 = vld [vmem:[#allocation358_spill] sm:$0xff]  ;;  %v12208_v55 = vld [vmem:[#allocation148_spill] sm:$0xff] }
 0x4d8   : > { %v2358_v18 = vsub.f32 %v12197_v60, %v2230_v41  ;;  %v2232_v53 = vmul.f32 %v12199_v39, %v12198_v8  ;;  %4499 = vperm.xlu1 %5779, %v4174_v56   ;;  %v9581_v15 = vpop.eup %6180  ;;  %v12203_v11 = vld [vmem:[#allocation387_spill] sm:$0xff]  ;;  %v3032_v54 = vadd.f32 1.0, %v12204_v45  ;;  %v12206_v41 = vmax.f32 %v12190_v30, 0.0  ;;  %v12207_v60 = vld [vmem:[#allocation24_spill] sm:$0xff]  ;;  %v12212_v45 = vld [vmem:[#allocation382_spill] sm:$0xff] }
 0x4d9   : > { %v3165_v34 = vmul.f32 0.6931472, %v12203_v11  ;;  %v9586_v48 = vpop.permute.xlu0 %3935  ;;  %v2241_v50 = vmul.f32 %v12208_v55, %v12207_v60  ;;  %v3389_v52 = vadd.f32 %v9506_v5, %v2365_v38  ;;  %v12209_v28 = vld [vmem:[#allocation363_spill] sm:$0xff]  ;;  %6192 = vlog2.f32 %v3043_v57  ;;  %v12219_v42 = vld [vmem:[#allocation392_spill] sm:$0xff] }
 0x4da   : > { %12205 = vst [vmem:[#allocation97_spill] sm:$0xff] %v9586_v48  ;;  %v2367_v39 = vsub.f32 %v12206_v41, %v2239_v25  ;;  %v4176_v56 = vmul.f32 %v12209_v28, %v3380_v35  ;;  %4526 = vperm.xlu0 %5778, %v4183_v17   ;;  %v9594_v59 = vpop.eup %6182  ;;  %v3045_v48 = vadd.f32 1.0, %v12212_v45  ;;  %v12213_v30 = vmax.f32 %v12198_v8, 0.0  ;;  %v12214_v41 = vld [vmem:[#allocation286_spill] sm:$0xff]  ;;  %v12215_v32 = vld [vmem:[#allocation151_spill] sm:$0xff]  ;;  %v9604_v17 = vpop.permute.xlu1 %3899  ;;  %v12220_v45 = vld [vmem:[#allocation360_spill] sm:$0xff] }
 0x4db   : > { %v2234_v55 = vmul.f32 %v12215_v32, %v12214_v41  ;;  %v4185_v5 = vmul.f32 %v12216_v29, %v3389_v52  ;;  %v3382_v38 = vadd.f32 %v3165_v34, %v2358_v18  ;;  %12217 = vst [vmem:[#allocation229_spill] sm:$0xff] %v9604_v17  ;;  %v3169_v57 = vmul.f32 0.6931472, %v12219_v42  ;;  %v12224_v29 = vld [vmem:[#allocation150_spill] sm:$0xff] }
 0x4dc   : > { %v2360_v25 = vsub.f32 %v12213_v30, %v2232_v53  ;;  %4505 = vperm.xlu1 %5779, %v4176_v56   ;;  %v9606_v35 = vpop.eup %6184  ;;  %6194 = vlog2.f32 %v3032_v54  ;;  %v3034_v23 = vadd.f32 1.0, %v12220_v45  ;;  %v12222_v53 = vmax.f32 %v12207_v60, 0.0  ;;  %v12223_v30 = vld [vmem:[#allocation26_spill] sm:$0xff]  ;;  %v12227_v54 = vld [vmem:[#allocation389_spill] sm:$0xff] }
 0x4dd   : > { %v9611_v8 = vpop.permute.xlu0 %3943  ;;  %v2243_v18 = vmul.f32 %v12224_v29, %v12223_v30  ;;  %v3391_v34 = vadd.f32 %v9533_v20, %v2367_v39  ;;  %v12225_v52 = vld [vmem:[#allocation366_spill] sm:$0xff]  ;;  %v3191_v43 = vmul.f32 0.6931472, %v12227_v54  ;;  %6196 = vlog2.f32 %v3045_v48  ;;  %v12228_v45 = vld [vmem:[#allocation385_spill] sm:$0xff]  ;;  %v12235_v54 = vld [vmem:[#allocation396_spill] sm:$0xff] }
 0x4de   : > { %12221 = vst [vmem:[#allocation127_spill] sm:$0xff] %v9611_v8  ;;  %v2369_v32 = vsub.f32 %v12222_v53, %v2241_v50  ;;  %v4178_v56 = vmul.f32 %v12225_v52, %v3382_v38  ;;  %4532 = vperm.xlu0 %5778, %v4185_v5   ;;  %v9619_v17 = vpop.eup %6186  ;;  %v3047_v8 = vadd.f32 1.0, %v12228_v45  ;;  %v12229_v60 = vmax.f32 %v12214_v41, 0.0  ;;  %v12230_v53 = vld [vmem:[#allocation19_spill] sm:$0xff]  ;;  %v9629_v5 = vpop.permute.xlu1 %3907  ;;  %v12234_v52 = vld [vmem:[#allocation73_spill] sm:$0xff]  ;;  %v12236_v45 = vld [vmem:[#allocation362_spill] sm:$0xff] }
 0x4df   : > { %v2236_v29 = vmul.f32 %v12231_v46, %v12230_v53  ;;  %v4187_v20 = vmul.f32 %v12232_v1, %v3391_v34  ;;  %v3384_v39 = vadd.f32 %v3169_v57, %v2360_v25  ;;  %12233 = vst [vmem:[#allocation312_spill] sm:$0xff] %v9629_v5  ;;  %v9631_v38 = vpop.eup %6188  ;;  %v3173_v48 = vmul.f32 0.6931472, %v12235_v54  ;;  %v12240_v1 = vld [vmem:[#allocation152_spill] sm:$0xff]  ;;  %v12241_v34 = vld [vmem:[#allocation371_spill] sm:$0xff]  ;;  %v12243_v54 = vld [vmem:[#allocation393_spill] sm:$0xff] }
 0x4e0   : > { %v2362_v50 = vsub.f32 %v12229_v60, %v2234_v55  ;;  %4511 = vperm.xlu1 %5779, %v4178_v56   ;;  %6198 = vlog2.f32 %v3034_v23  ;;  %v3036_v36 = vadd.f32 1.0, %v12236_v45  ;;  %v12238_v55 = vmax.f32 %v12223_v30, 0.0  ;;  %v12239_v60 = vld [vmem:[#allocation28_spill] sm:$0xff]  ;;  %v12244_v45 = vld [vmem:[#allocation390_spill] sm:$0xff] }
 0x4e1   : > { %v9636_v41 = vpop.permute.xlu0 %3954  ;;  %v2245_v25 = vmul.f32 %v12240_v1, %v12239_v60  ;;  %v3393_v57 = vadd.f32 %v3187_v10, %v2369_v32  ;;  %v4180_v56 = vmul.f32 %v12241_v34, %v3384_v39  ;;  %v9643_v5 = vpop.eup %6190  ;;  %v3195_v23 = vmul.f32 0.6931472, %v12243_v54  ;;  %v12248_v1 = vld [vmem:[#allocation368_spill] sm:$0xff] }
 0x4e2   : > { %12237 = vst [vmem:[#allocation315_spill] sm:$0xff] %v9636_v41  ;;  %v2371_v46 = vsub.f32 %v12238_v55, %v2243_v18  ;;  %4538 = vperm.xlu0 %5778, %v4187_v20   ;;  %6200 = vlog2.f32 %v3047_v8  ;;  %v3049_v19 = vadd.f32 1.0, %v12244_v45  ;;  %v12245_v41 = vmax.f32 %v12230_v53, 0.0  ;;  %v12246_v18 = vld [vmem:[#allocation21_spill] sm:$0xff]  ;;  %v12247_v55 = vld [vmem:[#allocation155_spill] sm:$0xff]  ;;  %v9653_v20 = vpop.permute.xlu1 %3915  ;;  %v12251_v54 = vld [vmem:[#allocation84_spill] sm:$0xff] }
 0x4e3   : > { %v2238_v28 = vmul.f32 %v12247_v55, %v12246_v18  ;;  %v4189_v10 = vmul.f32 %v12248_v1, %v3393_v57  ;;  %v3386_v32 = vadd.f32 %v3173_v48, %v2362_v50  ;;  %12249 = vst [vmem:[#allocation98_spill] sm:$0xff] %v9653_v20  ;;  %v9655_v39 = vpop.eup %6192  ;;  %v3177_v8 = vmul.f32 0.6931472, %v12251_v54  ;;  %v12252_v45 = vld [vmem:[#allocation365_spill] sm:$0xff]  ;;  %v12255_v55 = vld [vmem:[#allocation30_spill] sm:$0xff] }
 0x4e4   : > { %v2364_v30 = vsub.f32 %v12245_v41, %v2236_v29  ;;  %4517 = vperm.xlu1 %5779, %v4180_v56   ;;  %6202 = vlog2.f32 %v3036_v36  ;;  %v3038_v42 = vadd.f32 1.0, %v12252_v45  ;;  %v12254_v29 = vmax.f32 %v12239_v60, 0.0  ;;  %v12256_v57 = vld [vmem:[#allocation154_spill] sm:$0xff]  ;;  %v12257_v56 = vld [vmem:[#allocation376_spill] sm:$0xff]  ;;  %v12259_v54 = vld [vmem:[#allocation193_spill] sm:$0xff] }
 0x4e5   : > { %v9660_v53 = vpop.permute.xlu0 %3962  ;;  %v2247_v50 = vmul.f32 %v12256_v57, %v12255_v55  ;;  %v3395_v48 = vadd.f32 %v3191_v43, %v2371_v46  ;;  %v4182_v1 = vmul.f32 %v12257_v56, %v3386_v32  ;;  %v3199_v36 = vmul.f32 0.6931472, %v12259_v54  ;;  %v12260_v45 = vld [vmem:[#allocation395_spill] sm:$0xff]  ;;  %v12264_v57 = vld [vmem:[#allocation373_spill] sm:$0xff]  ;;  %v12268_v54 = vld [vmem:[#allocation336_spill] sm:$0xff] }
 0x4e6   : > { %12253 = vst [vmem:[#allocation252_spill] sm:$0xff] %v9660_v53  ;;  %v2373_v41 = vsub.f32 %v12254_v29, %v2245_v25  ;;  %4544 = vperm.xlu0 %5778, %v4189_v10   ;;  %v9667_v20 = vpop.eup %6194  ;;  %6204 = vlog2.f32 %v3049_v19  ;;  %v3051_v40 = vadd.f32 1.0, %v12260_v45  ;;  %v12261_v53 = vmax.f32 %v12246_v18, 0.0  ;;  %v12262_v25 = vld [vmem:[#allocation23_spill] sm:$0xff]  ;;  %v12263_v29 = vld [vmem:[#allocation157_spill] sm:$0xff]  ;;  %v9677_v10 = vpop.permute.xlu1 %3923  ;;  %v12269_v45 = vld [vmem:[#allocation370_spill] sm:$0xff] }
 0x4e7   : > { %v2240_v11 = vmul.f32 %v12263_v29, %v12262_v25  ;;  %v4191_v43 = vmul.f32 %v12264_v57, %v3395_v48  ;;  %v3388_v46 = vadd.f32 %v3177_v8, %v2364_v30  ;;  %12265 = vst [vmem:[#allocation126_spill] sm:$0xff] %v9677_v10  ;;  %v9679_v32 = vpop.eup %6196  ;;  %v3181_v19 = vmul.f32 0.6931472, %v12268_v54  ;;  %v12272_v29 = vld [vmem:[#allocation32_spill] sm:$0xff] }
 0x4e8   : > { %v2366_v60 = vsub.f32 %v12261_v53, %v2238_v28  ;;  %4523 = vperm.xlu1 %5779, %v4182_v1   ;;  %12266 = vst [vmem:[#allocation305_spill] sm:$0xff] %v9679_v32  ;;  %6206 = vlog2.f32 %v3038_v42  ;;  %v3040_v16 = vadd.f32 1.0, %v12269_v45  ;;  %v12271_v28 = vmax.f32 %v12255_v55, 0.0  ;;  %v12273_v48 = vld [vmem:[#allocation156_spill] sm:$0xff]  ;;  %v12274_v1 = vld [vmem:[#allocation381_spill] sm:$0xff]  ;;  %v12277_v45 = vld [vmem:[#allocation82_spill] sm:$0xff] }
 0x4e9   : > { %v9684_v18 = vpop.permute.xlu0 %3970  ;;  %v2249_v30 = vmul.f32 %v12273_v48, %v12272_v29  ;;  %v3397_v8 = vadd.f32 %v3195_v23, %v2373_v41  ;;  %v4184_v57 = vmul.f32 %v12274_v1, %v3388_v46  ;;  %6208 = vlog2.f32 %v3051_v40  ;;  %v12281_v48 = vld [vmem:[#allocation378_spill] sm:$0xff]  ;;  %v12285_v42 = vld [vmem:[#allocation284_spill] sm:$0xff] }
 0x4ea   : > { %12270 = vst [vmem:[#allocation320_spill] sm:$0xff] %v9684_v18  ;;  %v2375_v53 = vsub.f32 %v12271_v28, %v2247_v50  ;;  %4550 = vperm.xlu0 %5778, %v4191_v43   ;;  %v9691_v10 = vpop.eup %6198  ;;  %v3053_v6 = vadd.f32 1.0, %v12277_v45  ;;  %v12278_v18 = vmax.f32 %v12262_v25, 0.0  ;;  %v12279_v50 = vld [vmem:[#allocation25_spill] sm:$0xff]  ;;  %v12280_v28 = vld [vmem:[#allocation159_spill] sm:$0xff]  ;;  %v3390_v41 = vadd.f32 %v3181_v19, %v2366_v60  ;;  %v9701_v43 = vpop.permute.xlu1 %3931  ;;  %v12284_v1 = vld [vmem:[#allocation198_spill] sm:$0xff] }
 0x4eb   : > { %v2242_v32 = vmul.f32 %v12280_v28, %v12279_v50  ;;  %v4193_v23 = vmul.f32 %v12281_v48, %v3397_v8  ;;  %12282 = vst [vmem:[#allocation232_spill] sm:$0xff] %v9701_v43  ;;  %v3203_v56 = vmul.f32 0.6931472, %v12284_v1  ;;  %v3185_v40 = vmul.f32 0.6931472, %v12285_v42  ;;  %v12286_v45 = vld [vmem:[#allocation375_spill] sm:$0xff] }
 0x4ec   : > { %v2368_v55 = vsub.f32 %v12278_v18, %v2240_v11  ;;  %4529 = vperm.xlu1 %5779, %v4184_v57   ;;  %v9703_v46 = vpop.eup %6200  ;;  %6210 = vlog2.f32 %v3040_v16  ;;  %v3042_v54 = vadd.f32 1.0, %v12286_v45  ;;  %v12288_v11 = vmax.f32 %v12272_v29, 0.0  ;;  %v12289_v28 = vld [vmem:[#allocation34_spill] sm:$0xff]  ;;  %v12302_v16 = vld [vmem:[#allocation88_spill] sm:$0xff] }
 0x4ed   : > { %12283 = vst [vmem:[#allocation129_spill] sm:$0xff] %v9703_v46  ;;  %v9708_v25 = vpop.permute.xlu0 %3978  ;;  %v12290_v8 = vld [vmem:[#allocation158_spill] sm:$0xff]  ;;  %v3399_v19 = vadd.f32 %v3199_v36, %v2375_v53  ;;  %6212 = vlog2.f32 %v3053_v6  ;;  %v3189_v6 = vmul.f32 0.6931472, %v12302_v16 }
 0x4ee   : > { %12287 = vst [vmem:[#allocation317_spill] sm:$0xff] %v9708_v25  ;;  %v2377_v18 = vsub.f32 %v12288_v11, %v2249_v30  ;;  %v2251_v60 = vmul.f32 %v12290_v8, %v12289_v28  ;;  %v12291_v57 = vld [vmem:[#allocation386_spill] sm:$0xff]  ;;  %4556 = vperm.xlu0 %5778, %v4193_v23   ;;  %v9715_v43 = vpop.eup %6202  ;;  %v12295_v25 = vmax.f32 %v12279_v50, 0.0  ;;  %v12296_v30 = vld [vmem:[#allocation27_spill] sm:$0xff]  ;;  %v12297_v11 = vld [vmem:[#allocation161_spill] sm:$0xff]  ;;  %v3392_v53 = vadd.f32 %v3185_v40, %v2368_v55  ;;  %v9725_v23 = vpop.permute.xlu1 %3939 }
 0x4ef   : > { %v4186_v48 = vmul.f32 %v12291_v57, %v3390_v41  ;;  %v12294_v45 = vld [vmem:[#allocation194_spill] sm:$0xff]  ;;  %v2244_v0 = vmul.f32 %v12297_v11, %v12296_v30  ;;  %12299 = vst [vmem:[#allocation322_spill] sm:$0xff] %v9725_v23  ;;  %6214 = vlog2.f32 %v3042_v54  ;;  %v12306_v11 = vld [vmem:[#allocation36_spill] sm:$0xff] }
 0x4f0   : > { %v3055_v46 = vadd.f32 1.0, %v12294_v45  ;;  %v2370_v29 = vsub.f32 %v12295_v25, %v2242_v32  ;;  %v12298_v8 = vld [vmem:[#allocation330_spill] sm:$0xff]  ;;  %v9727_v41 = vpop.eup %6204  ;;  %v12303_v45 = vld [vmem:[#allocation380_spill] sm:$0xff]  ;;  %v12305_v32 = vmax.f32 %v12289_v28, 0.0  ;;  %v3401_v40 = vadd.f32 %v3203_v56, %v2377_v18 }
 0x4f1   : > { %v4195_v36 = vmul.f32 %v12298_v8, %v3399_v19  ;;  %4535 = vperm.xlu1 %5779, %v4186_v48   ;;  %12300 = vst [vmem:[#allocation256_spill] sm:$0xff] %v9727_v41  ;;  %v3044_v42 = vadd.f32 1.0, %v12303_v45  ;;  %v9732_v50 = vpop.permute.xlu0 %3986  ;;  %v12307_v19 = vld [vmem:[#allocation160_spill] sm:$0xff]  ;;  %v12308_v48 = vld [vmem:[#allocation391_spill] sm:$0xff]  ;;  %v12310_v16 = vld [vmem:[#allocation202_spill] sm:$0xff] }
 0x4f2   : > { %12304 = vst [vmem:[#allocation128_spill] sm:$0xff] %v9732_v50  ;;  %v2379_v25 = vsub.f32 %v12305_v32, %v2251_v60  ;;  %v2253_v55 = vmul.f32 %v12307_v19, %v12306_v11  ;;  %v4188_v8 = vmul.f32 %v12308_v48, %v3392_v53  ;;  %v9739_v23 = vpop.eup %6206  ;;  %v3207_v54 = vmul.f32 0.6931472, %v12310_v16  ;;  %v12311_v45 = vld [vmem:[#allocation402_spill] sm:$0xff]  ;;  %v12313_v60 = vld [vmem:[#allocation29_spill] sm:$0xff]  ;;  %v12314_v32 = vld [vmem:[#allocation164_spill] sm:$0xff] }
 0x4f3   : > { %4562 = vperm.xlu0 %5778, %v4195_v36   ;;  %6216 = vlog2.f32 %v3055_v46  ;;  %v3057_v1 = vadd.f32 1.0, %v12311_v45  ;;  %v12312_v50 = vmax.f32 %v12296_v30, 0.0  ;;  %v2246_v41 = vmul.f32 %v12314_v32, %v12313_v60  ;;  %v12315_v19 = vld [vmem:[#allocation388_spill] sm:$0xff]  ;;  %v9749_v36 = vpop.permute.xlu1 %3950  ;;  %v9751_v53 = vpop.eup %6208  ;;  %v12322_v32 = vld [vmem:[#allocation38_spill] sm:$0xff] }
 0x4f4   : > { %v4197_v56 = vmul.f32 %v12315_v19, %v3401_v40  ;;  %v3394_v18 = vadd.f32 %v3189_v6, %v2370_v29  ;;  %12316 = vst [vmem:[#allocation313_spill] sm:$0xff] %v9749_v36  ;;  %12317 = vst [vmem:[#allocation324_spill] sm:$0xff] %v9751_v53  ;;  %v3193_v46 = vmul.f32 0.6931472, %v9162_v22  ;;  %6218 = vlog2.f32 %v3044_v42  ;;  %v12319_v16 = vld [vmem:[#allocation384_spill] sm:$0xff]  ;;  %v12323_v40 = vld [vmem:[#allocation162_spill] sm:$0xff] }
 0x4f5   : > { %v2372_v28 = vsub.f32 %v12312_v50, %v2244_v0  ;;  %4541 = vperm.xlu1 %5779, %v4188_v8   ;;  %v3046_v45 = vadd.f32 1.0, %v12319_v16  ;;  %v9756_v30 = vpop.permute.xlu0 %3994  ;;  %v12321_v0 = vmax.f32 %v12306_v11, 0.0  ;;  %v2255_v29 = vmul.f32 %v12323_v40, %v12322_v32  ;;  %v12324_v8 = vld [vmem:[#allocation314_spill] sm:$0xff]  ;;  %v12326_v22 = vld [vmem:[#allocation341_spill] sm:$0xff]  ;;  %v12327_v16 = vld [vmem:[#allocation323_spill] sm:$0xff] }
 0x4f6   : > { %12320 = vst [vmem:[#allocation100_spill] sm:$0xff] %v9756_v30  ;;  %v3403_v6 = vadd.f32 %v3207_v54, %v2379_v25  ;;  %v4190_v19 = vmul.f32 %v12324_v8, %v3394_v18  ;;  %v9763_v34 = vpop.eup %6210  ;;  %v3211_v42 = vmul.f32 0.6931472, %v12326_v22  ;;  %6220 = vlog2.f32 %v3057_v1  ;;  %v12331_v40 = vld [vmem:[#allocation334_spill] sm:$0xff]  ;;  %v12334_v8 = vld [vmem:[#allocation248_spill] sm:$0xff] }
 0x4f7   : > { %v2381_v50 = vsub.f32 %v12321_v0, %v2253_v55  ;;  %4568 = vperm.xlu0 %5778, %v4197_v56   ;;  %v3059_v36 = vadd.f32 1.0, %v12327_v16  ;;  %v12328_v30 = vmax.f32 %v12313_v60, 0.0  ;;  %v12329_v55 = vld [vmem:[#allocation31_spill] sm:$0xff]  ;;  %v12330_v0 = vld [vmem:[#allocation166_spill] sm:$0xff]  ;;  %v3396_v54 = vadd.f32 %v3193_v46, %v2372_v28  ;;  %v9773_v56 = vpop.permute.xlu1 %3958  ;;  %v9775_v18 = vpop.eup %6212 }
 0x4f8   : > { %v2248_v53 = vmul.f32 %v12330_v0, %v12329_v55  ;;  %v4199_v25 = vmul.f32 %v12331_v40, %v3403_v6  ;;  %12332 = vst [vmem:[#allocation238_spill] sm:$0xff] %v9773_v56  ;;  %12333 = vst [vmem:[#allocation131_spill] sm:$0xff] %v9775_v18  ;;  %v3197_v1 = vmul.f32 0.6931472, %v9223_v49  ;;  %6222 = vlog2.f32 %v3046_v45  ;;  %v12335_v22 = vld [vmem:[#allocation310_spill] sm:$0xff]  ;;  %v12338_v0 = vld [vmem:[#allocation165_spill] sm:$0xff] }
 0x4f9   : > { %v2374_v11 = vsub.f32 %v12328_v30, %v2246_v41  ;;  %4547 = vperm.xlu1 %5779, %v4190_v19   ;;  %v3048_v16 = vadd.f32 1.0, %v12335_v22  ;;  %v12336_v41 = vmax.f32 %v12322_v32, 0.0  ;;  %v12337_v30 = vld [vmem:[#allocation40_spill] sm:$0xff]  ;;  %v3405_v6 = vadd.f32 %v3211_v42, %v2381_v50  ;;  %v12339_v28 = vld [vmem:[#allocation319_spill] sm:$0xff]  ;;  %v9785_v19 = vpop.eup %6214  ;;  %v12341_v49 = vld [vmem:[#allocation190_spill] sm:$0xff]  ;;  %v9790_v22 = vpop.permute.xlu0 %4002 }
 0x4fa   : > { %v2257_v57 = vmul.f32 %v12338_v0, %v12337_v30  ;;  %v4192_v46 = vmul.f32 %v12339_v28, %v3396_v54  ;;  %v3215_v48 = vmul.f32 0.6931472, %v9137_v58  ;;  %6224 = vlog2.f32 %v3059_v36  ;;  %12342 = vst [vmem:[#allocation321_spill] sm:$0xff] %v9790_v22  ;;  %v12345_v0 = vld [vmem:[#allocation168_spill] sm:$0xff]  ;;  %v12356_v58 = vld [vmem:[#allocation219_spill] sm:$0xff] }
 0x4fb   : > { %v2383_v60 = vsub.f32 %v12336_v41, %v2255_v29  ;;  %4574 = vperm.xlu0 %5778, %v4199_v25   ;;  %v3061_v45 = vadd.f32 1.0, %v12341_v49  ;;  %v12343_v32 = vmax.f32 %v12329_v55, 0.0  ;;  %v12344_v41 = vld [vmem:[#allocation33_spill] sm:$0xff]  ;;  %v12346_v42 = vld [vmem:[#allocation340_spill] sm:$0xff]  ;;  %v3398_v25 = vadd.f32 %v3197_v1, %v2374_v11  ;;  %v9797_v28 = vpop.permute.xlu1 %3966  ;;  %v12349_v49 = vld [vmem:[#allocation394_spill] sm:$0xff] }
 0x4fc   : > { %v2250_v50 = vmul.f32 %v12345_v0, %v12344_v41  ;;  %v4201_v54 = vmul.f32 %v12346_v42, %v3405_v6  ;;  %12347 = vst [vmem:[#allocation99_spill] sm:$0xff] %v9797_v28  ;;  %v3201_v36 = vmul.f32 0.6931472, %v9275_v13  ;;  %6226 = vlog2.f32 %v3048_v16  ;;  %v12352_v0 = vld [vmem:[#allocation167_spill] sm:$0xff] }
 0x4fd   : > { %v2376_v29 = vsub.f32 %v12343_v32, %v2248_v53  ;;  %4553 = vperm.xlu1 %5779, %v4192_v46   ;;  %v9799_v56 = vpop.eup %6216  ;;  %v3050_v22 = vadd.f32 1.0, %v12349_v49  ;;  %v12350_v53 = vmax.f32 %v12337_v30, 0.0  ;;  %v12351_v32 = vld [vmem:[#allocation42_spill] sm:$0xff]  ;;  %v3407_v6 = vadd.f32 %v3215_v48, %v2383_v60  ;;  %v12353_v11 = vld [vmem:[#allocation399_spill] sm:$0xff] }
 0x4fe   : > { %12348 = vst [vmem:[#allocation344_spill] sm:$0xff] %v9799_v56  ;;  %v2259_v18 = vmul.f32 %v12352_v0, %v12351_v32  ;;  %v4194_v1 = vmul.f32 %v12353_v11, %v3398_v25  ;;  %v9809_v46 = vpop.eup %6218  ;;  %v3219_v56 = vmul.f32 0.6931472, %v12356_v58  ;;  %6228 = vlog2.f32 %v3061_v45  ;;  %v12357_v13 = vld [vmem:[#allocation107_spill] sm:$0xff]  ;;  %v12361_v0 = vld [vmem:[#allocation397_spill] sm:$0xff] }
 0x4ff   : > { %v2385_v55 = vsub.f32 %v12350_v53, %v2257_v57  ;;  %4580 = vperm.xlu0 %5778, %v4201_v54   ;;  %12354 = vst [vmem:[#allocation260_spill] sm:$0xff] %v9809_v46  ;;  %v3063_v16 = vadd.f32 1.0, %v12357_v13  ;;  %v12358_v49 = vmax.f32 %v12344_v41, 0.0  ;;  %v12359_v57 = vld [vmem:[#allocation35_spill] sm:$0xff]  ;;  %v12360_v53 = vld [vmem:[#allocation170_spill] sm:$0xff]  ;;  %v4203_v48 = vmul.f32 %v12361_v0, %v3407_v6  ;;  %v9819_v54 = vpop.permute.xlu1 %3974  ;;  %v9826_v41 = vpop.permute.xlu0 %4010  ;;  %v12368_v6 = vld [vmem:[#allocation169_spill] sm:$0xff] }
 0x500   : > { %v2252_v40 = vmul.f32 %v12360_v53, %v12359_v57  ;;  %v3400_v60 = vadd.f32 %v3201_v36, %v2376_v29  ;;  %12362 = vst [vmem:[#allocation130_spill] sm:$0xff] %v9819_v54  ;;  %v9821_v25 = vpop.eup %6220  ;;  %v3205_v45 = vmul.f32 0.6931472, %v9330_v37  ;;  %6230 = vlog2.f32 %v3050_v22  ;;  %v12364_v58 = vld [vmem:[#allocation335_spill] sm:$0xff]  ;;  %12365 = vst [vmem:[#allocation318_spill] sm:$0xff] %v9826_v41  ;;  %v12367_v53 = vld [vmem:[#allocation44_spill] sm:$0xff] }
 0x501   : > { %v2378_v30 = vsub.f32 %v12358_v49, %v2250_v50  ;;  %4559 = vperm.xlu1 %5779, %v4194_v1   ;;  %v3052_v13 = vadd.f32 1.0, %v12364_v58  ;;  %v12366_v50 = vmax.f32 %v12351_v32, 0.0  ;;  %v2261_v29 = vmul.f32 %v12368_v6, %v12367_v53  ;;  %v12369_v1 = vld [vmem:[#allocation85_spill] sm:$0xff]  ;;  %v12372_v58 = vld [vmem:[#allocation255_spill] sm:$0xff] }
 0x502   : > { %v3409_v36 = vadd.f32 %v3219_v56, %v2385_v55  ;;  %v4196_v0 = vmul.f32 %v12369_v1, %v3400_v60  ;;  %v9833_v54 = vpop.eup %6222  ;;  %v12371_v37 = vld [vmem:[#allocation273_spill] sm:$0xff]  ;;  %6232 = vlog2.f32 %v3063_v16  ;;  %v3065_v42 = vadd.f32 1.0, %v12372_v58 }
 0x503   : > { %v2387_v49 = vsub.f32 %v12366_v50, %v2259_v18  ;;  %4586 = vperm.xlu0 %5778, %v4203_v48   ;;  %v3223_v22 = vmul.f32 0.6931472, %v12371_v37  ;;  %v12373_v41 = vmax.f32 %v12359_v57, 0.0  ;;  %v12374_v18 = vld [vmem:[#allocation37_spill] sm:$0xff]  ;;  %v12375_v50 = vld [vmem:[#allocation172_spill] sm:$0xff]  ;;  %v3402_v55 = vadd.f32 %v3205_v45, %v2378_v30  ;;  %v9843_v48 = vpop.permute.xlu1 %3982  ;;  %v12379_v37 = vld [vmem:[#allocation398_spill] sm:$0xff]  ;;  %v9850_v57 = vpop.permute.xlu0 %4400 }
 0x504   : > { %v2254_v46 = vmul.f32 %v12375_v50, %v12374_v18  ;;  %v12376_v6 = vld [vmem:[#allocation401_spill] sm:$0xff]  ;;  %12377 = vst [vmem:[#allocation327_spill] sm:$0xff] %v9843_v48  ;;  %v9845_v60 = vpop.eup %6224  ;;  %v3209_v16 = vmul.f32 0.6931472, %v9439_v21  ;;  %6234 = vlog2.f32 %v3052_v13  ;;  %v3054_v58 = vadd.f32 1.0, %v12379_v37  ;;  %12380 = vst [vmem:[#allocation242_spill] sm:$0xff] %v9850_v57 }
 0x505   : > { %v2380_v32 = vsub.f32 %v12373_v41, %v2252_v40  ;;  %v4205_v56 = vmul.f32 %v12376_v6, %v3409_v36  ;;  %4565 = vperm.xlu1 %5779, %v4196_v0   ;;  %v12381_v40 = vmax.f32 %v12367_v53, 0.0  ;;  %v12382_v50 = vld [vmem:[#allocation46_spill] sm:$0xff]  ;;  %v12383_v36 = vld [vmem:[#allocation171_spill] sm:$0xff]  ;;  %v3411_v45 = vadd.f32 %v3223_v22, %v2387_v49  ;;  %v12384_v0 = vld [vmem:[#allocation244_spill] sm:$0xff] }
 0x506   : > { %v2263_v30 = vmul.f32 %v12383_v36, %v12382_v50  ;;  %v4198_v6 = vmul.f32 %v12384_v0, %v3402_v55  ;;  %v9857_v48 = vpop.eup %6226  ;;  %v3227_v21 = vmul.f32 0.6931472, %v9316_v31  ;;  %6236 = vlog2.f32 %v3065_v42  ;;  %v12386_v13 = vld [vmem:[#allocation290_spill] sm:$0xff]  ;;  %v12393_v42 = vld [vmem:[#allocation400_spill] sm:$0xff]  ;;  %v12399_v1 = vld [vmem:[#allocation117_spill] sm:$0xff] }
 0x507   : > { %v2389_v41 = vsub.f32 %v12381_v40, %v2261_v29  ;;  %4592 = vperm.xlu0 %5778, %v4205_v56   ;;  %v3067_v37 = vadd.f32 1.0, %v12386_v13  ;;  %v12387_v57 = vmax.f32 %v12374_v18, 0.0  ;;  %v12388_v29 = vld [vmem:[#allocation39_spill] sm:$0xff]  ;;  %v12389_v40 = vld [vmem:[#allocation174_spill] sm:$0xff]  ;;  %v3404_v22 = vadd.f32 %v3209_v16, %v2380_v32  ;;  %v9867_v56 = vpop.permute.xlu1 %3990  ;;  %v9874_v18 = vpop.permute.xlu0 %4406 }
 0x508   : > { %v2256_v28 = vmul.f32 %v12389_v40, %v12388_v29  ;;  %v12390_v36 = vld [vmem:[#allocation86_spill] sm:$0xff]  ;;  %12391 = vst [vmem:[#allocation133_spill] sm:$0xff] %v9867_v56  ;;  %v9869_v55 = vpop.eup %6228  ;;  %v3213_v31 = vmul.f32 0.6931472, %v9489_v7  ;;  %6238 = vlog2.f32 %v3054_v58  ;;  %v3056_v13 = vadd.f32 1.0, %v12393_v42  ;;  %12394 = vst [vmem:[#allocation325_spill] sm:$0xff] %v9874_v18 }
 0x509   : > { %v2382_v53 = vsub.f32 %v12387_v57, %v2254_v46  ;;  %v4207_v49 = vmul.f32 %v12390_v36, %v3411_v45  ;;  %4571 = vperm.xlu1 %5779, %v4198_v6   ;;  %v12395_v46 = vmax.f32 %v12382_v50, 0.0  ;;  %v12396_v40 = vld [vmem:[#allocation48_spill] sm:$0xff]  ;;  %v12397_v45 = vld [vmem:[#allocation173_spill] sm:$0xff]  ;;  %v3413_v16 = vadd.f32 %v3227_v21, %v2389_v41  ;;  %v12400_v58 = vld [vmem:[#allocation215_spill] sm:$0xff] }
 0x50a   : > { %v2265_v32 = vmul.f32 %v12397_v45, %v12396_v40  ;;  %v12398_v6 = vld [vmem:[#allocation108_spill] sm:$0xff]  ;;  %v9881_v56 = vpop.eup %6230  ;;  %v3231_v7 = vmul.f32 0.6931472, %v9400_v47  ;;  %6240 = vlog2.f32 %v3067_v37  ;;  %v3069_v42 = vadd.f32 1.0, %v12400_v58 }
 0x50b   : > { %v2391_v57 = vsub.f32 %v12395_v46, %v2263_v30  ;;  %v4200_v36 = vmul.f32 %v12398_v6, %v3404_v22  ;;  %4598 = vperm.xlu0 %5778, %v4207_v49   ;;  %v12401_v18 = vmax.f32 %v12388_v29, 0.0  ;;  %v12402_v30 = vld [vmem:[#allocation41_spill] sm:$0xff]  ;;  %v12403_v46 = vld [vmem:[#allocation176_spill] sm:$0xff]  ;;  %v3406_v21 = vadd.f32 %v3213_v31, %v2382_v53  ;;  %v9891_v49 = vpop.permute.xlu1 %3998  ;;  %v9898_v29 = vpop.permute.xlu0 %4412  ;;  %v12412_v6 = vld [vmem:[#allocation91_spill] sm:$0xff] }
 0x50c   : > { %v2258_v11 = vmul.f32 %v12403_v46, %v12402_v30  ;;  %v12404_v45 = vld [vmem:[#allocation104_spill] sm:$0xff]  ;;  %12405 = vst [vmem:[#allocation265_spill] sm:$0xff] %v9891_v49  ;;  %v9893_v22 = vpop.eup %6232  ;;  %v3217_v47 = vmul.f32 0.6931472, %v9544_v12  ;;  %6242 = vlog2.f32 %v3056_v13  ;;  %12407 = vst [vmem:[#allocation132_spill] sm:$0xff] %v9898_v29  ;;  %v12409_v46 = vld [vmem:[#allocation50_spill] sm:$0xff] }
 0x50d   : > { %v2384_v50 = vsub.f32 %v12401_v18, %v2256_v28  ;;  %v4209_v41 = vmul.f32 %v12404_v45, %v3413_v16  ;;  %4577 = vperm.xlu1 %5779, %v4200_v36   ;;  %v12406_v37 = vld [vmem:[#allocation240_spill] sm:$0xff]  ;;  %v12408_v28 = vmax.f32 %v12396_v40, 0.0  ;;  %v12410_v16 = vld [vmem:[#allocation175_spill] sm:$0xff]  ;;  %v3415_v31 = vadd.f32 %v3231_v7, %v2391_v57  ;;  %v12413_v13 = vld [vmem:[#allocation293_spill] sm:$0xff] }
 0x50e   : > { %v3058_v58 = vadd.f32 1.0, %v12406_v37  ;;  %v2267_v53 = vmul.f32 %v12410_v16, %v12409_v46  ;;  %v12411_v36 = vld [vmem:[#allocation288_spill] sm:$0xff]  ;;  %v9905_v0 = vpop.eup %6234  ;;  %v3235_v12 = vmul.f32 0.6931472, %v9475_v33  ;;  %6244 = vlog2.f32 %v3069_v42  ;;  %v12417_v16 = vld [vmem:[#allocation87_spill] sm:$0xff] }
 0x50f   : > { %v2393_v18 = vsub.f32 %v12408_v28, %v2265_v32  ;;  %v4202_v45 = vmul.f32 %v12411_v36, %v3406_v21  ;;  %4604 = vperm.xlu0 %5778, %v4209_v41   ;;  %v3071_v37 = vadd.f32 1.0, %v12413_v13  ;;  %v12414_v29 = vmax.f32 %v12402_v30, 0.0  ;;  %v12415_v32 = vld [vmem:[#allocation43_spill] sm:$0xff]  ;;  %v12416_v28 = vld [vmem:[#allocation178_spill] sm:$0xff]  ;;  %v9915_v41 = vpop.permute.xlu1 %4006  ;;  %v9922_v30 = vpop.permute.xlu0 %4418 }
 0x510   : > { %v2260_v44 = vmul.f32 %v12416_v28, %v12415_v32  ;;  %v4211_v57 = vmul.f32 %v12417_v16, %v3415_v31  ;;  %v3408_v7 = vadd.f32 %v3217_v47, %v2384_v50  ;;  %12418 = vst [vmem:[#allocation345_spill] sm:$0xff] %v9915_v41  ;;  %v9917_v21 = vpop.eup %6236  ;;  %v3221_v33 = vmul.f32 0.6931472, %v9594_v59  ;;  %v12419_v42 = vld [vmem:[#allocation115_spill] sm:$0xff]  ;;  %12420 = vst [vmem:[#allocation331_spill] sm:$0xff] %v9922_v30 }
 0x511   : > { %v2386_v40 = vsub.f32 %v12414_v29, %v2258_v11  ;;  %4583 = vperm.xlu1 %5779, %v4202_v45   ;;  %6246 = vlog2.f32 %v3058_v58  ;;  %v3060_v13 = vadd.f32 1.0, %v12419_v42  ;;  %v12421_v11 = vmax.f32 %v12409_v46, 0.0  ;;  %v12422_v31 = vld [vmem:[#allocation191_spill] sm:$0xff]  ;;  %v12423_v45 = vld [vmem:[#allocation342_spill] sm:$0xff] }
 0x512   : > { %v2272_v50 = vmul.f32 %v12422_v31, %v8577_v26  ;;  %v3417_v47 = vadd.f32 %v3235_v12, %v2393_v18  ;;  %v4204_v28 = vmul.f32 %v12423_v45, %v3408_v7  ;;  %v9929_v16 = vpop.eup %6238  ;;  %v3239_v59 = vmul.f32 0.6931472, %v9529_v24  ;;  %v12424_v58 = vld [vmem:[#allocation251_spill] sm:$0xff]  ;;  %v12428_v31 = vld [vmem:[#allocation212_spill] sm:$0xff] }
 0x513   : > { %v2395_v29 = vsub.f32 %v12421_v11, %v2267_v53  ;;  %4610 = vperm.xlu0 %5778, %v4211_v57   ;;  %6248 = vlog2.f32 %v3071_v37  ;;  %v3073_v42 = vadd.f32 1.0, %v12424_v58  ;;  %v12425_v49 = vmax.f32 %v12415_v32, 0.0  ;;  %v12426_v53 = vld [vmem:[#allocation45_spill] sm:$0xff]  ;;  %v12427_v11 = vld [vmem:[#allocation180_spill] sm:$0xff]  ;;  %v9939_v57 = vpop.permute.xlu1 %4397  ;;  %v9946_v32 = vpop.permute.xlu0 %4424 }
 0x514   : > { %v2262_v41 = vmul.f32 %v12427_v11, %v12426_v53  ;;  %v4213_v18 = vmul.f32 %v12428_v31, %v3417_v47  ;;  %v3410_v12 = vadd.f32 %v3221_v33, %v2386_v40  ;;  %v9941_v7 = vpop.eup %6240  ;;  %v3225_v24 = vmul.f32 0.6931472, %v9619_v17  ;;  %v12429_v37 = vld [vmem:[#allocation197_spill] sm:$0xff]  ;;  %12430 = vst [vmem:[#allocation103_spill] sm:$0xff] %v9946_v32  ;;  %v12432_v47 = vld [vmem:[#allocation195_spill] sm:$0xff] }
 0x515   : > { %v2388_v46 = vsub.f32 %v12425_v49, %v2260_v44  ;;  %4589 = vperm.xlu1 %5779, %v4204_v28   ;;  %6250 = vlog2.f32 %v3060_v13  ;;  %v3062_v58 = vadd.f32 1.0, %v12429_v37  ;;  %v12431_v44 = vmax.f32 %v8577_v26, 0.0  ;;  %v12433_v28 = vld [vmem:[#allocation89_spill] sm:$0xff]  ;;  %v12434_v13 = vld [vmem:[#allocation279_spill] sm:$0xff] }
 0x516   : > { %v2274_v40 = vmul.f32 %v12432_v47, %v12136_v4  ;;  %v3419_v33 = vadd.f32 %v3239_v59, %v2395_v29  ;;  %v4206_v11 = vmul.f32 %v12433_v28, %v3410_v12  ;;  %v9953_v31 = vpop.eup %6242  ;;  %v3249_v17 = vmul.f32 0.6931472, %v9763_v34  ;;  %v12438_v47 = vld [vmem:[#allocation109_spill] sm:$0xff] }
 0x517   : > { %v2400_v49 = vsub.f32 %v12431_v44, %v2272_v50  ;;  %4616 = vperm.xlu0 %5778, %v4213_v18   ;;  %6252 = vlog2.f32 %v3073_v42  ;;  %v3075_v37 = vadd.f32 1.0, %v12434_v13  ;;  %v12435_v36 = vmax.f32 %v12426_v53, 0.0  ;;  %v12436_v50 = vld [vmem:[#allocation47_spill] sm:$0xff]  ;;  %v12437_v44 = vld [vmem:[#allocation182_spill] sm:$0xff]  ;;  %v9963_v18 = vpop.permute.xlu1 %4403 }
 0x518   : > { %v2264_v32 = vmul.f32 %v12437_v44, %v12436_v50  ;;  %v4215_v29 = vmul.f32 %v12438_v47, %v3419_v33  ;;  %v3412_v59 = vadd.f32 %v3225_v24, %v2388_v46  ;;  %12439 = vst [vmem:[#allocation249_spill] sm:$0xff] %v9963_v18  ;;  %v9965_v12 = vpop.eup %6244  ;;  %v9968_v28 = vmul.f32 0.6931472, %v9581_v15  ;;  %v12440_v42 = vld [vmem:[#allocation110_spill] sm:$0xff]  ;;  %v12443_v46 = vld [vmem:[#allocation204_spill] sm:$0xff] }
 0x519   : > { %v2390_v26 = vsub.f32 %v12435_v36, %v2262_v41  ;;  %4595 = vperm.xlu1 %5779, %v4206_v11   ;;  %v3229_v34 = vmul.f32 0.6931472, %v9643_v5  ;;  %6254 = vlog2.f32 %v3062_v58  ;;  %v3064_v53 = vadd.f32 1.0, %v12440_v42  ;;  %v9972_v41 = vpop.permute.xlu0 %4430  ;;  %v12444_v33 = vld [vmem:[#allocation328_spill] sm:$0xff] }
 0x51a   : > { %12441 = vst [vmem:[#allocation135_spill] sm:$0xff] %v9972_v41  ;;  %v12442_v36 = vmax.f32 %v12136_v4, 0.0  ;;  %v2289_v24 = vmul.f32 %v12443_v46, %v12210_v51  ;;  %v4208_v11 = vmul.f32 %v12444_v33, %v3412_v59  ;;  %v3424_v44 = vadd.f32 %v3249_v17, %v2400_v49  ;;  %v12448_v41 = vld [vmem:[#allocation118_spill] sm:$0xff] }
 0x51b   : > { %4622 = vperm.xlu0 %5778, %v4215_v29   ;;  %v6247_v47 = vpop.eup %6246  ;;  %v9980_v15 = vmul.f32 0.6931472, %v9606_v35  ;;  %v3253_v5 = vmul.f32 0.6931472, %v9785_v19  ;;  %6256 = vlog2.f32 %v3075_v37  ;;  %v3077_v58 = vadd.f32 1.0, %v9359_v27  ;;  %v9989_v49 = vpop.permute.xlu1 %4409  ;;  %v12450_v27 = vld [vmem:[#allocation201_spill] sm:$0xff] }
 0x51c   : > { %v2402_v13 = vsub.f32 %v12442_v36, %v2274_v40  ;;  %v12445_v42 = vmax.f32 %v12436_v50, 0.0  ;;  %v12446_v40 = vld [vmem:[#allocation49_spill] sm:$0xff]  ;;  %v12447_v36 = vld [vmem:[#allocation184_spill] sm:$0xff]  ;;  %v3414_v46 = vadd.f32 %v3229_v34, %v2390_v26  ;;  %v4220_v59 = vmul.f32 %v12448_v41, %v3424_v44  ;;  %12449 = vst [vmem:[#allocation329_spill] sm:$0xff] %v9989_v49  ;;  %v12453_v29 = vld [vmem:[#allocation226_spill] sm:$0xff] }
 0x51d   : > { %v2266_v45 = vmul.f32 %v12447_v36, %v12446_v40  ;;  %4601 = vperm.xlu1 %5779, %v4208_v11   ;;  %v9991_v17 = vpop.eup %6248  ;;  %v9994_v35 = vmul.f32 0.6931472, %v9631_v38  ;;  %v3233_v19 = vmul.f32 0.6931472, %v9667_v20  ;;  %6258 = vlog2.f32 %v3064_v53  ;;  %v12454_v41 = vld [vmem:[#allocation90_spill] sm:$0xff]  ;;  %v12455_v53 = vld [vmem:[#allocation297_spill] sm:$0xff] }
 0x51e   : > { %v2392_v4 = vsub.f32 %v12445_v42, %v2264_v32  ;;  %v3066_v37 = vadd.f32 1.0, %v12450_v27  ;;  %v9998_v32 = vpop.permute.xlu0 %4436  ;;  %v12452_v50 = vmax.f32 %v12210_v51, 0.0  ;;  %v2290_v34 = vmul.f32 %v12453_v29, %v12234_v52  ;;  %v12457_v36 = vld [vmem:[#allocation51_spill] sm:$0xff]  ;;  %v12458_v27 = vld [vmem:[#allocation186_spill] sm:$0xff] }
 0x51f   : > { %12451 = vst [vmem:[#allocation101_spill] sm:$0xff] %v9998_v32  ;;  %v4210_v33 = vmul.f32 %v12454_v41, %v3414_v46  ;;  %v3426_v11 = vadd.f32 %v3253_v5, %v2402_v13  ;;  %4637 = vperm.xlu0 %5778, %v4220_v59   ;;  %v10005_v44 = vpop.eup %6250  ;;  %v10008_v38 = vmul.f32 0.6931472, %v9655_v39  ;;  %v3283_v20 = vmul.f32 0.6931472, %v9821_v25  ;;  %v12459_v46 = vld [vmem:[#allocation220_spill] sm:$0xff]  ;;  %v10017_v5 = vpop.permute.xlu1 %4415 }
 0x520   : > { %v2417_v26 = vsub.f32 %v12452_v50, %v2289_v24  ;;  %6260 = vlog2.f32 %v3077_v58  ;;  %v3079_v42 = vadd.f32 1.0, %v12455_v53  ;;  %v12456_v51 = vmax.f32 %v12446_v40, 0.0  ;;  %12460 = vst [vmem:[#allocation347_spill] sm:$0xff] %v10017_v5  ;;  %v12461_v25 = vld [vmem:[#allocation236_spill] sm:$0xff]  ;;  %v12496_v49 = vld [vmem:[#allocation58_spill] sm:$0xff] }
 0x521   : > { %v2268_v50 = vmul.f32 %v12458_v27, %v12457_v36  ;;  %v3416_v29 = vadd.f32 %v3233_v19, %v2392_v4  ;;  %v4222_v13 = vmul.f32 %v12459_v46, %v3426_v11  ;;  %4607 = vperm.xlu1 %5779, %v4210_v33   ;;  %v6253_v59 = vpop.eup %6252  ;;  %v3237_v39 = vmul.f32 0.6931472, %v9691_v10  ;;  %v12464_v4 = vld [vmem:[#allocation234_spill] sm:$0xff] }
 0x522   : > { %v2394_v24 = vsub.f32 %v12456_v51, %v2266_v45  ;;  %6262 = vlog2.f32 %v3066_v37  ;;  %v3068_v58 = vadd.f32 1.0, %v12461_v25  ;;  %v3081_v41 = vadd.f32 1.0, %v9427_v62  ;;  %v10022_v53 = vpop.permute.xlu0 %4442  ;;  %v12465_v11 = vld [vmem:[#allocation298_spill] sm:$0xff]  ;;  %v12466_v37 = vld [vmem:[#allocation205_spill] sm:$0xff]  ;;  %v12467_v25 = vld [vmem:[#allocation208_spill] sm:$0xff] }
 0x523   : > { %12462 = vst [vmem:[#allocation270_spill] sm:$0xff] %v10022_v53  ;;  %v12463_v45 = vmax.f32 %v12234_v52, 0.0  ;;  %v2305_v19 = vmul.f32 %v12464_v4, %v12334_v8  ;;  %v4212_v33 = vmul.f32 %v12465_v11, %v3416_v29  ;;  %v3441_v51 = vadd.f32 %v3283_v20, %v2417_v26  ;;  %4643 = vperm.xlu0 %5778, %v4222_v13   ;;  %v10029_v27 = vpop.eup %6254  ;;  %v12468_v53 = vld [vmem:[#allocation181_spill] sm:$0xff]  ;;  %v12470_v4 = vld [vmem:[#allocation123_spill] sm:$0xff]  ;;  %v10038_v26 = vpop.permute.xlu1 %4421  ;;  %v12473_v13 = vld [vmem:[#allocation338_spill] sm:$0xff] }
 0x524   : > { %v3285_v10 = vmul.f32 0.6931472, %v6247_v47  ;;  %6264 = vlog2.f32 %v3079_v42  ;;  %v3070_v46 = vadd.f32 1.0, %v12466_v37  ;;  %v3072_v62 = vadd.f32 1.0, %v12467_v25  ;;  %12471 = vst [vmem:[#allocation134_spill] sm:$0xff] %v10038_v26  ;;  %v12472_v47 = vld [vmem:[#allocation305_spill] sm:$0xff] }
 0x525   : > { %v2418_v40 = vsub.f32 %v12463_v45, %v2290_v34  ;;  %v2273_v32 = vmul.f32 %v12468_v53, %v8585_v3  ;;  %v12469_v52 = vmax.f32 %v12457_v36, 0.0  ;;  %v3418_v45 = vadd.f32 %v3237_v39, %v2394_v24  ;;  %4613 = vperm.xlu1 %5779, %v4212_v33   ;;  %v10040_v20 = vpop.eup %6256  ;;  %v12475_v36 = vld [vmem:[#allocation74_spill] sm:$0xff] }
 0x526   : > { %v4237_v14 = vmul.f32 %v12470_v4, %v3441_v51  ;;  %v10043_v42 = vmul.f32 0.6931472, %v12472_v47  ;;  %v3241_v29 = vmul.f32 0.6931472, %v9715_v43  ;;  %6266 = vlog2.f32 %v3068_v58  ;;  %v10047_v53 = vpop.permute.xlu0 %4448  ;;  %v12478_v51 = vld [vmem:[#allocation116_spill] sm:$0xff]  ;;  %v12479_v43 = vld [vmem:[#allocation225_spill] sm:$0xff] }
 0x527   : > { %v2396_v34 = vsub.f32 %v12469_v52, %v2268_v50  ;;  %v3083_v11 = vadd.f32 1.0, %v12473_v13  ;;  %12474 = vst [vmem:[#allocation337_spill] sm:$0xff] %v10047_v53  ;;  %v12476_v50 = vld [vmem:[#allocation207_spill] sm:$0xff]  ;;  %v12477_v39 = vmax.f32 %v12334_v8, 0.0  ;;  %v4214_v37 = vmul.f32 %v12478_v51, %v3418_v45  ;;  %v10054_v52 = vpop.eup %6258  ;;  %v12480_v47 = vld [vmem:[#allocation216_spill] sm:$0xff] }
 0x528   : > { %v2291_v24 = vmul.f32 %v12476_v50, %v12475_v36  ;;  %v3442_v25 = vadd.f32 %v3285_v10, %v2418_v40  ;;  %4688 = vperm.xlu0 %5778, %v4237_v14   ;;  %v3315_v4 = vmul.f32 0.6931472, %v6253_v59  ;;  %6268 = vlog2.f32 %v3072_v62  ;;  %v12482_v50 = vld [vmem:[#allocation71_spill] sm:$0xff]  ;;  %v10065_v14 = vpop.permute.xlu1 %4427  ;;  %v12486_v59 = vld [vmem:[#allocation129_spill] sm:$0xff] }
 0x529   : > { %v2433_v33 = vsub.f32 %v12477_v39, %v2305_v19  ;;  %v10057_v58 = vadd.f32 1.0, %v12479_v43  ;;  %v3074_v13 = vadd.f32 1.0, %v12480_v47  ;;  %v12481_v30 = vmax.f32 %v8585_v3, 0.0  ;;  %v12484_v39 = vld [vmem:[#allocation316_spill] sm:$0xff]  ;;  %4619 = vperm.xlu1 %5779, %v4214_v37   ;;  %12485 = vst [vmem:[#allocation254_spill] sm:$0xff] %v10065_v14  ;;  %v12487_v62 = vld [vmem:[#allocation299_spill] sm:$0xff] }
 0x52a   : > { %v2288_v8 = vmul.f32 %v12483_v2, %v12482_v50  ;;  %v3420_v19 = vadd.f32 %v3241_v29, %v2396_v34  ;;  %v4238_v45 = vmul.f32 %v12484_v39, %v3442_v25  ;;  %v10067_v40 = vpop.eup %6260  ;;  %v10070_v10 = vmul.f32 0.6931472, %v12486_v59  ;;  %v12488_v43 = vld [vmem:[#allocation278_spill] sm:$0xff]  ;;  %v12491_v2 = vld [vmem:[#allocation185_spill] sm:$0xff]  ;;  %v12493_v25 = vld [vmem:[#allocation92_spill] sm:$0xff] }
 0x52b   : > { %v2401_v26 = vsub.f32 %v12481_v30, %v2273_v32  ;;  %6270 = vlog2.f32 %v3081_v41  ;;  %v3087_v51 = vadd.f32 1.0, %v12487_v62  ;;  %v3076_v3 = vadd.f32 1.0, %v12488_v43  ;;  %v10074_v30 = vpop.permute.xlu0 %4454  ;;  %v12490_v32 = vld [vmem:[#allocation60_spill] sm:$0xff]  ;;  %v12494_v59 = vld [vmem:[#allocation121_spill] sm:$0xff] }
 0x52c   : > { %12489 = vst [vmem:[#allocation137_spill] sm:$0xff] %v10074_v30  ;;  %v2277_v34 = vmul.f32 %v12491_v2, %v12490_v32  ;;  %v12492_v29 = vmax.f32 %v12475_v36, 0.0  ;;  %v4216_v47 = vmul.f32 %v12493_v25, %v3420_v19  ;;  %v3457_v39 = vadd.f32 %v3315_v4, %v2433_v33  ;;  %4691 = vperm.xlu0 %5778, %v4238_v45   ;;  %v10081_v14 = vpop.eup %6262  ;;  %v12495_v43 = vld [vmem:[#allocation308_spill] sm:$0xff]  ;;  %v12497_v30 = vld [vmem:[#allocation183_spill] sm:$0xff]  ;;  %v10094_v45 = vpop.permute.xlu1 %4433 }
 0x52d   : > { %v3287_v41 = vmul.f32 0.6931472, %v9845_v60  ;;  %6272 = vlog2.f32 %v3070_v46  ;;  %v3078_v62 = vadd.f32 1.0, %v12494_v59  ;;  %v10086_v5 = vadd.f32 1.0, %v12495_v43  ;;  %v12499_v33 = vld [vmem:[#allocation315_spill] sm:$0xff]  ;;  %12500 = vst [vmem:[#allocation333_spill] sm:$0xff] %v10094_v45 }
 0x52e   : > { %v2419_v37 = vsub.f32 %v12492_v29, %v2291_v24  ;;  %v2275_v2 = vmul.f32 %v12497_v30, %v12496_v49  ;;  %v12498_v36 = vmax.f32 %v12482_v50, 0.0  ;;  %v3425_v19 = vadd.f32 %v9994_v35, %v2401_v26  ;;  %4625 = vperm.xlu1 %5779, %v4216_v47   ;;  %v10096_v60 = vpop.eup %6264  ;;  %v12501_v46 = vld [vmem:[#allocation256_spill] sm:$0xff]  ;;  %v12502_v59 = vld [vmem:[#allocation302_spill] sm:$0xff] }
 0x52f   : > { %v4253_v4 = vmul.f32 %v12499_v33, %v3457_v39  ;;  %v10099_v29 = vmul.f32 0.6931472, %v12501_v46  ;;  %v3281_v25 = vmul.f32 0.6931472, %v9953_v31  ;;  %6274 = vlog2.f32 %v3083_v11  ;;  %v10105_v50 = vpop.permute.xlu0 %4460  ;;  %v12506_v39 = vld [vmem:[#allocation269_spill] sm:$0xff]  ;;  %v12507_v11 = vld [vmem:[#allocation311_spill] sm:$0xff] }
 0x530   : > { %v2416_v24 = vsub.f32 %v12498_v36, %v2288_v8  ;;  %v10103_v30 = vadd.f32 1.0, %v12502_v59  ;;  %12503 = vst [vmem:[#allocation275_spill] sm:$0xff] %v10105_v50  ;;  %v12504_v35 = vmax.f32 %v12490_v32, 0.0  ;;  %v12505_v8 = vld [vmem:[#allocation239_spill] sm:$0xff]  ;;  %v4221_v43 = vmul.f32 %v12506_v39, %v3425_v19  ;;  %v10112_v33 = vpop.eup %6266  ;;  %v12508_v59 = vld [vmem:[#allocation245_spill] sm:$0xff]  ;;  %v10128_v39 = vpop.permute.xlu1 %4439 }
 0x531   : > { %v2307_v47 = vmul.f32 %v12505_v8, %v9125_v9  ;;  %v3443_v36 = vadd.f32 %v3287_v41, %v2419_v37  ;;  %4736 = vperm.xlu0 %5778, %v4253_v4   ;;  %v10115_v31 = vmul.f32 0.6931472, %v9739_v23  ;;  %6276 = vlog2.f32 %v3074_v13  ;;  %v12511_v8 = vld [vmem:[#allocation261_spill] sm:$0xff]  ;;  %v12512_v37 = vld [vmem:[#allocation95_spill] sm:$0xff]  ;;  %12513 = vst [vmem:[#allocation136_spill] sm:$0xff] %v10128_v39  ;;  %v12514_v13 = vld [vmem:[#allocation324_spill] sm:$0xff] }
 0x532   : > { %v2405_v26 = vsub.f32 %v12504_v35, %v2277_v34  ;;  %v10118_v46 = vadd.f32 1.0, %v12507_v11  ;;  %v10121_v45 = vadd.f32 1.0, %v12508_v59  ;;  %v12509_v32 = vmax.f32 %v12496_v49, 0.0  ;;  %v12510_v35 = vld [vmem:[#allocation209_spill] sm:$0xff]  ;;  %4640 = vperm.xlu1 %5779, %v4221_v43   ;;  %v6269_v23 = vpop.eup %6268  ;;  %v12515_v11 = vld [vmem:[#allocation131_spill] sm:$0xff]  ;;  %v12516_v59 = vld [vmem:[#allocation344_spill] sm:$0xff] }
 0x533   : > { %v2304_v19 = vmul.f32 %v12511_v8, %v12510_v35  ;;  %v4239_v41 = vmul.f32 %v12512_v37, %v3443_v36  ;;  %v3440_v4 = vadd.f32 %v3281_v25, %v2416_v24  ;;  %v10131_v50 = vmul.f32 0.6931472, %v12514_v13  ;;  %v10139_v49 = vpop.permute.xlu0 %4466  ;;  %v12522_v8 = vld [vmem:[#allocation307_spill] sm:$0xff] }
 0x534   : > { %v2403_v34 = vsub.f32 %v12509_v32, %v2275_v2  ;;  %v10134_v18 = vmul.f32 0.6931472, %v12515_v11  ;;  %v10137_v63 = vmul.f32 0.6931472, %v12516_v59  ;;  %6278 = vlog2.f32 %v3087_v51  ;;  %12518 = vst [vmem:[#allocation259_spill] sm:$0xff] %v10139_v49  ;;  %v12519_v2 = vld [vmem:[#allocation76_spill] sm:$0xff] }
 0x535   : > { %v12520_v32 = vld [vmem:[#allocation211_spill] sm:$0xff]  ;;  %v12521_v24 = vmax.f32 %v9125_v9, 0.0  ;;  %v3429_v43 = vadd.f32 %v10043_v42, %v2405_v26  ;;  %v4236_v37 = vmul.f32 %v12522_v8, %v3440_v4  ;;  %4694 = vperm.xlu0 %5778, %v4239_v41   ;;  %v10147_v13 = vpop.eup %6270  ;;  %v12523_v11 = vld [vmem:[#allocation260_spill] sm:$0xff]  ;;  %v10151_v59 = vmul.f32 0.6931472, %v9833_v54  ;;  %v12527_v26 = vld [vmem:[#allocation301_spill] sm:$0xff]  ;;  %v10160_v4 = vpop.permute.xlu1 %4445 }
 0x536   : > { %12517 = vst [vmem:[#allocation343_spill] sm:$0xff] %v10137_v63  ;;  %v2293_v36 = vmul.f32 %v12520_v32, %v12519_v2  ;;  %v3257_v39 = vmul.f32 0.6931472, %v12523_v11  ;;  %v3319_v51 = vmul.f32 0.6931472, %v10040_v20  ;;  %6280 = vlog2.f32 %v3076_v3  ;;  %v12524_v63 = vld [vmem:[#allocation59_spill] sm:$0xff] }
 0x537   : > { %v2435_v25 = vsub.f32 %v12521_v24, %v2307_v47  ;;  %v12525_v32 = vld [vmem:[#allocation199_spill] sm:$0xff]  ;;  %v12526_v9 = vmax.f32 %v12510_v35, 0.0  ;;  %v3427_v42 = vadd.f32 %v10008_v38, %v2403_v34  ;;  %v4225_v41 = vmul.f32 %v12527_v26, %v3429_v43  ;;  %4685 = vperm.xlu1 %5779, %v4236_v37   ;;  %v10162_v24 = vpop.eup %6272  ;;  %v10168_v8 = vpop.permute.xlu0 %4472  ;;  %v12529_v35 = vld [vmem:[#allocation62_spill] sm:$0xff]  ;;  %v12532_v43 = vld [vmem:[#allocation296_spill] sm:$0xff] }
 0x538   : > { %v2276_v49 = vmul.f32 %v12525_v32, %v12524_v63  ;;  %v10165_v54 = vmul.f32 0.6931472, %v9857_v48  ;;  %v3291_v20 = vmul.f32 0.6931472, %v9869_v55  ;;  %v3313_v3 = vmul.f32 0.6931472, %v6269_v23 }
 0x539   : > { %v2432_v47 = vsub.f32 %v12526_v9, %v2304_v19  ;;  %6282 = vlog2.f32 %v3078_v62  ;;  %12528 = vst [vmem:[#allocation139_spill] sm:$0xff] %v10168_v8  ;;  %v12530_v19 = vld [vmem:[#allocation187_spill] sm:$0xff]  ;;  %v12531_v38 = vmax.f32 %v12519_v2, 0.0  ;;  %v4223_v32 = vmul.f32 %v12532_v43, %v3427_v42  ;;  %4652 = vperm.xlu0 %5778, %v4225_v41   ;;  %v10175_v9 = vpop.eup %6274  ;;  %v12535_v42 = vld [vmem:[#allocation266_spill] sm:$0xff] }
 0x53a   : > { %v2279_v11 = vmul.f32 %v12530_v19, %v12529_v35  ;;  %v3459_v37 = vadd.f32 %v3319_v51, %v2435_v25  ;;  %v10178_v48 = vmul.f32 0.6931472, %v9881_v56  ;;  %v10181_v55 = vmul.f32 0.6931472, %v9893_v22  ;;  %v12536_v51 = vld [vmem:[#allocation252_spill] sm:$0xff]  ;;  %v10192_v19 = vpop.permute.xlu1 %4451 }
 0x53b   : > { %v2421_v34 = vsub.f32 %v12531_v38, %v2293_v36  ;;  %v10184_v62 = vmul.f32 0.6931472, %v9905_v0  ;;  %6284 = vlog2.f32 %v10086_v5  ;;  %v12533_v23 = vmax.f32 %v12524_v63, 0.0  ;;  %v12534_v36 = vld [vmem:[#allocation326_spill] sm:$0xff]  ;;  %4646 = vperm.xlu1 %5779, %v4223_v32   ;;  %v6277_v56 = vpop.eup %6276  ;;  %v10204_v63 = vpop.permute.xlu0 %4478 }
 0x53c   : > { %v2306_v25 = vmul.f32 %v12535_v42, %v12534_v36  ;;  %v4255_v26 = vmul.f32 %v12536_v51, %v3459_v37  ;;  %v3456_v41 = vadd.f32 %v3313_v3, %v2432_v47  ;;  %v10195_v22 = vmul.f32 0.6931472, %v9917_v21  ;;  %12537 = vst [vmem:[#allocation339_spill] sm:$0xff] %v10204_v63  ;;  %v12539_v3 = vld [vmem:[#allocation295_spill] sm:$0xff]  ;;  %v12540_v38 = vld [vmem:[#allocation246_spill] sm:$0xff]  ;;  %v12541_v37 = vld [vmem:[#allocation313_spill] sm:$0xff] }
 0x53d   : > { %v2404_v2 = vsub.f32 %v12533_v23, %v2276_v49  ;;  %v10198_v0 = vmul.f32 0.6931472, %v9929_v16  ;;  %v10201_v5 = vmul.f32 0.6931472, %v9941_v7  ;;  %6286 = vlog2.f32 %v10103_v30 }
 0x53e   : > { %v12538_v49 = vmax.f32 %v12529_v35, 0.0  ;;  %v2309_v43 = vmul.f32 %v12540_v38, %v12539_v3  ;;  %v3445_v32 = vadd.f32 %v3291_v20, %v2421_v34  ;;  %v4252_v21 = vmul.f32 %v12541_v37, %v3456_v41  ;;  %4742 = vperm.xlu0 %5778, %v4255_v26   ;;  %v6279_v23 = vpop.eup %6278  ;;  %v12544_v35 = vld [vmem:[#allocation75_spill] sm:$0xff]  ;;  %v12547_v41 = vld [vmem:[#allocation122_spill] sm:$0xff] }
 0x53f   : > { %v10212_v16 = vmul.f32 0.6931472, %v9965_v12  ;;  %v10215_v7 = vmul.f32 0.6931472, %v9991_v17  ;;  %v3289_v30 = vmul.f32 0.6931472, %v10005_v44  ;;  %6288 = vlog2.f32 %v10118_v46  ;;  %v10232_v38 = vpop.permute.xlu0 %4484 }
 0x540   : > { %v2407_v47 = vsub.f32 %v12538_v49, %v2279_v11  ;;  %v12545_v11 = vld [vmem:[#allocation230_spill] sm:$0xff]  ;;  %v12546_v51 = vmax.f32 %v12534_v36, 0.0  ;;  %v3428_v34 = vadd.f32 %v3257_v39, %v2404_v2  ;;  %v4241_v26 = vmul.f32 %v12547_v41, %v3445_v32  ;;  %v10224_v49 = vpop.permute.xlu1 %4457  ;;  %4733 = vperm.xlu1 %5779, %v4252_v21   ;;  %v6281_v12 = vpop.eup %6280  ;;  %12549 = vst [vmem:[#allocation348_spill] sm:$0xff] %v10232_v38  ;;  %v12553_v32 = vld [vmem:[#allocation235_spill] sm:$0xff]  ;;  %v12554_v41 = vld [vmem:[#allocation61_spill] sm:$0xff] }
 0x541   : > { %12542 = vst [vmem:[#allocation56_spill] sm:$0xff] %v10212_v16  ;;  %12543 = vst [vmem:[#allocation281_spill] sm:$0xff] %v10215_v7  ;;  %v2292_v42 = vmul.f32 %v12545_v11, %v12544_v35  ;;  %v10227_v17 = vmul.f32 0.6931472, %v10029_v27  ;;  %v10230_v44 = vmul.f32 0.6931472, %v10054_v52  ;;  %6290 = vlog2.f32 %v10057_v58 }
 0x542   : > { %v2434_v20 = vsub.f32 %v12546_v51, %v2306_v25  ;;  %12548 = vst [vmem:[#allocation138_spill] sm:$0xff] %v10224_v49  ;;  %v3317_v46 = vmul.f32 0.6931472, %v6277_v56  ;;  %v12550_v37 = vld [vmem:[#allocation78_spill] sm:$0xff]  ;;  %v12552_v39 = vmax.f32 %v12539_v3, 0.0  ;;  %v3431_v25 = vadd.f32 %v10070_v10, %v2407_v47  ;;  %4700 = vperm.xlu0 %5778, %v4241_v26   ;;  %v12555_v38 = vld [vmem:[#allocation203_spill] sm:$0xff] }
 0x543   : > { %v12551_v11 = vld [vmem:[#allocation214_spill] sm:$0xff]  ;;  %v4224_v21 = vmul.f32 %v12553_v32, %v3428_v34  ;;  %v6283_v51 = vpop.eup %6282  ;;  %v3323_v27 = vmul.f32 0.6931472, %v10067_v40  ;;  %v10242_v52 = vmul.f32 0.6931472, %v10081_v14  ;;  %v12556_v3 = vmax.f32 %v12544_v35, 0.0  ;;  %v10264_v35 = vpop.permute.xlu0 %4490 }
 0x544   : > { %v2295_v36 = vmul.f32 %v12551_v11, %v12550_v37  ;;  %v2437_v2 = vsub.f32 %v12552_v39, %v2309_v43  ;;  %v10245_v56 = vmul.f32 0.6931472, %v10096_v60  ;;  %v2278_v11 = vmul.f32 %v12555_v38, %v12554_v41  ;;  %v12557_v39 = vld [vmem:[#allocation300_spill] sm:$0xff]  ;;  %v10252_v34 = vpop.permute.xlu1 %4463  ;;  %12561 = vst [vmem:[#allocation346_spill] sm:$0xff] %v10264_v35  ;;  %v12563_v38 = vld [vmem:[#allocation189_spill] sm:$0xff]  ;;  %v12583_v16 = vld [vmem:[#allocation66_spill] sm:$0xff] }
 0x545   : > { %v2420_v43 = vsub.f32 %v12556_v3, %v2292_v42  ;;  %v4227_v10 = vmul.f32 %v12557_v39, %v3431_v25  ;;  %v3458_v47 = vadd.f32 %v3317_v46, %v2434_v20  ;;  %12558 = vst [vmem:[#allocation57_spill] sm:$0xff] %v10252_v34  ;;  %4649 = vperm.xlu1 %5779, %v4224_v21   ;;  %v6285_v26 = vpop.eup %6284  ;;  %v10255_v40 = vmul.f32 0.6931472, %v10112_v33  ;;  %v12562_v42 = vld [vmem:[#allocation64_spill] sm:$0xff]  ;;  %v12565_v21 = vld [vmem:[#allocation238_spill] sm:$0xff]  ;;  %v12567_v39 = vld [vmem:[#allocation177_spill] sm:$0xff] }
 0x546   : > { %v10258_v14 = vmul.f32 0.6931472, %v10147_v13  ;;  %v10261_v60 = vmul.f32 0.6931472, %v10162_v24  ;;  %v2281_v20 = vmul.f32 %v12563_v38, %v12562_v42  ;;  %v12564_v46 = vmax.f32 %v12550_v37, 0.0  ;;  %v12566_v13 = vld [vmem:[#allocation52_spill] sm:$0xff] }
 0x547   : > { %12559 = vst [vmem:[#allocation263_spill] sm:$0xff] %v10255_v40  ;;  %v3461_v32 = vadd.f32 %v3323_v27, %v2437_v2  ;;  %v4254_v33 = vmul.f32 %v12565_v21, %v3458_v47  ;;  %4658 = vperm.xlu0 %5778, %v4227_v10   ;;  %v6287_v3 = vpop.eup %6286  ;;  %v2269_v63 = vmul.f32 %v12567_v39, %v12566_v13  ;;  %v10274_v24 = vmul.f32 0.6931472, %v10175_v9  ;;  %v12570_v37 = vld [vmem:[#allocation264_spill] sm:$0xff]  ;;  %v12574_v39 = vld [vmem:[#allocation54_spill] sm:$0xff]  ;;  %v12575_v9 = vld [vmem:[#allocation179_spill] sm:$0xff] }
 0x548   : > { %12560 = vst [vmem:[#allocation141_spill] sm:$0xff] %v10261_v60  ;;  %v2423_v25 = vsub.f32 %v12564_v46, %v2295_v36  ;;  %v10276_v58 = vmul.f32 0.6931472, %v6279_v23  ;;  %6292 = vlog2.f32 %v10121_v45  ;;  %v12569_v38 = vmax.f32 %v12554_v41, 0.0  ;;  %v12571_v36 = vld [vmem:[#allocation271_spill] sm:$0xff]  ;;  %v12572_v47 = vld [vmem:[#allocation320_spill] sm:$0xff]  ;;  %v10284_v46 = vpop.permute.xlu1 %4469  ;;  %v10292_v41 = vpop.permute.xlu0 %4496 }
 0x549   : > { %v2308_v2 = vmul.f32 %v12571_v36, %v12570_v37  ;;  %v3444_v27 = vadd.f32 %v3289_v30, %v2420_v43  ;;  %v4257_v10 = vmul.f32 %v12572_v47, %v3461_v32  ;;  %12573 = vst [vmem:[#allocation140_spill] sm:$0xff] %v10284_v46  ;;  %4739 = vperm.xlu1 %5779, %v4254_v33   ;;  %v6289_v21 = vpop.eup %6288  ;;  %v3321_v23 = vmul.f32 0.6931472, %v6281_v12  ;;  %v12577_v30 = vld [vmem:[#allocation114_spill] sm:$0xff]  ;;  %v12578_v43 = vld [vmem:[#allocation253_spill] sm:$0xff]  ;;  %v12582_v46 = vld [vmem:[#allocation188_spill] sm:$0xff] }
 0x54a   : > { %12568 = vst [vmem:[#allocation285_spill] sm:$0xff] %v10276_v58  ;;  %v2406_v35 = vsub.f32 %v12569_v38, %v2278_v11  ;;  %v2271_v8 = vmul.f32 %v12575_v9, %v12574_v39  ;;  %v10288_v58 = vmul.f32 0.6931472, %v6283_v51  ;;  %v10290_v45 = vmul.f32 0.6931472, %v6285_v26  ;;  %v12579_v33 = vld [vmem:[#allocation229_spill] sm:$0xff] }
 0x54b   : > { %v12576_v11 = vmax.f32 %v12562_v42, 0.0  ;;  %v2311_v32 = vmul.f32 %v12578_v43, %v12577_v30  ;;  %v3447_v36 = vadd.f32 %v10181_v55, %v2423_v25  ;;  %v4240_v47 = vmul.f32 %v12579_v33, %v3444_v27  ;;  %4748 = vperm.xlu0 %5778, %v4257_v10   ;;  %v12581_v51 = vld [vmem:[#allocation53_spill] sm:$0xff]  ;;  %v12584_v34 = vld [vmem:[#allocation192_spill] sm:$0xff] }
 0x54c   : > { %v12580_v9 = vmax.f32 %v12566_v13, 0.0  ;;  %v2270_v26 = vmul.f32 %v12582_v46, %v12581_v51  ;;  %v2283_v40 = vmul.f32 %v12584_v34, %v12583_v16  ;;  %v12585_v7 = vld [vmem:[#allocation68_spill] sm:$0xff]  ;;  %v12588_v60 = vld [vmem:[#allocation233_spill] sm:$0xff]  ;;  %v12589_v55 = vmax.f32 %v12570_v37, 0.0  ;;  %v12593_v34 = vld [vmem:[#allocation63_spill] sm:$0xff] }
 0x54d   : > { %v2409_v38 = vsub.f32 %v12576_v11, %v2281_v20  ;;  %v12586_v42 = vld [vmem:[#allocation196_spill] sm:$0xff]  ;;  %v12587_v11 = vld [vmem:[#allocation77_spill] sm:$0xff]  ;;  %v3430_v27 = vadd.f32 %v10151_v59, %v2406_v35  ;;  %4697 = vperm.xlu1 %5779, %v4240_v47   ;;  %v12592_v46 = vmax.f32 %v12574_v39, 0.0  ;;  %v10322_v53 = vmul.f32 0.6931472, %v6289_v21 }
 0x54e   : > { %v2397_v12 = vsub.f32 %v12580_v9, %v2269_v63  ;;  %v2285_v20 = vmul.f32 %v12586_v42, %v12585_v7  ;;  %v2294_v43 = vmul.f32 %v12588_v60, %v12587_v11  ;;  %v2436_v25 = vsub.f32 %v12589_v55, %v2308_v2  ;;  %v12590_v10 = vld [vmem:[#allocation96_spill] sm:$0xff]  ;;  %v10314_v63 = vpop.permute.xlu1 %4475  ;;  %v12594_v9 = vld [vmem:[#allocation206_spill] sm:$0xff]  ;;  %v10324_v60 = vpop.permute.xlu0 %4502 }
 0x54f   : > { %v4243_v13 = vmul.f32 %v12590_v10, %v3447_v36  ;;  %12591 = vst [vmem:[#allocation55_spill] sm:$0xff] %v10314_v63  ;;  %v2399_v33 = vsub.f32 %v12592_v46, %v2271_v8  ;;  %v2280_v49 = vmul.f32 %v12594_v9, %v12593_v34  ;;  %v10320_v42 = vmul.f32 0.6931472, %v6287_v3  ;;  %v12595_v37 = vld [vmem:[#allocation80_spill] sm:$0xff]  ;;  %v12596_v2 = vld [vmem:[#allocation218_spill] sm:$0xff]  ;;  %v10332_v8 = vpop.eup %6290 }
 0x550   : > { %v2297_v59 = vmul.f32 %v12596_v2, %v12595_v37  ;;  %v12597_v35 = vmax.f32 %v12577_v30, 0.0  ;;  %v3433_v47 = vadd.f32 %v10099_v29, %v2409_v38  ;;  %v12598_v55 = vld [vmem:[#allocation222_spill] sm:$0xff]  ;;  %v12599_v3 = vmax.f32 %v12581_v51, 0.0  ;;  %v12602_v30 = vld [vmem:[#allocation65_spill] sm:$0xff] }
 0x551   : > { %v4226_v39 = vmul.f32 %v12598_v55, %v3430_v27  ;;  %4706 = vperm.xlu0 %5778, %v4243_v13   ;;  %v12600_v21 = vmax.f32 %v12583_v16, 0.0  ;;  %v12601_v9 = vmax.f32 %v12585_v7, 0.0  ;;  %v10341_v2 = vadd.f32 %v9968_v28, %v2397_v12  ;;  %v12605_v13 = vld [vmem:[#allocation228_spill] sm:$0xff] }
 0x552   : > { %v2439_v36 = vsub.f32 %v12597_v35, %v2311_v32  ;;  %v2398_v10 = vsub.f32 %v12599_v3, %v2270_v26  ;;  %v12603_v32 = vld [vmem:[#allocation210_spill] sm:$0xff]  ;;  %v12604_v38 = vmax.f32 %v12587_v11, 0.0  ;;  %v4229_v35 = vmul.f32 %v12605_v13, %v3433_v47  ;;  %v10348_v51 = vpop.permute.xlu1 %4481  ;;  %v10350_v16 = vpop.eup %6292  ;;  %v12607_v7 = vld [vmem:[#allocation200_spill] sm:$0xff]  ;;  %v12610_v3 = vld [vmem:[#allocation213_spill] sm:$0xff] }
 0x553   : > { %v2411_v46 = vsub.f32 %v12600_v21, %v2283_v40  ;;  %v2413_v63 = vsub.f32 %v12601_v9, %v2285_v20  ;;  %v2282_v29 = vmul.f32 %v12603_v32, %v12602_v30  ;;  %v3460_v55 = vadd.f32 %v3321_v23, %v2436_v25  ;;  %4655 = vperm.xlu1 %5779, %v4226_v39   ;;  %v12606_v40 = vld [vmem:[#allocation70_spill] sm:$0xff]  ;;  %v12609_v20 = vld [vmem:[#allocation67_spill] sm:$0xff]  ;;  %v12612_v47 = vld [vmem:[#allocation69_spill] sm:$0xff] }
 0x554   : > { %v2422_v27 = vsub.f32 %v12604_v38, %v2294_v43  ;;  %v2287_v26 = vmul.f32 %v12607_v7, %v12606_v40  ;;  %v12608_v28 = vmax.f32 %v12593_v34, 0.0  ;;  %v2284_v21 = vmul.f32 %v12610_v3, %v12609_v20  ;;  %v10361_v43 = vpop.permute.xlu0 %4508  ;;  %v12613_v39 = vld [vmem:[#allocation217_spill] sm:$0xff]  ;;  %v12614_v38 = vld [vmem:[#allocation99_spill] sm:$0xff]  ;;  %v12618_v3 = vld [vmem:[#allocation276_spill] sm:$0xff] }
 0x555   : > { %v10359_v11 = vadd.f32 %v9980_v15, %v2399_v33  ;;  %v12611_v23 = vmax.f32 %v12595_v37, 0.0  ;;  %v2286_v9 = vmul.f32 %v12613_v39, %v12612_v47  ;;  %v3463_v32 = vadd.f32 %v10245_v56, %v2439_v36  ;;  %4664 = vperm.xlu0 %5778, %v4229_v35   ;;  %v12615_v33 = vld [vmem:[#allocation102_spill] sm:$0xff]  ;;  %v12619_v36 = vld [vmem:[#allocation317_spill] sm:$0xff] }
 0x556   : > { %v2408_v12 = vsub.f32 %v12608_v28, %v2280_v49  ;;  %v4256_v13 = vmul.f32 %v12614_v38, %v3460_v55  ;;  %v10370_v49 = vadd.f32 %v10115_v31, %v2398_v10  ;;  %v3435_v34 = vadd.f32 %v10131_v50, %v2411_v46  ;;  %v12617_v28 = vld [vmem:[#allocation247_spill] sm:$0xff]  ;;  %v10383_v55 = vpop.permute.xlu1 %4487  ;;  %v12623_v46 = vld [vmem:[#allocation224_spill] sm:$0xff] }
 0x557   : > { %v2425_v25 = vsub.f32 %v12611_v23, %v2297_v59  ;;  %v10374_v15 = vadd.f32 %v10134_v18, %v2413_v63  ;;  %v4784_v7 = vadd.s32 4294967288, %v12615_v33  ;;  %v12616_v37 = vmax.f32 %v12602_v30, 0.0  ;;  %v12621_v18 = vld [vmem:[#allocation79_spill] sm:$0xff]  ;;  %v12622_v63 = vld [vmem:[#allocation237_spill] sm:$0xff]  ;;  %v12624_v30 = vld [vmem:[#allocation258_spill] sm:$0xff] }
 0x558   : > { %v2310_v23 = vmul.f32 %v12618_v3, %v12617_v28  ;;  %v3446_v56 = vadd.f32 %v10227_v17, %v2422_v27  ;;  %v4259_v35 = vmul.f32 %v12619_v36, %v3463_v32  ;;  %4745 = vperm.xlu1 %5779, %v4256_v13   ;;  %v12620_v50 = vmax.f32 %v12606_v40, 0.0  ;;  %v10394_v38 = vpop.permute.xlu0 %4514  ;;  %v12628_v3 = vld [vmem:[#allocation81_spill] sm:$0xff]  ;;  %v12629_v36 = vld [vmem:[#allocation223_spill] sm:$0xff] }
 0x559   : > { %v2410_v59 = vsub.f32 %v12616_v37, %v2282_v29  ;;  %v2296_v10 = vmul.f32 %v12622_v63, %v12621_v18  ;;  %v2313_v29 = vmul.f32 %v12624_v30, %v12623_v46  ;;  %v3432_v39 = vadd.f32 %v10165_v54, %v2408_v12  ;;  %v12630_v63 = vld [vmem:[#allocation17_spill] sm:$0xff] }
 0x55a   : > { %v10387_v31 = vsub.f32 %v12620_v50, %v2287_v26  ;;  %v12625_v17 = vmax.f32 %v12609_v20, 0.0  ;;  %v12626_v32 = vmax.f32 %v12612_v47, 0.0  ;;  %v3449_v40 = vadd.f32 %v10195_v22, %v2425_v25  ;;  %v12627_v26 = vld [vmem:[#allocation312_spill] sm:$0xff]  ;;  %4754 = vperm.xlu0 %5778, %v4259_v35   ;;  %v12632_v25 = vld [vmem:[#allocation309_spill] sm:$0xff] }
 0x55b   : > { %v4242_v37 = vmul.f32 %v12627_v26, %v3446_v56  ;;  %v2299_v50 = vmul.f32 %v12629_v36, %v12628_v3  ;;  %v10405_v30 = vsub.s32 %v4784_v7, %v12630_v63  ;;  %v10409_v54 = vsub.s32 %v12615_v33, %v12630_v63  ;;  %v4494_v56 = vpop.permute.xlu1 %4493 }
 0x55c   : > { %v2412_v27 = vsub.f32 %v12625_v17, %v2284_v21  ;;  %v2414_v13 = vsub.f32 %v12626_v32, %v2286_v9  ;;  %v4791_v12 = vadd.s32 4294967280, %v12615_v33  ;;  %v12631_v20 = vmax.f32 %v12617_v28, 0.0  ;;  %v10425_v28 = vpop.permute.xlu0 %4520 }
 0x55d   : > { %v10415_v22 = vadd.f32 %v10178_v48, %v2410_v59  ;;  %v4245_v47 = vmul.f32 %v12632_v25, %v3449_v40  ;;  %v4798_v9 = vadd.s32 4294967272, %v12615_v33  ;;  %4703 = vperm.xlu1 %5779, %v4242_v37   ;;  %v12633_v7 = vmax.f32 %v12621_v18, 0.0  ;;  %v12635_v59 = vld [vmem:[#allocation306_spill] sm:$0xff]  ;;  %v12637_v37 = vld [vmem:[#allocation93_spill] sm:$0xff] }
 0x55e   : > { %v2438_v21 = vsub.f32 %v12631_v20, %v2310_v23  ;;  %v12634_v17 = vmax.f32 %v12623_v46, 0.0  ;;  %v4975_v26 = vrot.slane %v10292_v41, %v10405_v30  ;;  %v4971_v48 = vrot.slane %v4494_v56, %v10409_v54 }
 0x55f   : > { %v2424_v35 = vsub.f32 %v12633_v7, %v2296_v10  ;;  %v4228_v23 = vmul.f32 %v12635_v59, %v3432_v39  ;;  %v3436_v40 = vadd.f32 %v10184_v62, %v2412_v27  ;;  %v10431_v36 = vadd.f32 %v10198_v0, %v2414_v13  ;;  %4712 = vperm.xlu0 %5778, %v4245_v47   ;;  %v4500_v13 = vpop.permute.xlu1 %4499  ;;  %v12640_v47 = vld [vmem:[#allocation130_spill] sm:$0xff] }
 0x560   : > { %v2441_v32 = vsub.f32 %v12634_v17, %v2313_v29  ;;  %v12636_v18 = vmax.f32 %v12628_v3, 0.0  ;;  %v10438_v46 = vsub.s32 %v4791_v12, %v12630_v63  ;;  %v4805_v41 = vadd.s32 4294967264, %v12615_v33  ;;  %v12638_v3 = vld [vmem:[#allocation282_spill] sm:$0xff]  ;;  %v10452_v25 = vpop.permute.xlu0 %4526 }
 0x561   : > { %v4976_v29 = vsel %vm4789_vm12, %v4975_v26, %v4971_v48  ;;  %v4231_v39 = vmul.f32 %v12637_v37, %v3435_v34  ;;  %v3462_v62 = vadd.f32 %v10288_v58, %v2438_v21  ;;  %v10445_v0 = vsub.s32 %v4798_v9, %v12630_v63  ;;  %4661 = vperm.xlu1 %5779, %v4228_v23   ;;  %v12639_v58 = vld [vmem:[#allocation287_spill] sm:$0xff] }
 0x562   : > { %v10435_v10 = vsub.f32 %v12636_v18, %v2299_v50  ;;  %v4812_v27 = vadd.s32 4294967256, %v12615_v33  ;;  %v2312_v50 = vmul.f32 %v12638_v3, %v12399_v1  ;;  %v3448_v12 = vadd.f32 %v10230_v44, %v2424_v35  ;;  %v12641_v35 = vld [vmem:[#allocation128_spill] sm:$0xff]  ;;  %v12643_v23 = vld [vmem:[#allocation227_spill] sm:$0xff] }
 0x563   : > { %v3465_v20 = vadd.f32 %v10258_v14, %v2441_v32  ;;  %v4980_v34 = vrot.slane %v4500_v13, %v10438_v46  ;;  %v2314_v21 = vmul.f32 %v12639_v58, %v12412_v6  ;;  %v4258_v9 = vmul.f32 %v12640_v47, %v3462_v62  ;;  %4670 = vperm.xlu0 %5778, %v4231_v39   ;;  %v4506_v48 = vpop.permute.xlu1 %4505  ;;  %v12645_v37 = vld [vmem:[#allocation243_spill] sm:$0xff] }
 0x564   : > { %v4985_v56 = vrot.slane %v10324_v60, %v10445_v0  ;;  %v10461_v7 = vsub.s32 %v4805_v41, %v12630_v63  ;;  %v4819_v44 = vadd.s32 4294967248, %v12615_v33  ;;  %v10467_v32 = vsub.s32 %v4812_v27, %v12630_v63  ;;  %v12642_v60 = vld [vmem:[#allocation106_spill] sm:$0xff]  ;;  %v12644_v41 = vld [vmem:[#allocation105_spill] sm:$0xff]  ;;  %v10479_v13 = vpop.permute.xlu0 %4532 }
 0x565   : > { %v4981_v14 = vsel %vm4796_vm13, %v4980_v34, %v4976_v29  ;;  %v4261_v17 = vmul.f32 %v12641_v35, %v3465_v20  ;;  %v4826_v26 = vadd.s32 4294967240, %v12615_v33  ;;  %4751 = vperm.xlu1 %5779, %v4258_v9   ;;  %v10473_v18 = vmul.f32 %v12643_v23, %v12642_v60  ;;  %v12648_v34 = vld [vmem:[#allocation98_spill] sm:$0xff] }
 0x566   : > { %v4986_v59 = vsel %vm4803_vm14, %v4985_v56, %v4981_v14  ;;  %v2298_v39 = vmul.f32 %v12645_v37, %v12644_v41  ;;  %v12646_v29 = vmax.f32 %v12399_v1, 0.0  ;;  %v4990_v27 = vrot.slane %v4506_v48, %v10461_v7  ;;  %v12649_v56 = vld [vmem:[#allocation294_spill] sm:$0xff] }
 0x567   : > { %v12647_v3 = vmax.f32 %v12412_v6, 0.0  ;;  %v4244_v58 = vmul.f32 %v12648_v34, %v3448_v12  ;;  %v4995_v47 = vrot.slane %v10361_v43, %v10467_v32  ;;  %4760 = vperm.xlu0 %5778, %v4261_v17   ;;  %v10488_v9 = vsub.s32 %v4819_v44, %v12630_v63  ;;  %v12651_v44 = vld [vmem:[#allocation119_spill] sm:$0xff]  ;;  %v12652_v48 = vld [vmem:[#allocation262_spill] sm:$0xff] }
 0x568   : > { %v2440_v62 = vsub.f32 %v12646_v29, %v2312_v50  ;;  %v4833_v1 = vadd.s32 4294967232, %v12615_v33  ;;  %v4991_v50 = vsel %vm4810_vm15, %v4990_v27, %v4986_v59  ;;  %v4232_v14 = vmul.f32 %v12649_v56, %v3436_v40  ;;  %v10503_v59 = vpop.permute.xlu0 %4538 }
 0x569   : > { %v2442_v20 = vsub.f32 %v12647_v3, %v2314_v21  ;;  %v10494_v6 = vsub.s32 %v4826_v26, %v12630_v63  ;;  %v4840_v12 = vadd.s32 4294967224, %v12615_v33  ;;  %v4512_v21 = vpop.permute.xlu1 %4511  ;;  %v4996_v35 = vsel %vm4817_vm0, %v4995_v47, %v4991_v50  ;;  %4709 = vperm.xlu1 %5779, %v4244_v58   ;;  %v12653_v26 = vld [vmem:[#allocation241_spill] sm:$0xff]  ;;  %v12656_v47 = vld [vmem:[#allocation231_spill] sm:$0xff] }
 0x56a   : > { %v12650_v43 = vmax.f32 %v12644_v41, 0.0  ;;  %v2315_v23 = vmul.f32 %v12652_v48, %v12651_v44  ;;  %v3464_v37 = vadd.f32 %v10290_v45, %v2440_v62  ;;  %v5000_v40 = vrot.slane %v4512_v21, %v10488_v9  ;;  %v12654_v62 = vld [vmem:[#allocation133_spill] sm:$0xff] }
 0x56b   : > { %v4230_v29 = vmul.f32 %v12653_v26, %v10415_v22  ;;  %v3466_v27 = vadd.f32 %v10320_v42, %v2442_v20  ;;  %v5005_v3 = vrot.slane %v10394_v38, %v10494_v6  ;;  %4673 = vperm.xlu0 %5778, %v4232_v14   ;;  %v10512_v41 = vsub.s32 %v4833_v1, %v12630_v63  ;;  %v12655_v38 = vld [vmem:[#allocation277_spill] sm:$0xff] }
 0x56c   : > { %v2426_v17 = vsub.f32 %v12650_v43, %v2298_v39  ;;  %v4847_v45 = vadd.s32 4294967216, %v12615_v33  ;;  %v5001_v39 = vsel %vm4824_vm1, %v5000_v40, %v4996_v35  ;;  %v10518_v58 = vsub.s32 %v4840_v12, %v12630_v63  ;;  %v10529_v14 = vpop.permute.xlu0 %4544  ;;  %v12658_v43 = vld [vmem:[#allocation327_spill] sm:$0xff] }
 0x56d   : > { %v4262_v34 = vmul.f32 %v12654_v62, %v3466_v27  ;;  %v4854_v42 = vadd.s32 4294967208, %v12615_v33  ;;  %v4518_v22 = vpop.permute.xlu1 %4517  ;;  %v5006_v20 = vsel %vm4831_vm2, %v5005_v3, %v5001_v39  ;;  %4667 = vperm.xlu1 %5779, %v4230_v29   ;;  %v2303_v50 = vmul.f32 %v12656_v47, %v12655_v38  ;;  %v12660_v29 = vld [vmem:[#allocation83_spill] sm:$0xff]  ;;  %v12661_v27 = vld [vmem:[#allocation250_spill] sm:$0xff]  ;;  %v12663_v39 = vld [vmem:[#allocation257_spill] sm:$0xff] }
 0x56e   : > { %v10526_v1 = vadd.f32 %v10201_v5, %v10435_v10  ;;  %v3450_v56 = vadd.f32 %v10242_v52, %v2426_v17  ;;  %v5010_v12 = vrot.slane %v4518_v22, %v10512_v41  ;;  %v12657_v21 = vmax.f32 %v12651_v44, 0.0  ;;  %v12659_v17 = vld [vmem:[#allocation303_spill] sm:$0xff] }
 0x56f   : > { %v4260_v48 = vmul.f32 %v12658_v43, %v3464_v37  ;;  %v5015_v40 = vrot.slane %v10425_v28, %v10518_v58  ;;  %4763 = vperm.xlu0 %5778, %v4262_v34   ;;  %v10538_v5 = vsub.s32 %v4847_v45, %v12630_v63  ;;  %v4861_v52 = vadd.s32 4294967200, %v12615_v33  ;;  %v12662_v45 = vld [vmem:[#allocation111_spill] sm:$0xff]  ;;  %v12664_v34 = vld [vmem:[#allocation289_spill] sm:$0xff] }
 0x570   : > { %v2443_v35 = vsub.f32 %v12657_v21, %v2315_v23  ;;  %v5011_v10 = vsel %vm4838_vm4, %v5010_v12, %v5006_v20  ;;  %v4233_v26 = vmul.f32 %v12659_v17, %v10374_v15  ;;  %v10545_v44 = vsub.s32 %v4854_v42, %v12630_v63  ;;  %v10555_v20 = vpop.permute.xlu0 %4550  ;;  %v12665_v42 = vld [vmem:[#allocation126_spill] sm:$0xff] }
 0x571   : > { %v4868_v23 = vadd.s32 4294967192, %v12615_v33  ;;  %v4524_v37 = vpop.permute.xlu1 %4523  ;;  %v5016_v28 = vsel %vm4845_vm5, %v5015_v40, %v5011_v10  ;;  %4757 = vperm.xlu1 %5779, %v4260_v48   ;;  %v2300_v3 = vmul.f32 %v12661_v27, %v12660_v29  ;;  %v2302_v62 = vmul.f32 %v12663_v39, %v12662_v45  ;;  %v12666_v10 = vld [vmem:[#allocation100_spill] sm:$0xff] }
 0x572   : > { %v2316_v22 = vmul.f32 %v12664_v34, %v9334_v61  ;;  %v5020_v15 = vrot.slane %v4524_v37, %v10538_v5  ;;  %v4246_v47 = vmul.f32 %v12665_v42, %v3450_v56  ;;  %v3467_v12 = vadd.f32 %v10274_v24, %v2443_v35 }
 0x573   : > { %v5025_v21 = vrot.slane %v10452_v25, %v10545_v44  ;;  %4676 = vperm.xlu0 %5778, %v4233_v26   ;;  %v10563_v43 = vsub.s32 %v4861_v52, %v12630_v63  ;;  %v4875_v48 = vadd.s32 4294967184, %v12615_v33  ;;  %v10569_v37 = vsub.s32 %v4868_v23, %v12630_v63 }
 0x574   : > { %v5021_v40 = vsel %vm4852_vm6, %v5020_v15, %v5016_v28  ;;  %v4263_v17 = vmul.f32 %v12666_v10, %v3467_v12  ;;  %v4882_v24 = vadd.s32 4294967176, %v12615_v33  ;;  %v12667_v25 = vmax.f32 %v12642_v60, 0.0  ;;  %v10582_v34 = vpop.permute.xlu0 %4556 }
 0x575   : > { %v4530_v56 = vpop.permute.xlu1 %4529  ;;  %v5026_v35 = vsel %vm11288_vm7, %v5025_v21, %v5021_v40  ;;  %4715 = vperm.xlu1 %5779, %v4246_v47   ;;  %v12668_v26 = vmax.f32 %v12655_v38, 0.0  ;;  %v12669_v28 = vmax.f32 %v9334_v61, 0.0  ;;  %v12670_v15 = vmax.f32 %v12660_v29, 0.0  ;;  %v12671_v47 = vld [vmem:[#allocation112_spill] sm:$0xff]  ;;  %v12673_v29 = vld [vmem:[#allocation125_spill] sm:$0xff] }
 0x576   : > { %v10576_v52 = vsub.f32 %v12667_v25, %v10473_v18  ;;  %v5030_v23 = vrot.slane %v4530_v56, %v10563_v43  ;;  %v4217_v12 = vmul.f32 %v12671_v47, %v10341_v2  ;;  %v5035_v60 = vrot.slane %v10479_v13, %v10569_v37  ;;  %v12674_v40 = vld [vmem:[#allocation124_spill] sm:$0xff]  ;;  %v12678_v25 = vld [vmem:[#allocation249_spill] sm:$0xff] }
 0x577   : > { %v2431_v27 = vsub.f32 %v12668_v26, %v2303_v50  ;;  %v2444_v39 = vsub.f32 %v12669_v28, %v2316_v22  ;;  %v2428_v42 = vsub.f32 %v12670_v15, %v2300_v3  ;;  %4766 = vperm.xlu0 %5778, %v4263_v17   ;;  %v12672_v18 = vmax.f32 %v12662_v45, 0.0  ;;  %v12675_v17 = vld [vmem:[#allocation337_spill] sm:$0xff]  ;;  %v12676_v56 = vld [vmem:[#allocation120_spill] sm:$0xff] }
 0x578   : > { %v10594_v61 = vsub.s32 %v4875_v48, %v12630_v63  ;;  %v5031_v50 = vsel %vm11289_vm8, %v5030_v23, %v5026_v35  ;;  %v4234_v3 = vmul.f32 %v12673_v29, %v10431_v36  ;;  %v10600_v22 = vsub.s32 %v4882_v24, %v12630_v63  ;;  %v10608_v48 = vpop.permute.xlu0 %4562  ;;  %v12677_v35 = vld [vmem:[#allocation272_spill] sm:$0xff] }
 0x579   : > { %v2430_v38 = vsub.f32 %v12672_v18, %v2302_v62  ;;  %v4892_v2 = vrot.slane %v10160_v4, %v10409_v54  ;;  %v4536_v13 = vpop.permute.xlu1 %4535  ;;  %v5036_v21 = vsel %vm4873_vm9, %v5035_v60, %v5031_v50  ;;  %4628 = vperm.xlu1 %5779, %v4217_v12   ;;  %v3468_v45 = vadd.f32 %v10322_v53, %v2444_v39  ;;  %v12681_v60 = vld [vmem:[#allocation138_spill] sm:$0xff] }
 0x57a   : > { %v4901_v62 = vrot.slane %v10192_v19, %v10438_v46  ;;  %v5040_v36 = vrot.slane %v4536_v13, %v10594_v61  ;;  %v4247_v10 = vmul.f32 %v12674_v40, %v10526_v1  ;;  %v4783_v4 = vrot.slane %v9939_v57, %v10409_v54  ;;  %v12679_v1 = vld [vmem:[#allocation242_spill] sm:$0xff]  ;;  %v12680_v57 = vld [vmem:[#allocation265_spill] sm:$0xff]  ;;  %v12682_v13 = vld [vmem:[#allocation332_spill] sm:$0xff] }
 0x57b   : > { %v4896_v24 = vrot.slane %v12675_v17, %v10405_v30  ;;  %v5045_v53 = vrot.slane %v10503_v59, %v10600_v22  ;;  %4679 = vperm.xlu0 %5778, %v4234_v3   ;;  %v2319_v19 = vmul.f32 %v12677_v35, %v12676_v56  ;;  %v4795_v26 = vrot.slane %v12678_v25, %v10438_v46  ;;  %v12684_v40 = vld [vmem:[#allocation137_spill] sm:$0xff]  ;;  %v12687_v25 = vld [vmem:[#allocation263_spill] sm:$0xff] }
 0x57c   : > { %v5041_v28 = vsel %vm4880_vm10, %v5040_v36, %v5036_v21  ;;  %v4788_v39 = vrot.slane %v12679_v1, %v10405_v30  ;;  %v4264_v23 = vmul.f32 %v12680_v57, %v3468_v45  ;;  %v4911_v18 = vrot.slane %v12681_v60, %v10461_v7  ;;  %v10636_v29 = vpop.permute.xlu0 %4568  ;;  %v12683_v21 = vld [vmem:[#allocation141_spill] sm:$0xff] }
 0x57d   : > { %v4897_v15 = vsel %vm4789_vm12, %v4896_v24, %v4892_v2  ;;  %v10629_v47 = vsel %vm4887_vm11, %v5045_v53, %v5041_v28  ;;  %v4542_v59 = vpop.permute.xlu1 %4541  ;;  %4718 = vperm.xlu1 %5779, %v4247_v10   ;;  %v5054_v50 = vrot.slane %v10529_v14, %v10405_v30  ;;  %v4218_v2 = vmul.f32 %v12682_v13, %v10370_v49  ;;  %v12685_v10 = vld [vmem:[#allocation281_spill] sm:$0xff]  ;;  %v12688_v49 = vld [vmem:[#allocation322_spill] sm:$0xff] }
 0x57e   : > { %v4902_v12 = vsel %vm4796_vm13, %v4901_v62, %v4897_v15  ;;  %v5050_v3 = vrot.slane %v4542_v59, %v10409_v54  ;;  %v3454_v45 = vadd.f32 %v12683_v21, %v2430_v38  ;;  %v4790_v36 = vsel %vm4789_vm12, %v4788_v39, %v4783_v4  ;;  %v12686_v14 = vld [vmem:[#allocation329_spill] sm:$0xff] }
 0x57f   : > { %v4906_v62 = vrot.slane %v12684_v40, %v10445_v0  ;;  %4769 = vperm.xlu0 %5778, %v4264_v23   ;;  %v3455_v17 = vadd.f32 %v12685_v10, %v2431_v27  ;;  %v4797_v24 = vsel %vm4796_vm13, %v4795_v26, %v4790_v36  ;;  %v4809_v53 = vrot.slane %v12686_v14, %v10461_v7  ;;  %v12689_v38 = vld [vmem:[#allocation325_spill] sm:$0xff] }
 0x580   : > { %v5055_v35 = vsel %vm4789_vm12, %v5054_v50, %v5050_v3  ;;  %v3452_v28 = vadd.f32 %v12687_v25, %v2428_v42  ;;  %v4250_v1 = vmul.f32 %v12688_v49, %v3454_v45  ;;  %v4802_v4 = vrot.slane %v12689_v38, %v10445_v0  ;;  %v12691_v15 = vld [vmem:[#allocation57_spill] sm:$0xff]  ;;  %v10660_v60 = vpop.permute.xlu0 %4574  ;;  %v12692_v50 = vld [vmem:[#allocation232_spill] sm:$0xff]  ;;  %v12695_v45 = vld [vmem:[#allocation347_spill] sm:$0xff] }
 0x581   : > { %v4907_v39 = vsel %vm4803_vm14, %v4906_v62, %v4902_v12  ;;  %v4548_v57 = vpop.permute.xlu1 %4547  ;;  %4631 = vperm.xlu1 %5779, %v4218_v2   ;;  %v12690_v27 = vmax.f32 %v12676_v56, 0.0  ;;  %v4921_v59 = vrot.slane %v12691_v15, %v10488_v9  ;;  %v12693_v12 = vld [vmem:[#allocation275_spill] sm:$0xff]  ;;  %v5064_v56 = vrot.slane %v10555_v20, %v10445_v0  ;;  %v12698_v49 = vld [vmem:[#allocation285_spill] sm:$0xff]  ;;  %v12702_v15 = vld [vmem:[#allocation304_spill] sm:$0xff] }
 0x582   : > { %v4912_v26 = vsel %vm4810_vm15, %v4911_v18, %v4907_v39  ;;  %v5059_v42 = vrot.slane %v4548_v57, %v10438_v46  ;;  %v4248_v3 = vmul.f32 %v12692_v50, %v3452_v28  ;;  %v4804_v13 = vsel %vm4803_vm14, %v4802_v4, %v4797_v24  ;;  %v12696_v62 = vld [vmem:[#allocation127_spill] sm:$0xff]  ;;  %v12697_v24 = vld [vmem:[#allocation132_spill] sm:$0xff] }
 0x583   : > { %v2447_v23 = vsub.f32 %v12690_v27, %v2319_v19  ;;  %v4916_v21 = vrot.slane %v12693_v12, %v10467_v32  ;;  %4727 = vperm.xlu0 %5778, %v4250_v1   ;;  %v12694_v19 = vld [vmem:[#allocation56_spill] sm:$0xff]  ;;  %v4811_v2 = vsel %vm4810_vm15, %v4809_v53, %v4804_v13  ;;  %v4823_v36 = vrot.slane %v12695_v45, %v10488_v9  ;;  %v12701_v27 = vld [vmem:[#allocation259_spill] sm:$0xff] }
 0x584   : > { %v3453_v18 = vadd.f32 %v12694_v19, %v10576_v52  ;;  %v5060_v40 = vsel %vm4796_vm13, %v5059_v42, %v5055_v35  ;;  %v4251_v10 = vmul.f32 %v12696_v62, %v3455_v17  ;;  %v4816_v14 = vrot.slane %v12697_v24, %v10467_v32  ;;  %v12699_v1 = vld [vmem:[#allocation140_spill] sm:$0xff]  ;;  %v10684_v4 = vpop.permute.xlu0 %4580  ;;  %v12700_v35 = vld [vmem:[#allocation113_spill] sm:$0xff] }
 0x585   : > { %v4917_v25 = vsel %vm4817_vm0, %v4916_v21, %v4912_v26  ;;  %v4554_v28 = vpop.permute.xlu1 %4553  ;;  %v5065_v20 = vsel %vm4803_vm14, %v5064_v56, %v5060_v40  ;;  %4721 = vperm.xlu1 %5779, %v4248_v3   ;;  %v3471_v52 = vadd.f32 %v12698_v49, %v2447_v23  ;;  %v4931_v38 = vrot.slane %v12699_v1, %v10512_v41  ;;  %v12704_v3 = vld [vmem:[#allocation134_spill] sm:$0xff]  ;;  %v12706_v56 = vld [vmem:[#allocation331_spill] sm:$0xff] }
 0x586   : > { %v4922_v53 = vsel %vm4824_vm1, %v4921_v59, %v4917_v25  ;;  %v5069_v17 = vrot.slane %v4554_v28, %v10461_v7  ;;  %v4219_v39 = vmul.f32 %v12700_v35, %v10359_v11  ;;  %v4818_v57 = vsel %vm4817_vm0, %v4816_v14, %v4811_v2  ;;  %v12703_v59 = vld [vmem:[#allocation267_spill] sm:$0xff]  ;;  %v12705_v11 = vld [vmem:[#allocation318_spill] sm:$0xff]  ;;  %v12709_v28 = vld [vmem:[#allocation97_spill] sm:$0xff] }
 0x587   : > { %v4926_v26 = vrot.slane %v12701_v27, %v10494_v6  ;;  %v5074_v23 = vrot.slane %v10582_v34, %v10467_v32  ;;  %4730 = vperm.xlu0 %5778, %v4251_v10   ;;  %v2317_v42 = vmul.f32 %v12703_v59, %v12702_v15  ;;  %v4825_v50 = vsel %vm4824_vm1, %v4823_v36, %v4818_v57  ;;  %v12707_v40 = vld [vmem:[#allocation343_spill] sm:$0xff]  ;;  %v12712_v35 = vld [vmem:[#allocation254_spill] sm:$0xff]  ;;  %v12714_v27 = vld [vmem:[#allocation292_spill] sm:$0xff] }
 0x588   : > { %v4837_v13 = vrot.slane %v12704_v3, %v10512_v41  ;;  %v5070_v12 = vsel %vm4810_vm15, %v5069_v17, %v5065_v20  ;;  %v4267_v21 = vmul.f32 %v12705_v11, %v3471_v52  ;;  %v4830_v19 = vrot.slane %v12706_v56, %v10494_v6  ;;  %v12708_v10 = vld [vmem:[#allocation55_spill] sm:$0xff]  ;;  %v10710_v14 = vpop.permute.xlu0 %4586 }
 0x589   : > { %v4927_v2 = vsel %vm4831_vm2, %v4926_v26, %v4922_v53  ;;  %v4560_v45 = vpop.permute.xlu1 %4559  ;;  %v5075_v34 = vsel %vm4817_vm0, %v5074_v23, %v5070_v12  ;;  %4634 = vperm.xlu1 %5779, %v4219_v39   ;;  %v3439_v62 = vadd.f32 %v12707_v40, %v10387_v31  ;;  %v4941_v24 = vrot.slane %v12708_v10, %v10538_v5  ;;  %v12710_v52 = vld [vmem:[#allocation139_spill] sm:$0xff] }
 0x58a   : > { %v4932_v36 = vsel %vm4838_vm4, %v4931_v38, %v4927_v2  ;;  %v5079_v25 = vrot.slane %v4560_v45, %v10488_v9  ;;  %v4249_v20 = vmul.f32 %v12709_v28, %v3453_v18  ;;  %v4832_v49 = vsel %vm4831_vm2, %v4830_v19, %v4825_v50  ;;  %v12713_v18 = vld [vmem:[#allocation94_spill] sm:$0xff]  ;;  %v12715_v23 = vld [vmem:[#allocation103_spill] sm:$0xff] }
 0x58b   : > { %v4936_v53 = vrot.slane %v12710_v52, %v10518_v58  ;;  %v5084_v1 = vrot.slane %v10608_v48, %v10494_v6  ;;  %4778 = vperm.xlu0 %5778, %v4267_v21   ;;  %v12711_v31 = vmax.f32 %v12702_v15, 0.0  ;;  %v4839_v17 = vsel %vm4838_vm4, %v4837_v13, %v4832_v49  ;;  %v12716_v21 = vld [vmem:[#allocation291_spill] sm:$0xff] }
 0x58c   : > { %v4851_v39 = vrot.slane %v12712_v35, %v10538_v5  ;;  %v5080_v57 = vsel %vm4824_vm1, %v5079_v25, %v5075_v34  ;;  %v2318_v26 = vmul.f32 %v12714_v27, %v12713_v18  ;;  %v4844_v59 = vrot.slane %v12715_v23, %v10518_v58  ;;  %v10735_v12 = vpop.permute.xlu0 %4592  ;;  %v12717_v2 = vld [vmem:[#allocation339_spill] sm:$0xff] }
 0x58d   : > { %v2445_v38 = vsub.f32 %v12711_v31, %v2317_v42  ;;  %v4937_v50 = vsel %vm4845_vm5, %v4936_v53, %v4932_v36  ;;  %v4566_v48 = vpop.permute.xlu1 %4565  ;;  %v5085_v3 = vsel %vm4831_vm2, %v5084_v1, %v5080_v57  ;;  %4724 = vperm.xlu1 %5779, %v4249_v20   ;;  %v3339_v15 = vmul.f32 0.6931472, %v10332_v8  ;;  %v12718_v36 = vld [vmem:[#allocation333_spill] sm:$0xff]  ;;  %v12722_v57 = vld [vmem:[#allocation348_spill] sm:$0xff] }
 0x58e   : > { %v4942_v42 = vsel %vm4852_vm6, %v4941_v24, %v4937_v50  ;;  %v4951_v13 = vrot.slane %v10348_v51, %v10563_v43  ;;  %v5089_v11 = vrot.slane %v4566_v48, %v10512_v41  ;;  %v4235_v56 = vmul.f32 %v12716_v21, %v3439_v62  ;;  %v12720_v62 = vld [vmem:[#allocation135_spill] sm:$0xff]  ;;  %v12724_v50 = vld [vmem:[#allocation101_spill] sm:$0xff] }
 0x58f   : > { %v4846_v19 = vsel %vm4845_vm5, %v4844_v59, %v4839_v17  ;;  %v4946_v45 = vrot.slane %v12717_v2, %v10545_v44  ;;  %v5094_v34 = vrot.slane %v10636_v29, %v10518_v58  ;;  %v3469_v8 = vadd.f32 %v3339_v15, %v2445_v38  ;;  %v12721_v17 = vld [vmem:[#allocation321_spill] sm:$0xff]  ;;  %v12726_v2 = vld [vmem:[#allocation346_spill] sm:$0xff] }
 0x590   : > { %v4853_v40 = vsel %vm4852_vm6, %v4851_v39, %v4846_v19  ;;  %v4865_v51 = vrot.slane %v12718_v36, %v10563_v43  ;;  %v5090_v10 = vsel %vm4838_vm4, %v5089_v11, %v5085_v3  ;;  %v12719_v24 = vmax.f32 %v12713_v18, 0.0  ;;  %v4599_v31 = vpop.permute.xlu0 %4598  ;;  %v12725_v21 = vld [vmem:[#allocation345_spill] sm:$0xff]  ;;  %v12727_v36 = vld [vmem:[#allocation270_spill] sm:$0xff] }
 0x591   : > { %v4858_v28 = vrot.slane %v12720_v62, %v10545_v44  ;;  %v4947_v20 = vsel %vm11288_vm7, %v4946_v45, %v4942_v42  ;;  %v4572_v49 = vpop.permute.xlu1 %4571  ;;  %v5095_v52 = vsel %vm4845_vm5, %v5094_v34, %v5090_v10  ;;  %4682 = vperm.xlu1 %5779, %v4235_v56   ;;  %v3341_v29 = vmul.f32 0.6931472, %v10350_v16 }
 0x592   : > { %v2446_v25 = vsub.f32 %v12719_v24, %v2318_v26  ;;  %v4952_v53 = vsel %vm11289_vm8, %v4951_v13, %v4947_v20  ;;  %v4961_v1 = vrot.slane %v10383_v55, %v10594_v61  ;;  %v5099_v38 = vrot.slane %v4572_v49, %v10538_v5  ;;  %v12723_v26 = vld [vmem:[#allocation136_spill] sm:$0xff] }
 0x593   : > { %v4265_v35 = vmul.f32 %v12721_v17, %v3469_v8  ;;  %v4860_v39 = vsel %vm11288_vm7, %v4858_v28, %v4853_v40  ;;  %v4956_v18 = vrot.slane %v12722_v57, %v10569_v37  ;;  %v5104_v27 = vrot.slane %v10660_v60, %v10545_v44 }
 0x594   : > { %v4867_v16 = vsel %vm11289_vm8, %v4865_v51, %v4860_v39  ;;  %v4879_v23 = vrot.slane %v12723_v26, %v10594_v61  ;;  %v5100_v55 = vsel %vm4852_vm6, %v5099_v38, %v5095_v52  ;;  %v3470_v59 = vadd.f32 %v3341_v29, %v2446_v25  ;;  %v4605_v60 = vpop.permute.xlu0 %4604 }
 0x595   : > { %v4872_v48 = vrot.slane %v12724_v50, %v10569_v37  ;;  %v4957_v3 = vsel %vm4873_vm9, %v4956_v18, %v4952_v53  ;;  %v4578_v15 = vpop.permute.xlu1 %4577  ;;  %v5105_v42 = vsel %vm11288_vm7, %v5104_v27, %v5100_v55  ;;  %4772 = vperm.xlu1 %5779, %v4265_v35   ;;  %v4966_v45 = vrot.slane %v12726_v2, %v10600_v22 }
 0x596   : > { %v4962_v13 = vsel %vm4880_vm10, %v4961_v1, %v4957_v3  ;;  %v5109_v11 = vrot.slane %v4578_v15, %v10563_v43  ;;  %v4266_v56 = vmul.f32 %v12725_v21, %v3470_v59  ;;  %v5114_v34 = vrot.slane %v10684_v4, %v10569_v37  ;;  %v12728_v15 = vld [vmem:[#allocation163_spill] sm:$0xff] }
 0x597   : > { %v4874_v19 = vsel %vm4873_vm9, %v4872_v48, %v4867_v16  ;;  %v4886_v51 = vrot.slane %v12727_v36, %v10600_v22  ;;  %v4967_v10 = vsel %vm4887_vm11, %v4966_v45, %v4962_v13  ;;  %vm5444_vm7 = vcmask 1042434  }
 0x598   : > { %v4881_v8 = vsel %vm4880_vm10, %v4879_v23, %v4874_v19  ;;  %v5110_v40 = vsel %vm11289_vm8, %v5109_v11, %v5105_v42  ;;  %v4611_v62 = vpop.permute.xlu0 %4610  ;;  %v5124_v20 = vrot.slane %v10710_v14, %v10600_v22  ;;  %vm5446_vm8 = vcmask 1043459  }
 0x599   : > { %v4584_v24 = vpop.permute.xlu1 %4583  ;;  %v5115_v25 = vsel %vm4873_vm9, %v5114_v34, %v5110_v40  ;;  %4775 = vperm.xlu1 %5779, %v4266_v56   ;;  %v4888_v4 = vsel %vm4887_vm11, %v4886_v51, %v4881_v8  ;;  %v5133_v38 = vrot.slane %v10735_v12, %v10405_v30  ;;  %v5143_v16 = vrot.slane %v4599_v31, %v10445_v0 }
 0x59a   : > { %v5119_v28 = vrot.slane %v4584_v24, %v10594_v61  ;;  %v5443_v49 = vsel %vm5442_vm3, %v4967_v10, %v4888_v4  ;;  %v5153_v59 = vrot.slane %v4605_v60, %v10467_v32  ;;  %v5163_v13 = vrot.slane %v4611_v62, %v10494_v6 }
 0x59b   : > { %v5445_v29 = vsel %vm5444_vm7, %v10629_v47, %v5443_v49  ;;  %vm12729_vm3 = vcmask 786112   ;;  %vm12730_vm7 = vcmask 851712  }
 0x59c   : > { %v5120_v52 = vsel %vm4880_vm10, %v5119_v28, %v5115_v25  ;;  %v4617_v17 = vpop.permute.xlu0 %4616 }
 0x59d   : > { %v5125_v53 = vsel %vm4887_vm11, %v5124_v20, %v5120_v52  ;;  %v4590_v1 = vpop.permute.xlu1 %4589  ;;  %v5173_v2 = vrot.slane %v4617_v17, %v10518_v58 }
 0x59e   : > { %v5129_v35 = vrot.slane %v4590_v1, %v10409_v54  ;;  %v10797_v39 = vsel %vm5446_vm8, %v5125_v53, %v5445_v29  ;;  %vm5454_vm8 = vcmask 1047559  }
 0x5a0   : > { %v5134_v57 = vsel %vm4789_vm12, %v5133_v38, %v5129_v35  ;;  %v4623_v18 = vpop.permute.xlu0 %4622 }
 0x5a1   : > { %v4596_v14 = vpop.permute.xlu1 %4595  ;;  %v5183_v51 = vrot.slane %v4623_v18, %v10545_v44 }
 0x5a2   : > { %v5138_v27 = vrot.slane %v4596_v14, %v10438_v46 }
 0x5a4   : > { %v5139_v47 = vsel %vm4796_vm13, %v5138_v27, %v5134_v57  ;;  %v4638_v55 = vpop.permute.xlu0 %4637 }
 0x5a5   : > { %v4602_v26 = vpop.permute.xlu1 %4601  ;;  %v5144_v23 = vsel %vm4803_vm14, %v5143_v16, %v5139_v47  ;;  %v5208_v49 = vrot.slane %v4638_v55, %v10409_v54 }
 0x5a6   : > { %v5148_v12 = vrot.slane %v4602_v26, %v10461_v7 }
 0x5a8   : > { %v5149_v50 = vsel %vm4810_vm15, %v5148_v12, %v5144_v23  ;;  %v4644_v42 = vpop.permute.xlu0 %4643 }
 0x5a9   : > { %v4608_v48 = vpop.permute.xlu1 %4607  ;;  %v5154_v3 = vsel %vm4817_vm0, %v5153_v59, %v5149_v50  ;;  %v5217_v53 = vrot.slane %v4644_v42, %v10438_v46 }
 0x5aa   : > { %5466 = vadd.xlane.f32.xlu0 %v12728_v15  ;;  %v5158_v31 = vrot.slane %v4608_v48, %v10488_v9 }
 0x5ac   : > { %v5159_v11 = vsel %vm4824_vm1, %v5158_v31, %v5154_v3  ;;  %v4689_v19 = vpop.permute.xlu0 %4688 }
 0x5ad   : > { %v4614_v21 = vpop.permute.xlu1 %4613  ;;  %v5164_v56 = vsel %vm4831_vm2, %v5163_v13, %v5159_v11  ;;  %v5291_v35 = vrot.slane %v4689_v19, %v10405_v30 }
 0x5ae   : > { %v5168_v60 = vrot.slane %v4614_v21, %v10512_v41 }
 0x5b0   : > { %v5169_v45 = vsel %vm4838_vm4, %v5168_v60, %v5164_v56  ;;  %v4692_v40 = vpop.permute.xlu0 %4691 }
 0x5b1   : > { %v4620_v34 = vpop.permute.xlu1 %4619  ;;  %v5174_v8 = vsel %vm4845_vm5, %v5173_v2, %v5169_v45  ;;  %v5296_v18 = vrot.slane %v4692_v40, %v10438_v46 }
 0x5b2   : > { %v5178_v36 = vrot.slane %v4620_v34, %v10538_v5 }
 0x5b4   : > { %v5179_v10 = vsel %vm4852_vm6, %v5178_v36, %v5174_v8  ;;  %v4737_v62 = vpop.permute.xlu0 %4736 }
 0x5b5   : > { %v4626_v24 = vpop.permute.xlu1 %4625  ;;  %v5184_v25 = vsel %vm12729_vm3, %v5183_v51, %v5179_v10  ;;  %v5370_v48 = vrot.slane %v4737_v62, %v10405_v30 }
 0x5b6   : > { %v5188_v28 = vrot.slane %v4626_v24, %v10563_v43 }
 0x5b8   : > { %v10823_v4 = vsel %vm12730_vm7, %v5188_v28, %v5184_v25  ;;  %v4695_v52 = vpop.permute.xlu0 %4694 }
 0x5b9   : > { %v4641_v20 = vpop.permute.xlu1 %4640  ;;  %v5301_v27 = vrot.slane %v4695_v52, %v10445_v0 }
 0x5ba   : > { %v5212_v29 = vrot.slane %v4641_v20, %v10405_v30 }
 0x5bc   : > { %v5213_v1 = vsel %vm4789_vm12, %v5212_v29, %v5208_v49  ;;  %v4653_v57 = vpop.permute.xlu0 %4652 }
 0x5bd   : > { %v4686_v38 = vpop.permute.xlu1 %4685  ;;  %v5218_v17 = vsel %vm4796_vm13, %v5217_v53, %v5213_v1  ;;  %v5232_v21 = vrot.slane %v4653_v57, %v10467_v32 }
 0x5be   : > { %v5287_v14 = vrot.slane %v4686_v38, %v10409_v54 }
 0x5c0   : > { %v5292_v16 = vsel %vm4789_vm12, %v5291_v35, %v5287_v14  ;;  %v4743_v23 = vpop.permute.xlu0 %4742 }
 0x5c1   : > { %v5297_v47 = vsel %vm4796_vm13, %v5296_v18, %v5292_v16  ;;  %v4647_v26 = vpop.permute.xlu1 %4646  ;;  %v5380_v16 = vrot.slane %v4743_v23, %v10445_v0 }
 0x5c2   : > { %v5222_v55 = vrot.slane %v4647_v26, %v10445_v0  ;;  %v5302_v12 = vsel %vm4803_vm14, %v5301_v27, %v5297_v47 }
 0x5c4   : > { %v5223_v59 = vsel %vm4803_vm14, %v5222_v55, %v5218_v17  ;;  %v4701_v3 = vpop.permute.xlu0 %4700 }
 0x5c5   : > { %v4734_v50 = vpop.permute.xlu1 %4733 }
 0x5c6   : > { %v5366_v15 = vrot.slane %v4734_v50, %v10409_v54 }
 0x5c8   : > { %v5371_v42 = vsel %vm4789_vm12, %v5370_v48, %v5366_v15  ;;  %v4659_v13 = vpop.permute.xlu0 %4658  ;;  %v5311_v15 = vrot.slane %v4701_v3, %v10467_v32  ;;  %vm5448_vm12 = vcmask 1044484  }
 0x5c9   : > { %v4650_v31 = vpop.permute.xlu1 %4649 }
 0x5ca   : > { %v5227_v11 = vrot.slane %v4650_v31, %v10461_v7 }
 0x5cc   : > { %v5228_v56 = vsel %vm4810_vm15, %v5227_v11, %v5223_v59  ;;  %v4749_v2 = vpop.permute.xlu0 %4748 }
 0x5cd   : > { %v4740_v19 = vpop.permute.xlu1 %4739  ;;  %v5233_v60 = vsel %vm4817_vm0, %v5232_v21, %v5228_v56 }
 0x5ce   : > { %v5375_v45 = vrot.slane %v4740_v19, %v10438_v46 }
 0x5d0   : > { %v5376_v30 = vsel %vm4796_vm13, %v5375_v45, %v5371_v42  ;;  %v4707_v54 = vpop.permute.xlu0 %4706  ;;  %v5242_v42 = vrot.slane %v4659_v13, %v10494_v6  ;;  %v5390_v13 = vrot.slane %v4749_v2, %v10467_v32  ;;  %vm12731_vm13 = vmmov %vm12729_vm3 }
 0x5d1   : > { %v4698_v34 = vpop.permute.xlu1 %4697  ;;  %v5381_v31 = vsel %vm4803_vm14, %v5380_v16, %v5376_v30  ;;  %vm12732_vm14 = vmmov %vm12729_vm3 }
 0x5d2   : > { %v5306_v57 = vrot.slane %v4698_v34, %v10461_v7 }
 0x5d4   : > { %v4665_v40 = vpop.permute.xlu0 %4664  ;;  %v5307_v26 = vsel %vm4810_vm15, %v5306_v57, %v5302_v12 }
 0x5d5   : > { %v4656_v8 = vpop.permute.xlu1 %4655  ;;  %v5312_v0 = vsel %vm4817_vm0, %v5311_v15, %v5307_v26  ;;  %v5252_v45 = vrot.slane %v4665_v40, %v10518_v58 }
 0x5d6   : > { %v5237_v14 = vrot.slane %v4656_v8, %v10488_v9 }
 0x5d8   : > { %v5238_v55 = vsel %vm4824_vm1, %v5237_v14, %v5233_v60  ;;  %v5321_v60 = vrot.slane %v4707_v54, %v10494_v6 }
 0x5d9   : > { %v4746_v36 = vpop.permute.xlu1 %4745  ;;  %v10848_v51 = vpop.permute.xlu0 %4754 }
 0x5da   : > { %v5385_v47 = vrot.slane %v4746_v36, %v10461_v7  ;;  %v5243_v7 = vsel %vm4831_vm2, %v5242_v42, %v5238_v55 }
 0x5dc   : > { %v5386_v11 = vsel %vm4810_vm15, %v5385_v47, %v5381_v31  ;;  %vm12733_vm15 = vmmov %vm12730_vm7 }
 0x5dd   : > { %v4704_v10 = vpop.permute.xlu1 %4703  ;;  %v5391_v36 = vsel %vm4817_vm0, %v5390_v13, %v5386_v11  ;;  %vm12734_vm0 = vmmov %vm12730_vm7 }
 0x5de   : > { %v10850_v24 = vpop.permute.xlu0 %4712  ;;  %v5316_v59 = vrot.slane %v4704_v10, %v10488_v9 }
 0x5df   : > { %v5331_v32 = vrot.slane %v10850_v24, %v10518_v58 }
 0x5e0   : > { %v5317_v12 = vsel %vm4824_vm1, %v5316_v59, %v5312_v0 }
 0x5e1   : > { %v4662_v25 = vpop.permute.xlu1 %4661  ;;  %v5322_v10 = vsel %vm4831_vm2, %v5321_v60, %v5317_v12 }
 0x5e2   : > { %v4671_v62 = vpop.permute.xlu0 %4670  ;;  %v5247_v50 = vrot.slane %v4662_v25, %v10512_v41 }
 0x5e4   : > { %v5248_v21 = vsel %vm4838_vm4, %v5247_v50, %v5243_v7 }
 0x5e5   : > { %v4752_v28 = vpop.permute.xlu1 %4751  ;;  %v5253_v25 = vsel %vm4845_vm5, %v5252_v45, %v5248_v21 }
 0x5e6   : > { %v10852_v20 = vpop.permute.xlu0 %4760  ;;  %v5395_v34 = vrot.slane %v4752_v28, %v10488_v9  ;;  %v5262_v9 = vrot.slane %v4671_v62, %v10545_v44 }
 0x5e7   : > { %v5410_v11 = vrot.slane %v10852_v20, %v10518_v58 }
 0x5e8   : > { %v5396_v14 = vsel %vm4824_vm1, %v5395_v34, %v5391_v36  ;;  %vm5450_vm1 = vcmask 1045509  }
 0x5e9   : > { %v4710_v49 = vpop.permute.xlu1 %4709 }
 0x5ea   : > { %v10854_v52 = vpop.permute.xlu0 %4673  ;;  %v5326_v56 = vrot.slane %v4710_v49, %v10512_v41 }
 0x5eb   : > { %v5267_v26 = vrot.slane %v10854_v52, %v10563_v43 }
 0x5ec   : > { %v5327_v2 = vsel %vm4838_vm4, %v5326_v56, %v5322_v10 }
 0x5ed   : > { %v4668_v46 = vpop.permute.xlu1 %4667  ;;  %v5332_v62 = vsel %vm4845_vm5, %v5331_v32, %v5327_v2 }
 0x5ee   : > { %v10856_v29 = vpop.permute.xlu0 %4763  ;;  %v5257_v3 = vrot.slane %v4668_v46, %v10538_v5 }
 0x5f0   : > { %v5258_v54 = vsel %vm4852_vm6, %v5257_v3, %v5253_v25 }
 0x5f1   : > { %v10858_v53 = vpop.permute.xlu1 %4757  ;;  %v5263_v47 = vsel %vm12731_vm13, %v5262_v9, %v5258_v54 }
 0x5f2   : > { %v10860_v1 = vpop.permute.xlu0 %4676  ;;  %v5268_v15 = vsel %vm12733_vm15, %v5267_v26, %v5263_v47 }
 0x5f5   : > { %v4716_v38 = vpop.permute.xlu1 %4715 }
 0x5f6   : > { %v10862_v17 = vpop.permute.xlu0 %4766  ;;  %v5336_v40 = vrot.slane %v4716_v38, %v10538_v5  ;;  %v5405_v38 = vrot.slane %v10858_v53, %v10512_v41 }
 0x5f7   : > { %v5420_v20 = vrot.slane %v10862_v17, %v10545_v44 }
 0x5f8   : > { %v5337_v55 = vsel %vm4852_vm6, %v5336_v40, %v5332_v62 }
 0x5f9   : > { %v4629_v35 = vpop.permute.xlu1 %4628 }
 0x5fa   : > { %v10866_v27 = vpop.permute.xlu0 %4679  ;;  %v5193_v30 = vrot.slane %v4629_v35, %v10569_v37 }
 0x5fc   : > { %v5194_v28 = vsel %vm4873_vm9, %v5193_v30, %v10823_v4 }
 0x5fd   : > { %v4719_v18 = vpop.permute.xlu1 %4718 }
 0x5fe   : > { %v10880_v23 = vpop.permute.xlu0 %4769  ;;  %v5341_v46 = vrot.slane %v4719_v18, %v10545_v44  ;;  %v5400_v18 = vrot.slane %v10848_v51, %v10494_v6  ;;  %v5277_v51 = vrot.slane %v10866_v27, %v10594_v61 }
 0x5ff   : > { %v5425_v34 = vrot.slane %v10880_v23, %v10563_v43 }
 0x600   : > { %v5342_v41 = vsel %vm12732_vm14, %v5341_v46, %v5337_v55  ;;  %v5401_v6 = vsel %vm4831_vm2, %v5400_v18, %v5396_v14  ;;  %vm5452_vm2 = vcmask 1046534  }
 0x601   : > { %v4632_v48 = vpop.permute.xlu1 %4631  ;;  %v5406_v42 = vsel %vm4838_vm4, %v5405_v38, %v5401_v6  ;;  %vm12735_vm4 = vmmov %vm12729_vm3 }
 0x602   : > { %v5198_v8 = vrot.slane %v4632_v48, %v10594_v61  ;;  %v4728_v35 = vpop.permute.xlu0 %4727  ;;  %v5272_v48 = vrot.slane %v10860_v1, %v10569_v37  ;;  %v5411_v27 = vsel %vm4845_vm5, %v5410_v11, %v5406_v42  ;;  %vm12736_vm5 = vmmov %vm12734_vm0 }
 0x604   : > { %v5199_v24 = vsel %vm4880_vm10, %v5198_v8, %v5194_v28  ;;  %v5273_v7 = vsel %vm4873_vm9, %v5272_v48, %v5268_v15 }
 0x605   : > { %v4722_v19 = vpop.permute.xlu1 %4721  ;;  %v5278_v56 = vsel %vm4880_vm10, %v5277_v51, %v5273_v7 }
 0x606   : > { %v5346_v16 = vrot.slane %v4722_v19, %v10563_v43  ;;  %v4731_v31 = vpop.permute.xlu0 %4730  ;;  %v5415_v19 = vrot.slane %v10856_v29, %v10538_v5 }
 0x607   : > { %v5361_v3 = vrot.slane %v4731_v31, %v10600_v22 }
 0x608   : > { %v5347_v52 = vsel %vm12734_vm0, %v5346_v16, %v5342_v41  ;;  %v5416_v30 = vsel %vm4852_vm6, %v5415_v19, %v5411_v27  ;;  %vm5477_vm6 = vcmp.eq.s32.totalorder %v12630_v63, 0 }
 0x609   : > { %v4635_v49 = vpop.permute.xlu1 %4634  ;;  %v5421_v5 = vsel %vm12735_vm4, %v5420_v20, %v5416_v30 }
 0x60a   : > { %v5203_v57 = vrot.slane %v4635_v49, %v10600_v22  ;;  %v4779_v10 = vpop.permute.xlu0 %4778  ;;  %v5426_v25 = vsel %vm12736_vm5, %v5425_v34, %v5421_v5 }
 0x60b   : > { %v5440_v17 = vrot.slane %v4779_v10, %v10600_v22 }
 0x60c   : > { %v5204_v4 = vsel %vm4887_vm11, %v5203_v57, %v5199_v24 }
 0x60d   : > { %v5449_v59 = vsel %vm5448_vm12, %v5204_v4, %v10797_v39  ;;  %v4725_v50 = vpop.permute.xlu1 %4724  ;;  %v5356_v39 = vrot.slane %v4728_v35, %v10594_v61 }
 0x60e   : > { %v5351_v53 = vrot.slane %v4725_v50, %v10569_v37 }
 0x610   : > { %v5352_v1 = vsel %vm4873_vm9, %v5351_v53, %v5347_v52 }
 0x611   : > { %v4683_v0 = vpop.permute.xlu1 %4682  ;;  %v5357_v12 = vsel %vm4880_vm10, %v5356_v39, %v5352_v1 }
 0x612   : > { %v5282_v21 = vrot.slane %v4683_v0, %v10600_v22  ;;  %v5362_v60 = vsel %vm4887_vm11, %v5361_v3, %v5357_v12 }
 0x614   : > { %v5283_v58 = vsel %vm4887_vm11, %v5282_v21, %v5278_v56 }
 0x615   : > { %v4773_v13 = vpop.permute.xlu1 %4772  ;;  %v5451_v45 = vsel %vm5450_vm1, %v5283_v58, %v5449_v59 }
 0x616   : > { %v5453_v8 = vsel %vm5452_vm2, %v5362_v60, %v5451_v45  ;;  %v5430_v36 = vrot.slane %v4773_v13, %v10569_v37 }
 0x618   : > { %v5431_v32 = vsel %vm4873_vm9, %v5430_v36, %v5426_v25  ;;  %vm5479_vm9 = vcmp.eq.s32.totalorder %v12615_v33, 1 }
 0x619   : > { %v4776_v29 = vpop.permute.xlu1 %4775 }
 0x61a   : > { %v5435_v44 = vrot.slane %v4776_v29, %v10594_v61 }
 0x61c   : > { %v5436_v2 = vsel %vm4880_vm10, %v5435_v44, %v5431_v32  ;;  %vm5480_vm10 = vmand %vm5477_vm6, %vm5479_vm9 }
 0x61d   : > { %v5441_v43 = vsel %vm4887_vm11, %v5440_v17, %v5436_v2  ;;  %vm12737_vm11 = vcmp.eq.s32.totalorder %v12615_v33, 0 }
 0x61e   : > { %v5455_v23 = vsel %vm5454_vm8, %v5441_v43, %v5453_v8  ;;  %vm5478_vm3 = vmand %vm5477_vm6, %vm12737_vm11 }
 0x61f   : > { %5457 = vadd.xlane.f32.xlu1 %v5455_v23 }
 0x637   : > { %v5467_v37 = vpop.xlane.xlu0 %5466 }
 0x638   : > { %v5468_v54 = vrot.slane %v5467_v37, 4 }
 0x63a   : > { %v5469_v40 = vadd.f32 %v5468_v54, %v5467_v37 }
 0x63c   : > { %v5470_v49 = vrot.slane %v5469_v40, 2 }
 0x63e   : > { %v5471_v46 = vadd.f32 %v5470_v49, %v5469_v40 }
 0x640   : > { %v5472_v57 = vrot.slane %v5471_v46, 1 }
 0x642   : > { %v5473_v16 = vadd.f32 %v5472_v57, %v5471_v46 }
 0x6ac   : > { %v5458_v9 = vpop.xlane.xlu1 %5457 }
 0x6ad   : > { %v5459_v28 = vrot.slane %v5458_v9, 4 }
 0x6af   : > { %v5460_v61 = vadd.f32 %v5459_v28, %v5458_v9 }
 0x6b1   : > { %v5461_v22 = vrot.slane %v5460_v61, 2 }
 0x6b3   : > { %v5462_v35 = vadd.f32 %v5461_v22, %v5460_v61 }
 0x6b5   : > { %v5463_v14 = vrot.slane %v5462_v35, 1 }
 0x6b7   : > { %v5464_v24 = vadd.f32 %v5463_v14, %v5462_v35 }
 0x6b9   : > { %5693 = vpush %v5464_v24 }
 0x6ba   : > { %5695 = vpush %v5473_v16 }
 0x6ea   : > { %s5694_s19 = spop %5693 }
 0x6eb   : > { %v5483_v47 = vstv %s5694_s19  ;;  %s5696_s10 = spop %5695 }
 0x6ec   : > { %v5481_v38 = vstv %s5696_s10 }
 0x6ed   : > { %v5482_v62 = vsel %vm5480_vm10, %v5481_v38, 0.0 }
 0x6ee   : > { %v5484_v63 = vsel %vm5478_vm3, %v5483_v47, %v5482_v62 }
 0x6ef   : > { %5485 = vst [vmem:[%s447_s20] sm:$0xff] %v5484_v63 }
 0x6f0   : > { %6485 = shalt.err (!%p6482_p0)
}
 0x6f1   : > { %s6486_s0 = scalar_lea.hbm %s10966_s11, 128  ;;  %s6490_s13 = scalar_lea.hbm %s11017_s7, 256 }
 0x6f2   : > { %p6487_p6 = scmp.ne.s32.totalorder %s10966_s11, %s6486_s0  ;;  %p6491_p10 = scmp.lt.u32.totalorder %s10966_s11, %s11017_s7 }
 0x6f3   : > { %p6492_p13 = scmp.lt.u32.totalorder %s6490_s13, %s6486_s0  ;;  %p6494_p3 = scmp.lt.u32.totalorder %s6486_s0, %s10966_s11 }
 0x6f4   : > { %p6488_p2 = pnand %p6487_p6, %p12738_p7 }
 0x6f5   : > { %p6493_p4 = por %p6492_p13, %p6491_p10 }
 0x6f6   : > { %p6489_p8 = pneg %p6488_p2 }
 0x6f7   : > { %p6495_p5 = por %p6494_p3, %p6493_p4 }
 0x6f9   : > { %p6496_p11 = pnand %p6495_p5, %p6489_p8 }
 0x6fb   : > { %6499 = shalt.err (!%p6496_p11)
}
 0x6fc   : > { %5711 = dma.vmem_to_hbm [thread:$0]  (%p12738_p7), %s10968_s18, 128, %s10966_s11, %s5487_s14  }
 0x6fd PF: > { %s5512_s20 = sand.u32 1, %s6534_s26   ;;  %p12739_p1 = scmp.ne.s32.totalorder %s11300_s15, 0 }
 0x6fe   : > { %p12740_p9 = scmp.ge.s32.totalorder %s6546_s29, 2  ;;  %s5513_s10 = scalar_lea.sflag [#allocation5], %s5512_s20 }
 0x700   : > { %p5734_p12 = pnand %p12740_p9, %p12739_p1 }
 0x702   : > { %6529 = dma.done.wait (!%p5734_p12), %s5513_s10, 128  }
 0x703   : > { %6531 = vsyncadd (!%p5734_p12), %s5513_s10, 4294967168  ;;  %p22_p0 = scmp.ge.s32.totalorder %s6623_s2, 4   ;;  %s12741_s26 = smov %s6538_s27 }
 0x704   : > { %s12742_s27 = smov %s6542_s28  ;;  %s12743_s28 = smov %s6634_s9 }
 0x705   : > { %s12744_s29 = smov %s6623_s2  ;;  %24 = sbr.rel (!%p22_p0) target bundleno = 9 (0x9), region = 141 }
 0x70c   :  { %5518 = vsyncpa [#allocation4], 1 }
 0x70d   :  { %5520 = vsyncpa [#allocation4 + $0x1], 1 }
 0x70e   :  { %5521 = vsyncpa [#allocation7], 1 }
 0x70f   :  { %5522 = vsyncpa [#allocation5], 1 }
 0x710   :  { %5524 = vsyncpa [#allocation5 + $0x1], 1 }

</bundles_post_ra>
